<compile_context>
chip_gen: v7x
topology: tpu7x:2x2x1
jax: 0.10.0
libtpu: 0.0.40
codegen_flags: <defaults>
</compile_context>

<pallas_src>
import math

import numpy as np

import jax
import jax.numpy as jnp
from jax.experimental import pallas as pl
from jax.experimental.pallas import tpu as pltpu

BN_EPS = 1e-5


# ----------------------------------------------------------------------------
# Fused layer5 kernel: everything happens on VMEM-resident (M, C) tiles,
# M = N*Ho*Wo rows (ordered n-major, then h, then w), C = 256 channels.
# ----------------------------------------------------------------------------
def _layer5_kernel(xt_ref, sel_ref,
                   w1a_ref, wd_ref, w1b_ref, w2a_ref, w2b_ref,
                   g1a_ref, be1a_ref, gd_ref, bed_ref,
                   g1b_ref, be1b_ref, g2a_ref, be2a_ref, g2b_ref, be2b_ref,
                   o_ref):
    m, cout = o_ref.shape
    inv_m = 1.0 / m

    def batchnorm(y, g_ref, b_ref):
        # PyTorch train-mode BatchNorm2d: per-channel batch statistics over all
        # M = N*H*W rows, biased variance, eps = 1e-5.  One pass (sum, sumsq).
        s1 = jnp.sum(y, axis=0, keepdims=True)
        s2 = jnp.sum(y * y, axis=0, keepdims=True)
        mu = s1 * inv_m
        var = jnp.maximum(s2 * inv_m - mu * mu, 0.0)
        return (y - mu) * (g_ref[...] * jax.lax.rsqrt(var + BN_EPS)) + b_ref[...]

    def conv3x3_s1(a_f32, w_ref):
        # Implicit im2col for a 3x3 / stride-1 / pad-1 conv: per tap, a one-hot
        # (M, M) shift matrix gathers the spatially shifted rows (out-of-range
        # rows are all-zero), then the (C, C) tap weight is applied.  Both ride
        # the MXU; bf16 operands, f32 accumulation.
        acc = jnp.zeros((m, cout), jnp.float32)
        for t in range(9):
            src = jnp.dot(sel_ref[t], a_f32,
                          preferred_element_type=jnp.float32)  # exact gather
            acc = acc + jnp.dot(src.astype(jnp.bfloat16), w_ref[t],
                                preferred_element_type=jnp.float32)
        return acc

    # ---- block 1 : conv1 (3x3, stride 2) -- stride-2 taps built wrapper-side
    acc = jnp.zeros((m, cout), jnp.float32)
    for t in range(9):
        acc = acc + jnp.dot(xt_ref[t], w1a_ref[t],
                            preferred_element_type=jnp.float32)
    a1 = jnp.maximum(batchnorm(acc, g1a_ref, be1a_ref), 0.0)

    # ---- block 1 : 1x1 / stride-2 shortcut + BN (no relu); it reads exactly
    #      the centre tap (ki = kj = 1) of the stride-2 taps -> reuse it.
    res1 = batchnorm(jnp.dot(xt_ref[4], wd_ref[...],
                             preferred_element_type=jnp.float32),
                     gd_ref, bed_ref)

    # ---- block 1 : conv2 + bn2 + shortcut add + relu
    a2 = jnp.maximum(batchnorm(conv3x3_s1(a1, w1b_ref), g1b_ref, be1b_ref)
                     + res1, 0.0)

    # ---- block 2 : conv1 + bn1 + relu
    a3 = jnp.maximum(batchnorm(conv3x3_s1(a2, w2a_ref), g2a_ref, be2a_ref), 0.0)

    # ---- block 2 : conv2 + bn2 + identity residual + relu
    out = jnp.maximum(batchnorm(conv3x3_s1(a3, w2b_ref), g2b_ref, be2b_ref)
                      + a2, 0.0)

    o_ref[...] = out


# ----------------------------------------------------------------------------
# Wrapper-side prep (plain JAX / numpy; cheap, constant-shaped)
# ----------------------------------------------------------------------------
def _w3x3_taps(w):
    """(Cout, Cin, 3, 3) -> (9, Cin, Cout) bf16, tap order t = ki*3 + kj."""
    cout, cin = w.shape[0], w.shape[1]
    return jnp.transpose(w, (2, 3, 1, 0)).reshape(9, cin, cout).astype(jnp.bfloat16)


def _w1x1_mat(w):
    """(Cout, Cin, 1, 1) -> (Cin, Cout) bf16."""
    return jnp.transpose(w[:, :, 0, 0], (1, 0)).astype(jnp.bfloat16)


def _row(v):
    return v.reshape(1, -1).astype(jnp.float32)


def _stride2_taps(x_nhwc, ho, wo):
    """9 stride-2-decimated shifted views of the padded input, (9, M, Cin) bf16."""
    n, _, _, c = x_nhwc.shape
    xp = jnp.pad(x_nhwc, ((0, 0), (1, 1), (1, 1), (0, 0)))
    taps = []
    for ki in range(3):
        for kj in range(3):
            s = xp[:, ki:ki + 2 * ho:2, kj:kj + 2 * wo:2, :]
            taps.append(s.reshape(n * ho * wo, c))
    return jnp.stack(taps, axis=0).astype(jnp.bfloat16)


def _shift_matrices(n, ho, wo):
    """One-hot (9, M, M) shift/boundary-mask matrices for 3x3 stride-1 pad-1."""
    m = n * ho * wo
    sel = np.zeros((9, m, m), np.float32)
    for t in range(9):
        di, dj = t // 3 - 1, t % 3 - 1
        for b in range(n):
            for h in range(ho):
                for w in range(wo):
                    hi, wi = h + di, w + dj
                    if 0 <= hi < ho and 0 <= wi < wo:
                        sel[t, b * ho * wo + h * wo + w,
                               b * ho * wo + hi * wo + wi] = 1.0
    return jnp.asarray(sel)


def resnet18_layer5_forward(x_nchw, params):
    block1, dim_change, block2 = params
    w1, g1, be1, w2, g2, be2 = block1
    wd, gd, bed = dim_change
    w3, g3, be3, w4, g4, be4 = block2

    n, cin, h, w = x_nchw.shape
    ho, wo = h // 2, w // 2
    m = n * ho * wo
    cout = w1.shape[0]

    x_nhwc = jnp.transpose(x_nchw, (0, 2, 3, 1)).astype(jnp.float32)
    args = (
        _stride2_taps(x_nhwc, ho, wo),            # (9, M, Cin)  bf16
        _shift_matrices(n, ho, wo),               # (9, M, M)    f32
        _w3x3_taps(w1), _w1x1_mat(wd), _w3x3_taps(w2),
        _w3x3_taps(w3), _w3x3_taps(w4),
        _row(g1), _row(be1), _row(gd), _row(bed), _row(g2), _row(be2),
        _row(g3), _row(be3), _row(g4), _row(be4),
    )

    # Advisory cost estimate so XLA schedules surrounding ops around the call.
    flops = 2 * m * cout * (10 * cin + 27 * (m + cout))
    bytes_accessed = sum(int(a.size) * a.dtype.itemsize for a in args) + m * cout * 4

    out2d = pl.pallas_call(
        _layer5_kernel,
        out_shape=jax.ShapeDtypeStruct((m, cout), jnp.float32),
        in_specs=[pl.BlockSpec(memory_space=pltpu.MemorySpace.VMEM)] * len(args),
        out_specs=pl.BlockSpec(memory_space=pltpu.MemorySpace.VMEM),
        cost_estimate=pl.CostEstimate(flops=flops, transcendentals=5 * cout,
                                      bytes_accessed=int(bytes_accessed)),
    )(*args)

    return jnp.transpose(out2d.reshape(n, ho, wo, cout), (0, 3, 1, 2))


# ----------------------------------------------------------------------------
# Parameter init (deterministic, synthetic).  Conv biases are omitted: they
# precede train-mode BN and are exactly cancelled by the batch-mean subtraction.
# ----------------------------------------------------------------------------
def conv_weight(key, cin, cout, k):
    return jax.random.normal(key, (cout, cin, k, k), jnp.float32) / math.sqrt(cin * k * k)


def bn_params(key, c):
    k1, k2 = jax.random.split(key)
    return (1.0 + 0.1 * jax.random.normal(k1, (c,), jnp.float32),
            0.1 * jax.random.normal(k2, (c,), jnp.float32))


def make_block_params(key, cin, cout):
    ks = jax.random.split(key, 4)
    w1 = conv_weight(ks[0], cin, cout, 3)
    g1, be1 = bn_params(ks[1], cout)
    w2 = conv_weight(ks[2], cout, cout, 3)
    g2, be2 = bn_params(ks[3], cout)
    return (w1, g1, be1, w2, g2, be2)


def make_dim_change_params(key, cin, cout):
    ks = jax.random.split(key, 2)
    g, b = bn_params(ks[1], cout)
    return (conv_weight(ks[0], cin, cout, 1), g, b)


# ----------------------------------------------------------------------------
# Pure-JAX reference (lax.conv) for a numerical self-check.  Conv inputs are
# cast to bf16 exactly as the kernel feeds the MXU; everything else is f32.
# ----------------------------------------------------------------------------
def _ref_conv(x, w, stride, pad):
    return jax.lax.conv_general_dilated(
        x.astype(jnp.bfloat16), w.astype(jnp.bfloat16),
        window_strides=(stride, stride), padding=((pad, pad), (pad, pad)),
        dimension_numbers=("NCHW", "OIHW", "NCHW"),
        preferred_element_type=jnp.float32)


def _ref_bn(y, g, b):
    mu = jnp.mean(y, axis=(0, 2, 3), keepdims=True)
    var = jnp.mean((y - mu) ** 2, axis=(0, 2, 3), keepdims=True)
    return (g.reshape(1, -1, 1, 1) * (y - mu) * jax.lax.rsqrt(var + BN_EPS)
            + b.reshape(1, -1, 1, 1))


def resnet18_layer5_reference(x, params):
    block1, dim_change, block2 = params
    w1, g1, be1, w2, g2, be2 = block1
    wd, gd, bed = dim_change
    w3, g3, be3, w4, g4, be4 = block2
    x = x.astype(jnp.float32)
    o = jax.nn.relu(_ref_bn(_ref_conv(x, w1, 2, 1), g1, be1))
    res = _ref_bn(_ref_conv(x, wd, 2, 0), gd, bed)
    o = jax.nn.relu(_ref_bn(_ref_conv(o, w2, 1, 1), g2, be2) + res)
    res = o
    o2 = jax.nn.relu(_ref_bn(_ref_conv(o, w3, 1, 1), g3, be3))
    o2 = jax.nn.relu(_ref_bn(_ref_conv(o2, w4, 1, 1), g4, be4) + res)
    return o2


if __name__ == "__main__":
    root = jax.random.PRNGKey(0)
    k_x, k_b1, k_dc, k_b2 = jax.random.split(root, 4)

    # layer5 requires 128 input channels; keep batch/spatial small.
    x = jax.random.normal(k_x, (2, 128, 8, 8), jnp.float32)   # NCHW

    params = (
        make_block_params(k_b1, 128, 256),        # Baseblock 1 (stride 2)
        make_dim_change_params(k_dc, 128, 256),   # 1x1 conv + BN shortcut
        make_block_params(k_b2, 256, 256),        # Baseblock 2 (stride 1)
    )

    out = jax.block_until_ready(jax.jit(resnet18_layer5_forward)(x, params))
    assert out.shape == (2, 256, 4, 4), out.shape

    ref = jax.block_until_ready(jax.jit(resnet18_layer5_reference)(x, params))
    err = float(jnp.max(jnp.abs(out - ref)))
    assert err < 2e-2, f"max |pallas - reference| = {err}"

    print("KERNEL_OK")
</pallas_src>

<mosaic_0001>
module attributes {stable_mosaic.version = 11 : i64} {
  func.func @_layer5_kernel(%arg0: memref<9x32x128xbf16, #tpu.memory_space<vmem>>, %arg1: memref<9x32x32xf32, #tpu.memory_space<vmem>>, %arg2: memref<9x128x256xbf16, #tpu.memory_space<vmem>>, %arg3: memref<128x256xbf16, #tpu.memory_space<vmem>>, %arg4: memref<9x256x256xbf16, #tpu.memory_space<vmem>>, %arg5: memref<9x256x256xbf16, #tpu.memory_space<vmem>>, %arg6: memref<9x256x256xbf16, #tpu.memory_space<vmem>>, %arg7: memref<1x256xf32, #tpu.memory_space<vmem>>, %arg8: memref<1x256xf32, #tpu.memory_space<vmem>>, %arg9: memref<1x256xf32, #tpu.memory_space<vmem>>, %arg10: memref<1x256xf32, #tpu.memory_space<vmem>>, %arg11: memref<1x256xf32, #tpu.memory_space<vmem>>, %arg12: memref<1x256xf32, #tpu.memory_space<vmem>>, %arg13: memref<1x256xf32, #tpu.memory_space<vmem>>, %arg14: memref<1x256xf32, #tpu.memory_space<vmem>>, %arg15: memref<1x256xf32, #tpu.memory_space<vmem>>, %arg16: memref<1x256xf32, #tpu.memory_space<vmem>>, %arg17: memref<32x256xf32, #tpu.memory_space<vmem>>) attributes {dimension_semantics = [], scalar_prefetch = 0 : i64, scratch_operands = 0 : i64, tpu.core_type = #tpu.core_type<tc>} {
    %cst = arith.constant 0.000000e+00 : f32
    %0 = vector.broadcast %cst : f32 to vector<32x256xf32>
    %c0 = arith.constant 0 : index
    %c0_0 = arith.constant 0 : index
    %c0_1 = arith.constant 0 : index
    %1 = vector.load %arg0[%c0, %c0_0, %c0_1] : memref<9x32x128xbf16, #tpu.memory_space<vmem>>, vector<1x32x128xbf16>
    %2 = vector.shape_cast %1 : vector<1x32x128xbf16> to vector<32x128xbf16>
    %c0_2 = arith.constant 0 : index
    %c0_3 = arith.constant 0 : index
    %c0_4 = arith.constant 0 : index
    %3 = vector.load %arg2[%c0_2, %c0_3, %c0_4] : memref<9x128x256xbf16, #tpu.memory_space<vmem>>, vector<1x128x256xbf16>
    %4 = vector.shape_cast %3 : vector<1x128x256xbf16> to vector<128x256xbf16>
    %cst_5 = arith.constant dense<0.000000e+00> : vector<32x256xf32>
    %5 = tpu.matmul %2, %4, %cst_5 {dimension_numbers = #tpu.dot_dimension_numbers<[1], [0], [0], [1], [0, 0, 1, 1], [], []>} : vector<32x128xbf16>, vector<128x256xbf16>, vector<32x256xf32> -> vector<32x256xf32>
    %6 = arith.addf %0, %5 : vector<32x256xf32>
    %c1 = arith.constant 1 : index
    %c0_6 = arith.constant 0 : index
    %c0_7 = arith.constant 0 : index
    %7 = vector.load %arg0[%c1, %c0_6, %c0_7] : memref<9x32x128xbf16, #tpu.memory_space<vmem>>, vector<1x32x128xbf16>
    %8 = vector.shape_cast %7 : vector<1x32x128xbf16> to vector<32x128xbf16>
    %c1_8 = arith.constant 1 : index
    %c0_9 = arith.constant 0 : index
    %c0_10 = arith.constant 0 : index
    %9 = vector.load %arg2[%c1_8, %c0_9, %c0_10] : memref<9x128x256xbf16, #tpu.memory_space<vmem>>, vector<1x128x256xbf16>
    %10 = vector.shape_cast %9 : vector<1x128x256xbf16> to vector<128x256xbf16>
    %cst_11 = arith.constant dense<0.000000e+00> : vector<32x256xf32>
    %11 = tpu.matmul %8, %10, %cst_11 {dimension_numbers = #tpu.dot_dimension_numbers<[1], [0], [0], [1], [0, 0, 1, 1], [], []>} : vector<32x128xbf16>, vector<128x256xbf16>, vector<32x256xf32> -> vector<32x256xf32>
    %12 = arith.addf %6, %11 : vector<32x256xf32>
    %c2 = arith.constant 2 : index
    %c0_12 = arith.constant 0 : index
    %c0_13 = arith.constant 0 : index
    %13 = vector.load %arg0[%c2, %c0_12, %c0_13] : memref<9x32x128xbf16, #tpu.memory_space<vmem>>, vector<1x32x128xbf16>
    %14 = vector.shape_cast %13 : vector<1x32x128xbf16> to vector<32x128xbf16>
    %c2_14 = arith.constant 2 : index
    %c0_15 = arith.constant 0 : index
    %c0_16 = arith.constant 0 : index
    %15 = vector.load %arg2[%c2_14, %c0_15, %c0_16] : memref<9x128x256xbf16, #tpu.memory_space<vmem>>, vector<1x128x256xbf16>
    %16 = vector.shape_cast %15 : vector<1x128x256xbf16> to vector<128x256xbf16>
    %cst_17 = arith.constant dense<0.000000e+00> : vector<32x256xf32>
    %17 = tpu.matmul %14, %16, %cst_17 {dimension_numbers = #tpu.dot_dimension_numbers<[1], [0], [0], [1], [0, 0, 1, 1], [], []>} : vector<32x128xbf16>, vector<128x256xbf16>, vector<32x256xf32> -> vector<32x256xf32>
    %18 = arith.addf %12, %17 : vector<32x256xf32>
    %c3 = arith.constant 3 : index
    %c0_18 = arith.constant 0 : index
    %c0_19 = arith.constant 0 : index
    %19 = vector.load %arg0[%c3, %c0_18, %c0_19] : memref<9x32x128xbf16, #tpu.memory_space<vmem>>, vector<1x32x128xbf16>
    %20 = vector.shape_cast %19 : vector<1x32x128xbf16> to vector<32x128xbf16>
    %c3_20 = arith.constant 3 : index
    %c0_21 = arith.constant 0 : index
    %c0_22 = arith.constant 0 : index
    %21 = vector.load %arg2[%c3_20, %c0_21, %c0_22] : memref<9x128x256xbf16, #tpu.memory_space<vmem>>, vector<1x128x256xbf16>
    %22 = vector.shape_cast %21 : vector<1x128x256xbf16> to vector<128x256xbf16>
    %cst_23 = arith.constant dense<0.000000e+00> : vector<32x256xf32>
    %23 = tpu.matmul %20, %22, %cst_23 {dimension_numbers = #tpu.dot_dimension_numbers<[1], [0], [0], [1], [0, 0, 1, 1], [], []>} : vector<32x128xbf16>, vector<128x256xbf16>, vector<32x256xf32> -> vector<32x256xf32>
    %24 = arith.addf %18, %23 : vector<32x256xf32>
    %c4 = arith.constant 4 : index
    %c0_24 = arith.constant 0 : index
    %c0_25 = arith.constant 0 : index
    %25 = vector.load %arg0[%c4, %c0_24, %c0_25] : memref<9x32x128xbf16, #tpu.memory_space<vmem>>, vector<1x32x128xbf16>
    %26 = vector.shape_cast %25 : vector<1x32x128xbf16> to vector<32x128xbf16>
    %c4_26 = arith.constant 4 : index
    %c0_27 = arith.constant 0 : index
    %c0_28 = arith.constant 0 : index
    %27 = vector.load %arg2[%c4_26, %c0_27, %c0_28] : memref<9x128x256xbf16, #tpu.memory_space<vmem>>, vector<1x128x256xbf16>
    %28 = vector.shape_cast %27 : vector<1x128x256xbf16> to vector<128x256xbf16>
    %cst_29 = arith.constant dense<0.000000e+00> : vector<32x256xf32>
    %29 = tpu.matmul %26, %28, %cst_29 {dimension_numbers = #tpu.dot_dimension_numbers<[1], [0], [0], [1], [0, 0, 1, 1], [], []>} : vector<32x128xbf16>, vector<128x256xbf16>, vector<32x256xf32> -> vector<32x256xf32>
    %30 = arith.addf %24, %29 : vector<32x256xf32>
    %c5 = arith.constant 5 : index
    %c0_30 = arith.constant 0 : index
    %c0_31 = arith.constant 0 : index
    %31 = vector.load %arg0[%c5, %c0_30, %c0_31] : memref<9x32x128xbf16, #tpu.memory_space<vmem>>, vector<1x32x128xbf16>
    %32 = vector.shape_cast %31 : vector<1x32x128xbf16> to vector<32x128xbf16>
    %c5_32 = arith.constant 5 : index
    %c0_33 = arith.constant 0 : index
    %c0_34 = arith.constant 0 : index
    %33 = vector.load %arg2[%c5_32, %c0_33, %c0_34] : memref<9x128x256xbf16, #tpu.memory_space<vmem>>, vector<1x128x256xbf16>
    %34 = vector.shape_cast %33 : vector<1x128x256xbf16> to vector<128x256xbf16>
    %cst_35 = arith.constant dense<0.000000e+00> : vector<32x256xf32>
    %35 = tpu.matmul %32, %34, %cst_35 {dimension_numbers = #tpu.dot_dimension_numbers<[1], [0], [0], [1], [0, 0, 1, 1], [], []>} : vector<32x128xbf16>, vector<128x256xbf16>, vector<32x256xf32> -> vector<32x256xf32>
    %36 = arith.addf %30, %35 : vector<32x256xf32>
    %c6 = arith.constant 6 : index
    %c0_36 = arith.constant 0 : index
    %c0_37 = arith.constant 0 : index
    %37 = vector.load %arg0[%c6, %c0_36, %c0_37] : memref<9x32x128xbf16, #tpu.memory_space<vmem>>, vector<1x32x128xbf16>
    %38 = vector.shape_cast %37 : vector<1x32x128xbf16> to vector<32x128xbf16>
    %c6_38 = arith.constant 6 : index
    %c0_39 = arith.constant 0 : index
    %c0_40 = arith.constant 0 : index
    %39 = vector.load %arg2[%c6_38, %c0_39, %c0_40] : memref<9x128x256xbf16, #tpu.memory_space<vmem>>, vector<1x128x256xbf16>
    %40 = vector.shape_cast %39 : vector<1x128x256xbf16> to vector<128x256xbf16>
    %cst_41 = arith.constant dense<0.000000e+00> : vector<32x256xf32>
    %41 = tpu.matmul %38, %40, %cst_41 {dimension_numbers = #tpu.dot_dimension_numbers<[1], [0], [0], [1], [0, 0, 1, 1], [], []>} : vector<32x128xbf16>, vector<128x256xbf16>, vector<32x256xf32> -> vector<32x256xf32>
    %42 = arith.addf %36, %41 : vector<32x256xf32>
    %c7 = arith.constant 7 : index
    %c0_42 = arith.constant 0 : index
    %c0_43 = arith.constant 0 : index
    %43 = vector.load %arg0[%c7, %c0_42, %c0_43] : memref<9x32x128xbf16, #tpu.memory_space<vmem>>, vector<1x32x128xbf16>
    %44 = vector.shape_cast %43 : vector<1x32x128xbf16> to vector<32x128xbf16>
    %c7_44 = arith.constant 7 : index
    %c0_45 = arith.constant 0 : index
    %c0_46 = arith.constant 0 : index
    %45 = vector.load %arg2[%c7_44, %c0_45, %c0_46] : memref<9x128x256xbf16, #tpu.memory_space<vmem>>, vector<1x128x256xbf16>
    %46 = vector.shape_cast %45 : vector<1x128x256xbf16> to vector<128x256xbf16>
    %cst_47 = arith.constant dense<0.000000e+00> : vector<32x256xf32>
    %47 = tpu.matmul %44, %46, %cst_47 {dimension_numbers = #tpu.dot_dimension_numbers<[1], [0], [0], [1], [0, 0, 1, 1], [], []>} : vector<32x128xbf16>, vector<128x256xbf16>, vector<32x256xf32> -> vector<32x256xf32>
    %48 = arith.addf %42, %47 : vector<32x256xf32>
    %c8 = arith.constant 8 : index
    %c0_48 = arith.constant 0 : index
    %c0_49 = arith.constant 0 : index
    %49 = vector.load %arg0[%c8, %c0_48, %c0_49] : memref<9x32x128xbf16, #tpu.memory_space<vmem>>, vector<1x32x128xbf16>
    %50 = vector.shape_cast %49 : vector<1x32x128xbf16> to vector<32x128xbf16>
    %c8_50 = arith.constant 8 : index
    %c0_51 = arith.constant 0 : index
    %c0_52 = arith.constant 0 : index
    %51 = vector.load %arg2[%c8_50, %c0_51, %c0_52] : memref<9x128x256xbf16, #tpu.memory_space<vmem>>, vector<1x128x256xbf16>
    %52 = vector.shape_cast %51 : vector<1x128x256xbf16> to vector<128x256xbf16>
    %cst_53 = arith.constant dense<0.000000e+00> : vector<32x256xf32>
    %53 = tpu.matmul %50, %52, %cst_53 {dimension_numbers = #tpu.dot_dimension_numbers<[1], [0], [0], [1], [0, 0, 1, 1], [], []>} : vector<32x128xbf16>, vector<128x256xbf16>, vector<32x256xf32> -> vector<32x256xf32>
    %54 = arith.addf %48, %53 : vector<32x256xf32>
    %cst_54 = arith.constant dense<0.000000e+00> : vector<256xf32>
    %55 = vector.multi_reduction <add>, %54, %cst_54 [0] : vector<32x256xf32> to vector<256xf32>
    %56 = vector.shape_cast %55 : vector<256xf32> to vector<1x256xf32>
    %57 = arith.mulf %54, %54 : vector<32x256xf32>
    %cst_55 = arith.constant dense<0.000000e+00> : vector<256xf32>
    %58 = vector.multi_reduction <add>, %57, %cst_55 [0] : vector<32x256xf32> to vector<256xf32>
    %59 = vector.shape_cast %58 : vector<256xf32> to vector<1x256xf32>
    %cst_56 = arith.constant 3.125000e-02 : f32
    %60 = vector.broadcast %cst_56 : f32 to vector<1x256xf32>
    %61 = arith.mulf %56, %60 : vector<1x256xf32>
    %cst_57 = arith.constant 3.125000e-02 : f32
    %62 = vector.broadcast %cst_57 : f32 to vector<1x256xf32>
    %63 = arith.mulf %59, %62 : vector<1x256xf32>
    %64 = arith.mulf %61, %61 : vector<1x256xf32>
    %65 = arith.subf %63, %64 : vector<1x256xf32>
    %cst_58 = arith.constant 0.000000e+00 : f32
    %66 = vector.broadcast %cst_58 : f32 to vector<1x256xf32>
    %67 = arith.maximumf %65, %66 : vector<1x256xf32>
    %68 = vector.broadcast %61 : vector<1x256xf32> to vector<32x256xf32>
    %69 = arith.subf %54, %68 : vector<32x256xf32>
    %c0_59 = arith.constant 0 : index
    %c0_60 = arith.constant 0 : index
    %70 = vector.load %arg7[%c0_59, %c0_60] : memref<1x256xf32, #tpu.memory_space<vmem>>, vector<1x256xf32>
    %cst_61 = arith.constant 9.99999974E-6 : f32
    %71 = vector.broadcast %cst_61 : f32 to vector<1x256xf32>
    %72 = arith.addf %67, %71 : vector<1x256xf32>
    %73 = math.rsqrt %72 : vector<1x256xf32>
    %74 = arith.mulf %70, %73 : vector<1x256xf32>
    %75 = vector.broadcast %74 : vector<1x256xf32> to vector<32x256xf32>
    %76 = arith.mulf %69, %75 : vector<32x256xf32>
    %c0_62 = arith.constant 0 : index
    %c0_63 = arith.constant 0 : index
    %77 = vector.load %arg8[%c0_62, %c0_63] : memref<1x256xf32, #tpu.memory_space<vmem>>, vector<1x256xf32>
    %78 = vector.broadcast %77 : vector<1x256xf32> to vector<32x256xf32>
    %79 = arith.addf %76, %78 : vector<32x256xf32>
    %cst_64 = arith.constant 0.000000e+00 : f32
    %80 = vector.broadcast %cst_64 : f32 to vector<32x256xf32>
    %81 = arith.maximumf %79, %80 : vector<32x256xf32>
    %c4_65 = arith.constant 4 : index
    %c0_66 = arith.constant 0 : index
    %c0_67 = arith.constant 0 : index
    %82 = vector.load %arg0[%c4_65, %c0_66, %c0_67] : memref<9x32x128xbf16, #tpu.memory_space<vmem>>, vector<1x32x128xbf16>
    %83 = vector.shape_cast %82 : vector<1x32x128xbf16> to vector<32x128xbf16>
    %c0_68 = arith.constant 0 : index
    %c0_69 = arith.constant 0 : index
    %84 = vector.load %arg3[%c0_68, %c0_69] : memref<128x256xbf16, #tpu.memory_space<vmem>>, vector<128x256xbf16>
    %cst_70 = arith.constant dense<0.000000e+00> : vector<32x256xf32>
    %85 = tpu.matmul %83, %84, %cst_70 {dimension_numbers = #tpu.dot_dimension_numbers<[1], [0], [0], [1], [0, 0, 1, 1], [], []>} : vector<32x128xbf16>, vector<128x256xbf16>, vector<32x256xf32> -> vector<32x256xf32>
    %cst_71 = arith.constant dense<0.000000e+00> : vector<256xf32>
    %86 = vector.multi_reduction <add>, %85, %cst_71 [0] : vector<32x256xf32> to vector<256xf32>
    %87 = vector.shape_cast %86 : vector<256xf32> to vector<1x256xf32>
    %88 = arith.mulf %85, %85 : vector<32x256xf32>
    %cst_72 = arith.constant dense<0.000000e+00> : vector<256xf32>
    %89 = vector.multi_reduction <add>, %88, %cst_72 [0] : vector<32x256xf32> to vector<256xf32>
    %90 = vector.shape_cast %89 : vector<256xf32> to vector<1x256xf32>
    %cst_73 = arith.constant 3.125000e-02 : f32
    %91 = vector.broadcast %cst_73 : f32 to vector<1x256xf32>
    %92 = arith.mulf %87, %91 : vector<1x256xf32>
    %cst_74 = arith.constant 3.125000e-02 : f32
    %93 = vector.broadcast %cst_74 : f32 to vector<1x256xf32>
    %94 = arith.mulf %90, %93 : vector<1x256xf32>
    %95 = arith.mulf %92, %92 : vector<1x256xf32>
    %96 = arith.subf %94, %95 : vector<1x256xf32>
    %cst_75 = arith.constant 0.000000e+00 : f32
    %97 = vector.broadcast %cst_75 : f32 to vector<1x256xf32>
    %98 = arith.maximumf %96, %97 : vector<1x256xf32>
    %99 = vector.broadcast %92 : vector<1x256xf32> to vector<32x256xf32>
    %100 = arith.subf %85, %99 : vector<32x256xf32>
    %c0_76 = arith.constant 0 : index
    %c0_77 = arith.constant 0 : index
    %101 = vector.load %arg9[%c0_76, %c0_77] : memref<1x256xf32, #tpu.memory_space<vmem>>, vector<1x256xf32>
    %cst_78 = arith.constant 9.99999974E-6 : f32
    %102 = vector.broadcast %cst_78 : f32 to vector<1x256xf32>
    %103 = arith.addf %98, %102 : vector<1x256xf32>
    %104 = math.rsqrt %103 : vector<1x256xf32>
    %105 = arith.mulf %101, %104 : vector<1x256xf32>
    %106 = vector.broadcast %105 : vector<1x256xf32> to vector<32x256xf32>
    %107 = arith.mulf %100, %106 : vector<32x256xf32>
    %c0_79 = arith.constant 0 : index
    %c0_80 = arith.constant 0 : index
    %108 = vector.load %arg10[%c0_79, %c0_80] : memref<1x256xf32, #tpu.memory_space<vmem>>, vector<1x256xf32>
    %109 = vector.broadcast %108 : vector<1x256xf32> to vector<32x256xf32>
    %110 = arith.addf %107, %109 : vector<32x256xf32>
    %cst_81 = arith.constant 0.000000e+00 : f32
    %111 = vector.broadcast %cst_81 : f32 to vector<32x256xf32>
    %c0_82 = arith.constant 0 : index
    %c0_83 = arith.constant 0 : index
    %c0_84 = arith.constant 0 : index
    %112 = vector.load %arg1[%c0_82, %c0_83, %c0_84] : memref<9x32x32xf32, #tpu.memory_space<vmem>>, vector<1x32x32xf32>
    %113 = vector.shape_cast %112 : vector<1x32x32xf32> to vector<32x32xf32>
    %cst_85 = arith.constant dense<0.000000e+00> : vector<32x256xf32>
    %114 = tpu.matmul %113, %81, %cst_85 {dimension_numbers = #tpu.dot_dimension_numbers<[1], [0], [0], [1], [0, 0, 1, 1], [], []>} : vector<32x32xf32>, vector<32x256xf32>, vector<32x256xf32> -> vector<32x256xf32>
    %115 = arith.truncf %114 : vector<32x256xf32> to vector<32x256xbf16>
    %c0_86 = arith.constant 0 : index
    %c0_87 = arith.constant 0 : index
    %c0_88 = arith.constant 0 : index
    %116 = vector.load %arg4[%c0_86, %c0_87, %c0_88] : memref<9x256x256xbf16, #tpu.memory_space<vmem>>, vector<1x256x256xbf16>
    %117 = vector.shape_cast %116 : vector<1x256x256xbf16> to vector<256x256xbf16>
    %cst_89 = arith.constant dense<0.000000e+00> : vector<32x256xf32>
    %118 = tpu.matmul %115, %117, %cst_89 {dimension_numbers = #tpu.dot_dimension_numbers<[1], [0], [0], [1], [0, 0, 1, 1], [], []>} : vector<32x256xbf16>, vector<256x256xbf16>, vector<32x256xf32> -> vector<32x256xf32>
    %119 = arith.addf %111, %118 : vector<32x256xf32>
    %c1_90 = arith.constant 1 : index
    %c0_91 = arith.constant 0 : index
    %c0_92 = arith.constant 0 : index
    %120 = vector.load %arg1[%c1_90, %c0_91, %c0_92] : memref<9x32x32xf32, #tpu.memory_space<vmem>>, vector<1x32x32xf32>
    %121 = vector.shape_cast %120 : vector<1x32x32xf32> to vector<32x32xf32>
    %cst_93 = arith.constant dense<0.000000e+00> : vector<32x256xf32>
    %122 = tpu.matmul %121, %81, %cst_93 {dimension_numbers = #tpu.dot_dimension_numbers<[1], [0], [0], [1], [0, 0, 1, 1], [], []>} : vector<32x32xf32>, vector<32x256xf32>, vector<32x256xf32> -> vector<32x256xf32>
    %123 = arith.truncf %122 : vector<32x256xf32> to vector<32x256xbf16>
    %c1_94 = arith.constant 1 : index
    %c0_95 = arith.constant 0 : index
    %c0_96 = arith.constant 0 : index
    %124 = vector.load %arg4[%c1_94, %c0_95, %c0_96] : memref<9x256x256xbf16, #tpu.memory_space<vmem>>, vector<1x256x256xbf16>
    %125 = vector.shape_cast %124 : vector<1x256x256xbf16> to vector<256x256xbf16>
    %cst_97 = arith.constant dense<0.000000e+00> : vector<32x256xf32>
    %126 = tpu.matmul %123, %125, %cst_97 {dimension_numbers = #tpu.dot_dimension_numbers<[1], [0], [0], [1], [0, 0, 1, 1], [], []>} : vector<32x256xbf16>, vector<256x256xbf16>, vector<32x256xf32> -> vector<32x256xf32>
    %127 = arith.addf %119, %126 : vector<32x256xf32>
    %c2_98 = arith.constant 2 : index
    %c0_99 = arith.constant 0 : index
    %c0_100 = arith.constant 0 : index
    %128 = vector.load %arg1[%c2_98, %c0_99, %c0_100] : memref<9x32x32xf32, #tpu.memory_space<vmem>>, vector<1x32x32xf32>
    %129 = vector.shape_cast %128 : vector<1x32x32xf32> to vector<32x32xf32>
    %cst_101 = arith.constant dense<0.000000e+00> : vector<32x256xf32>
    %130 = tpu.matmul %129, %81, %cst_101 {dimension_numbers = #tpu.dot_dimension_numbers<[1], [0], [0], [1], [0, 0, 1, 1], [], []>} : vector<32x32xf32>, vector<32x256xf32>, vector<32x256xf32> -> vector<32x256xf32>
    %131 = arith.truncf %130 : vector<32x256xf32> to vector<32x256xbf16>
    %c2_102 = arith.constant 2 : index
    %c0_103 = arith.constant 0 : index
    %c0_104 = arith.constant 0 : index
    %132 = vector.load %arg4[%c2_102, %c0_103, %c0_104] : memref<9x256x256xbf16, #tpu.memory_space<vmem>>, vector<1x256x256xbf16>
    %133 = vector.shape_cast %132 : vector<1x256x256xbf16> to vector<256x256xbf16>
    %cst_105 = arith.constant dense<0.000000e+00> : vector<32x256xf32>
    %134 = tpu.matmul %131, %133, %cst_105 {dimension_numbers = #tpu.dot_dimension_numbers<[1], [0], [0], [1], [0, 0, 1, 1], [], []>} : vector<32x256xbf16>, vector<256x256xbf16>, vector<32x256xf32> -> vector<32x256xf32>
    %135 = arith.addf %127, %134 : vector<32x256xf32>
    %c3_106 = arith.constant 3 : index
    %c0_107 = arith.constant 0 : index
    %c0_108 = arith.constant 0 : index
    %136 = vector.load %arg1[%c3_106, %c0_107, %c0_108] : memref<9x32x32xf32, #tpu.memory_space<vmem>>, vector<1x32x32xf32>
    %137 = vector.shape_cast %136 : vector<1x32x32xf32> to vector<32x32xf32>
    %cst_109 = arith.constant dense<0.000000e+00> : vector<32x256xf32>
    %138 = tpu.matmul %137, %81, %cst_109 {dimension_numbers = #tpu.dot_dimension_numbers<[1], [0], [0], [1], [0, 0, 1, 1], [], []>} : vector<32x32xf32>, vector<32x256xf32>, vector<32x256xf32> -> vector<32x256xf32>
    %139 = arith.truncf %138 : vector<32x256xf32> to vector<32x256xbf16>
    %c3_110 = arith.constant 3 : index
    %c0_111 = arith.constant 0 : index
    %c0_112 = arith.constant 0 : index
    %140 = vector.load %arg4[%c3_110, %c0_111, %c0_112] : memref<9x256x256xbf16, #tpu.memory_space<vmem>>, vector<1x256x256xbf16>
    %141 = vector.shape_cast %140 : vector<1x256x256xbf16> to vector<256x256xbf16>
    %cst_113 = arith.constant dense<0.000000e+00> : vector<32x256xf32>
    %142 = tpu.matmul %139, %141, %cst_113 {dimension_numbers = #tpu.dot_dimension_numbers<[1], [0], [0], [1], [0, 0, 1, 1], [], []>} : vector<32x256xbf16>, vector<256x256xbf16>, vector<32x256xf32> -> vector<32x256xf32>
    %143 = arith.addf %135, %142 : vector<32x256xf32>
    %c4_114 = arith.constant 4 : index
    %c0_115 = arith.constant 0 : index
    %c0_116 = arith.constant 0 : index
    %144 = vector.load %arg1[%c4_114, %c0_115, %c0_116] : memref<9x32x32xf32, #tpu.memory_space<vmem>>, vector<1x32x32xf32>
    %145 = vector.shape_cast %144 : vector<1x32x32xf32> to vector<32x32xf32>
    %cst_117 = arith.constant dense<0.000000e+00> : vector<32x256xf32>
    %146 = tpu.matmul %145, %81, %cst_117 {dimension_numbers = #tpu.dot_dimension_numbers<[1], [0], [0], [1], [0, 0, 1, 1], [], []>} : vector<32x32xf32>, vector<32x256xf32>, vector<32x256xf32> -> vector<32x256xf32>
    %147 = arith.truncf %146 : vector<32x256xf32> to vector<32x256xbf16>
    %c4_118 = arith.constant 4 : index
    %c0_119 = arith.constant 0 : index
    %c0_120 = arith.constant 0 : index
    %148 = vector.load %arg4[%c4_118, %c0_119, %c0_120] : memref<9x256x256xbf16, #tpu.memory_space<vmem>>, vector<1x256x256xbf16>
    %149 = vector.shape_cast %148 : vector<1x256x256xbf16> to vector<256x256xbf16>
    %cst_121 = arith.constant dense<0.000000e+00> : vector<32x256xf32>
    %150 = tpu.matmul %147, %149, %cst_121 {dimension_numbers = #tpu.dot_dimension_numbers<[1], [0], [0], [1], [0, 0, 1, 1], [], []>} : vector<32x256xbf16>, vector<256x256xbf16>, vector<32x256xf32> -> vector<32x256xf32>
    %151 = arith.addf %143, %150 : vector<32x256xf32>
    %c5_122 = arith.constant 5 : index
    %c0_123 = arith.constant 0 : index
    %c0_124 = arith.constant 0 : index
    %152 = vector.load %arg1[%c5_122, %c0_123, %c0_124] : memref<9x32x32xf32, #tpu.memory_space<vmem>>, vector<1x32x32xf32>
    %153 = vector.shape_cast %152 : vector<1x32x32xf32> to vector<32x32xf32>
    %cst_125 = arith.constant dense<0.000000e+00> : vector<32x256xf32>
    %154 = tpu.matmul %153, %81, %cst_125 {dimension_numbers = #tpu.dot_dimension_numbers<[1], [0], [0], [1], [0, 0, 1, 1], [], []>} : vector<32x32xf32>, vector<32x256xf32>, vector<32x256xf32> -> vector<32x256xf32>
    %155 = arith.truncf %154 : vector<32x256xf32> to vector<32x256xbf16>
    %c5_126 = arith.constant 5 : index
    %c0_127 = arith.constant 0 : index
    %c0_128 = arith.constant 0 : index
    %156 = vector.load %arg4[%c5_126, %c0_127, %c0_128] : memref<9x256x256xbf16, #tpu.memory_space<vmem>>, vector<1x256x256xbf16>
    %157 = vector.shape_cast %156 : vector<1x256x256xbf16> to vector<256x256xbf16>
    %cst_129 = arith.constant dense<0.000000e+00> : vector<32x256xf32>
    %158 = tpu.matmul %155, %157, %cst_129 {dimension_numbers = #tpu.dot_dimension_numbers<[1], [0], [0], [1], [0, 0, 1, 1], [], []>} : vector<32x256xbf16>, vector<256x256xbf16>, vector<32x256xf32> -> vector<32x256xf32>
    %159 = arith.addf %151, %158 : vector<32x256xf32>
    %c6_130 = arith.constant 6 : index
    %c0_131 = arith.constant 0 : index
    %c0_132 = arith.constant 0 : index
    %160 = vector.load %arg1[%c6_130, %c0_131, %c0_132] : memref<9x32x32xf32, #tpu.memory_space<vmem>>, vector<1x32x32xf32>
    %161 = vector.shape_cast %160 : vector<1x32x32xf32> to vector<32x32xf32>
    %cst_133 = arith.constant dense<0.000000e+00> : vector<32x256xf32>
    %162 = tpu.matmul %161, %81, %cst_133 {dimension_numbers = #tpu.dot_dimension_numbers<[1], [0], [0], [1], [0, 0, 1, 1], [], []>} : vector<32x32xf32>, vector<32x256xf32>, vector<32x256xf32> -> vector<32x256xf32>
    %163 = arith.truncf %162 : vector<32x256xf32> to vector<32x256xbf16>
    %c6_134 = arith.constant 6 : index
    %c0_135 = arith.constant 0 : index
    %c0_136 = arith.constant 0 : index
    %164 = vector.load %arg4[%c6_134, %c0_135, %c0_136] : memref<9x256x256xbf16, #tpu.memory_space<vmem>>, vector<1x256x256xbf16>
    %165 = vector.shape_cast %164 : vector<1x256x256xbf16> to vector<256x256xbf16>
    %cst_137 = arith.constant dense<0.000000e+00> : vector<32x256xf32>
    %166 = tpu.matmul %163, %165, %cst_137 {dimension_numbers = #tpu.dot_dimension_numbers<[1], [0], [0], [1], [0, 0, 1, 1], [], []>} : vector<32x256xbf16>, vector<256x256xbf16>, vector<32x256xf32> -> vector<32x256xf32>
    %167 = arith.addf %159, %166 : vector<32x256xf32>
    %c7_138 = arith.constant 7 : index
    %c0_139 = arith.constant 0 : index
    %c0_140 = arith.constant 0 : index
    %168 = vector.load %arg1[%c7_138, %c0_139, %c0_140] : memref<9x32x32xf32, #tpu.memory_space<vmem>>, vector<1x32x32xf32>
    %169 = vector.shape_cast %168 : vector<1x32x32xf32> to vector<32x32xf32>
    %cst_141 = arith.constant dense<0.000000e+00> : vector<32x256xf32>
    %170 = tpu.matmul %169, %81, %cst_141 {dimension_numbers = #tpu.dot_dimension_numbers<[1], [0], [0], [1], [0, 0, 1, 1], [], []>} : vector<32x32xf32>, vector<32x256xf32>, vector<32x256xf32> -> vector<32x256xf32>
    %171 = arith.truncf %170 : vector<32x256xf32> to vector<32x256xbf16>
    %c7_142 = arith.constant 7 : index
    %c0_143 = arith.constant 0 : index
    %c0_144 = arith.constant 0 : index
    %172 = vector.load %arg4[%c7_142, %c0_143, %c0_144] : memref<9x256x256xbf16, #tpu.memory_space<vmem>>, vector<1x256x256xbf16>
    %173 = vector.shape_cast %172 : vector<1x256x256xbf16> to vector<256x256xbf16>
    %cst_145 = arith.constant dense<0.000000e+00> : vector<32x256xf32>
    %174 = tpu.matmul %171, %173, %cst_145 {dimension_numbers = #tpu.dot_dimension_numbers<[1], [0], [0], [1], [0, 0, 1, 1], [], []>} : vector<32x256xbf16>, vector<256x256xbf16>, vector<32x256xf32> -> vector<32x256xf32>
    %175 = arith.addf %167, %174 : vector<32x256xf32>
    %c8_146 = arith.constant 8 : index
    %c0_147 = arith.constant 0 : index
    %c0_148 = arith.constant 0 : index
    %176 = vector.load %arg1[%c8_146, %c0_147, %c0_148] : memref<9x32x32xf32, #tpu.memory_space<vmem>>, vector<1x32x32xf32>
    %177 = vector.shape_cast %176 : vector<1x32x32xf32> to vector<32x32xf32>
    %cst_149 = arith.constant dense<0.000000e+00> : vector<32x256xf32>
    %178 = tpu.matmul %177, %81, %cst_149 {dimension_numbers = #tpu.dot_dimension_numbers<[1], [0], [0], [1], [0, 0, 1, 1], [], []>} : vector<32x32xf32>, vector<32x256xf32>, vector<32x256xf32> -> vector<32x256xf32>
    %179 = arith.truncf %178 : vector<32x256xf32> to vector<32x256xbf16>
    %c8_150 = arith.constant 8 : index
    %c0_151 = arith.constant 0 : index
    %c0_152 = arith.constant 0 : index
    %180 = vector.load %arg4[%c8_150, %c0_151, %c0_152] : memref<9x256x256xbf16, #tpu.memory_space<vmem>>, vector<1x256x256xbf16>
    %181 = vector.shape_cast %180 : vector<1x256x256xbf16> to vector<256x256xbf16>
    %cst_153 = arith.constant dense<0.000000e+00> : vector<32x256xf32>
    %182 = tpu.matmul %179, %181, %cst_153 {dimension_numbers = #tpu.dot_dimension_numbers<[1], [0], [0], [1], [0, 0, 1, 1], [], []>} : vector<32x256xbf16>, vector<256x256xbf16>, vector<32x256xf32> -> vector<32x256xf32>
    %183 = arith.addf %175, %182 : vector<32x256xf32>
    %cst_154 = arith.constant dense<0.000000e+00> : vector<256xf32>
    %184 = vector.multi_reduction <add>, %183, %cst_154 [0] : vector<32x256xf32> to vector<256xf32>
    %185 = vector.shape_cast %184 : vector<256xf32> to vector<1x256xf32>
    %186 = arith.mulf %183, %183 : vector<32x256xf32>
    %cst_155 = arith.constant dense<0.000000e+00> : vector<256xf32>
    %187 = vector.multi_reduction <add>, %186, %cst_155 [0] : vector<32x256xf32> to vector<256xf32>
    %188 = vector.shape_cast %187 : vector<256xf32> to vector<1x256xf32>
    %cst_156 = arith.constant 3.125000e-02 : f32
    %189 = vector.broadcast %cst_156 : f32 to vector<1x256xf32>
    %190 = arith.mulf %185, %189 : vector<1x256xf32>
    %cst_157 = arith.constant 3.125000e-02 : f32
    %191 = vector.broadcast %cst_157 : f32 to vector<1x256xf32>
    %192 = arith.mulf %188, %191 : vector<1x256xf32>
    %193 = arith.mulf %190, %190 : vector<1x256xf32>
    %194 = arith.subf %192, %193 : vector<1x256xf32>
    %cst_158 = arith.constant 0.000000e+00 : f32
    %195 = vector.broadcast %cst_158 : f32 to vector<1x256xf32>
    %196 = arith.maximumf %194, %195 : vector<1x256xf32>
    %197 = vector.broadcast %190 : vector<1x256xf32> to vector<32x256xf32>
    %198 = arith.subf %183, %197 : vector<32x256xf32>
    %c0_159 = arith.constant 0 : index
    %c0_160 = arith.constant 0 : index
    %199 = vector.load %arg11[%c0_159, %c0_160] : memref<1x256xf32, #tpu.memory_space<vmem>>, vector<1x256xf32>
    %cst_161 = arith.constant 9.99999974E-6 : f32
    %200 = vector.broadcast %cst_161 : f32 to vector<1x256xf32>
    %201 = arith.addf %196, %200 : vector<1x256xf32>
    %202 = math.rsqrt %201 : vector<1x256xf32>
    %203 = arith.mulf %199, %202 : vector<1x256xf32>
    %204 = vector.broadcast %203 : vector<1x256xf32> to vector<32x256xf32>
    %205 = arith.mulf %198, %204 : vector<32x256xf32>
    %c0_162 = arith.constant 0 : index
    %c0_163 = arith.constant 0 : index
    %206 = vector.load %arg12[%c0_162, %c0_163] : memref<1x256xf32, #tpu.memory_space<vmem>>, vector<1x256xf32>
    %207 = vector.broadcast %206 : vector<1x256xf32> to vector<32x256xf32>
    %208 = arith.addf %205, %207 : vector<32x256xf32>
    %209 = arith.addf %208, %110 : vector<32x256xf32>
    %cst_164 = arith.constant 0.000000e+00 : f32
    %210 = vector.broadcast %cst_164 : f32 to vector<32x256xf32>
    %211 = arith.maximumf %209, %210 : vector<32x256xf32>
    %cst_165 = arith.constant 0.000000e+00 : f32
    %212 = vector.broadcast %cst_165 : f32 to vector<32x256xf32>
    %c0_166 = arith.constant 0 : index
    %c0_167 = arith.constant 0 : index
    %c0_168 = arith.constant 0 : index
    %213 = vector.load %arg1[%c0_166, %c0_167, %c0_168] : memref<9x32x32xf32, #tpu.memory_space<vmem>>, vector<1x32x32xf32>
    %214 = vector.shape_cast %213 : vector<1x32x32xf32> to vector<32x32xf32>
    %cst_169 = arith.constant dense<0.000000e+00> : vector<32x256xf32>
    %215 = tpu.matmul %214, %211, %cst_169 {dimension_numbers = #tpu.dot_dimension_numbers<[1], [0], [0], [1], [0, 0, 1, 1], [], []>} : vector<32x32xf32>, vector<32x256xf32>, vector<32x256xf32> -> vector<32x256xf32>
    %216 = arith.truncf %215 : vector<32x256xf32> to vector<32x256xbf16>
    %c0_170 = arith.constant 0 : index
    %c0_171 = arith.constant 0 : index
    %c0_172 = arith.constant 0 : index
    %217 = vector.load %arg5[%c0_170, %c0_171, %c0_172] : memref<9x256x256xbf16, #tpu.memory_space<vmem>>, vector<1x256x256xbf16>
    %218 = vector.shape_cast %217 : vector<1x256x256xbf16> to vector<256x256xbf16>
    %cst_173 = arith.constant dense<0.000000e+00> : vector<32x256xf32>
    %219 = tpu.matmul %216, %218, %cst_173 {dimension_numbers = #tpu.dot_dimension_numbers<[1], [0], [0], [1], [0, 0, 1, 1], [], []>} : vector<32x256xbf16>, vector<256x256xbf16>, vector<32x256xf32> -> vector<32x256xf32>
    %220 = arith.addf %212, %219 : vector<32x256xf32>
    %c1_174 = arith.constant 1 : index
    %c0_175 = arith.constant 0 : index
    %c0_176 = arith.constant 0 : index
    %221 = vector.load %arg1[%c1_174, %c0_175, %c0_176] : memref<9x32x32xf32, #tpu.memory_space<vmem>>, vector<1x32x32xf32>
    %222 = vector.shape_cast %221 : vector<1x32x32xf32> to vector<32x32xf32>
    %cst_177 = arith.constant dense<0.000000e+00> : vector<32x256xf32>
    %223 = tpu.matmul %222, %211, %cst_177 {dimension_numbers = #tpu.dot_dimension_numbers<[1], [0], [0], [1], [0, 0, 1, 1], [], []>} : vector<32x32xf32>, vector<32x256xf32>, vector<32x256xf32> -> vector<32x256xf32>
    %224 = arith.truncf %223 : vector<32x256xf32> to vector<32x256xbf16>
    %c1_178 = arith.constant 1 : index
    %c0_179 = arith.constant 0 : index
    %c0_180 = arith.constant 0 : index
    %225 = vector.load %arg5[%c1_178, %c0_179, %c0_180] : memref<9x256x256xbf16, #tpu.memory_space<vmem>>, vector<1x256x256xbf16>
    %226 = vector.shape_cast %225 : vector<1x256x256xbf16> to vector<256x256xbf16>
    %cst_181 = arith.constant dense<0.000000e+00> : vector<32x256xf32>
    %227 = tpu.matmul %224, %226, %cst_181 {dimension_numbers = #tpu.dot_dimension_numbers<[1], [0], [0], [1], [0, 0, 1, 1], [], []>} : vector<32x256xbf16>, vector<256x256xbf16>, vector<32x256xf32> -> vector<32x256xf32>
    %228 = arith.addf %220, %227 : vector<32x256xf32>
    %c2_182 = arith.constant 2 : index
    %c0_183 = arith.constant 0 : index
    %c0_184 = arith.constant 0 : index
    %229 = vector.load %arg1[%c2_182, %c0_183, %c0_184] : memref<9x32x32xf32, #tpu.memory_space<vmem>>, vector<1x32x32xf32>
    %230 = vector.shape_cast %229 : vector<1x32x32xf32> to vector<32x32xf32>
    %cst_185 = arith.constant dense<0.000000e+00> : vector<32x256xf32>
    %231 = tpu.matmul %230, %211, %cst_185 {dimension_numbers = #tpu.dot_dimension_numbers<[1], [0], [0], [1], [0, 0, 1, 1], [], []>} : vector<32x32xf32>, vector<32x256xf32>, vector<32x256xf32> -> vector<32x256xf32>
    %232 = arith.truncf %231 : vector<32x256xf32> to vector<32x256xbf16>
    %c2_186 = arith.constant 2 : index
    %c0_187 = arith.constant 0 : index
    %c0_188 = arith.constant 0 : index
    %233 = vector.load %arg5[%c2_186, %c0_187, %c0_188] : memref<9x256x256xbf16, #tpu.memory_space<vmem>>, vector<1x256x256xbf16>
    %234 = vector.shape_cast %233 : vector<1x256x256xbf16> to vector<256x256xbf16>
    %cst_189 = arith.constant dense<0.000000e+00> : vector<32x256xf32>
    %235 = tpu.matmul %232, %234, %cst_189 {dimension_numbers = #tpu.dot_dimension_numbers<[1], [0], [0], [1], [0, 0, 1, 1], [], []>} : vector<32x256xbf16>, vector<256x256xbf16>, vector<32x256xf32> -> vector<32x256xf32>
    %236 = arith.addf %228, %235 : vector<32x256xf32>
    %c3_190 = arith.constant 3 : index
    %c0_191 = arith.constant 0 : index
    %c0_192 = arith.constant 0 : index
    %237 = vector.load %arg1[%c3_190, %c0_191, %c0_192] : memref<9x32x32xf32, #tpu.memory_space<vmem>>, vector<1x32x32xf32>
    %238 = vector.shape_cast %237 : vector<1x32x32xf32> to vector<32x32xf32>
    %cst_193 = arith.constant dense<0.000000e+00> : vector<32x256xf32>
    %239 = tpu.matmul %238, %211, %cst_193 {dimension_numbers = #tpu.dot_dimension_numbers<[1], [0], [0], [1], [0, 0, 1, 1], [], []>} : vector<32x32xf32>, vector<32x256xf32>, vector<32x256xf32> -> vector<32x256xf32>
    %240 = arith.truncf %239 : vector<32x256xf32> to vector<32x256xbf16>
    %c3_194 = arith.constant 3 : index
    %c0_195 = arith.constant 0 : index
    %c0_196 = arith.constant 0 : index
    %241 = vector.load %arg5[%c3_194, %c0_195, %c0_196] : memref<9x256x256xbf16, #tpu.memory_space<vmem>>, vector<1x256x256xbf16>
    %242 = vector.shape_cast %241 : vector<1x256x256xbf16> to vector<256x256xbf16>
    %cst_197 = arith.constant dense<0.000000e+00> : vector<32x256xf32>
    %243 = tpu.matmul %240, %242, %cst_197 {dimension_numbers = #tpu.dot_dimension_numbers<[1], [0], [0], [1], [0, 0, 1, 1], [], []>} : vector<32x256xbf16>, vector<256x256xbf16>, vector<32x256xf32> -> vector<32x256xf32>
    %244 = arith.addf %236, %243 : vector<32x256xf32>
    %c4_198 = arith.constant 4 : index
    %c0_199 = arith.constant 0 : index
    %c0_200 = arith.constant 0 : index
    %245 = vector.load %arg1[%c4_198, %c0_199, %c0_200] : memref<9x32x32xf32, #tpu.memory_space<vmem>>, vector<1x32x32xf32>
    %246 = vector.shape_cast %245 : vector<1x32x32xf32> to vector<32x32xf32>
    %cst_201 = arith.constant dense<0.000000e+00> : vector<32x256xf32>
    %247 = tpu.matmul %246, %211, %cst_201 {dimension_numbers = #tpu.dot_dimension_numbers<[1], [0], [0], [1], [0, 0, 1, 1], [], []>} : vector<32x32xf32>, vector<32x256xf32>, vector<32x256xf32> -> vector<32x256xf32>
    %248 = arith.truncf %247 : vector<32x256xf32> to vector<32x256xbf16>
    %c4_202 = arith.constant 4 : index
    %c0_203 = arith.constant 0 : index
    %c0_204 = arith.constant 0 : index
    %249 = vector.load %arg5[%c4_202, %c0_203, %c0_204] : memref<9x256x256xbf16, #tpu.memory_space<vmem>>, vector<1x256x256xbf16>
    %250 = vector.shape_cast %249 : vector<1x256x256xbf16> to vector<256x256xbf16>
    %cst_205 = arith.constant dense<0.000000e+00> : vector<32x256xf32>
    %251 = tpu.matmul %248, %250, %cst_205 {dimension_numbers = #tpu.dot_dimension_numbers<[1], [0], [0], [1], [0, 0, 1, 1], [], []>} : vector<32x256xbf16>, vector<256x256xbf16>, vector<32x256xf32> -> vector<32x256xf32>
    %252 = arith.addf %244, %251 : vector<32x256xf32>
    %c5_206 = arith.constant 5 : index
    %c0_207 = arith.constant 0 : index
    %c0_208 = arith.constant 0 : index
    %253 = vector.load %arg1[%c5_206, %c0_207, %c0_208] : memref<9x32x32xf32, #tpu.memory_space<vmem>>, vector<1x32x32xf32>
    %254 = vector.shape_cast %253 : vector<1x32x32xf32> to vector<32x32xf32>
    %cst_209 = arith.constant dense<0.000000e+00> : vector<32x256xf32>
    %255 = tpu.matmul %254, %211, %cst_209 {dimension_numbers = #tpu.dot_dimension_numbers<[1], [0], [0], [1], [0, 0, 1, 1], [], []>} : vector<32x32xf32>, vector<32x256xf32>, vector<32x256xf32> -> vector<32x256xf32>
    %256 = arith.truncf %255 : vector<32x256xf32> to vector<32x256xbf16>
    %c5_210 = arith.constant 5 : index
    %c0_211 = arith.constant 0 : index
    %c0_212 = arith.constant 0 : index
    %257 = vector.load %arg5[%c5_210, %c0_211, %c0_212] : memref<9x256x256xbf16, #tpu.memory_space<vmem>>, vector<1x256x256xbf16>
    %258 = vector.shape_cast %257 : vector<1x256x256xbf16> to vector<256x256xbf16>
    %cst_213 = arith.constant dense<0.000000e+00> : vector<32x256xf32>
    %259 = tpu.matmul %256, %258, %cst_213 {dimension_numbers = #tpu.dot_dimension_numbers<[1], [0], [0], [1], [0, 0, 1, 1], [], []>} : vector<32x256xbf16>, vector<256x256xbf16>, vector<32x256xf32> -> vector<32x256xf32>
    %260 = arith.addf %252, %259 : vector<32x256xf32>
    %c6_214 = arith.constant 6 : index
    %c0_215 = arith.constant 0 : index
    %c0_216 = arith.constant 0 : index
    %261 = vector.load %arg1[%c6_214, %c0_215, %c0_216] : memref<9x32x32xf32, #tpu.memory_space<vmem>>, vector<1x32x32xf32>
    %262 = vector.shape_cast %261 : vector<1x32x32xf32> to vector<32x32xf32>
    %cst_217 = arith.constant dense<0.000000e+00> : vector<32x256xf32>
    %263 = tpu.matmul %262, %211, %cst_217 {dimension_numbers = #tpu.dot_dimension_numbers<[1], [0], [0], [1], [0, 0, 1, 1], [], []>} : vector<32x32xf32>, vector<32x256xf32>, vector<32x256xf32> -> vector<32x256xf32>
    %264 = arith.truncf %263 : vector<32x256xf32> to vector<32x256xbf16>
    %c6_218 = arith.constant 6 : index
    %c0_219 = arith.constant 0 : index
    %c0_220 = arith.constant 0 : index
    %265 = vector.load %arg5[%c6_218, %c0_219, %c0_220] : memref<9x256x256xbf16, #tpu.memory_space<vmem>>, vector<1x256x256xbf16>
    %266 = vector.shape_cast %265 : vector<1x256x256xbf16> to vector<256x256xbf16>
    %cst_221 = arith.constant dense<0.000000e+00> : vector<32x256xf32>
    %267 = tpu.matmul %264, %266, %cst_221 {dimension_numbers = #tpu.dot_dimension_numbers<[1], [0], [0], [1], [0, 0, 1, 1], [], []>} : vector<32x256xbf16>, vector<256x256xbf16>, vector<32x256xf32> -> vector<32x256xf32>
    %268 = arith.addf %260, %267 : vector<32x256xf32>
    %c7_222 = arith.constant 7 : index
    %c0_223 = arith.constant 0 : index
    %c0_224 = arith.constant 0 : index
    %269 = vector.load %arg1[%c7_222, %c0_223, %c0_224] : memref<9x32x32xf32, #tpu.memory_space<vmem>>, vector<1x32x32xf32>
    %270 = vector.shape_cast %269 : vector<1x32x32xf32> to vector<32x32xf32>
    %cst_225 = arith.constant dense<0.000000e+00> : vector<32x256xf32>
    %271 = tpu.matmul %270, %211, %cst_225 {dimension_numbers = #tpu.dot_dimension_numbers<[1], [0], [0], [1], [0, 0, 1, 1], [], []>} : vector<32x32xf32>, vector<32x256xf32>, vector<32x256xf32> -> vector<32x256xf32>
    %272 = arith.truncf %271 : vector<32x256xf32> to vector<32x256xbf16>
    %c7_226 = arith.constant 7 : index
    %c0_227 = arith.constant 0 : index
    %c0_228 = arith.constant 0 : index
    %273 = vector.load %arg5[%c7_226, %c0_227, %c0_228] : memref<9x256x256xbf16, #tpu.memory_space<vmem>>, vector<1x256x256xbf16>
    %274 = vector.shape_cast %273 : vector<1x256x256xbf16> to vector<256x256xbf16>
    %cst_229 = arith.constant dense<0.000000e+00> : vector<32x256xf32>
    %275 = tpu.matmul %272, %274, %cst_229 {dimension_numbers = #tpu.dot_dimension_numbers<[1], [0], [0], [1], [0, 0, 1, 1], [], []>} : vector<32x256xbf16>, vector<256x256xbf16>, vector<32x256xf32> -> vector<32x256xf32>
    %276 = arith.addf %268, %275 : vector<32x256xf32>
    %c8_230 = arith.constant 8 : index
    %c0_231 = arith.constant 0 : index
    %c0_232 = arith.constant 0 : index
    %277 = vector.load %arg1[%c8_230, %c0_231, %c0_232] : memref<9x32x32xf32, #tpu.memory_space<vmem>>, vector<1x32x32xf32>
    %278 = vector.shape_cast %277 : vector<1x32x32xf32> to vector<32x32xf32>
    %cst_233 = arith.constant dense<0.000000e+00> : vector<32x256xf32>
    %279 = tpu.matmul %278, %211, %cst_233 {dimension_numbers = #tpu.dot_dimension_numbers<[1], [0], [0], [1], [0, 0, 1, 1], [], []>} : vector<32x32xf32>, vector<32x256xf32>, vector<32x256xf32> -> vector<32x256xf32>
    %280 = arith.truncf %279 : vector<32x256xf32> to vector<32x256xbf16>
    %c8_234 = arith.constant 8 : index
    %c0_235 = arith.constant 0 : index
    %c0_236 = arith.constant 0 : index
    %281 = vector.load %arg5[%c8_234, %c0_235, %c0_236] : memref<9x256x256xbf16, #tpu.memory_space<vmem>>, vector<1x256x256xbf16>
    %282 = vector.shape_cast %281 : vector<1x256x256xbf16> to vector<256x256xbf16>
    %cst_237 = arith.constant dense<0.000000e+00> : vector<32x256xf32>
    %283 = tpu.matmul %280, %282, %cst_237 {dimension_numbers = #tpu.dot_dimension_numbers<[1], [0], [0], [1], [0, 0, 1, 1], [], []>} : vector<32x256xbf16>, vector<256x256xbf16>, vector<32x256xf32> -> vector<32x256xf32>
    %284 = arith.addf %276, %283 : vector<32x256xf32>
    %cst_238 = arith.constant dense<0.000000e+00> : vector<256xf32>
    %285 = vector.multi_reduction <add>, %284, %cst_238 [0] : vector<32x256xf32> to vector<256xf32>
    %286 = vector.shape_cast %285 : vector<256xf32> to vector<1x256xf32>
    %287 = arith.mulf %284, %284 : vector<32x256xf32>
    %cst_239 = arith.constant dense<0.000000e+00> : vector<256xf32>
    %288 = vector.multi_reduction <add>, %287, %cst_239 [0] : vector<32x256xf32> to vector<256xf32>
    %289 = vector.shape_cast %288 : vector<256xf32> to vector<1x256xf32>
    %cst_240 = arith.constant 3.125000e-02 : f32
    %290 = vector.broadcast %cst_240 : f32 to vector<1x256xf32>
    %291 = arith.mulf %286, %290 : vector<1x256xf32>
    %cst_241 = arith.constant 3.125000e-02 : f32
    %292 = vector.broadcast %cst_241 : f32 to vector<1x256xf32>
    %293 = arith.mulf %289, %292 : vector<1x256xf32>
    %294 = arith.mulf %291, %291 : vector<1x256xf32>
    %295 = arith.subf %293, %294 : vector<1x256xf32>
    %cst_242 = arith.constant 0.000000e+00 : f32
    %296 = vector.broadcast %cst_242 : f32 to vector<1x256xf32>
    %297 = arith.maximumf %295, %296 : vector<1x256xf32>
    %298 = vector.broadcast %291 : vector<1x256xf32> to vector<32x256xf32>
    %299 = arith.subf %284, %298 : vector<32x256xf32>
    %c0_243 = arith.constant 0 : index
    %c0_244 = arith.constant 0 : index
    %300 = vector.load %arg13[%c0_243, %c0_244] : memref<1x256xf32, #tpu.memory_space<vmem>>, vector<1x256xf32>
    %cst_245 = arith.constant 9.99999974E-6 : f32
    %301 = vector.broadcast %cst_245 : f32 to vector<1x256xf32>
    %302 = arith.addf %297, %301 : vector<1x256xf32>
    %303 = math.rsqrt %302 : vector<1x256xf32>
    %304 = arith.mulf %300, %303 : vector<1x256xf32>
    %305 = vector.broadcast %304 : vector<1x256xf32> to vector<32x256xf32>
    %306 = arith.mulf %299, %305 : vector<32x256xf32>
    %c0_246 = arith.constant 0 : index
    %c0_247 = arith.constant 0 : index
    %307 = vector.load %arg14[%c0_246, %c0_247] : memref<1x256xf32, #tpu.memory_space<vmem>>, vector<1x256xf32>
    %308 = vector.broadcast %307 : vector<1x256xf32> to vector<32x256xf32>
    %309 = arith.addf %306, %308 : vector<32x256xf32>
    %cst_248 = arith.constant 0.000000e+00 : f32
    %310 = vector.broadcast %cst_248 : f32 to vector<32x256xf32>
    %311 = arith.maximumf %309, %310 : vector<32x256xf32>
    %cst_249 = arith.constant 0.000000e+00 : f32
    %312 = vector.broadcast %cst_249 : f32 to vector<32x256xf32>
    %c0_250 = arith.constant 0 : index
    %c0_251 = arith.constant 0 : index
    %c0_252 = arith.constant 0 : index
    %313 = vector.load %arg1[%c0_250, %c0_251, %c0_252] : memref<9x32x32xf32, #tpu.memory_space<vmem>>, vector<1x32x32xf32>
    %314 = vector.shape_cast %313 : vector<1x32x32xf32> to vector<32x32xf32>
    %cst_253 = arith.constant dense<0.000000e+00> : vector<32x256xf32>
    %315 = tpu.matmul %314, %311, %cst_253 {dimension_numbers = #tpu.dot_dimension_numbers<[1], [0], [0], [1], [0, 0, 1, 1], [], []>} : vector<32x32xf32>, vector<32x256xf32>, vector<32x256xf32> -> vector<32x256xf32>
    %316 = arith.truncf %315 : vector<32x256xf32> to vector<32x256xbf16>
    %c0_254 = arith.constant 0 : index
    %c0_255 = arith.constant 0 : index
    %c0_256 = arith.constant 0 : index
    %317 = vector.load %arg6[%c0_254, %c0_255, %c0_256] : memref<9x256x256xbf16, #tpu.memory_space<vmem>>, vector<1x256x256xbf16>
    %318 = vector.shape_cast %317 : vector<1x256x256xbf16> to vector<256x256xbf16>
    %cst_257 = arith.constant dense<0.000000e+00> : vector<32x256xf32>
    %319 = tpu.matmul %316, %318, %cst_257 {dimension_numbers = #tpu.dot_dimension_numbers<[1], [0], [0], [1], [0, 0, 1, 1], [], []>} : vector<32x256xbf16>, vector<256x256xbf16>, vector<32x256xf32> -> vector<32x256xf32>
    %320 = arith.addf %312, %319 : vector<32x256xf32>
    %c1_258 = arith.constant 1 : index
    %c0_259 = arith.constant 0 : index
    %c0_260 = arith.constant 0 : index
    %321 = vector.load %arg1[%c1_258, %c0_259, %c0_260] : memref<9x32x32xf32, #tpu.memory_space<vmem>>, vector<1x32x32xf32>
    %322 = vector.shape_cast %321 : vector<1x32x32xf32> to vector<32x32xf32>
    %cst_261 = arith.constant dense<0.000000e+00> : vector<32x256xf32>
    %323 = tpu.matmul %322, %311, %cst_261 {dimension_numbers = #tpu.dot_dimension_numbers<[1], [0], [0], [1], [0, 0, 1, 1], [], []>} : vector<32x32xf32>, vector<32x256xf32>, vector<32x256xf32> -> vector<32x256xf32>
    %324 = arith.truncf %323 : vector<32x256xf32> to vector<32x256xbf16>
    %c1_262 = arith.constant 1 : index
    %c0_263 = arith.constant 0 : index
    %c0_264 = arith.constant 0 : index
    %325 = vector.load %arg6[%c1_262, %c0_263, %c0_264] : memref<9x256x256xbf16, #tpu.memory_space<vmem>>, vector<1x256x256xbf16>
    %326 = vector.shape_cast %325 : vector<1x256x256xbf16> to vector<256x256xbf16>
    %cst_265 = arith.constant dense<0.000000e+00> : vector<32x256xf32>
    %327 = tpu.matmul %324, %326, %cst_265 {dimension_numbers = #tpu.dot_dimension_numbers<[1], [0], [0], [1], [0, 0, 1, 1], [], []>} : vector<32x256xbf16>, vector<256x256xbf16>, vector<32x256xf32> -> vector<32x256xf32>
    %328 = arith.addf %320, %327 : vector<32x256xf32>
    %c2_266 = arith.constant 2 : index
    %c0_267 = arith.constant 0 : index
    %c0_268 = arith.constant 0 : index
    %329 = vector.load %arg1[%c2_266, %c0_267, %c0_268] : memref<9x32x32xf32, #tpu.memory_space<vmem>>, vector<1x32x32xf32>
    %330 = vector.shape_cast %329 : vector<1x32x32xf32> to vector<32x32xf32>
    %cst_269 = arith.constant dense<0.000000e+00> : vector<32x256xf32>
    %331 = tpu.matmul %330, %311, %cst_269 {dimension_numbers = #tpu.dot_dimension_numbers<[1], [0], [0], [1], [0, 0, 1, 1], [], []>} : vector<32x32xf32>, vector<32x256xf32>, vector<32x256xf32> -> vector<32x256xf32>
    %332 = arith.truncf %331 : vector<32x256xf32> to vector<32x256xbf16>
    %c2_270 = arith.constant 2 : index
    %c0_271 = arith.constant 0 : index
    %c0_272 = arith.constant 0 : index
    %333 = vector.load %arg6[%c2_270, %c0_271, %c0_272] : memref<9x256x256xbf16, #tpu.memory_space<vmem>>, vector<1x256x256xbf16>
    %334 = vector.shape_cast %333 : vector<1x256x256xbf16> to vector<256x256xbf16>
    %cst_273 = arith.constant dense<0.000000e+00> : vector<32x256xf32>
    %335 = tpu.matmul %332, %334, %cst_273 {dimension_numbers = #tpu.dot_dimension_numbers<[1], [0], [0], [1], [0, 0, 1, 1], [], []>} : vector<32x256xbf16>, vector<256x256xbf16>, vector<32x256xf32> -> vector<32x256xf32>
    %336 = arith.addf %328, %335 : vector<32x256xf32>
    %c3_274 = arith.constant 3 : index
    %c0_275 = arith.constant 0 : index
    %c0_276 = arith.constant 0 : index
    %337 = vector.load %arg1[%c3_274, %c0_275, %c0_276] : memref<9x32x32xf32, #tpu.memory_space<vmem>>, vector<1x32x32xf32>
    %338 = vector.shape_cast %337 : vector<1x32x32xf32> to vector<32x32xf32>
    %cst_277 = arith.constant dense<0.000000e+00> : vector<32x256xf32>
    %339 = tpu.matmul %338, %311, %cst_277 {dimension_numbers = #tpu.dot_dimension_numbers<[1], [0], [0], [1], [0, 0, 1, 1], [], []>} : vector<32x32xf32>, vector<32x256xf32>, vector<32x256xf32> -> vector<32x256xf32>
    %340 = arith.truncf %339 : vector<32x256xf32> to vector<32x256xbf16>
    %c3_278 = arith.constant 3 : index
    %c0_279 = arith.constant 0 : index
    %c0_280 = arith.constant 0 : index
    %341 = vector.load %arg6[%c3_278, %c0_279, %c0_280] : memref<9x256x256xbf16, #tpu.memory_space<vmem>>, vector<1x256x256xbf16>
    %342 = vector.shape_cast %341 : vector<1x256x256xbf16> to vector<256x256xbf16>
    %cst_281 = arith.constant dense<0.000000e+00> : vector<32x256xf32>
    %343 = tpu.matmul %340, %342, %cst_281 {dimension_numbers = #tpu.dot_dimension_numbers<[1], [0], [0], [1], [0, 0, 1, 1], [], []>} : vector<32x256xbf16>, vector<256x256xbf16>, vector<32x256xf32> -> vector<32x256xf32>
    %344 = arith.addf %336, %343 : vector<32x256xf32>
    %c4_282 = arith.constant 4 : index
    %c0_283 = arith.constant 0 : index
    %c0_284 = arith.constant 0 : index
    %345 = vector.load %arg1[%c4_282, %c0_283, %c0_284] : memref<9x32x32xf32, #tpu.memory_space<vmem>>, vector<1x32x32xf32>
    %346 = vector.shape_cast %345 : vector<1x32x32xf32> to vector<32x32xf32>
    %cst_285 = arith.constant dense<0.000000e+00> : vector<32x256xf32>
    %347 = tpu.matmul %346, %311, %cst_285 {dimension_numbers = #tpu.dot_dimension_numbers<[1], [0], [0], [1], [0, 0, 1, 1], [], []>} : vector<32x32xf32>, vector<32x256xf32>, vector<32x256xf32> -> vector<32x256xf32>
    %348 = arith.truncf %347 : vector<32x256xf32> to vector<32x256xbf16>
    %c4_286 = arith.constant 4 : index
    %c0_287 = arith.constant 0 : index
    %c0_288 = arith.constant 0 : index
    %349 = vector.load %arg6[%c4_286, %c0_287, %c0_288] : memref<9x256x256xbf16, #tpu.memory_space<vmem>>, vector<1x256x256xbf16>
    %350 = vector.shape_cast %349 : vector<1x256x256xbf16> to vector<256x256xbf16>
    %cst_289 = arith.constant dense<0.000000e+00> : vector<32x256xf32>
    %351 = tpu.matmul %348, %350, %cst_289 {dimension_numbers = #tpu.dot_dimension_numbers<[1], [0], [0], [1], [0, 0, 1, 1], [], []>} : vector<32x256xbf16>, vector<256x256xbf16>, vector<32x256xf32> -> vector<32x256xf32>
    %352 = arith.addf %344, %351 : vector<32x256xf32>
    %c5_290 = arith.constant 5 : index
    %c0_291 = arith.constant 0 : index
    %c0_292 = arith.constant 0 : index
    %353 = vector.load %arg1[%c5_290, %c0_291, %c0_292] : memref<9x32x32xf32, #tpu.memory_space<vmem>>, vector<1x32x32xf32>
    %354 = vector.shape_cast %353 : vector<1x32x32xf32> to vector<32x32xf32>
    %cst_293 = arith.constant dense<0.000000e+00> : vector<32x256xf32>
    %355 = tpu.matmul %354, %311, %cst_293 {dimension_numbers = #tpu.dot_dimension_numbers<[1], [0], [0], [1], [0, 0, 1, 1], [], []>} : vector<32x32xf32>, vector<32x256xf32>, vector<32x256xf32> -> vector<32x256xf32>
    %356 = arith.truncf %355 : vector<32x256xf32> to vector<32x256xbf16>
    %c5_294 = arith.constant 5 : index
    %c0_295 = arith.constant 0 : index
    %c0_296 = arith.constant 0 : index
    %357 = vector.load %arg6[%c5_294, %c0_295, %c0_296] : memref<9x256x256xbf16, #tpu.memory_space<vmem>>, vector<1x256x256xbf16>
    %358 = vector.shape_cast %357 : vector<1x256x256xbf16> to vector<256x256xbf16>
    %cst_297 = arith.constant dense<0.000000e+00> : vector<32x256xf32>
    %359 = tpu.matmul %356, %358, %cst_297 {dimension_numbers = #tpu.dot_dimension_numbers<[1], [0], [0], [1], [0, 0, 1, 1], [], []>} : vector<32x256xbf16>, vector<256x256xbf16>, vector<32x256xf32> -> vector<32x256xf32>
    %360 = arith.addf %352, %359 : vector<32x256xf32>
    %c6_298 = arith.constant 6 : index
    %c0_299 = arith.constant 0 : index
    %c0_300 = arith.constant 0 : index
    %361 = vector.load %arg1[%c6_298, %c0_299, %c0_300] : memref<9x32x32xf32, #tpu.memory_space<vmem>>, vector<1x32x32xf32>
    %362 = vector.shape_cast %361 : vector<1x32x32xf32> to vector<32x32xf32>
    %cst_301 = arith.constant dense<0.000000e+00> : vector<32x256xf32>
    %363 = tpu.matmul %362, %311, %cst_301 {dimension_numbers = #tpu.dot_dimension_numbers<[1], [0], [0], [1], [0, 0, 1, 1], [], []>} : vector<32x32xf32>, vector<32x256xf32>, vector<32x256xf32> -> vector<32x256xf32>
    %364 = arith.truncf %363 : vector<32x256xf32> to vector<32x256xbf16>
    %c6_302 = arith.constant 6 : index
    %c0_303 = arith.constant 0 : index
    %c0_304 = arith.constant 0 : index
    %365 = vector.load %arg6[%c6_302, %c0_303, %c0_304] : memref<9x256x256xbf16, #tpu.memory_space<vmem>>, vector<1x256x256xbf16>
    %366 = vector.shape_cast %365 : vector<1x256x256xbf16> to vector<256x256xbf16>
    %cst_305 = arith.constant dense<0.000000e+00> : vector<32x256xf32>
    %367 = tpu.matmul %364, %366, %cst_305 {dimension_numbers = #tpu.dot_dimension_numbers<[1], [0], [0], [1], [0, 0, 1, 1], [], []>} : vector<32x256xbf16>, vector<256x256xbf16>, vector<32x256xf32> -> vector<32x256xf32>
    %368 = arith.addf %360, %367 : vector<32x256xf32>
    %c7_306 = arith.constant 7 : index
    %c0_307 = arith.constant 0 : index
    %c0_308 = arith.constant 0 : index
    %369 = vector.load %arg1[%c7_306, %c0_307, %c0_308] : memref<9x32x32xf32, #tpu.memory_space<vmem>>, vector<1x32x32xf32>
    %370 = vector.shape_cast %369 : vector<1x32x32xf32> to vector<32x32xf32>
    %cst_309 = arith.constant dense<0.000000e+00> : vector<32x256xf32>
    %371 = tpu.matmul %370, %311, %cst_309 {dimension_numbers = #tpu.dot_dimension_numbers<[1], [0], [0], [1], [0, 0, 1, 1], [], []>} : vector<32x32xf32>, vector<32x256xf32>, vector<32x256xf32> -> vector<32x256xf32>
    %372 = arith.truncf %371 : vector<32x256xf32> to vector<32x256xbf16>
    %c7_310 = arith.constant 7 : index
    %c0_311 = arith.constant 0 : index
    %c0_312 = arith.constant 0 : index
    %373 = vector.load %arg6[%c7_310, %c0_311, %c0_312] : memref<9x256x256xbf16, #tpu.memory_space<vmem>>, vector<1x256x256xbf16>
    %374 = vector.shape_cast %373 : vector<1x256x256xbf16> to vector<256x256xbf16>
    %cst_313 = arith.constant dense<0.000000e+00> : vector<32x256xf32>
    %375 = tpu.matmul %372, %374, %cst_313 {dimension_numbers = #tpu.dot_dimension_numbers<[1], [0], [0], [1], [0, 0, 1, 1], [], []>} : vector<32x256xbf16>, vector<256x256xbf16>, vector<32x256xf32> -> vector<32x256xf32>
    %376 = arith.addf %368, %375 : vector<32x256xf32>
    %c8_314 = arith.constant 8 : index
    %c0_315 = arith.constant 0 : index
    %c0_316 = arith.constant 0 : index
    %377 = vector.load %arg1[%c8_314, %c0_315, %c0_316] : memref<9x32x32xf32, #tpu.memory_space<vmem>>, vector<1x32x32xf32>
    %378 = vector.shape_cast %377 : vector<1x32x32xf32> to vector<32x32xf32>
    %cst_317 = arith.constant dense<0.000000e+00> : vector<32x256xf32>
    %379 = tpu.matmul %378, %311, %cst_317 {dimension_numbers = #tpu.dot_dimension_numbers<[1], [0], [0], [1], [0, 0, 1, 1], [], []>} : vector<32x32xf32>, vector<32x256xf32>, vector<32x256xf32> -> vector<32x256xf32>
    %380 = arith.truncf %379 : vector<32x256xf32> to vector<32x256xbf16>
    %c8_318 = arith.constant 8 : index
    %c0_319 = arith.constant 0 : index
    %c0_320 = arith.constant 0 : index
    %381 = vector.load %arg6[%c8_318, %c0_319, %c0_320] : memref<9x256x256xbf16, #tpu.memory_space<vmem>>, vector<1x256x256xbf16>
    %382 = vector.shape_cast %381 : vector<1x256x256xbf16> to vector<256x256xbf16>
    %cst_321 = arith.constant dense<0.000000e+00> : vector<32x256xf32>
    %383 = tpu.matmul %380, %382, %cst_321 {dimension_numbers = #tpu.dot_dimension_numbers<[1], [0], [0], [1], [0, 0, 1, 1], [], []>} : vector<32x256xbf16>, vector<256x256xbf16>, vector<32x256xf32> -> vector<32x256xf32>
    %384 = arith.addf %376, %383 : vector<32x256xf32>
    %cst_322 = arith.constant dense<0.000000e+00> : vector<256xf32>
    %385 = vector.multi_reduction <add>, %384, %cst_322 [0] : vector<32x256xf32> to vector<256xf32>
    %386 = vector.shape_cast %385 : vector<256xf32> to vector<1x256xf32>
    %387 = arith.mulf %384, %384 : vector<32x256xf32>
    %cst_323 = arith.constant dense<0.000000e+00> : vector<256xf32>
    %388 = vector.multi_reduction <add>, %387, %cst_323 [0] : vector<32x256xf32> to vector<256xf32>
    %389 = vector.shape_cast %388 : vector<256xf32> to vector<1x256xf32>
    %cst_324 = arith.constant 3.125000e-02 : f32
    %390 = vector.broadcast %cst_324 : f32 to vector<1x256xf32>
    %391 = arith.mulf %386, %390 : vector<1x256xf32>
    %cst_325 = arith.constant 3.125000e-02 : f32
    %392 = vector.broadcast %cst_325 : f32 to vector<1x256xf32>
    %393 = arith.mulf %389, %392 : vector<1x256xf32>
    %394 = arith.mulf %391, %391 : vector<1x256xf32>
    %395 = arith.subf %393, %394 : vector<1x256xf32>
    %cst_326 = arith.constant 0.000000e+00 : f32
    %396 = vector.broadcast %cst_326 : f32 to vector<1x256xf32>
    %397 = arith.maximumf %395, %396 : vector<1x256xf32>
    %398 = vector.broadcast %391 : vector<1x256xf32> to vector<32x256xf32>
    %399 = arith.subf %384, %398 : vector<32x256xf32>
    %c0_327 = arith.constant 0 : index
    %c0_328 = arith.constant 0 : index
    %400 = vector.load %arg15[%c0_327, %c0_328] : memref<1x256xf32, #tpu.memory_space<vmem>>, vector<1x256xf32>
    %cst_329 = arith.constant 9.99999974E-6 : f32
    %401 = vector.broadcast %cst_329 : f32 to vector<1x256xf32>
    %402 = arith.addf %397, %401 : vector<1x256xf32>
    %403 = math.rsqrt %402 : vector<1x256xf32>
    %404 = arith.mulf %400, %403 : vector<1x256xf32>
    %405 = vector.broadcast %404 : vector<1x256xf32> to vector<32x256xf32>
    %406 = arith.mulf %399, %405 : vector<32x256xf32>
    %c0_330 = arith.constant 0 : index
    %c0_331 = arith.constant 0 : index
    %407 = vector.load %arg16[%c0_330, %c0_331] : memref<1x256xf32, #tpu.memory_space<vmem>>, vector<1x256xf32>
    %408 = vector.broadcast %407 : vector<1x256xf32> to vector<32x256xf32>
    %409 = arith.addf %406, %408 : vector<32x256xf32>
    %410 = arith.addf %409, %211 : vector<32x256xf32>
    %cst_332 = arith.constant 0.000000e+00 : f32
    %411 = vector.broadcast %cst_332 : f32 to vector<32x256xf32>
    %412 = arith.maximumf %410, %411 : vector<32x256xf32>
    %c0_333 = arith.constant 0 : index
    %c0_334 = arith.constant 0 : index
    %413 = vector.load %arg17[%c0_333, %c0_334] : memref<32x256xf32, #tpu.memory_space<vmem>>, vector<32x256xf32>
    tpu.vector_store %arg17[%c0_333, %c0_334], %412 {strides = array<i32>} : memref<32x256xf32, #tpu.memory_space<vmem>>, vector<32x256xf32>,
    return
  }
}

</mosaic_0001>

<bundles_post_ra>
// kernel: resnet18_layer5_forward.1
= control target key start
LH: loop header
LB: loop body
LE: loop exit
PB: predicated region body
PF: predicated region fallthrough
CT: control target
= control target key end

     0   :  { %v16152_v1 = vmov 0   ;;  %vm2025_vm0 = vcmask 261120   ;;  %s21097_s2 = inlined_call_operand.vmem [shape: bf16[9,128,256], index: 2, kind: input, shape index: {}]   ;;  %s21098_s0 = inlined_call_operand.vmem [shape: bf16[9,32,128], index: 0, kind: input, shape index: {}]   ;;  %s21099_s4 = inlined_call_operand.vmem [shape: bf16[9,256,256], index: 4, kind: input, shape index: {}]   ;;  %s21100_s3 = inlined_call_operand.vmem [shape: bf16[128,256], index: 3, kind: input, shape index: {}]   ;;  %s21101_s7 = inlined_call_operand.vmem [shape: f32[1,256], index: 7, kind: input, shape index: {}]   ;;  %s21102_s8 = inlined_call_operand.vmem [shape: f32[1,256], index: 8, kind: input, shape index: {}]   ;;  %s21103_s1 = inlined_call_operand.vmem [shape: f32[9,32,32], index: 1, kind: input, shape index: {}]   ;;  %s21104_s9 = inlined_call_operand.vmem [shape: f32[1,256], index: 9, kind: input, shape index: {}]   ;;  %s21105_s5 = inlined_call_operand.vmem [shape: bf16[9,256,256], index: 5, kind: input, shape index: {}]   ;;  %s21106_s10 = inlined_call_operand.vmem [shape: f32[1,256], index: 10, kind: input, shape index: {}]   ;;  %s21107_s11 = inlined_call_operand.vmem [shape: f32[1,256], index: 11, kind: input, shape index: {}]   ;;  %s21108_s12 = inlined_call_operand.vmem [shape: f32[1,256], index: 12, kind: input, shape index: {}]   ;;  %s21109_s6 = inlined_call_operand.vmem [shape: bf16[9,256,256], index: 6, kind: input, shape index: {}]   ;;  %s21110_s13 = inlined_call_operand.vmem [shape: f32[1,256], index: 13, kind: input, shape index: {}]   ;;  %s21111_s14 = inlined_call_operand.vmem [shape: f32[1,256], index: 14, kind: input, shape index: {}]   ;;  %s21112_s15 = inlined_call_operand.vmem [shape: f32[1,256], index: 15, kind: input, shape index: {}]   ;;  %s21113_s16 = inlined_call_operand.vmem [shape: f32[1,256], index: 16, kind: input, shape index: {}]   ;;  %s21114_s17 = inlined_call_operand.vmem [shape: f32[32,256], index: 17, kind: output, shape index: {}]  }
   0x1   :  { %21117 = sst [smem:[#allocation2_spill]] %s21097_s2  ;;  %223 = vmatprep.mubr.bf16.mxu0 %v16152_v1 }
   0x2   :  { %21118 = sst [smem:[#allocation3_spill]] %s21098_s0  ;;  %s21119_s26 = sld [smem:[#allocation2_spill]] }
   0x3   :  { %s21120_s19 = sld [smem:[#allocation3_spill]] }
   0x8   :  { %v14504_v0 = vld [vmem:[%s21119_s26 + $0x84] ss:$8 sps:$4 sm:$0xff]   ;;  %v14506_v2 = vld [vmem:[%s21119_s26 + $0x80] ss:$8 sps:$4 sm:$0xff]   ;;  %v14507_v3 = vld [vmem:[%s21119_s26 + $0x94] ss:$8 sps:$4 sm:$0xff]  }
   0x9   :  { %191 = vmatprep.subr.bf16.mxu0 %v14504_v0  ;;  %v14509_v4 = vld [vmem:[%s21119_s26 + $0x90] ss:$8 sps:$4 sm:$0xff]   ;;  %v14510_v5 = vld [vmem:[%s21119_s26 + $0xa4] ss:$8 sps:$4 sm:$0xff]   ;;  %v14512_v6 = vld [vmem:[%s21119_s26 + $0xa0] ss:$8 sps:$4 sm:$0xff]  }
   0xa   :  { %192 = vmatpush1.bf16.msra.mxu0 %v14506_v2  ;;  %v14513_v7 = vld [vmem:[%s21119_s26 + $0xb4] ss:$8 sps:$4 sm:$0xff]   ;;  %v14515_v8 = vld [vmem:[%s21119_s26 + $0xb0] ss:$8 sps:$4 sm:$0xff]   ;;  %v14516_v9 = vld [vmem:[%s21119_s26 + $0xc4] ss:$8 sps:$4 sm:$0xff]  }
   0xb   :  { %193 = vmatprep.subr.bf16.mxu0 %v14507_v3  ;;  %v14518_v10 = vld [vmem:[%s21119_s26 + $0xc0] ss:$8 sps:$4 sm:$0xff]   ;;  %v14519_v11 = vld [vmem:[%s21119_s26 + $0xd4] ss:$8 sps:$4 sm:$0xff]   ;;  %v14521_v12 = vld [vmem:[%s21119_s26 + $0xd0] ss:$8 sps:$4 sm:$0xff]  }
   0xc   :  { %v14522_v13 = vld [vmem:[%s21119_s26 + $0xe4] ss:$8 sps:$4 sm:$0xff]   ;;  %v14524_v14 = vld [vmem:[%s21119_s26 + $0xe0] ss:$8 sps:$4 sm:$0xff]   ;;  %v14525_v15 = vld [vmem:[%s21119_s26 + $0xf4] ss:$8 sps:$4 sm:$0xff]  }
   0xd   :  { %v14527_v16 = vld [vmem:[%s21119_s26 + $0xf0] ss:$8 sps:$4 sm:$0xff]   ;;  %v14530_v17 = vld [vmem:[%s21119_s26 + $0x4] ss:$8 sps:$4 sm:$0xff]   ;;  %v14528_v19 = vld [vmem:[%s21119_s26] ss:$8 sps:$4 sm:$0xff]  }
   0xe   :  { %194 = vmatpush1.bf16.msra.mxu0 %v14509_v4  ;;  %v14531_v18 = vld [vmem:[%s21120_s19 + $0x10] sm:$0xff]   ;;  %v14537_v22 = vld [vmem:[%s21119_s26 + $0x24] ss:$8 sps:$4 sm:$0xff]   ;;  %v14550_v23 = vld [vmem:[%s21120_s19 + $0x18] sm:$0xff]  }
   0xf   :  { %195 = vmatprep.subr.bf16.mxu0 %v14510_v5  ;;  %v14534_v20 = vld [vmem:[%s21119_s26 + $0x14] ss:$8 sps:$4 sm:$0xff]   ;;  %v14532_v21 = vld [vmem:[%s21119_s26 + $0x10] ss:$8 sps:$4 sm:$0xff]   ;;  %v14535_v24 = vld [vmem:[%s21119_s26 + $0x20] ss:$8 sps:$4 sm:$0xff]  }
  0x10   :  { %v14540_v25 = vld [vmem:[%s21119_s26 + $0x34] ss:$8 sps:$4 sm:$0xff]   ;;  %v14538_v26 = vld [vmem:[%s21119_s26 + $0x30] ss:$8 sps:$4 sm:$0xff]   ;;  %v14543_v27 = vld [vmem:[%s21119_s26 + $0x44] ss:$8 sps:$4 sm:$0xff]  }
  0x11   :  { %v14541_v28 = vld [vmem:[%s21119_s26 + $0x40] ss:$8 sps:$4 sm:$0xff]   ;;  %v14546_v29 = vld [vmem:[%s21119_s26 + $0x54] ss:$8 sps:$4 sm:$0xff]   ;;  %v14544_v30 = vld [vmem:[%s21119_s26 + $0x50] ss:$8 sps:$4 sm:$0xff]  }
  0x12   :  { %196 = vmatpush1.bf16.msra.mxu0 %v14512_v6  ;;  %v14549_v31 = vld [vmem:[%s21119_s26 + $0x64] ss:$8 sps:$4 sm:$0xff]   ;;  %v14547_v32 = vld [vmem:[%s21119_s26 + $0x60] ss:$8 sps:$4 sm:$0xff]   ;;  %v14553_v33 = vld [vmem:[%s21119_s26 + $0x74] ss:$8 sps:$4 sm:$0xff]  }
  0x13   :  { %197 = vmatprep.subr.bf16.mxu0 %v14513_v7  ;;  %v14551_v34 = vld [vmem:[%s21119_s26 + $0x70] ss:$8 sps:$4 sm:$0xff]   ;;  %v14556_v35 = vld [vmem:[%s21119_s26 + $0x104] ss:$8 sps:$4 sm:$0xff]   ;;  %v14554_v37 = vld [vmem:[%s21119_s26 + $0x100] ss:$8 sps:$4 sm:$0xff]  }
  0x14   :  { %v14557_v36 = vld [vmem:[%s21120_s19] sm:$0xff]   ;;  %v14560_v38 = vld [vmem:[%s21119_s26 + $0x114] ss:$8 sps:$4 sm:$0xff]   ;;  %v14558_v39 = vld [vmem:[%s21119_s26 + $0x110] ss:$8 sps:$4 sm:$0xff]  }
  0x15   :  { %v14563_v40 = vld [vmem:[%s21119_s26 + $0x124] ss:$8 sps:$4 sm:$0xff]   ;;  %v14561_v42 = vld [vmem:[%s21119_s26 + $0x120] ss:$8 sps:$4 sm:$0xff]   ;;  %v14566_v43 = vld [vmem:[%s21119_s26 + $0x134] ss:$8 sps:$4 sm:$0xff]  }
  0x16   :  { %198 = vmatpush1.bf16.msra.mxu0 %v14515_v8  ;;  %v14576_v41 = vld [vmem:[%s21120_s19 + $0x8] sm:$0xff]   ;;  %v14564_v44 = vld [vmem:[%s21119_s26 + $0x130] ss:$8 sps:$4 sm:$0xff]   ;;  %v14572_v47 = vld [vmem:[%s21119_s26 + $0x154] ss:$8 sps:$4 sm:$0xff]  }
  0x17   :  { %199 = vmatprep.subr.bf16.mxu0 %v14516_v9  ;;  %v14569_v45 = vld [vmem:[%s21119_s26 + $0x144] ss:$8 sps:$4 sm:$0xff]   ;;  %v14567_v46 = vld [vmem:[%s21119_s26 + $0x140] ss:$8 sps:$4 sm:$0xff]   ;;  %v14570_v48 = vld [vmem:[%s21119_s26 + $0x150] ss:$8 sps:$4 sm:$0xff]  }
  0x18   :  { %v14575_v49 = vld [vmem:[%s21119_s26 + $0x164] ss:$8 sps:$4 sm:$0xff]   ;;  %v14573_v50 = vld [vmem:[%s21119_s26 + $0x160] ss:$8 sps:$4 sm:$0xff]   ;;  %v14579_v51 = vld [vmem:[%s21119_s26 + $0x174] ss:$8 sps:$4 sm:$0xff]  }
  0x19   :  { %v14577_v52 = vld [vmem:[%s21119_s26 + $0x170] ss:$8 sps:$4 sm:$0xff]   ;;  %v14582_v53 = vld [vmem:[%s21119_s26 + $0x184] ss:$8 sps:$4 sm:$0xff]   ;;  %v14580_v55 = vld [vmem:[%s21119_s26 + $0x180] ss:$8 sps:$4 sm:$0xff]  }
  0x1a   :  { %200 = vmatpush1.bf16.msra.mxu0 %v14518_v10  ;;  %v14583_v54 = vld [vmem:[%s21120_s19 + $0x20] sm:$0xff]   ;;  %v14586_v56 = vld [vmem:[%s21119_s26 + $0x194] ss:$8 sps:$4 sm:$0xff]   ;;  %v14584_v57 = vld [vmem:[%s21119_s26 + $0x190] ss:$8 sps:$4 sm:$0xff]  }
  0x1b   :  { %201 = vmatprep.subr.bf16.mxu0 %v14519_v11  ;;  %v14589_v58 = vld [vmem:[%s21119_s26 + $0x1a4] ss:$8 sps:$4 sm:$0xff]   ;;  %v14587_v60 = vld [vmem:[%s21119_s26 + $0x1a0] ss:$8 sps:$4 sm:$0xff]   ;;  %v14592_v61 = vld [vmem:[%s21119_s26 + $0x1b4] ss:$8 sps:$4 sm:$0xff]  }
  0x1c   :  { %v14602_v59 = vld [vmem:[%s21120_s19 + $0x28] sm:$0xff]   ;;  %v14590_v62 = vld [vmem:[%s21119_s26 + $0x1b0] ss:$8 sps:$4 sm:$0xff]   ;;  %v14598_v2 = vld [vmem:[%s21119_s26 + $0x1d4] ss:$8 sps:$4 sm:$0xff]  }
  0x1d   :  { %v14595_v63 = vld [vmem:[%s21119_s26 + $0x1c4] ss:$8 sps:$4 sm:$0xff]   ;;  %v14593_v0 = vld [vmem:[%s21119_s26 + $0x1c0] ss:$8 sps:$4 sm:$0xff]   ;;  %v14596_v3 = vld [vmem:[%s21119_s26 + $0x1d0] ss:$8 sps:$4 sm:$0xff]  }
  0x1e   :  { %202 = vmatpush1.bf16.msra.mxu0 %v14521_v12  ;;  %v14601_v4 = vld [vmem:[%s21119_s26 + $0x1e4] ss:$8 sps:$4 sm:$0xff]   ;;  %v14599_v5 = vld [vmem:[%s21119_s26 + $0x1e0] ss:$8 sps:$4 sm:$0xff]   ;;  %v14605_v6 = vld [vmem:[%s21119_s26 + $0x1f4] ss:$8 sps:$4 sm:$0xff]  }
  0x1f   :  { %203 = vmatprep.subr.bf16.mxu0 %v14522_v13  ;;  %v14603_v7 = vld [vmem:[%s21119_s26 + $0x1f0] ss:$8 sps:$4 sm:$0xff]   ;;  %v14608_v8 = vld [vmem:[%s21119_s26 + $0x204] ss:$8 sps:$4 sm:$0xff]   ;;  %v14606_v10 = vld [vmem:[%s21119_s26 + $0x200] ss:$8 sps:$4 sm:$0xff]  }
  0x20   :  { %v14609_v9 = vld [vmem:[%s21120_s19 + $0x30] sm:$0xff]   ;;  %v14615_v13 = vld [vmem:[%s21119_s26 + $0x224] ss:$8 sps:$4 sm:$0xff]  }
  0x21   :  { %v14612_v11 = vld [vmem:[%s21119_s26 + $0x214] ss:$8 sps:$4 sm:$0xff]   ;;  %v14610_v12 = vld [vmem:[%s21119_s26 + $0x210] ss:$8 sps:$4 sm:$0xff]  }
  0x22   :  { %204 = vmatpush1.bf16.msra.mxu0 %v14524_v14  ;;  %v14628_v14 = vld [vmem:[%s21120_s19 + $0x38] sm:$0xff]  }
  0x23   :  { %205 = vmatprep.subr.bf16.mxu0 %v14525_v15  ;;  %v14613_v15 = vld [vmem:[%s21119_s26 + $0x220] ss:$8 sps:$4 sm:$0xff]  }
  0x26   :  { %206 = vmatpush1.bf16.msra.mxu0 %v14527_v16  ;;  %v14618_v16 = vld [vmem:[%s21119_s26 + $0x234] ss:$8 sps:$4 sm:$0xff]  }
  0x27   :  { %336 = vmatprep.subr.bf16.mxu0 %v14530_v17  ;;  %v14616_v17 = vld [vmem:[%s21119_s26 + $0x230] ss:$8 sps:$4 sm:$0xff]  }
  0x29   :  { %224 = vmatmul.mubr.bf16.vlgmr.msra.gmra.mrb[0].mxu0 %v14531_v18  ;;  %v14621_v18 = vld [vmem:[%s21119_s26 + $0x244] ss:$8 sps:$4 sm:$0xff]  }
  0x2a   :  { %337 = vmatpush1.bf16.msra.mxu0 %v14528_v19  ;;  %233 = vmatprep.mubr.bf16.mxu0 %v16152_v1  ;;  %v14619_v19 = vld [vmem:[%s21119_s26 + $0x240] ss:$8 sps:$4 sm:$0xff]  }
  0x2b   :  { %338 = vmatprep.subr.bf16.mxu0 %v14534_v20  ;;  %v14624_v20 = vld [vmem:[%s21119_s26 + $0x254] ss:$8 sps:$4 sm:$0xff]  }
  0x2e   :  { %339 = vmatpush1.bf16.msra.mxu0 %v14532_v21  ;;  %v14622_v21 = vld [vmem:[%s21119_s26 + $0x250] ss:$8 sps:$4 sm:$0xff]  }
  0x2f   :  { %340 = vmatprep.subr.bf16.mxu0 %v14537_v22  ;;  %v14627_v22 = vld [vmem:[%s21119_s26 + $0x264] ss:$8 sps:$4 sm:$0xff]  }
  0x31   :  { %234 = vmatmul.mubr.bf16.gmra.mrb[4].mxu0 %v14550_v23  ;;  %v14625_v23 = vld [vmem:[%s21119_s26 + $0x260] ss:$8 sps:$4 sm:$0xff]  }
  0x32   :  { %341 = vmatpush1.bf16.msra.mxu0 %v14535_v24  ;;  %368 = vmatprep.mubr.bf16.mxu0 %v16152_v1  ;;  %v14631_v24 = vld [vmem:[%s21119_s26 + $0x274] ss:$8 sps:$4 sm:$0xff]  }
  0x33   :  { %342 = vmatprep.subr.bf16.mxu0 %v14540_v25  ;;  %v14629_v25 = vld [vmem:[%s21119_s26 + $0x270] ss:$8 sps:$4 sm:$0xff]  }
  0x36   :  { %343 = vmatpush1.bf16.msra.mxu0 %v14538_v26  ;;  %v14634_v26 = vld [vmem:[%s21119_s26 + $0x284] ss:$8 sps:$4 sm:$0xff]  }
  0x37   :  { %344 = vmatprep.subr.bf16.mxu0 %v14543_v27  ;;  %v14635_v27 = vld [vmem:[%s21120_s19 + $0x40] sm:$0xff]  }
  0x3a   :  { %345 = vmatpush1.bf16.msra.mxu0 %v14541_v28  ;;  %v14632_v28 = vld [vmem:[%s21119_s26 + $0x280] ss:$8 sps:$4 sm:$0xff]  }
  0x3b   :  { %346 = vmatprep.subr.bf16.mxu0 %v14546_v29  ;;  %v14638_v29 = vld [vmem:[%s21119_s26 + $0x294] ss:$8 sps:$4 sm:$0xff]  }
  0x3e   :  { %347 = vmatpush1.bf16.msra.mxu0 %v14544_v30  ;;  %v14636_v30 = vld [vmem:[%s21119_s26 + $0x290] ss:$8 sps:$4 sm:$0xff]  }
  0x3f   :  { %348 = vmatprep.subr.bf16.mxu0 %v14549_v31  ;;  %v14641_v31 = vld [vmem:[%s21119_s26 + $0x2a4] ss:$8 sps:$4 sm:$0xff]  }
  0x42   :  { %349 = vmatpush1.bf16.msra.mxu0 %v14547_v32  ;;  %v14654_v32 = vld [vmem:[%s21120_s19 + $0x48] sm:$0xff]  }
  0x43   :  { %350 = vmatprep.subr.bf16.mxu0 %v14553_v33  ;;  %v14639_v33 = vld [vmem:[%s21119_s26 + $0x2a0] ss:$8 sps:$4 sm:$0xff]  }
  0x46   :  { %351 = vmatpush1.bf16.msra.mxu0 %v14551_v34  ;;  %v14644_v34 = vld [vmem:[%s21119_s26 + $0x2b4] ss:$8 sps:$4 sm:$0xff]  }
  0x47   :  { %503 = vmatprep.subr.bf16.mxu0 %v14556_v35  ;;  %v14642_v35 = vld [vmem:[%s21119_s26 + $0x2b0] ss:$8 sps:$4 sm:$0xff]  }
  0x49   :  { %369 = vmatmul.mubr.bf16.vlgmr.msra.gmra.mrb[0].mxu0 %v14557_v36  ;;  %v14647_v36 = vld [vmem:[%s21119_s26 + $0x2c4] ss:$8 sps:$4 sm:$0xff]  }
  0x4a   :  { %504 = vmatpush1.bf16.msra.mxu0 %v14554_v37  ;;  %378 = vmatprep.mubr.bf16.mxu0 %v16152_v1  ;;  %v14645_v37 = vld [vmem:[%s21119_s26 + $0x2c0] ss:$8 sps:$4 sm:$0xff]  }
  0x4b   :  { %505 = vmatprep.subr.bf16.mxu0 %v14560_v38  ;;  %v14650_v38 = vld [vmem:[%s21119_s26 + $0x2d4] ss:$8 sps:$4 sm:$0xff]  }
  0x4e   :  { %506 = vmatpush1.bf16.msra.mxu0 %v14558_v39  ;;  %v14648_v39 = vld [vmem:[%s21119_s26 + $0x2d0] ss:$8 sps:$4 sm:$0xff]  }
  0x4f   :  { %507 = vmatprep.subr.bf16.mxu0 %v14563_v40  ;;  %v14653_v40 = vld [vmem:[%s21119_s26 + $0x2e4] ss:$8 sps:$4 sm:$0xff]  }
  0x51   :  { %379 = vmatmul.mubr.bf16.gmra.mrb[4].mxu0 %v14576_v41  ;;  %v14651_v41 = vld [vmem:[%s21119_s26 + $0x2e0] ss:$8 sps:$4 sm:$0xff]  }
  0x52   :  { %508 = vmatpush1.bf16.msra.mxu0 %v14561_v42  ;;  %535 = vmatprep.mubr.bf16.mxu0 %v16152_v1  ;;  %v14657_v42 = vld [vmem:[%s21119_s26 + $0x2f4] ss:$8 sps:$4 sm:$0xff]  }
  0x53   :  { %509 = vmatprep.subr.bf16.mxu0 %v14566_v43  ;;  %v14655_v43 = vld [vmem:[%s21119_s26 + $0x2f0] ss:$8 sps:$4 sm:$0xff]  }
  0x56   :  { %510 = vmatpush1.bf16.msra.mxu0 %v14564_v44  ;;  %v14660_v44 = vld [vmem:[%s21119_s26 + $0x304] ss:$8 sps:$4 sm:$0xff]  }
  0x57   :  { %511 = vmatprep.subr.bf16.mxu0 %v14569_v45  ;;  %v14661_v45 = vld [vmem:[%s21120_s19 + $0x50] sm:$0xff]  }
  0x5a   :  { %512 = vmatpush1.bf16.msra.mxu0 %v14567_v46  ;;  %v14658_v46 = vld [vmem:[%s21119_s26 + $0x300] ss:$8 sps:$4 sm:$0xff]  }
  0x5b   :  { %513 = vmatprep.subr.bf16.mxu0 %v14572_v47  ;;  %v14664_v47 = vld [vmem:[%s21119_s26 + $0x314] ss:$8 sps:$4 sm:$0xff]  }
  0x5e   :  { %514 = vmatpush1.bf16.msra.mxu0 %v14570_v48  ;;  %v14662_v48 = vld [vmem:[%s21119_s26 + $0x310] ss:$8 sps:$4 sm:$0xff]  }
  0x5f   :  { %515 = vmatprep.subr.bf16.mxu0 %v14575_v49  ;;  %v14667_v49 = vld [vmem:[%s21119_s26 + $0x324] ss:$8 sps:$4 sm:$0xff]  }
  0x62   :  { %516 = vmatpush1.bf16.msra.mxu0 %v14573_v50  ;;  %v14680_v50 = vld [vmem:[%s21120_s19 + $0x58] sm:$0xff]  }
  0x63   :  { %517 = vmatprep.subr.bf16.mxu0 %v14579_v51  ;;  %v14665_v51 = vld [vmem:[%s21119_s26 + $0x320] ss:$8 sps:$4 sm:$0xff]  }
  0x66   :  { %518 = vmatpush1.bf16.msra.mxu0 %v14577_v52  ;;  %v14670_v52 = vld [vmem:[%s21119_s26 + $0x334] ss:$8 sps:$4 sm:$0xff]  }
  0x67   :  { %678 = vmatprep.subr.bf16.mxu0 %v14582_v53  ;;  %v14668_v53 = vld [vmem:[%s21119_s26 + $0x330] ss:$8 sps:$4 sm:$0xff]  }
  0x69   :  { %536 = vmatmul.mubr.bf16.vlgmr.msra.gmra.mrb[0].mxu0 %v14583_v54  ;;  %v14673_v54 = vld [vmem:[%s21119_s26 + $0x344] ss:$8 sps:$4 sm:$0xff]  }
  0x6a   :  { %679 = vmatpush1.bf16.msra.mxu0 %v14580_v55  ;;  %545 = vmatprep.mubr.bf16.mxu0 %v16152_v1  ;;  %v14671_v55 = vld [vmem:[%s21119_s26 + $0x340] ss:$8 sps:$4 sm:$0xff]  }
  0x6b   :  { %680 = vmatprep.subr.bf16.mxu0 %v14586_v56  ;;  %v14676_v56 = vld [vmem:[%s21119_s26 + $0x354] ss:$8 sps:$4 sm:$0xff]  }
  0x6e   :  { %681 = vmatpush1.bf16.msra.mxu0 %v14584_v57  ;;  %v14674_v57 = vld [vmem:[%s21119_s26 + $0x350] ss:$8 sps:$4 sm:$0xff]  }
  0x6f   :  { %682 = vmatprep.subr.bf16.mxu0 %v14589_v58  ;;  %v14679_v58 = vld [vmem:[%s21119_s26 + $0x364] ss:$8 sps:$4 sm:$0xff]  }
  0x71   :  { %546 = vmatmul.mubr.bf16.gmra.mrb[4].mxu0 %v14602_v59  ;;  %v14677_v59 = vld [vmem:[%s21119_s26 + $0x360] ss:$8 sps:$4 sm:$0xff]  }
  0x72   :  { %683 = vmatpush1.bf16.msra.mxu0 %v14587_v60  ;;  %710 = vmatprep.mubr.bf16.mxu0 %v16152_v1  ;;  %v14683_v60 = vld [vmem:[%s21119_s26 + $0x374] ss:$8 sps:$4 sm:$0xff]  }
  0x73   :  { %684 = vmatprep.subr.bf16.mxu0 %v14592_v61  ;;  %v14681_v61 = vld [vmem:[%s21119_s26 + $0x370] ss:$8 sps:$4 sm:$0xff]  }
  0x76   :  { %685 = vmatpush1.bf16.msra.mxu0 %v14590_v62  ;;  %v14686_v62 = vld [vmem:[%s21119_s26 + $0x384] ss:$8 sps:$4 sm:$0xff]  }
  0x77   :  { %686 = vmatprep.subr.bf16.mxu0 %v14595_v63  ;;  %v14687_v63 = vld [vmem:[%s21120_s19 + $0x60] sm:$0xff]  }
  0x7a   :  { %687 = vmatpush1.bf16.msra.mxu0 %v14593_v0  ;;  %v14684_v0 = vld [vmem:[%s21119_s26 + $0x380] ss:$8 sps:$4 sm:$0xff]  }
  0x7b   :  { %688 = vmatprep.subr.bf16.mxu0 %v14598_v2  ;;  %v14690_v2 = vld [vmem:[%s21119_s26 + $0x394] ss:$8 sps:$4 sm:$0xff]  }
  0x7e   :  { %689 = vmatpush1.bf16.msra.mxu0 %v14596_v3  ;;  %v14688_v3 = vld [vmem:[%s21119_s26 + $0x390] ss:$8 sps:$4 sm:$0xff]  }
  0x7f   :  { %690 = vmatprep.subr.bf16.mxu0 %v14601_v4  ;;  %v14693_v4 = vld [vmem:[%s21119_s26 + $0x3a4] ss:$8 sps:$4 sm:$0xff]  }
  0x82   :  { %691 = vmatpush1.bf16.msra.mxu0 %v14599_v5  ;;  %v14706_v5 = vld [vmem:[%s21120_s19 + $0x68] sm:$0xff]  }
  0x83   :  { %692 = vmatprep.subr.bf16.mxu0 %v14605_v6  ;;  %v14691_v6 = vld [vmem:[%s21119_s26 + $0x3a0] ss:$8 sps:$4 sm:$0xff]  }
  0x86   :  { %693 = vmatpush1.bf16.msra.mxu0 %v14603_v7  ;;  %v14696_v7 = vld [vmem:[%s21119_s26 + $0x3b4] ss:$8 sps:$4 sm:$0xff]  }
  0x87   :  { %853 = vmatprep.subr.bf16.mxu0 %v14608_v8  ;;  %v14694_v8 = vld [vmem:[%s21119_s26 + $0x3b0] ss:$8 sps:$4 sm:$0xff]  }
  0x89   :  { %711 = vmatmul.mubr.bf16.vlgmr.msra.gmra.mrb[0].mxu0 %v14609_v9  ;;  %v14699_v9 = vld [vmem:[%s21119_s26 + $0x3c4] ss:$8 sps:$4 sm:$0xff]  }
  0x8a   :  { %854 = vmatpush1.bf16.msra.mxu0 %v14606_v10  ;;  %720 = vmatprep.mubr.bf16.mxu0 %v16152_v1  ;;  %v14697_v10 = vld [vmem:[%s21119_s26 + $0x3c0] ss:$8 sps:$4 sm:$0xff]  }
  0x8b   :  { %855 = vmatprep.subr.bf16.mxu0 %v14612_v11  ;;  %v14702_v11 = vld [vmem:[%s21119_s26 + $0x3d4] ss:$8 sps:$4 sm:$0xff]  }
  0x8e   :  { %856 = vmatpush1.bf16.msra.mxu0 %v14610_v12  ;;  %v14700_v12 = vld [vmem:[%s21119_s26 + $0x3d0] ss:$8 sps:$4 sm:$0xff]  }
  0x8f   :  { %857 = vmatprep.subr.bf16.mxu0 %v14615_v13  ;;  %v14705_v13 = vld [vmem:[%s21119_s26 + $0x3e4] ss:$8 sps:$4 sm:$0xff]  }
  0x91   :  { %721 = vmatmul.mubr.bf16.gmra.mrb[4].mxu0 %v14628_v14  ;;  %v14703_v14 = vld [vmem:[%s21119_s26 + $0x3e0] ss:$8 sps:$4 sm:$0xff]  }
  0x92   :  { %858 = vmatpush1.bf16.msra.mxu0 %v14613_v15  ;;  %885 = vmatprep.mubr.bf16.mxu0 %v16152_v1  ;;  %v14709_v15 = vld [vmem:[%s21119_s26 + $0x3f4] ss:$8 sps:$4 sm:$0xff]  }
  0x93   :  { %859 = vmatprep.subr.bf16.mxu0 %v14618_v16  ;;  %v14707_v16 = vld [vmem:[%s21119_s26 + $0x3f0] ss:$8 sps:$4 sm:$0xff]  }
  0x96   :  { %860 = vmatpush1.bf16.msra.mxu0 %v14616_v17  ;;  %v14712_v17 = vld [vmem:[%s21119_s26 + $0x404] ss:$8 sps:$4 sm:$0xff]  }
  0x97   :  { %861 = vmatprep.subr.bf16.mxu0 %v14621_v18  ;;  %v14713_v18 = vld [vmem:[%s21120_s19 + $0x70] sm:$0xff]  }
  0x9a   :  { %862 = vmatpush1.bf16.msra.mxu0 %v14619_v19  ;;  %v14710_v19 = vld [vmem:[%s21119_s26 + $0x400] ss:$8 sps:$4 sm:$0xff]  }
  0x9b   :  { %863 = vmatprep.subr.bf16.mxu0 %v14624_v20  ;;  %v14716_v20 = vld [vmem:[%s21119_s26 + $0x414] ss:$8 sps:$4 sm:$0xff]  }
  0x9e   :  { %864 = vmatpush1.bf16.msra.mxu0 %v14622_v21  ;;  %v14714_v21 = vld [vmem:[%s21119_s26 + $0x410] ss:$8 sps:$4 sm:$0xff]  }
  0x9f   :  { %865 = vmatprep.subr.bf16.mxu0 %v14627_v22  ;;  %v14719_v22 = vld [vmem:[%s21119_s26 + $0x424] ss:$8 sps:$4 sm:$0xff]  }
  0xa2   :  { %866 = vmatpush1.bf16.msra.mxu0 %v14625_v23  ;;  %v14729_v23 = vld [vmem:[%s21120_s19 + $0x78] sm:$0xff]  }
  0xa3   :  { %867 = vmatprep.subr.bf16.mxu0 %v14631_v24  ;;  %v14717_v24 = vld [vmem:[%s21119_s26 + $0x420] ss:$8 sps:$4 sm:$0xff]  }
  0xa6   :  { %868 = vmatpush1.bf16.msra.mxu0 %v14629_v25  ;;  %v14722_v25 = vld [vmem:[%s21119_s26 + $0x434] ss:$8 sps:$4 sm:$0xff]  }
  0xa7   :  { %1028 = vmatprep.subr.bf16.mxu0 %v14634_v26  ;;  %v14720_v26 = vld [vmem:[%s21119_s26 + $0x430] ss:$8 sps:$4 sm:$0xff]  }
  0xa9   :  { %886 = vmatmul.mubr.bf16.vlgmr.msra.gmra.mrb[0].mxu0 %v14635_v27  ;;  %v14725_v27 = vld [vmem:[%s21119_s26 + $0x444] ss:$8 sps:$4 sm:$0xff]  }
  0xaa   :  { %1029 = vmatpush1.bf16.msra.mxu0 %v14632_v28  ;;  %895 = vmatprep.mubr.bf16.mxu0 %v16152_v1  ;;  %v14723_v28 = vld [vmem:[%s21119_s26 + $0x440] ss:$8 sps:$4 sm:$0xff]  }
  0xab   :  { %1030 = vmatprep.subr.bf16.mxu0 %v14638_v29  ;;  %v14728_v29 = vld [vmem:[%s21119_s26 + $0x454] ss:$8 sps:$4 sm:$0xff]  }
  0xae   :  { %1031 = vmatpush1.bf16.msra.mxu0 %v14636_v30  ;;  %v14726_v30 = vld [vmem:[%s21119_s26 + $0x450] ss:$8 sps:$4 sm:$0xff]  }
  0xaf   :  { %1032 = vmatprep.subr.bf16.mxu0 %v14641_v31  ;;  %v14732_v31 = vld [vmem:[%s21119_s26 + $0x464] ss:$8 sps:$4 sm:$0xff]  }
  0xb1   :  { %896 = vmatmul.mubr.bf16.gmra.mrb[4].mxu0 %v14654_v32  ;;  %v14730_v32 = vld [vmem:[%s21119_s26 + $0x460] ss:$8 sps:$4 sm:$0xff]  }
  0xb2   :  { %1033 = vmatpush1.bf16.msra.mxu0 %v14639_v33  ;;  %1060 = vmatprep.mubr.bf16.mxu0 %v16152_v1  ;;  %v14735_v33 = vld [vmem:[%s21119_s26 + $0x474] ss:$8 sps:$4 sm:$0xff]  }
  0xb3   :  { %1034 = vmatprep.subr.bf16.mxu0 %v14644_v34  ;;  %v14733_v34 = vld [vmem:[%s21119_s26 + $0x470] ss:$8 sps:$4 sm:$0xff]  }
  0xb6   :  { %1035 = vmatpush1.bf16.msra.mxu0 %v14642_v35  ;;  %v14736_v35 = vld [vmem:[%s21120_s19 + $0x80] sm:$0xff]  }
  0xb7   :  { %1036 = vmatprep.subr.bf16.mxu0 %v14647_v36  ;;  %v14737_v36 = vld [vmem:[%s21120_s19 + $0x88] sm:$0xff]  }
  0xba   :  { %1037 = vmatpush1.bf16.msra.mxu0 %v14645_v37  ;;  %v16153_v37 = vmov 0.0  }
  0xbb   :  { %1038 = vmatprep.subr.bf16.mxu0 %v14650_v38  ;;  %2102 = vmatprep.mubr.f32.mxu1 %v16153_v37 }
  0xbe   :  { %1039 = vmatpush1.bf16.msra.mxu0 %v14648_v39 }
  0xbf   :  { %1040 = vmatprep.subr.bf16.mxu0 %v14653_v40 }
  0xc2   :  { %1041 = vmatpush1.bf16.msra.mxu0 %v14651_v41 }
  0xc3   :  { %1042 = vmatprep.subr.bf16.mxu0 %v14657_v42 }
  0xc6   :  { %1043 = vmatpush1.bf16.msra.mxu0 %v14655_v43 }
  0xc7   :  { %1203 = vmatprep.subr.bf16.mxu0 %v14660_v44 }
  0xc9   :  { %1061 = vmatmul.mubr.bf16.vlgmr.msra.gmra.mrb[0].mxu0 %v14661_v45 }
  0xca   :  { %1204 = vmatpush1.bf16.msra.mxu0 %v14658_v46  ;;  %1070 = vmatprep.mubr.bf16.mxu0 %v16152_v1 }
  0xcb   :  { %1205 = vmatprep.subr.bf16.mxu0 %v14664_v47 }
  0xce   :  { %1206 = vmatpush1.bf16.msra.mxu0 %v14662_v48 }
  0xcf   :  { %1207 = vmatprep.subr.bf16.mxu0 %v14667_v49 }
  0xd1   :  { %1071 = vmatmul.mubr.bf16.gmra.mrb[4].mxu0 %v14680_v50 }
  0xd2   :  { %1208 = vmatpush1.bf16.msra.mxu0 %v14665_v51  ;;  %1235 = vmatprep.mubr.bf16.mxu0 %v16152_v1 }
  0xd3   :  { %1209 = vmatprep.subr.bf16.mxu0 %v14670_v52 }
  0xd6   :  { %1210 = vmatpush1.bf16.msra.mxu0 %v14668_v53 }
  0xd7   :  { %1211 = vmatprep.subr.bf16.mxu0 %v14673_v54 }
  0xda   :  { %1212 = vmatpush1.bf16.msra.mxu0 %v14671_v55 }
  0xdb   :  { %1213 = vmatprep.subr.bf16.mxu0 %v14676_v56 }
  0xde   :  { %1214 = vmatpush1.bf16.msra.mxu0 %v14674_v57 }
  0xdf   :  { %1215 = vmatprep.subr.bf16.mxu0 %v14679_v58 }
  0xe2   :  { %1216 = vmatpush1.bf16.msra.mxu0 %v14677_v59 }
  0xe3   :  { %1217 = vmatprep.subr.bf16.mxu0 %v14683_v60 }
  0xe6   :  { %1218 = vmatpush1.bf16.msra.mxu0 %v14681_v61 }
  0xe7   :  { %1378 = vmatprep.subr.bf16.mxu0 %v14686_v62 }
  0xe9   :  { %1236 = vmatmul.mubr.bf16.vlgmr.msra.gmra.mrb[0].mxu0 %v14687_v63 }
  0xea   :  { %1379 = vmatpush1.bf16.msra.mxu0 %v14684_v0  ;;  %1245 = vmatprep.mubr.bf16.mxu0 %v16152_v1 }
  0xeb   :  { %1380 = vmatprep.subr.bf16.mxu0 %v14690_v2 }
  0xee   :  { %1381 = vmatpush1.bf16.msra.mxu0 %v14688_v3 }
  0xef   :  { %1382 = vmatprep.subr.bf16.mxu0 %v14693_v4 }
  0xf1   :  { %1246 = vmatmul.mubr.bf16.gmra.mrb[4].mxu0 %v14706_v5 }
  0xf2   :  { %1383 = vmatpush1.bf16.msra.mxu0 %v14691_v6  ;;  %1410 = vmatprep.mubr.bf16.mxu0 %v16152_v1 }
  0xf3   :  { %1384 = vmatprep.subr.bf16.mxu0 %v14696_v7 }
  0xf6   :  { %1385 = vmatpush1.bf16.msra.mxu0 %v14694_v8 }
  0xf7   :  { %1386 = vmatprep.subr.bf16.mxu0 %v14699_v9 }
  0xfa   :  { %1387 = vmatpush1.bf16.msra.mxu0 %v14697_v10 }
  0xfb   :  { %1388 = vmatprep.subr.bf16.mxu0 %v14702_v11 }
  0xfe   :  { %1389 = vmatpush1.bf16.msra.mxu0 %v14700_v12 }
  0xff   :  { %1390 = vmatprep.subr.bf16.mxu0 %v14705_v13 }
 0x102   :  { %1391 = vmatpush1.bf16.msra.mxu0 %v14703_v14 }
 0x103   :  { %1392 = vmatprep.subr.bf16.mxu0 %v14709_v15 }
 0x106   :  { %1393 = vmatpush1.bf16.msra.mxu0 %v14707_v16 }
 0x107   :  { %1553 = vmatprep.subr.bf16.mxu0 %v14712_v17 }
 0x109   :  { %1411 = vmatmul.mubr.bf16.vlgmr.msra.gmra.mrb[0].mxu0 %v14713_v18 }
 0x10a   :  { %1554 = vmatpush1.bf16.msra.mxu0 %v14710_v19  ;;  %1420 = vmatprep.mubr.bf16.mxu0 %v16152_v1 }
 0x10b   :  { %1555 = vmatprep.subr.bf16.mxu0 %v14716_v20 }
 0x10e   :  { %1556 = vmatpush1.bf16.msra.mxu0 %v14714_v21 }
 0x10f   :  { %1557 = vmatprep.subr.bf16.mxu0 %v14719_v22 }
 0x111   :  { %1421 = vmatmul.mubr.bf16.gmra.mrb[4].mxu0 %v14729_v23 }
 0x112   :  { %1558 = vmatpush1.bf16.msra.mxu0 %v14717_v24  ;;  %1585 = vmatprep.mubr.bf16.mxu0 %v16152_v1 }
 0x113   :  { %1559 = vmatprep.subr.bf16.mxu0 %v14722_v25 }
 0x116   :  { %1560 = vmatpush1.bf16.msra.mxu0 %v14720_v26 }
 0x117   :  { %1561 = vmatprep.subr.bf16.mxu0 %v14725_v27 }
 0x11a   :  { %1562 = vmatpush1.bf16.msra.mxu0 %v14723_v28 }
 0x11b   :  { %1563 = vmatprep.subr.bf16.mxu0 %v14728_v29 }
 0x11e   :  { %1564 = vmatpush1.bf16.msra.mxu0 %v14726_v30 }
 0x11f   :  { %1565 = vmatprep.subr.bf16.mxu0 %v14732_v31 }
 0x122   :  { %1566 = vmatpush1.bf16.msra.mxu0 %v14730_v32 }
 0x123   :  { %1567 = vmatprep.subr.bf16.mxu0 %v14735_v33 }
 0x126   :  { %1568 = vmatpush1.bf16.msra.mxu0 %v14733_v34 }
 0x129   :  { %1586 = vmatmul.mubr.bf16.vlgmr.msra.gmra.mrb[0].mxu0 %v14736_v35 }
 0x12a   :  { %1595 = vmatprep.mubr.bf16.mxu0 %v16152_v1 }
 0x131   :  { %1596 = vmatmul.mubr.bf16.gmra.mrb[4].mxu0 %v14737_v36 }
 0x132   :  { %1875 = vmatprep.mubr.bf16.mxu0 %v16152_v1 }
 0x1fc   :  { %v16751_v38 = vpop.f32.mrb[0].mxu0 }
 0x1fd   :  { %v16753_v39 = vpop.f32.mrb[1].mxu0  ;;  %v1632_v41 = vmul.f32 %v16751_v38, %v16751_v38 }
 0x1fe   :  { %v16755_v40 = vpop.f32.mrb[2].mxu0  ;;  %v1633_v45 = vmul.f32 %v16753_v39, %v16753_v39 }
 0x1ff   :  { %v1614_v42 = vadd.f32 %v16755_v40, %v16751_v38  ;;  %v1634_v43 = vmul.f32 %v16755_v40, %v16755_v40  ;;  %v16763_v44 = vpop.f32.mrb[3].mxu0 }
 0x200   :  { %v1623_v46 = vadd.f32 %v16763_v44, %v16753_v39  ;;  %v1635_v47 = vmul.f32 %v16763_v44, %v16763_v44 }
 0x201   :  { %v1640_v48 = vadd.f32 %v1634_v43, %v1632_v41 }
 0x202   :  { %v1649_v49 = vadd.f32 %v1635_v47, %v1633_v45 }
 0x204   :  { %v16771_v50 = vpop.f32.mrb[4].mxu0 }
 0x205   :  { %v1615_v51 = vadd.f32 %v1614_v42, %v16771_v50  ;;  %v1636_v52 = vmul.f32 %v16771_v50, %v16771_v50  ;;  %v16776_v53 = vpop.f32.mrb[5].mxu0 }
 0x206   :  { %v1624_v54 = vadd.f32 %v1623_v46, %v16776_v53  ;;  %v1637_v55 = vmul.f32 %v16776_v53, %v16776_v53  ;;  %v16781_v56 = vpop.f32.mrb[6].mxu0 }
 0x207   :  { %v1641_v57 = vadd.f32 %v1640_v48, %v1636_v52  ;;  %v1616_v58 = vadd.f32 %v1615_v51, %v16781_v56  ;;  %v1638_v59 = vmul.f32 %v16781_v56, %v16781_v56  ;;  %v16786_v60 = vpop.f32.mrb[7].mxu0  ;;  %v16154_v51 = vmov 1966171168  }
 0x208   :  { %v1650_v61 = vadd.f32 %v1649_v49, %v1637_v55  ;;  %v1625_v62 = vadd.f32 %v1624_v54, %v16786_v60  ;;  %v1639_v63 = vmul.f32 %v16786_v60, %v16786_v60  ;;  %v1685_v52 = vunpack.c.l.s4 %v16154_v51 }
 0x209   :  { %v1617_v0 = vrot.slane %v1616_v58, 4  ;;  %v1642_v2 = vadd.f32 %v1641_v57, %v1638_v59  ;;  %v1687_v54 = vlaneseq  ;;  %v14791_v57 = vld [vmem:[%s21100_s3 + $0x14] ss:$8 sps:$4 sm:$0xff]  }
 0x20a   :  { %v1626_v3 = vrot.slane %v1625_v62, 4  ;;  %v1651_v4 = vadd.f32 %v1650_v61, %v1639_v63  ;;  %v14794_v61 = vld [vmem:[%s21100_s3 + $0x24] ss:$8 sps:$4 sm:$0xff]  }
 0x20b   :  { %v1618_v5 = vadd.f32 %v1617_v0, %v1616_v58  ;;  %v1643_v6 = vrot.slane %v1642_v2, 4  ;;  %v1688_v55 = vshrl.u32 %v1687_v54, 7  ;;  %v14789_v58 = vld [vmem:[%s21100_s3 + $0x10] ss:$8 sps:$4 sm:$0xff]   ;;  %v14792_v0 = vld [vmem:[%s21100_s3 + $0x20] ss:$8 sps:$4 sm:$0xff]  }
 0x20c   :  { %v1627_v7 = vadd.f32 %v1626_v3, %v1625_v62  ;;  %v1652_v8 = vrot.slane %v1651_v4, 4  ;;  %v14797_v3 = vld [vmem:[%s21100_s3 + $0x34] ss:$8 sps:$4 sm:$0xff]   ;;  %v14812_v54 = vld [vmem:[%s21099_s4 + $0x104] ss:$8 sps:$4 sm:$0xff]  }
 0x20d   :  { %v1619_v9 = vrot.slane %v1618_v5, 2  ;;  %v1644_v10 = vadd.f32 %v1643_v6, %v1642_v2  ;;  %v16843_v6 = vsub.s32 0, %v1688_v55 }
 0x20e   :  { %v1628_v11 = vrot.slane %v1627_v7, 2  ;;  %v1653_v12 = vadd.f32 %v1652_v8, %v1651_v4  ;;  %v1676_v4 = vld [vmem:[%s21101_s7] sm:$0x3] }
 0x20f   :  { %v1620_v13 = vadd.f32 %v1619_v9, %v1618_v5  ;;  %v1645_v14 = vrot.slane %v1644_v10, 2  ;;  %v1719_v8 = vld [vmem:[%s21102_s8] sm:$0x3]  ;;  %v14795_v9 = vld [vmem:[%s21100_s3 + $0x30] ss:$8 sps:$4 sm:$0xff]  }
 0x210   :  { %v1629_v15 = vadd.f32 %v1628_v11, %v1627_v7  ;;  %v1654_v16 = vrot.slane %v1653_v12, 2  ;;  %v16845_v7 = vsub.s32 1, %v1688_v55  ;;  %v14800_v11 = vld [vmem:[%s21100_s3 + $0x44] ss:$8 sps:$4 sm:$0xff]  }
 0x211   :  { %v1621_v17 = vrot.slane %v1620_v13, 1  ;;  %v1646_v18 = vadd.f32 %v1645_v14, %v1644_v10  ;;  %v1724_v14 = vrot.slane %v1719_v8, %v16843_v6 }
 0x212   :  { %v1630_v19 = vrot.slane %v1629_v15, 1  ;;  %v1655_v20 = vadd.f32 %v1654_v16, %v1653_v12  ;;  %v14798_v16 = vld [vmem:[%s21100_s3 + $0x40] ss:$8 sps:$4 sm:$0xff]  }
 0x213   :  { %v1622_v21 = vadd.f32 %v1621_v17, %v1620_v13  ;;  %v1647_v22 = vrot.slane %v1646_v18, 1  ;;  %v14803_v17 = vld [vmem:[%s21100_s3 + $0x54] ss:$8 sps:$4 sm:$0xff]  }
 0x214   :  { %v1631_v23 = vadd.f32 %v1630_v19, %v1629_v15  ;;  %v1656_v24 = vrot.slane %v1655_v20, 1  ;;  %v1728_v15 = vrot.slane %v1719_v8, %v16845_v7  ;;  %v14827_v8 = vld [vmem:[%s21099_s4 + $0x154] ss:$8 sps:$4 sm:$0xff]  }
 0x215   :  { %v1648_v25 = vadd.f32 %v1647_v22, %v1646_v18  ;;  %v16791_v26 = vmul.f32 0.03125, %v1622_v21 }
 0x216   :  { %v1657_v27 = vadd.f32 %v1656_v24, %v1655_v20  ;;  %v16793_v28 = vmul.f32 0.03125, %v1631_v23 }
 0x217   :  { %v1660_v29 = vmul.f32 0.03125, %v1648_v25  ;;  %v1662_v30 = vmul.f32 %v16791_v26, %v16791_v26  ;;  %v1668_v31 = vsub.f32 %v16751_v38, %v16791_v26  ;;  %v1670_v32 = vsub.f32 %v16755_v40, %v16791_v26 }
 0x218   :  { %v1672_v33 = vsub.f32 %v16771_v50, %v16791_v26  ;;  %v1674_v34 = vsub.f32 %v16781_v56, %v16791_v26  ;;  %v1661_v35 = vmul.f32 0.03125, %v1657_v27  ;;  %v1663_v36 = vmul.f32 %v16793_v28, %v16793_v28  ;;  %v14801_v27 = vld [vmem:[%s21100_s3 + $0x50] ss:$8 sps:$4 sm:$0xff]  }
 0x219   :  { %v1664_v41 = vsub.f32 %v1660_v29, %v1662_v30  ;;  %v1669_v42 = vsub.f32 %v16753_v39, %v16793_v28  ;;  %v1671_v38 = vsub.f32 %v16763_v44, %v16793_v28  ;;  %v1673_v40 = vsub.f32 %v16776_v53, %v16793_v28  ;;  %v14786_v39 = vld [vmem:[%s21100_s3] ss:$8 sps:$4 sm:$0xff]   ;;  %v14788_v53 = vld [vmem:[%s21100_s3 + $0x4] ss:$8 sps:$4 sm:$0xff]  }
 0x21a   :  { %v1665_v43 = vsub.f32 %v1661_v35, %v1663_v36  ;;  %v1675_v45 = vsub.f32 %v16786_v60, %v16793_v28  ;;  %v1686_v44 = vunpack.c.0.s8 %v1685_v52  ;;  %1843 = vmatprep.subr.bf16.mxu0 %v14788_v53  ;;  %v14807_v52 = vld [vmem:[%s21100_s3 + $0x70] ss:$8 sps:$4 sm:$0xff]   ;;  %v2022_v53 = vld [vmem:[%s21103_s1 + $0x8] sm:$0xff] }
 0x21b   :  { %v1666_v46 = vmax.f32 %v1664_v41, 0.0  ;;  %1844 = vmatpush1.bf16.msra.mxu0 %v14786_v39  ;;  %v2021_v39 = vld [vmem:[%s21103_s1] sm:$0xff] }
 0x21c   :  { %v1667_v47 = vmax.f32 %v1665_v43, 0.0  ;;  %v16827_v60 = vsub.s32 %v1686_v44, %v1688_v55  ;;  %1845 = vmatprep.subr.bf16.mxu0 %v14791_v57  ;;  %v14810_v44 = vld [vmem:[%s21099_s4 + $0x100] ss:$8 sps:$4 sm:$0xff]   ;;  %v14815_v55 = vld [vmem:[%s21099_s4 + $0x114] ss:$8 sps:$4 sm:$0xff]  }
 0x21d   :  { %v1677_v48 = vadd.f32 1e-05, %v1666_v46  ;;  %v14813_v57 = vld [vmem:[%s21099_s4 + $0x110] ss:$8 sps:$4 sm:$0xff]  }
 0x21e   :  { %v1678_v49 = vadd.f32 1e-05, %v1667_v47 }
 0x21f   :  { %16058 = vrsqrt.f32 %v1677_v48  ;;  %1846 = vmatpush1.bf16.msra.mxu0 %v14789_v58  ;;  %v14809_v48 = vld [vmem:[%s21100_s3 + $0x74] ss:$8 sps:$4 sm:$0xff]   ;;  %v16078_v58 = vld [vmem:[%s21120_s19 + $0x40] sm:$0xff]  }
 0x220   :  { %16060 = vrsqrt.f32 %v1678_v49  ;;  %1847 = vmatprep.subr.bf16.mxu0 %v14794_v61  ;;  %v2023_v61 = vld [vmem:[%s21103_s1 + $0x10] sm:$0xff] }
 0x223   :  { %1848 = vmatpush1.bf16.msra.mxu0 %v14792_v0  ;;  %v14819_v0 = vld [vmem:[%s21099_s4 + $0x130] ss:$8 sps:$4 sm:$0xff]  }
 0x224   :  { %1849 = vmatprep.subr.bf16.mxu0 %v14797_v3  ;;  %v16079_v3 = vld [vmem:[%s21120_s19 + $0x48] sm:$0xff]  }
 0x227   :  { %1850 = vmatpush1.bf16.msra.mxu0 %v14795_v9  ;;  %v12262_v9 = vld [vmem:[%s21103_s1 + $0x28] sm:$0xff] }
 0x228   :  { %1851 = vmatprep.subr.bf16.mxu0 %v14800_v11  ;;  %v14825_v11 = vld [vmem:[%s21099_s4 + $0x150] ss:$8 sps:$4 sm:$0xff]  }
 0x229   :  { %v16059_v59 = vpop.eup %16058 }
 0x22a   :  { %v16061_v62 = vpop.eup %16060 }
 0x22b   :  { %v1683_v63 = vcombine.low %v16059_v59, %v16061_v62  ;;  %1852 = vmatpush1.bf16.msra.mxu0 %v14798_v16  ;;  %v14818_v59 = vld [vmem:[%s21099_s4 + $0x124] ss:$8 sps:$4 sm:$0xff]   ;;  %v14816_v62 = vld [vmem:[%s21099_s4 + $0x120] ss:$8 sps:$4 sm:$0xff]   ;;  %v12264_v16 = vld [vmem:[%s21103_s1 + $0x38] sm:$0xff] }
 0x22c   :  { %1853 = vmatprep.subr.bf16.mxu0 %v14803_v17  ;;  %v14831_v17 = vld [vmem:[%s21099_s4 + $0x170] ss:$8 sps:$4 sm:$0xff]  }
 0x22d   :  { %v1690_v2 = vrot.slane %v1683_v63, %v16827_v60  ;;  %v14821_v63 = vld [vmem:[%s21099_s4 + $0x134] ss:$8 sps:$4 sm:$0xff]  }
 0x22f   :  { %v1697_v5 = vrot.slane %v1690_v2, %v16827_v60  ;;  %1854 = vmatpush1.bf16.msra.mxu0 %v14801_v27  ;;  %v14824_v2 = vld [vmem:[%s21099_s4 + $0x144] ss:$8 sps:$4 sm:$0xff]  }
 0x230   :  { %v14746_v27 = vld [vmem:[%s21099_s4 + $0x224] ss:$8 sps:$4 sm:$0xff]  }
 0x231   :  { %v1699_v10 = vmul.f32 %v1697_v5, %v1676_v4  ;;  %v12261_v4 = vld [vmem:[%s21103_s1 + $0x20] sm:$0xff] }
 0x232   :  { %v14822_v5 = vld [vmem:[%s21099_s4 + $0x140] ss:$8 sps:$4 sm:$0xff]  }
 0x233   :  { %v1704_v12 = vrot.slane %v1699_v10, %v16843_v6  ;;  %v1708_v13 = vrot.slane %v1699_v10, %v16845_v7  ;;  %v14740_v10 = vld [vmem:[%s21099_s4 + $0x204] ss:$8 sps:$4 sm:$0xff]  }
 0x235   :  { %v1711_v18 = vmul.f32 %v1704_v12, %v1668_v31  ;;  %v1712_v19 = vmul.f32 %v1708_v13, %v1669_v42  ;;  %v1713_v20 = vmul.f32 %v1704_v12, %v1670_v32  ;;  %v1714_v21 = vmul.f32 %v1708_v13, %v1671_v38  ;;  %v14806_v32 = vld [vmem:[%s21100_s3 + $0x64] ss:$8 sps:$4 sm:$0xff]  }
 0x236   :  { %v1715_v22 = vmul.f32 %v1704_v12, %v1672_v33  ;;  %v1716_v23 = vmul.f32 %v1708_v13, %v1673_v40  ;;  %v1717_v24 = vmul.f32 %v1704_v12, %v1674_v34  ;;  %v1718_v25 = vmul.f32 %v1708_v13, %v1675_v45  ;;  %v14804_v45 = vld [vmem:[%s21100_s3 + $0x60] ss:$8 sps:$4 sm:$0xff]   ;;  %1855 = vmatprep.subr.bf16.mxu0 %v14806_v32  ;;  %v14830_v12 = vld [vmem:[%s21099_s4 + $0x164] ss:$8 sps:$4 sm:$0xff]   ;;  %v12263_v13 = vld [vmem:[%s21103_s1 + $0x30] sm:$0xff] }
 0x237   :  { %v1731_v28 = vadd.f32 %v1724_v14, %v1711_v18  ;;  %v1732_v29 = vadd.f32 %v1728_v15, %v1712_v19  ;;  %v1733_v30 = vadd.f32 %v1724_v14, %v1713_v20  ;;  %v1734_v31 = vadd.f32 %v1728_v15, %v1714_v21  ;;  %1856 = vmatpush1.bf16.msra.mxu0 %v14804_v45  ;;  %v14836_v18 = vld [vmem:[%s21099_s4 + $0x184] ss:$8 sps:$4 sm:$0xff]   ;;  %v14738_v19 = vld [vmem:[%s21099_s4 + $0x200] ss:$8 sps:$4 sm:$0xff]   ;;  %v14743_v21 = vld [vmem:[%s21099_s4 + $0x214] ss:$8 sps:$4 sm:$0xff]  }
 0x238   :  { %v1735_v50 = vadd.f32 %v1724_v14, %v1715_v22  ;;  %v1736_v33 = vadd.f32 %v1728_v15, %v1716_v23  ;;  %v1737_v35 = vadd.f32 %v1724_v14, %v1717_v24  ;;  %v1738_v36 = vadd.f32 %v1728_v15, %v1718_v25  ;;  %1857 = vmatprep.subr.bf16.mxu0 %v14809_v48  ;;  %v14828_v14 = vld [vmem:[%s21099_s4 + $0x160] ss:$8 sps:$4 sm:$0xff]   ;;  %v14833_v15 = vld [vmem:[%s21099_s4 + $0x174] ss:$8 sps:$4 sm:$0xff]   ;;  %v14741_v24 = vld [vmem:[%s21099_s4 + $0x210] ss:$8 sps:$4 sm:$0xff]  }
 0x239   :  { %v1739_v56 = vmax.f32 %v1731_v28, 0.0  ;;  %v1740_v26 = vmax.f32 %v1732_v29, 0.0  ;;  %v1741_v34 = vmax.f32 %v1733_v30, 0.0  ;;  %v1742_v41 = vmax.f32 %v1734_v31, 0.0  ;;  %v12365_v20 = vld [vmem:[%s21103_s1 + $0x40] sm:$0xff]  ;;  %v12366_v25 = vld [vmem:[%s21103_s1 + $0x48] sm:$0xff] }
 0x23a   :  { %v1743_v42 = vmax.f32 %v1735_v50, 0.0  ;;  %v1744_v38 = vmax.f32 %v1736_v33, 0.0  ;;  %v1745_v40 = vmax.f32 %v1737_v35, 0.0  ;;  %v1746_v43 = vmax.f32 %v1738_v36, 0.0  ;;  %v14834_v22 = vld [vmem:[%s21099_s4 + $0x180] ss:$8 sps:$4 sm:$0xff]  }
 0x23b   :  { %v16881_v46 = vpack.c.bf16 %v1742_v41, %v1740_v26  ;;  %v16883_v47 = vpack.c.bf16 %v1741_v34, %v1739_v56  ;;  %1858 = vmatpush1.bf16.msra.mxu0 %v14807_v52  ;;  %v14839_v23 = vld [vmem:[%s21099_s4 + $0x194] ss:$8 sps:$4 sm:$0xff]   ;;  %v14837_v28 = vld [vmem:[%s21099_s4 + $0x190] ss:$8 sps:$4 sm:$0xff]   ;;  %v14744_v29 = vld [vmem:[%s21099_s4 + $0x220] ss:$8 sps:$4 sm:$0xff]  }
 0x23c   :  { %v16888_v49 = vpack.c.bf16 %v1746_v43, %v1744_v38  ;;  %v16890_v51 = vpack.c.bf16 %v1745_v40, %v1743_v42  ;;  %2466 = vmatprep.subr.bf16.mxu0 %v14812_v54  ;;  %v12367_v30 = vld [vmem:[%s21103_s1 + $0x50] sm:$0xff]  ;;  %v12368_v50 = vld [vmem:[%s21103_s1 + $0x58] sm:$0xff]  ;;  %v14752_v33 = vld [vmem:[%s21099_s4 + $0x244] ss:$8 sps:$4 sm:$0xff]  }
 0x23d   :  { %14030 = vmatprep.subr.bf16.mxu1 %v16881_v46  ;;  %v14749_v31 = vld [vmem:[%s21099_s4 + $0x234] ss:$8 sps:$4 sm:$0xff]   ;;  %v14747_v32 = vld [vmem:[%s21099_s4 + $0x230] ss:$8 sps:$4 sm:$0xff]   ;;  %v14750_v35 = vld [vmem:[%s21099_s4 + $0x240] ss:$8 sps:$4 sm:$0xff]  }
 0x23e   :  { %14032 = vmatpush1.bf16.msra.mxu1 %v16883_v47  ;;  %1876 = vmatmul.mubr.bf16.vlgmr.msra.gmra.mrb[8].mxu0 %v16078_v58  ;;  %v14755_v36 = vld [vmem:[%s21099_s4 + $0x254] ss:$8 sps:$4 sm:$0xff]   ;;  %v14753_v56 = vld [vmem:[%s21099_s4 + $0x250] ss:$8 sps:$4 sm:$0xff]   ;;  %v14758_v26 = vld [vmem:[%s21099_s4 + $0x264] ss:$8 sps:$4 sm:$0xff]  }
 0x23f   :  { %14034 = vmatprep.subr.bf16.mxu1 %v16888_v49  ;;  %2467 = vmatpush1.bf16.msra.mxu0 %v14810_v44  ;;  %v14756_v34 = vld [vmem:[%s21099_s4 + $0x260] ss:$8 sps:$4 sm:$0xff]   ;;  %v14761_v41 = vld [vmem:[%s21099_s4 + $0x274] ss:$8 sps:$4 sm:$0xff]   ;;  %v14759_v42 = vld [vmem:[%s21099_s4 + $0x270] ss:$8 sps:$4 sm:$0xff]  }
 0x240   :  { %1885 = vmatprep.mubr.bf16.mxu0 %v16152_v1  ;;  %2468 = vmatprep.subr.bf16.mxu0 %v14815_v55  ;;  %v2024_v1 = vld [vmem:[%s21103_s1 + $0x18] sm:$0xff]  ;;  %v14764_v38 = vld [vmem:[%s21099_s4 + $0x284] ss:$8 sps:$4 sm:$0xff]   ;;  %v14762_v40 = vld [vmem:[%s21099_s4 + $0x280] ss:$8 sps:$4 sm:$0xff]  }
 0x241   :  { %v14767_v43 = vld [vmem:[%s21099_s4 + $0x294] ss:$8 sps:$4 sm:$0xff]   ;;  %v14765_v45 = vld [vmem:[%s21099_s4 + $0x290] ss:$8 sps:$4 sm:$0xff]   ;;  %v14770_v48 = vld [vmem:[%s21099_s4 + $0x2a4] ss:$8 sps:$4 sm:$0xff]  }
 0x242   :  { %14036 = vmatpush1.bf16.msra.mxu1 %v16890_v51  ;;  %v14768_v52 = vld [vmem:[%s21099_s4 + $0x2a0] ss:$8 sps:$4 sm:$0xff]   ;;  %v14773_v54 = vld [vmem:[%s21099_s4 + $0x2b4] ss:$8 sps:$4 sm:$0xff]   ;;  %v14776_v44 = vld [vmem:[%s21099_s4 + $0x2c4] ss:$8 sps:$4 sm:$0xff]  }
 0x243   :  { %14038 = vmatprep.subr.bf16.mxu1 %v16881_v46  ;;  %2469 = vmatpush1.bf16.msra.mxu0 %v14813_v57  ;;  %v14774_v55 = vld [vmem:[%s21099_s4 + $0x2c0] ss:$8 sps:$4 sm:$0xff]   ;;  %v14777_v57 = vld [vmem:[%s21099_s4 + $0x2d0] ss:$8 sps:$4 sm:$0xff]   ;;  %v14782_v58 = vld [vmem:[%s21099_s4 + $0x2e4] ss:$8 sps:$4 sm:$0xff]  }
 0x244   :  { %2470 = vmatprep.subr.bf16.mxu0 %v14818_v59  ;;  %v14840_v59 = vld [vmem:[%s21099_s4 + $0x1a0] ss:$8 sps:$4 sm:$0xff]  }
 0x245   :  { %12257 = vmatmul.mubr.msk.f32.vlgmr.msra.gmra.mrb[0].mxu1 %vm2025_vm0, %v2021_v39  ;;  %v14771_v39 = vld [vmem:[%s21099_s4 + $0x2b0] ss:$8 sps:$4 sm:$0xff]  }
 0x246   :  { %14040 = vmatpush1.bf16.msra.mxu1 %v16883_v47  ;;  %2108 = vmatprep.mubr.f32.mxu1 %v16153_v37 }
 0x247   :  { %14042 = vmatprep.subr.bf16.mxu1 %v16888_v49  ;;  %1886 = vmatmul.mubr.bf16.gmra.mrb[12].mxu0 %v16079_v3  ;;  %v14846_v3 = vld [vmem:[%s21099_s4 + $0x1c0] ss:$8 sps:$4 sm:$0xff]  }
 0x248   :  { %2471 = vmatpush1.bf16.msra.mxu0 %v14816_v62  ;;  %v14780_v62 = vld [vmem:[%s21099_s4 + $0x2e0] ss:$8 sps:$4 sm:$0xff]  }
 0x249   :  { %12258 = vmatmul.mubr.msk.f32.gmra.mrb[2].mxu1 %vm2025_vm0, %v2022_v53  ;;  %2472 = vmatprep.subr.bf16.mxu0 %v14821_v63  ;;  %v14779_v53 = vld [vmem:[%s21099_s4 + $0x2d4] ss:$8 sps:$4 sm:$0xff]  }
 0x24a   :  { %14044 = vmatpush1.bf16.msra.mxu1 %v16890_v51  ;;  %2114 = vmatprep.mubr.f32.mxu1 %v16153_v37  ;;  %v14785_v63 = vld [vmem:[%s21099_s4 + $0x2f4] ss:$8 sps:$4 sm:$0xff]  }
 0x24b   :  { %14046 = vmatprep.subr.bf16.mxu1 %v16881_v46 }
 0x24c   :  { %2473 = vmatpush1.bf16.msra.mxu0 %v14819_v0  ;;  %v14843_v0 = vld [vmem:[%s21099_s4 + $0x1b0] ss:$8 sps:$4 sm:$0xff]  }
 0x24d   :  { %12259 = vmatmul.mubr.msk.f32.gmra.mrb[4].mxu1 %vm2025_vm0, %v2023_v61  ;;  %2474 = vmatprep.subr.bf16.mxu0 %v14824_v2  ;;  %v14842_v61 = vld [vmem:[%s21099_s4 + $0x1a4] ss:$8 sps:$4 sm:$0xff]   ;;  %v14783_v2 = vld [vmem:[%s21099_s4 + $0x2f0] ss:$8 sps:$4 sm:$0xff]  }
 0x24e   :  { %2120 = vmatprep.mubr.f32.mxu1 %v16153_v37 }
 0x250   :  { %2475 = vmatpush1.bf16.msra.mxu0 %v14822_v5  ;;  %v14851_v5 = vld [vmem:[%s21099_s4 + $0x1d4] ss:$8 sps:$4 sm:$0xff]  }
 0x251   :  { %12260 = vmatmul.mubr.msk.f32.gmra.mrb[6].mxu1 %vm2025_vm0, %v2024_v1  ;;  %2476 = vmatprep.subr.bf16.mxu0 %v14827_v8  ;;  %v14845_v1 = vld [vmem:[%s21099_s4 + $0x1b4] ss:$8 sps:$4 sm:$0xff]   ;;  %v14849_v8 = vld [vmem:[%s21099_s4 + $0x1d0] ss:$8 sps:$4 sm:$0xff]  }
 0x252   :  { %2244 = vmatprep.mubr.f32.mxu1 %v16153_v37 }
 0x254   :  { %2477 = vmatpush1.bf16.msra.mxu0 %v14825_v11  ;;  %v14857_v11 = vld [vmem:[%s21099_s4 + $0x1f4] ss:$8 sps:$4 sm:$0xff]  }
 0x255   :  { %12265 = vmatmul.mubr.msk.f32.vlgmr.msra.gmra.mrb[8].mxu1 %vm2025_vm0, %v12261_v4  ;;  %2478 = vmatprep.subr.bf16.mxu0 %v14830_v12  ;;  %v14848_v4 = vld [vmem:[%s21099_s4 + $0x1c4] ss:$8 sps:$4 sm:$0xff]   ;;  %v14855_v12 = vld [vmem:[%s21099_s4 + $0x1f0] ss:$8 sps:$4 sm:$0xff]  }
 0x256   :  { %14048 = vmatpush1.bf16.msra.mxu1 %v16883_v47  ;;  %2250 = vmatprep.mubr.f32.mxu1 %v16153_v37 }
 0x257   :  { %14050 = vmatprep.subr.bf16.mxu1 %v16888_v49 }
 0x258   :  { %2479 = vmatpush1.bf16.msra.mxu0 %v14828_v14 }
 0x259   :  { %12266 = vmatmul.mubr.msk.f32.gmra.mrb[10].mxu1 %vm2025_vm0, %v12262_v9  ;;  %2480 = vmatprep.subr.bf16.mxu0 %v14833_v15  ;;  %v14852_v9 = vld [vmem:[%s21099_s4 + $0x1e0] ss:$8 sps:$4 sm:$0xff]  }
 0x25a   :  { %14052 = vmatpush1.bf16.msra.mxu1 %v16890_v51  ;;  %2256 = vmatprep.mubr.f32.mxu1 %v16153_v37 }
 0x25b   :  { %3035 = vmatprep.subr.bf16.mxu1 %v14740_v10  ;;  %v14854_v10 = vld [vmem:[%s21099_s4 + $0x1e4] ss:$8 sps:$4 sm:$0xff]  }
 0x25c   :  { %2481 = vmatpush1.bf16.msra.mxu0 %v14831_v17 }
 0x25d   :  { %12267 = vmatmul.mubr.msk.f32.gmra.mrb[12].mxu1 %vm2025_vm0, %v12263_v13  ;;  %2482 = vmatprep.subr.bf16.mxu0 %v14836_v18  ;;  %v14860_v13 = vld [vmem:[%s21099_s4 + $0x4] ss:$8 sps:$4 sm:$0xff]  }
 0x25e   :  { %2262 = vmatprep.mubr.f32.mxu1 %v16153_v37 }
 0x260   :  { %2483 = vmatpush1.bf16.msra.mxu0 %v14834_v22 }
 0x261   :  { %12268 = vmatmul.mubr.msk.f32.gmra.mrb[14].mxu1 %vm2025_vm0, %v12264_v16  ;;  %2484 = vmatprep.subr.bf16.mxu0 %v14839_v23 }
 0x262   :  { %2813 = vmatprep.mubr.f32.mxu1 %v16153_v37 }
 0x264   :  { %2485 = vmatpush1.bf16.msra.mxu0 %v14837_v28 }
 0x265   :  { %12369 = vmatmul.mubr.msk.f32.vlgmr.msra.gmra.mrb[16].mxu1 %vm2025_vm0, %v12365_v20  ;;  %2486 = vmatprep.subr.bf16.mxu0 %v14842_v61 }
 0x266   :  { %3036 = vmatpush1.bf16.msra.mxu1 %v14738_v19  ;;  %2819 = vmatprep.mubr.f32.mxu1 %v16153_v37 }
 0x267   :  { %3037 = vmatprep.subr.bf16.mxu1 %v14743_v21 }
 0x268   :  { %2487 = vmatpush1.bf16.msra.mxu0 %v14840_v59 }
 0x269   :  { %12370 = vmatmul.mubr.msk.f32.gmra.mrb[18].mxu1 %vm2025_vm0, %v12366_v25  ;;  %2488 = vmatprep.subr.bf16.mxu0 %v14845_v1  ;;  %v14887_v1 = vld [vmem:[%s21099_s4 + $0x304] ss:$8 sps:$4 sm:$0xff]  }
 0x26a   :  { %3038 = vmatpush1.bf16.msra.mxu1 %v14741_v24  ;;  %2825 = vmatprep.mubr.f32.mxu1 %v16153_v37 }
 0x26b   :  { %3039 = vmatprep.subr.bf16.mxu1 %v14746_v27 }
 0x26c   :  { %2489 = vmatpush1.bf16.msra.mxu0 %v14843_v0 }
 0x26d   :  { %12371 = vmatmul.mubr.msk.f32.gmra.mrb[20].mxu1 %vm2025_vm0, %v12367_v30  ;;  %2490 = vmatprep.subr.bf16.mxu0 %v14848_v4 }
 0x26e   :  { %3040 = vmatpush1.bf16.msra.mxu1 %v14744_v29  ;;  %2831 = vmatprep.mubr.f32.mxu1 %v16153_v37 }
 0x26f   :  { %3041 = vmatprep.subr.bf16.mxu1 %v14749_v31 }
 0x270   :  { %2491 = vmatpush1.bf16.msra.mxu0 %v14846_v3 }
 0x271   :  { %12372 = vmatmul.mubr.msk.f32.gmra.mrb[22].mxu1 %vm2025_vm0, %v12368_v50  ;;  %2492 = vmatprep.subr.bf16.mxu0 %v14851_v5  ;;  %v14858_v50 = vld [vmem:[%s21099_s4] ss:$8 sps:$4 sm:$0xff]  }
 0x272   :  { %3042 = vmatpush1.bf16.msra.mxu1 %v14747_v32  ;;  %v14876_v5 = vld [vmem:[%s21099_s4 + $0x60] ss:$8 sps:$4 sm:$0xff]  }
 0x273   :  { %3043 = vmatprep.subr.bf16.mxu1 %v14752_v33  ;;  %v14863_v33 = vld [vmem:[%s21099_s4 + $0x14] ss:$8 sps:$4 sm:$0xff]  }
 0x274   :  { %2493 = vmatpush1.bf16.msra.mxu0 %v14849_v8  ;;  %v14881_v8 = vld [vmem:[%s21099_s4 + $0x74] ss:$8 sps:$4 sm:$0xff]  }
 0x275   :  { %2494 = vmatprep.subr.bf16.mxu0 %v14854_v10  ;;  %v14884_v10 = vld [vmem:[%s21099_s4 + $0x84] ss:$8 sps:$4 sm:$0xff]  }
 0x276   :  { %3044 = vmatpush1.bf16.msra.mxu1 %v14750_v35 }
 0x277   :  { %3045 = vmatprep.subr.bf16.mxu1 %v14755_v36 }
 0x278   :  { %2495 = vmatpush1.bf16.msra.mxu0 %v14852_v9  ;;  %v14879_v9 = vld [vmem:[%s21099_s4 + $0x70] ss:$8 sps:$4 sm:$0xff]  }
 0x279   :  { %2496 = vmatprep.subr.bf16.mxu0 %v14857_v11  ;;  %v14882_v11 = vld [vmem:[%s21099_s4 + $0x80] ss:$8 sps:$4 sm:$0xff]  }
 0x27a   :  { %3046 = vmatpush1.bf16.msra.mxu1 %v14753_v56  ;;  %v14861_v56 = vld [vmem:[%s21099_s4 + $0x10] ss:$8 sps:$4 sm:$0xff]  }
 0x27b   :  { %3047 = vmatprep.subr.bf16.mxu1 %v14758_v26  ;;  %v14866_v26 = vld [vmem:[%s21099_s4 + $0x24] ss:$8 sps:$4 sm:$0xff]  }
 0x27c   :  { %2497 = vmatpush1.bf16.msra.mxu0 %v14855_v12  ;;  %v14885_v12 = vld [vmem:[%s21099_s4 + $0x300] ss:$8 sps:$4 sm:$0xff]  }
 0x27d   :  { %2679 = vmatprep.subr.bf16.mxu0 %v14860_v13  ;;  %v12437_v13 = vld [vmem:[%s21103_s1 + $0x60] sm:$0xff] }
 0x27e   :  { %3048 = vmatpush1.bf16.msra.mxu1 %v14756_v34 }
 0x27f   :  { %3049 = vmatprep.subr.bf16.mxu1 %v14761_v41 }
 0x282   :  { %3050 = vmatpush1.bf16.msra.mxu1 %v14759_v42 }
 0x283   :  { %3051 = vmatprep.subr.bf16.mxu1 %v14764_v38 }
 0x286   :  { %3052 = vmatpush1.bf16.msra.mxu1 %v14762_v40  ;;  %v14864_v40 = vld [vmem:[%s21099_s4 + $0x20] ss:$8 sps:$4 sm:$0xff]  }
 0x287   :  { %3053 = vmatprep.subr.bf16.mxu1 %v14767_v43  ;;  %v14869_v43 = vld [vmem:[%s21099_s4 + $0x34] ss:$8 sps:$4 sm:$0xff]  }
 0x28a   :  { %3054 = vmatpush1.bf16.msra.mxu1 %v14765_v45 }
 0x28b   :  { %3055 = vmatprep.subr.bf16.mxu1 %v14770_v48 }
 0x28e   :  { %3056 = vmatpush1.bf16.msra.mxu1 %v14768_v52  ;;  %v14867_v52 = vld [vmem:[%s21099_s4 + $0x30] ss:$8 sps:$4 sm:$0xff]  }
 0x28f   :  { %3057 = vmatprep.subr.bf16.mxu1 %v14773_v54  ;;  %v14872_v54 = vld [vmem:[%s21099_s4 + $0x44] ss:$8 sps:$4 sm:$0xff]  }
 0x292   :  { %3058 = vmatpush1.bf16.msra.mxu1 %v14771_v39 }
 0x293   :  { %3059 = vmatprep.subr.bf16.mxu1 %v14776_v44 }
 0x296   :  { %3060 = vmatpush1.bf16.msra.mxu1 %v14774_v55 }
 0x297   :  { %3061 = vmatprep.subr.bf16.mxu1 %v14779_v53 }
 0x29a   :  { %3062 = vmatpush1.bf16.msra.mxu1 %v14777_v57  ;;  %v14870_v57 = vld [vmem:[%s21099_s4 + $0x40] ss:$8 sps:$4 sm:$0xff]  }
 0x29b   :  { %3063 = vmatprep.subr.bf16.mxu1 %v14782_v58  ;;  %v14875_v58 = vld [vmem:[%s21099_s4 + $0x54] ss:$8 sps:$4 sm:$0xff]  }
 0x29e   :  { %3064 = vmatpush1.bf16.msra.mxu1 %v14780_v62  ;;  %v14873_v62 = vld [vmem:[%s21099_s4 + $0x50] ss:$8 sps:$4 sm:$0xff]  }
 0x29f   :  { %3065 = vmatprep.subr.bf16.mxu1 %v14785_v63  ;;  %v14878_v63 = vld [vmem:[%s21099_s4 + $0x64] ss:$8 sps:$4 sm:$0xff]  }
 0x2a2   :  { %3066 = vmatpush1.bf16.msra.mxu1 %v14783_v2 }
 0x2a3   :  { %14054 = vmatprep.subr.bf16.mxu1 %v16881_v46 }
 0x318   :  { %v17169_v14 = vpop.f32.mrb[0].mxu1 }
 0x319   :  { %v2106_v15 = vpop.f32.mrb[1].mxu1 }
 0x31c   :  { %v17171_v16 = vpop.f32.mrb[2].mxu1 }
 0x31d   :  { %v2127_v17 = vpack.c.bf16 %v17171_v16, %v17169_v14  ;;  %v2112_v18 = vpop.f32.mrb[3].mxu1  ;;  %v14936_v14 = vld [vmem:[%s21099_s4 + $0x3a0] ss:$8 sps:$4 sm:$0xff]   ;;  %v14941_v16 = vld [vmem:[%s21099_s4 + $0x3b4] ss:$8 sps:$4 sm:$0xff]  }
 0x31e   :  { %v2128_v19 = vpack.c.bf16 %v2112_v18, %v2106_v15  ;;  %v14890_v15 = vld [vmem:[%s21099_s4 + $0x94] ss:$8 sps:$4 sm:$0xff]  }
 0x31f   :  { %v14893_v18 = vld [vmem:[%s21099_s4 + $0x314] ss:$8 sps:$4 sm:$0xff]  }
 0x320   :  { %v17175_v20 = vpop.f32.mrb[4].mxu1 }
 0x321   :  { %v17177_v21 = vpop.f32.mrb[5].mxu1 }
 0x324   :  { %v17179_v22 = vpop.f32.mrb[6].mxu1 }
 0x325   :  { %v2129_v23 = vpack.c.bf16 %v17179_v22, %v17175_v20  ;;  %v17183_v24 = vpop.f32.mrb[7].mxu1  ;;  %v12581_v20 = vld [vmem:[%s21103_s1 + $0xa0] sm:$0xff]  ;;  %v14947_v22 = vld [vmem:[%s21099_s4 + $0x3d4] ss:$8 sps:$4 sm:$0xff]  }
 0x326   :  { %v2130_v25 = vpack.c.bf16 %v17183_v24, %v17177_v21  ;;  %v14944_v21 = vld [vmem:[%s21099_s4 + $0x3c4] ss:$8 sps:$4 sm:$0xff]   ;;  %v14942_v24 = vld [vmem:[%s21099_s4 + $0x3c0] ss:$8 sps:$4 sm:$0xff]  }
 0x328   :  { %v2246_v27 = vpop.f32.mrb[8].mxu1 }
 0x329   :  { %v2248_v28 = vpop.f32.mrb[9].mxu1 }
 0x32c   :  { %v2252_v29 = vpop.f32.mrb[10].mxu1 }
 0x32d   :  { %v2269_v30 = vpack.c.bf16 %v2252_v29, %v2246_v27  ;;  %v2254_v31 = vpop.f32.mrb[11].mxu1  ;;  %v14891_v27 = vld [vmem:[%s21099_s4 + $0x310] ss:$8 sps:$4 sm:$0xff]   ;;  %v14896_v29 = vld [vmem:[%s21099_s4 + $0xa4] ss:$8 sps:$4 sm:$0xff]  }
 0x32e   :  { %v2270_v32 = vpack.c.bf16 %v2254_v31, %v2248_v28  ;;  %v12438_v28 = vld [vmem:[%s21103_s1 + $0x68] sm:$0xff] }
 0x32f   :  { %v14894_v31 = vld [vmem:[%s21099_s4 + $0xa0] ss:$8 sps:$4 sm:$0xff]  }
 0x330   :  { %v2258_v35 = vpop.f32.mrb[12].mxu1  ;;  %2498 = vmatprep.mubr.bf16.mxu0 %v2270_v32  ;;  %v14897_v32 = vld [vmem:[%s21099_s4 + $0x320] ss:$8 sps:$4 sm:$0xff]  }
 0x331   :  { %v2260_v36 = vpop.f32.mrb[13].mxu1  ;;  %2499 = vmatmul.mubr.bf16.vlgmr.msra.gmra.mrb[16].mxu0 %v2269_v30  ;;  %v14899_v30 = vld [vmem:[%s21099_s4 + $0x324] ss:$8 sps:$4 sm:$0xff]  }
 0x332   :  { %2680 = vmatpush1.bf16.msra.mxu0 %v14858_v50  ;;  %v12439_v50 = vld [vmem:[%s21103_s1 + $0x70] sm:$0xff] }
 0x333   :  { %2681 = vmatprep.subr.bf16.mxu0 %v14863_v33  ;;  %v14902_v33 = vld [vmem:[%s21099_s4 + $0xb4] ss:$8 sps:$4 sm:$0xff]  }
 0x334   :  { %v2264_v34 = vpop.f32.mrb[14].mxu1 }
 0x335   :  { %v2271_v41 = vpack.c.bf16 %v2264_v34, %v2258_v35  ;;  %v2266_v42 = vpop.f32.mrb[15].mxu1  ;;  %v14905_v35 = vld [vmem:[%s21099_s4 + $0x334] ss:$8 sps:$4 sm:$0xff]   ;;  %v14908_v34 = vld [vmem:[%s21099_s4 + $0xc4] ss:$8 sps:$4 sm:$0xff]  }
 0x336   :  { %v2272_v38 = vpack.c.bf16 %v2266_v42, %v2260_v36  ;;  %2682 = vmatpush1.bf16.msra.mxu0 %v14861_v56  ;;  %v14900_v36 = vld [vmem:[%s21099_s4 + $0xb0] ss:$8 sps:$4 sm:$0xff]   ;;  %v14906_v42 = vld [vmem:[%s21099_s4 + $0xc0] ss:$8 sps:$4 sm:$0xff]  }
 0x337   :  { %2683 = vmatprep.subr.bf16.mxu0 %v14866_v26  ;;  %v14903_v56 = vld [vmem:[%s21099_s4 + $0x330] ss:$8 sps:$4 sm:$0xff]  }
 0x338   :  { %2508 = vmatprep.mubr.bf16.mxu0 %v2272_v38  ;;  %v2815_v45 = vpop.f32.mrb[16].mxu1  ;;  %v12440_v26 = vld [vmem:[%s21103_s1 + $0x78] sm:$0xff]  ;;  %v14909_v38 = vld [vmem:[%s21099_s4 + $0x340] ss:$8 sps:$4 sm:$0xff]  }
 0x339   :  { %2509 = vmatmul.mubr.bf16.gmra.mrb[20].mxu0 %v2271_v41  ;;  %v2817_v48 = vpop.f32.mrb[17].mxu1  ;;  %v14911_v41 = vld [vmem:[%s21099_s4 + $0x344] ss:$8 sps:$4 sm:$0xff]  }
 0x33a   :  { %2684 = vmatpush1.bf16.msra.mxu0 %v14864_v40  ;;  %2711 = vmatprep.mubr.bf16.mxu0 %v2128_v19  ;;  %v14888_v19 = vld [vmem:[%s21099_s4 + $0x90] ss:$8 sps:$4 sm:$0xff]   ;;  %v14914_v40 = vld [vmem:[%s21099_s4 + $0xd4] ss:$8 sps:$4 sm:$0xff]  }
 0x33b   :  { %2685 = vmatprep.subr.bf16.mxu0 %v14869_v43  ;;  %v14917_v43 = vld [vmem:[%s21099_s4 + $0x354] ss:$8 sps:$4 sm:$0xff]  }
 0x33c   :  { %v2821_v39 = vpop.f32.mrb[18].mxu1 }
 0x33d   :  { %v2838_v44 = vpack.c.bf16 %v2821_v39, %v2815_v45  ;;  %v2823_v55 = vpop.f32.mrb[19].mxu1  ;;  %v14912_v45 = vld [vmem:[%s21099_s4 + $0xd0] ss:$8 sps:$4 sm:$0xff]   ;;  %v14918_v39 = vld [vmem:[%s21099_s4 + $0xe0] ss:$8 sps:$4 sm:$0xff]  }
 0x33e   :  { %2686 = vmatpush1.bf16.msra.mxu0 %v14867_v52  ;;  %v2839_v53 = vpack.c.bf16 %v2823_v55, %v2817_v48  ;;  %v14915_v48 = vld [vmem:[%s21099_s4 + $0x350] ss:$8 sps:$4 sm:$0xff]   ;;  %v14920_v52 = vld [vmem:[%s21099_s4 + $0xe4] ss:$8 sps:$4 sm:$0xff]   ;;  %v14926_v55 = vld [vmem:[%s21099_s4 + $0xf4] ss:$8 sps:$4 sm:$0xff]  }
 0x33f   :  { %2687 = vmatprep.subr.bf16.mxu0 %v14872_v54  ;;  %v14923_v54 = vld [vmem:[%s21099_s4 + $0x364] ss:$8 sps:$4 sm:$0xff]  }
 0x340   :  { %v2827_v59 = vpop.f32.mrb[20].mxu1  ;;  %3067 = vmatprep.mubr.bf16.mxu1 %v2839_v53  ;;  %v14929_v53 = vld [vmem:[%s21099_s4 + $0x374] ss:$8 sps:$4 sm:$0xff]  }
 0x341   :  { %v2829_v61 = vpop.f32.mrb[21].mxu1  ;;  %3068 = vmatmul.mubr.bf16.vlgmr.msra.gmra.mrb[24].mxu1 %v2838_v44  ;;  %v14921_v44 = vld [vmem:[%s21099_s4 + $0x360] ss:$8 sps:$4 sm:$0xff]  }
 0x342   :  { %2688 = vmatpush1.bf16.msra.mxu0 %v14870_v57  ;;  %14056 = vmatpush1.bf16.msra.mxu1 %v16883_v47  ;;  %v14924_v57 = vld [vmem:[%s21099_s4 + $0xf0] ss:$8 sps:$4 sm:$0xff]  }
 0x343   :  { %14058 = vmatprep.subr.bf16.mxu1 %v16888_v49  ;;  %2689 = vmatprep.subr.bf16.mxu0 %v14875_v58  ;;  %v14927_v58 = vld [vmem:[%s21099_s4 + $0x370] ss:$8 sps:$4 sm:$0xff]  }
 0x344   :  { %v2833_v0 = vpop.f32.mrb[22].mxu1 }
 0x345   :  { %v2840_v2 = vpack.c.bf16 %v2833_v0, %v2827_v59  ;;  %v2835_v3 = vpop.f32.mrb[23].mxu1  ;;  %v14932_v59 = vld [vmem:[%s21099_s4 + $0x384] ss:$8 sps:$4 sm:$0xff]  }
 0x346   :  { %2690 = vmatpush1.bf16.msra.mxu0 %v14873_v62  ;;  %v2841_v4 = vpack.c.bf16 %v2835_v3, %v2829_v61  ;;  %14060 = vmatpush1.bf16.msra.mxu1 %v16890_v51  ;;  %v14930_v61 = vld [vmem:[%s21099_s4 + $0x380] ss:$8 sps:$4 sm:$0xff]   ;;  %v14935_v62 = vld [vmem:[%s21099_s4 + $0x394] ss:$8 sps:$4 sm:$0xff]   ;;  %v14950_v0 = vld [vmem:[%s21099_s4 + $0x3e4] ss:$8 sps:$4 sm:$0xff]  }
 0x347   :  { %2691 = vmatprep.subr.bf16.mxu0 %v14878_v63  ;;  %3399 = vmatprep.subr.bf16.mxu1 %v14887_v1  ;;  %v14933_v63 = vld [vmem:[%s21099_s4 + $0x390] ss:$8 sps:$4 sm:$0xff]   ;;  %v14938_v1 = vld [vmem:[%s21099_s4 + $0x3a4] ss:$8 sps:$4 sm:$0xff]  }
 0x348   :  { %3077 = vmatprep.mubr.bf16.mxu1 %v2841_v4  ;;  %v12583_v3 = vld [vmem:[%s21103_s1 + $0xb0] sm:$0xff] }
 0x349   :  { %3078 = vmatmul.mubr.bf16.gmra.mrb[28].mxu1 %v2840_v2  ;;  %v14948_v2 = vld [vmem:[%s21099_s4 + $0x3e0] ss:$8 sps:$4 sm:$0xff]   ;;  %v14953_v4 = vld [vmem:[%s21099_s4 + $0x3f4] ss:$8 sps:$4 sm:$0xff]  }
 0x34a   :  { %2692 = vmatpush1.bf16.msra.mxu0 %v14876_v5  ;;  %3177 = vmatprep.mubr.f32.mxu1 %v16153_v37  ;;  %v14951_v5 = vld [vmem:[%s21099_s4 + $0x3f0] ss:$8 sps:$4 sm:$0xff]  }
 0x34b   :  { %2693 = vmatprep.subr.bf16.mxu0 %v14881_v8  ;;  %v12584_v8 = vld [vmem:[%s21103_s1 + $0xb8] sm:$0xff] }
 0x34e   :  { %2694 = vmatpush1.bf16.msra.mxu0 %v14879_v9  ;;  %v12653_v9 = vld [vmem:[%s21103_s1 + $0xc0] sm:$0xff] }
 0x34f   :  { %2695 = vmatprep.subr.bf16.mxu0 %v14884_v10  ;;  %v12654_v10 = vld [vmem:[%s21103_s1 + $0xc8] sm:$0xff] }
 0x351   :  { %12441 = vmatmul.mubr.msk.f32.vlgmr.msra.gmra.mrb[32].mxu1 %vm2025_vm0, %v12437_v13  ;;  %v12725_v13 = vld [vmem:[%s21103_s1 + $0xe0] sm:$0xff] }
 0x352   :  { %2696 = vmatpush1.bf16.msra.mxu0 %v14882_v11  ;;  %3400 = vmatpush1.bf16.msra.mxu1 %v14885_v12  ;;  %v12655_v11 = vld [vmem:[%s21103_s1 + $0xd0] sm:$0xff]  ;;  %v12656_v12 = vld [vmem:[%s21103_s1 + $0xd8] sm:$0xff] }
 0x353   :  { %2697 = vmatprep.subr.bf16.mxu0 %v14890_v15  ;;  %3183 = vmatprep.mubr.f32.mxu1 %v16153_v37 }
 0x354   :  { %3401 = vmatprep.subr.bf16.mxu1 %v14893_v18 }
 0x355   :  { %12442 = vmatmul.mubr.msk.f32.gmra.mrb[34].mxu1 %vm2025_vm0, %v12438_v28 }
 0x356   :  { %2698 = vmatpush1.bf16.msra.mxu0 %v14888_v19  ;;  %3402 = vmatpush1.bf16.msra.mxu1 %v14891_v27 }
 0x357   :  { %2699 = vmatprep.subr.bf16.mxu0 %v14896_v29  ;;  %3189 = vmatprep.mubr.f32.mxu1 %v16153_v37 }
 0x358   :  { %3403 = vmatprep.subr.bf16.mxu1 %v14899_v30 }
 0x359   :  { %12443 = vmatmul.mubr.msk.f32.gmra.mrb[36].mxu1 %vm2025_vm0, %v12439_v50 }
 0x35a   :  { %2700 = vmatpush1.bf16.msra.mxu0 %v14894_v31  ;;  %3404 = vmatpush1.bf16.msra.mxu1 %v14897_v32 }
 0x35b   :  { %2701 = vmatprep.subr.bf16.mxu0 %v14902_v33  ;;  %3195 = vmatprep.mubr.f32.mxu1 %v16153_v37 }
 0x35c   :  { %3405 = vmatprep.subr.bf16.mxu1 %v14905_v35 }
 0x35d   :  { %12444 = vmatmul.mubr.msk.f32.gmra.mrb[38].mxu1 %vm2025_vm0, %v12440_v26 }
 0x35e   :  { %2702 = vmatpush1.bf16.msra.mxu0 %v14900_v36  ;;  %3406 = vmatpush1.bf16.msra.mxu1 %v14903_v56 }
 0x35f   :  { %2703 = vmatprep.subr.bf16.mxu0 %v14908_v34  ;;  %3407 = vmatprep.subr.bf16.mxu1 %v14911_v41 }
 0x362   :  { %2704 = vmatpush1.bf16.msra.mxu0 %v14906_v42  ;;  %3408 = vmatpush1.bf16.msra.mxu1 %v14909_v38 }
 0x363   :  { %2705 = vmatprep.subr.bf16.mxu0 %v14914_v40  ;;  %3409 = vmatprep.subr.bf16.mxu1 %v14917_v43 }
 0x366   :  { %2706 = vmatpush1.bf16.msra.mxu0 %v14912_v45  ;;  %3410 = vmatpush1.bf16.msra.mxu1 %v14915_v48 }
 0x367   :  { %2707 = vmatprep.subr.bf16.mxu0 %v14920_v52  ;;  %3411 = vmatprep.subr.bf16.mxu1 %v14923_v54 }
 0x36a   :  { %2708 = vmatpush1.bf16.msra.mxu0 %v14918_v39  ;;  %3412 = vmatpush1.bf16.msra.mxu1 %v14921_v44 }
 0x36b   :  { %2709 = vmatprep.subr.bf16.mxu0 %v14926_v55  ;;  %3413 = vmatprep.subr.bf16.mxu1 %v14929_v53 }
 0x36e   :  { %2710 = vmatpush1.bf16.msra.mxu0 %v14924_v57  ;;  %3414 = vmatpush1.bf16.msra.mxu1 %v14927_v58 }
 0x36f   :  { %14070 = vmatprep.subr.bf16.mxu0 %v16881_v46  ;;  %3415 = vmatprep.subr.bf16.mxu1 %v14932_v59 }
 0x371   :  { %2712 = vmatmul.mubr.bf16.vlgmr.msra.gmra.mrb[16].mxu0 %v2127_v17  ;;  %v14939_v17 = vld [vmem:[%s21099_s4 + $0x3b0] ss:$8 sps:$4 sm:$0xff]  }
 0x372   :  { %2721 = vmatprep.mubr.bf16.mxu0 %v2130_v25  ;;  %3416 = vmatpush1.bf16.msra.mxu1 %v14930_v61  ;;  %v12582_v25 = vld [vmem:[%s21103_s1 + $0xa8] sm:$0xff] }
 0x373   :  { %14072 = vmatpush1.bf16.msra.mxu0 %v16883_v47  ;;  %3417 = vmatprep.subr.bf16.mxu1 %v14935_v62 }
 0x374   :  { %14074 = vmatprep.subr.bf16.mxu0 %v16888_v49 }
 0x376   :  { %3418 = vmatpush1.bf16.msra.mxu1 %v14933_v63 }
 0x377   :  { %14076 = vmatpush1.bf16.msra.mxu0 %v16890_v51  ;;  %3419 = vmatprep.subr.bf16.mxu1 %v14938_v1 }
 0x378   :  { %14078 = vmatprep.subr.bf16.mxu0 %v16881_v46 }
 0x379   :  { %2722 = vmatmul.mubr.bf16.gmra.mrb[20].mxu0 %v2129_v23  ;;  %v14945_v23 = vld [vmem:[%s21099_s4 + $0x3d0] ss:$8 sps:$4 sm:$0xff]  }
 0x37a   :  { %3420 = vmatpush1.bf16.msra.mxu1 %v14936_v14  ;;  %3905 = vmatprep.mubr.f32.mxu0 %v16153_v37 }
 0x37b   :  { %3421 = vmatprep.subr.bf16.mxu1 %v14941_v16 }
 0x37e   :  { %3422 = vmatpush1.bf16.msra.mxu1 %v14939_v17 }
 0x37f   :  { %3423 = vmatprep.subr.bf16.mxu1 %v14944_v21 }
 0x381   :  { %12585 = vmatmul.mubr.msk.f32.vlgmr.msra.gmra.mrb[24].mxu0 %vm2025_vm0, %v12581_v20 }
 0x382   :  { %14080 = vmatpush1.bf16.msra.mxu0 %v16883_v47  ;;  %3424 = vmatpush1.bf16.msra.mxu1 %v14942_v24 }
 0x383   :  { %14082 = vmatprep.subr.bf16.mxu0 %v16888_v49  ;;  %3911 = vmatprep.mubr.f32.mxu0 %v16153_v37 }
 0x384   :  { %3425 = vmatprep.subr.bf16.mxu1 %v14947_v22 }
 0x385   :  { %12586 = vmatmul.mubr.msk.f32.gmra.mrb[26].mxu0 %vm2025_vm0, %v12582_v25 }
 0x386   :  { %14084 = vmatpush1.bf16.msra.mxu0 %v16890_v51  ;;  %3426 = vmatpush1.bf16.msra.mxu1 %v14945_v23 }
 0x387   :  { %14086 = vmatprep.subr.bf16.mxu0 %v16881_v46  ;;  %3917 = vmatprep.mubr.f32.mxu0 %v16153_v37 }
 0x388   :  { %3427 = vmatprep.subr.bf16.mxu1 %v14950_v0 }
 0x389   :  { %12587 = vmatmul.mubr.msk.f32.gmra.mrb[28].mxu0 %vm2025_vm0, %v12583_v3 }
 0x38a   :  { %3428 = vmatpush1.bf16.msra.mxu1 %v14948_v2  ;;  %3923 = vmatprep.mubr.f32.mxu0 %v16153_v37 }
 0x38b   :  { %3429 = vmatprep.subr.bf16.mxu1 %v14953_v4 }
 0x38d   :  { %12588 = vmatmul.mubr.msk.f32.gmra.mrb[30].mxu0 %vm2025_vm0, %v12584_v8 }
 0x38e   :  { %3430 = vmatpush1.bf16.msra.mxu1 %v14951_v5  ;;  %4269 = vmatprep.mubr.f32.mxu0 %v16153_v37 }
 0x38f   :  { %14062 = vmatprep.subr.bf16.mxu1 %v16881_v46 }
 0x391   :  { %12657 = vmatmul.mubr.msk.f32.vlgmr.msra.gmra.mrb[32].mxu0 %vm2025_vm0, %v12653_v9 }
 0x392   :  { %14088 = vmatpush1.bf16.msra.mxu0 %v16883_v47  ;;  %4275 = vmatprep.mubr.f32.mxu0 %v16153_v37 }
 0x393   :  { %14090 = vmatprep.subr.bf16.mxu0 %v16888_v49 }
 0x395   :  { %12658 = vmatmul.mubr.msk.f32.gmra.mrb[34].mxu0 %vm2025_vm0, %v12654_v10 }
 0x396   :  { %14092 = vmatpush1.bf16.msra.mxu0 %v16890_v51  ;;  %4281 = vmatprep.mubr.f32.mxu0 %v16153_v37 }
 0x397   :  { %14094 = vmatprep.subr.bf16.mxu0 %v16881_v46  ;;  %v17471_v46 = vpop.f32.mrb[8].mxu0 }
 0x398   :  { %v1914_v15 = vmul.f32 %v17471_v46, %v17471_v46  ;;  %v17475_v18 = vpop.f32.mrb[9].mxu0 }
 0x399   :  { %12659 = vmatmul.mubr.msk.f32.gmra.mrb[36].mxu0 %vm2025_vm0, %v12655_v11  ;;  %v17477_v19 = vpop.f32.mrb[10].mxu0  ;;  %v1915_v30 = vmul.f32 %v17475_v18, %v17475_v18 }
 0x39a   :  { %4287 = vmatprep.mubr.f32.mxu0 %v16153_v37  ;;  %v1896_v27 = vadd.f32 %v17477_v19, %v17471_v46  ;;  %v1916_v28 = vmul.f32 %v17477_v19, %v17477_v19  ;;  %v17485_v31 = vpop.f32.mrb[11].mxu0 }
 0x39b   :  { %v1905_v32 = vadd.f32 %v17485_v31, %v17475_v18  ;;  %v1917_v50 = vmul.f32 %v17485_v31, %v17485_v31  ;;  %v17491_v33 = vpop.f32.mrb[12].mxu0 }
 0x39c   :  { %v1922_v29 = vadd.f32 %v1916_v28, %v1914_v15  ;;  %v1897_v35 = vadd.f32 %v1896_v27, %v17491_v33  ;;  %v1918_v36 = vmul.f32 %v17491_v33, %v17491_v33  ;;  %v17496_v56 = vpop.f32.mrb[13].mxu0 }
 0x39d   :  { %12660 = vmatmul.mubr.msk.f32.gmra.mrb[38].mxu0 %vm2025_vm0, %v12656_v12  ;;  %v1931_v26 = vadd.f32 %v1917_v50, %v1915_v30  ;;  %v1906_v34 = vadd.f32 %v1905_v32, %v17496_v56  ;;  %v1919_v41 = vmul.f32 %v17496_v56, %v17496_v56  ;;  %v17501_v42 = vpop.f32.mrb[14].mxu0 }
 0x39e   :  { %4633 = vmatprep.mubr.f32.mxu0 %v16153_v37  ;;  %v1923_v38 = vadd.f32 %v1922_v29, %v1918_v36  ;;  %v1898_v40 = vadd.f32 %v1897_v35, %v17501_v42  ;;  %v1920_v43 = vmul.f32 %v17501_v42, %v17501_v42  ;;  %v17506_v45 = vpop.f32.mrb[15].mxu0 }
 0x39f   :  { %v1932_v48 = vadd.f32 %v1931_v26, %v1919_v41  ;;  %v1907_v52 = vadd.f32 %v1906_v34, %v17506_v45  ;;  %v1921_v54 = vmul.f32 %v17506_v45, %v17506_v45  ;;  %v12726_v41 = vld [vmem:[%s21103_s1 + $0xe8] sm:$0xff] }
 0x3a0   :  { %v1899_v39 = vrot.slane %v1898_v40, 4  ;;  %v1924_v44 = vadd.f32 %v1923_v38, %v1920_v43 }
 0x3a1   :  { %12729 = vmatmul.mubr.msk.f32.vlgmr.msra.gmra.mrb[40].mxu0 %vm2025_vm0, %v12725_v13  ;;  %v1908_v55 = vrot.slane %v1907_v52, 4  ;;  %v1933_v53 = vadd.f32 %v1932_v48, %v1921_v54 }
 0x3a2   :  { %14096 = vmatpush1.bf16.msra.mxu0 %v16883_v47  ;;  %4639 = vmatprep.mubr.f32.mxu0 %v16153_v37  ;;  %v1900_v57 = vadd.f32 %v1899_v39, %v1898_v40  ;;  %v1925_v58 = vrot.slane %v1924_v44, 4  ;;  %v1958_v40 = vld [vmem:[%s21104_s9] sm:$0x3] }
 0x3a3   :  { %14098 = vmatprep.subr.bf16.mxu0 %v16888_v49  ;;  %v1909_v59 = vadd.f32 %v1908_v55, %v1907_v52  ;;  %v1934_v61 = vrot.slane %v1933_v53, 4 }
 0x3a4   :  { %v1901_v62 = vrot.slane %v1900_v57, 2  ;;  %v1926_v63 = vadd.f32 %v1925_v58, %v1924_v44 }
 0x3a5   :  { %v1910_v1 = vrot.slane %v1909_v59, 2  ;;  %v1935_v14 = vadd.f32 %v1934_v61, %v1933_v53  ;;  %12730 = vmatmul.mubr.msk.f32.gmra.mrb[42].mxu0 %vm2025_vm0, %v12726_v41  ;;  %v14975_v41 = vld [vmem:[%s21099_s4 + $0x470] ss:$8 sps:$4 sm:$0xff]  }
 0x3a6   :  { %14100 = vmatpush1.bf16.msra.mxu0 %v16890_v51  ;;  %v1902_v16 = vadd.f32 %v1901_v62, %v1900_v57  ;;  %v1927_v17 = vrot.slane %v1926_v63, 2  ;;  %4645 = vmatprep.mubr.f32.mxu0 %v16153_v37 }
 0x3a7   :  { %v1911_v21 = vadd.f32 %v1910_v1, %v1909_v59  ;;  %v1936_v24 = vrot.slane %v1935_v14, 2 }
 0x3a8   :  { %v1903_v20 = vrot.slane %v1902_v16, 1  ;;  %v1928_v22 = vadd.f32 %v1927_v17, %v1926_v63 }
 0x3a9   :  { %v1912_v23 = vrot.slane %v1911_v21, 1  ;;  %v1937_v25 = vadd.f32 %v1936_v24, %v1935_v14 }
 0x3aa   :  { %v1904_v0 = vadd.f32 %v1903_v20, %v1902_v16  ;;  %v1929_v2 = vrot.slane %v1928_v22, 1 }
 0x3ab   :  { %v1913_v3 = vadd.f32 %v1912_v23, %v1911_v21  ;;  %v1938_v4 = vrot.slane %v1937_v25, 1  ;;  %v14956_v21 = vld [vmem:[%s21099_s4 + $0x404] ss:$8 sps:$4 sm:$0xff]  }
 0x3ac   :  { %v1930_v5 = vadd.f32 %v1929_v2, %v1928_v22  ;;  %v1940_v8 = vmul.f32 0.03125, %v1904_v0  ;;  %v14957_v0 = vld [vmem:[%s21099_s4 + $0x410] ss:$8 sps:$4 sm:$0xff]   ;;  %v14962_v2 = vld [vmem:[%s21099_s4 + $0x424] ss:$8 sps:$4 sm:$0xff]  }
 0x3ad   :  { %v1939_v9 = vadd.f32 %v1938_v4, %v1937_v25  ;;  %v17511_v10 = vmul.f32 0.03125, %v1913_v3  ;;  %v14959_v25 = vld [vmem:[%s21099_s4 + $0x414] ss:$8 sps:$4 sm:$0xff]   ;;  %v14960_v4 = vld [vmem:[%s21099_s4 + $0x420] ss:$8 sps:$4 sm:$0xff]  }
 0x3ae   :  { %v1942_v11 = vmul.f32 0.03125, %v1930_v5  ;;  %v1944_v12 = vmul.f32 %v1940_v8, %v1940_v8  ;;  %v1950_v13 = vsub.f32 %v17471_v46, %v1940_v8  ;;  %v1952_v15 = vsub.f32 %v17477_v19, %v1940_v8  ;;  %v12511_v3 = vld [vmem:[%s21103_s1 + $0x90] sm:$0xff] }
 0x3af   :  { %v1954_v27 = vsub.f32 %v17491_v33, %v1940_v8  ;;  %v1956_v28 = vsub.f32 %v17501_v42, %v1940_v8  ;;  %v1943_v29 = vmul.f32 0.03125, %v1939_v9  ;;  %v1945_v30 = vmul.f32 %v17511_v10, %v17511_v10  ;;  %v14965_v5 = vld [vmem:[%s21099_s4 + $0x434] ss:$8 sps:$4 sm:$0xff]  }
 0x3b0   :  { %v1946_v32 = vsub.f32 %v1942_v11, %v1944_v12  ;;  %v1951_v50 = vsub.f32 %v17475_v18, %v17511_v10  ;;  %v1953_v35 = vsub.f32 %v17485_v31, %v17511_v10  ;;  %v1957_v46 = vsub.f32 %v17506_v45, %v17511_v10  ;;  %v12512_v12 = vld [vmem:[%s21103_s1 + $0x98] sm:$0xff] }
 0x3b1   :  { %v1947_v36 = vsub.f32 %v1943_v29, %v1945_v30  ;;  %v14971_v29 = vld [vmem:[%s21099_s4 + $0x454] ss:$8 sps:$4 sm:$0xff]  }
 0x3b2   :  { %v1948_v19 = vmax.f32 %v1946_v32, 0.0 }
 0x3b3   :  { %v1949_v26 = vmax.f32 %v1947_v36, 0.0  ;;  %v14974_v36 = vld [vmem:[%s21099_s4 + $0x464] ss:$8 sps:$4 sm:$0xff]  }
 0x3b4   :  { %v1959_v33 = vadd.f32 1e-05, %v1948_v19  ;;  %v14972_v19 = vld [vmem:[%s21099_s4 + $0x460] ss:$8 sps:$4 sm:$0xff]  }
 0x3b5   :  { %v1960_v34 = vadd.f32 1e-05, %v1949_v26  ;;  %v1955_v26 = vsub.f32 %v17496_v56, %v17511_v10  ;;  %v14978_v56 = vld [vmem:[%s21099_s4 + $0x480] ss:$8 sps:$4 sm:$0xff]   ;;  %v14983_v10 = vld [vmem:[%s21099_s4 + $0x494] ss:$8 sps:$4 sm:$0xff]  }
 0x3b6   :  { %16062 = vrsqrt.f32 %v1959_v33  ;;  %v14977_v33 = vld [vmem:[%s21099_s4 + $0x474] ss:$8 sps:$4 sm:$0xff]  }
 0x3b7   :  { %16064 = vrsqrt.f32 %v1960_v34 }
 0x3c0   :  { %v16063_v18 = vpop.eup %16062 }
 0x3c1   :  { %v16065_v31 = vpop.eup %16064 }
 0x3c2   :  { %v1965_v42 = vcombine.low %v16063_v18, %v16065_v31  ;;  %v14980_v18 = vld [vmem:[%s21099_s4 + $0x484] ss:$8 sps:$4 sm:$0xff]   ;;  %v14981_v31 = vld [vmem:[%s21099_s4 + $0x490] ss:$8 sps:$4 sm:$0xff]  }
 0x3c4   :  { %v1972_v38 = vrot.slane %v1965_v42, %v16827_v60  ;;  %v14986_v42 = vld [vmem:[%s21099_s4 + $0x4a4] ss:$8 sps:$4 sm:$0xff]  }
 0x3c6   :  { %v1979_v43 = vrot.slane %v1972_v38, %v16827_v60  ;;  %v14984_v38 = vld [vmem:[%s21099_s4 + $0x4a0] ss:$8 sps:$4 sm:$0xff]  }
 0x3c8   :  { %v1981_v45 = vmul.f32 %v1979_v43, %v1958_v40  ;;  %v14989_v40 = vld [vmem:[%s21099_s4 + $0x4b4] ss:$8 sps:$4 sm:$0xff]   ;;  %v14987_v43 = vld [vmem:[%s21099_s4 + $0x4b0] ss:$8 sps:$4 sm:$0xff]  }
 0x3ca   :  { %v1986_v48 = vrot.slane %v1981_v45, %v16843_v6  ;;  %v17537_v52 = vrot.slane %v1981_v45, %v16845_v7  ;;  %v14992_v45 = vld [vmem:[%s21099_s4 + $0x4c4] ss:$8 sps:$4 sm:$0xff]  }
 0x3cc   :  { %v17539_v54 = vmul.f32 %v1986_v48, %v1950_v13  ;;  %v17542_v39 = vmul.f32 %v17537_v52, %v1951_v50  ;;  %v17544_v44 = vmul.f32 %v1986_v48, %v1952_v15  ;;  %v17547_v55 = vmul.f32 %v17537_v52, %v1953_v35  ;;  %v14963_v13 = vld [vmem:[%s21099_s4 + $0x430] ss:$8 sps:$4 sm:$0xff]  }
 0x3cd   :  { %v17549_v53 = vmul.f32 %v1986_v48, %v1954_v27  ;;  %v17551_v57 = vmul.f32 %v1986_v48, %v1956_v28  ;;  %v17554_v58 = vmul.f32 %v17537_v52, %v1957_v46  ;;  %v14968_v27 = vld [vmem:[%s21099_s4 + $0x444] ss:$8 sps:$4 sm:$0xff]   ;;  %v14966_v28 = vld [vmem:[%s21099_s4 + $0x440] ss:$8 sps:$4 sm:$0xff]   ;;  %v14969_v35 = vld [vmem:[%s21099_s4 + $0x450] ss:$8 sps:$4 sm:$0xff]   ;;  %v17643_v34 = vmul.f32 %v17537_v52, %v1955_v26 }
 0x3ce   :  { %v14990_v48 = vld [vmem:[%s21099_s4 + $0x4c0] ss:$8 sps:$4 sm:$0xff]   ;;  %v14995_v52 = vld [vmem:[%s21099_s4 + $0x4d4] ss:$8 sps:$4 sm:$0xff]  }
 0x424   :  { %v3179_v59 = vpop.f32.mrb[32].mxu1 }
 0x425   :  { %v3181_v61 = vpop.f32.mrb[33].mxu1 }
 0x428   :  { %v3185_v62 = vpop.f32.mrb[34].mxu1 }
 0x429   :  { %v3202_v63 = vpack.c.bf16 %v3185_v62, %v3179_v59  ;;  %v3187_v1 = vpop.f32.mrb[35].mxu1  ;;  %v14993_v59 = vld [vmem:[%s21099_s4 + $0x4d0] ss:$8 sps:$4 sm:$0xff]   ;;  %v14998_v62 = vld [vmem:[%s21099_s4 + $0x4e4] ss:$8 sps:$4 sm:$0xff]  }
 0x42a   :  { %v3203_v14 = vpack.c.bf16 %v3187_v1, %v3181_v61  ;;  %v14996_v61 = vld [vmem:[%s21099_s4 + $0x4e0] ss:$8 sps:$4 sm:$0xff]   ;;  %v14999_v1 = vld [vmem:[%s21099_s4 + $0x4f0] ss:$8 sps:$4 sm:$0xff]  }
 0x42c   :  { %v3191_v16 = vpop.f32.mrb[36].mxu1  ;;  %3431 = vmatprep.mubr.bf16.mxu1 %v3203_v14  ;;  %v15004_v14 = vld [vmem:[%s21099_s4 + $0x504] ss:$8 sps:$4 sm:$0xff]  }
 0x42d   :  { %v3193_v17 = vpop.f32.mrb[37].mxu1  ;;  %3432 = vmatmul.mubr.bf16.vlgmr.msra.gmra.mrb[24].mxu1 %v3202_v63  ;;  %v15001_v63 = vld [vmem:[%s21099_s4 + $0x4f4] ss:$8 sps:$4 sm:$0xff]  }
 0x42e   :  { %14064 = vmatpush1.bf16.msra.mxu1 %v16883_v47  ;;  %v12509_v47 = vld [vmem:[%s21103_s1 + $0x80] sm:$0xff] }
 0x42f   :  { %14066 = vmatprep.subr.bf16.mxu1 %v16888_v49  ;;  %v14954_v49 = vld [vmem:[%s21099_s4 + $0x400] ss:$8 sps:$4 sm:$0xff]  }
 0x430   :  { %v3197_v24 = vpop.f32.mrb[38].mxu1 }
 0x431   :  { %v3204_v20 = vpack.c.bf16 %v3197_v24, %v3191_v16  ;;  %v3199_v22 = vpop.f32.mrb[39].mxu1  ;;  %v12727_v16 = vld [vmem:[%s21103_s1 + $0xf0] sm:$0xff]  ;;  %v12798_v24 = vld [vmem:[%s21103_s1 + $0x108] sm:$0xff] }
 0x432   :  { %v3205_v23 = vpack.c.bf16 %v3199_v22, %v3193_v17  ;;  %14068 = vmatpush1.bf16.msra.mxu1 %v16890_v51  ;;  %v12510_v51 = vld [vmem:[%s21103_s1 + $0x88] sm:$0xff]  ;;  %12731 = vmatmul.mubr.msk.f32.gmra.mrb[44].mxu0 %vm2025_vm0, %v12727_v16  ;;  %v12728_v17 = vld [vmem:[%s21103_s1 + $0xf8] sm:$0xff] }
 0x433   :  { %3763 = vmatprep.subr.bf16.mxu1 %v14956_v21  ;;  %4651 = vmatprep.mubr.f32.mxu0 %v16153_v37  ;;  %v12797_v21 = vld [vmem:[%s21103_s1 + $0x100] sm:$0xff]  ;;  %v12800_v22 = vld [vmem:[%s21103_s1 + $0x118] sm:$0xff] }
 0x434   :  { %3441 = vmatprep.mubr.bf16.mxu1 %v3205_v23  ;;  %v15014_v16 = vld [vmem:[%s21099_s4 + $0x540] ss:$8 sps:$4 sm:$0xff]  }
 0x435   :  { %3442 = vmatmul.mubr.bf16.gmra.mrb[28].mxu1 %v3204_v20  ;;  %v12799_v20 = vld [vmem:[%s21103_s1 + $0x110] sm:$0xff] }
 0x436   :  { %3541 = vmatprep.mubr.f32.mxu1 %v16153_v37  ;;  %12732 = vmatmul.mubr.msk.f32.gmra.mrb[46].mxu0 %vm2025_vm0, %v12728_v17  ;;  %v15019_v17 = vld [vmem:[%s21099_s4 + $0x554] ss:$8 sps:$4 sm:$0xff]  }
 0x437   :  { %4997 = vmatprep.mubr.f32.mxu0 %v16153_v37 }
 0x43a   :  { %12801 = vmatmul.mubr.msk.f32.vlgmr.msra.gmra.mrb[48].mxu0 %vm2025_vm0, %v12797_v21  ;;  %v15017_v21 = vld [vmem:[%s21099_s4 + $0x550] ss:$8 sps:$4 sm:$0xff]  }
 0x43b   :  { %5003 = vmatprep.mubr.f32.mxu0 %v16153_v37 }
 0x43d   :  { %12513 = vmatmul.mubr.msk.f32.vlgmr.msra.gmra.mrb[40].mxu1 %vm2025_vm0, %v12509_v47 }
 0x43e   :  { %3547 = vmatprep.mubr.f32.mxu1 %v16153_v37  ;;  %3764 = vmatpush1.bf16.msra.mxu1 %v14954_v49 }
 0x43f   :  { %3765 = vmatprep.subr.bf16.mxu1 %v14959_v25  ;;  %12802 = vmatmul.mubr.msk.f32.gmra.mrb[50].mxu0 %vm2025_vm0, %v12798_v24  ;;  %v15022_v24 = vld [vmem:[%s21099_s4 + $0x564] ss:$8 sps:$4 sm:$0xff]  }
 0x440   :  { %5009 = vmatprep.mubr.f32.mxu0 %v16153_v37 }
 0x441   :  { %12514 = vmatmul.mubr.msk.f32.gmra.mrb[42].mxu1 %vm2025_vm0, %v12510_v51 }
 0x442   :  { %3553 = vmatprep.mubr.f32.mxu1 %v16153_v37  ;;  %3766 = vmatpush1.bf16.msra.mxu1 %v14957_v0 }
 0x443   :  { %3767 = vmatprep.subr.bf16.mxu1 %v14962_v2  ;;  %12803 = vmatmul.mubr.msk.f32.gmra.mrb[52].mxu0 %vm2025_vm0, %v12799_v20  ;;  %v15020_v20 = vld [vmem:[%s21099_s4 + $0x560] ss:$8 sps:$4 sm:$0xff]  }
 0x444   :  { %v17594_v8 = vpop.f32.mrb[16].mxu0  ;;  %5015 = vmatprep.mubr.f32.mxu0 %v16153_v37 }
 0x445   :  { %v17596_v9 = vpop.f32.mrb[17].mxu0  ;;  %12515 = vmatmul.mubr.msk.f32.gmra.mrb[44].mxu1 %vm2025_vm0, %v12511_v3 }
 0x446   :  { %v17599_v11 = vpop.f32.mrb[18].mxu0  ;;  %3559 = vmatprep.mubr.f32.mxu1 %v16153_v37  ;;  %3768 = vmatpush1.bf16.msra.mxu1 %v14960_v4 }
 0x447   :  { %v17608_v15 = vpop.f32.mrb[19].mxu0  ;;  %3769 = vmatprep.subr.bf16.mxu1 %v14965_v5  ;;  %12804 = vmatmul.mubr.msk.f32.gmra.mrb[54].mxu0 %vm2025_vm0, %v12800_v22  ;;  %v15025_v22 = vld [vmem:[%s21099_s4 + $0x574] ss:$8 sps:$4 sm:$0xff]  }
 0x448   :  { %5485 = vmatprep.mubr.f32.mxu0 %v16153_v37 }
 0x449   :  { %12516 = vmatmul.mubr.msk.f32.gmra.mrb[46].mxu1 %vm2025_vm0, %v12512_v12 }
 0x44a   :  { %3770 = vmatpush1.bf16.msra.mxu1 %v14963_v13 }
 0x44b   :  { %3771 = vmatprep.subr.bf16.mxu1 %v14968_v27 }
 0x44c   :  { %v17620_v30 = vpop.f32.mrb[20].mxu0 }
 0x44d   :  { %v17622_v32 = vpop.f32.mrb[21].mxu0 }
 0x44e   :  { %v17624_v50 = vpop.f32.mrb[22].mxu0  ;;  %3772 = vmatpush1.bf16.msra.mxu1 %v14966_v28 }
 0x44f   :  { %v17629_v46 = vpop.f32.mrb[23].mxu0  ;;  %3773 = vmatprep.subr.bf16.mxu1 %v14971_v29 }
 0x452   :  { %3774 = vmatpush1.bf16.msra.mxu1 %v14969_v35 }
 0x453   :  { %3775 = vmatprep.subr.bf16.mxu1 %v14974_v36 }
 0x454   :  { %v17729_v23 = vpop.f32.mrb[24].mxu0 }
 0x455   :  { %v3909_v47 = vpop.f32.mrb[25].mxu0 }
 0x456   :  { %3776 = vmatpush1.bf16.msra.mxu1 %v14972_v19 }
 0x457   :  { %3777 = vmatprep.subr.bf16.mxu1 %v14977_v33 }
 0x458   :  { %v17731_v49 = vpop.f32.mrb[26].mxu0 }
 0x459   :  { %v3930_v25 = vpack.c.bf16 %v17731_v49, %v17729_v23  ;;  %v3915_v51 = vpop.f32.mrb[27].mxu0  ;;  %v15056_v23 = vld [vmem:[%s21099_s4 + $0x620] ss:$8 sps:$4 sm:$0xff]   ;;  %v15061_v49 = vld [vmem:[%s21099_s4 + $0x634] ss:$8 sps:$4 sm:$0xff]  }
 0x45a   :  { %3778 = vmatpush1.bf16.msra.mxu1 %v14975_v41  ;;  %v3931_v0 = vpack.c.bf16 %v3915_v51, %v3909_v47  ;;  %v15023_v47 = vld [vmem:[%s21099_s4 + $0x570] ss:$8 sps:$4 sm:$0xff]   ;;  %v15028_v51 = vld [vmem:[%s21099_s4 + $0x584] ss:$8 sps:$4 sm:$0xff]  }
 0x45b   :  { %3779 = vmatprep.subr.bf16.mxu1 %v14980_v18 }
 0x45c   :  { %v17735_v2 = vpop.f32.mrb[28].mxu0 }
 0x45d   :  { %v17737_v3 = vpop.f32.mrb[29].mxu0 }
 0x45e   :  { %3780 = vmatpush1.bf16.msra.mxu1 %v14978_v56 }
 0x45f   :  { %3781 = vmatprep.subr.bf16.mxu1 %v14983_v10 }
 0x460   :  { %v17739_v4 = vpop.f32.mrb[30].mxu0 }
 0x461   :  { %v3932_v5 = vpack.c.bf16 %v17739_v4, %v17735_v2  ;;  %v17743_v12 = vpop.f32.mrb[31].mxu0  ;;  %v15062_v2 = vld [vmem:[%s21099_s4 + $0x640] ss:$8 sps:$4 sm:$0xff]   ;;  %v15067_v4 = vld [vmem:[%s21099_s4 + $0x654] ss:$8 sps:$4 sm:$0xff]  }
 0x462   :  { %3782 = vmatpush1.bf16.msra.mxu1 %v14981_v31  ;;  %v3933_v13 = vpack.c.bf16 %v17743_v12, %v17737_v3  ;;  %v15002_v31 = vld [vmem:[%s21099_s4 + $0x500] ss:$8 sps:$4 sm:$0xff]   ;;  %v15064_v3 = vld [vmem:[%s21099_s4 + $0x644] ss:$8 sps:$4 sm:$0xff]  }
 0x463   :  { %3783 = vmatprep.subr.bf16.mxu1 %v14986_v42  ;;  %v15007_v42 = vld [vmem:[%s21099_s4 + $0x514] ss:$8 sps:$4 sm:$0xff]   ;;  %v15070_v12 = vld [vmem:[%s21099_s4 + $0x664] ss:$8 sps:$4 sm:$0xff]  }
 0x464   :  { %v17747_v27 = vpop.f32.mrb[32].mxu0 }
 0x465   :  { %v17749_v28 = vpop.f32.mrb[33].mxu0 }
 0x466   :  { %3784 = vmatpush1.bf16.msra.mxu1 %v14984_v38 }
 0x467   :  { %3785 = vmatprep.subr.bf16.mxu1 %v14989_v40 }
 0x468   :  { %v17751_v29 = vpop.f32.mrb[34].mxu0 }
 0x469   :  { %v4294_v36 = vpack.c.bf16 %v17751_v29, %v17747_v27  ;;  %v17755_v19 = vpop.f32.mrb[35].mxu0  ;;  %v15104_v27 = vld [vmem:[%s21099_s4 + $0x720] ss:$8 sps:$4 sm:$0xff]   ;;  %v15109_v29 = vld [vmem:[%s21099_s4 + $0x734] ss:$8 sps:$4 sm:$0xff]  }
 0x46a   :  { %3786 = vmatpush1.bf16.msra.mxu1 %v14987_v43  ;;  %v4295_v33 = vpack.c.bf16 %v17755_v19, %v17749_v28  ;;  %v15005_v43 = vld [vmem:[%s21099_s4 + $0x510] ss:$8 sps:$4 sm:$0xff]   ;;  %v15073_v28 = vld [vmem:[%s21099_s4 + $0x674] ss:$8 sps:$4 sm:$0xff]  }
 0x46b   :  { %3787 = vmatprep.subr.bf16.mxu1 %v14992_v45  ;;  %v15010_v45 = vld [vmem:[%s21099_s4 + $0x524] ss:$8 sps:$4 sm:$0xff]   ;;  %v15071_v19 = vld [vmem:[%s21099_s4 + $0x670] ss:$8 sps:$4 sm:$0xff]  }
 0x46e   :  { %3788 = vmatpush1.bf16.msra.mxu1 %v14990_v48 }
 0x46f   :  { %3789 = vmatprep.subr.bf16.mxu1 %v14995_v52 }
 0x472   :  { %3790 = vmatpush1.bf16.msra.mxu1 %v14993_v59 }
 0x473   :  { %3791 = vmatprep.subr.bf16.mxu1 %v14998_v62 }
 0x476   :  { %3792 = vmatpush1.bf16.msra.mxu1 %v14996_v61  ;;  %v15008_v61 = vld [vmem:[%s21099_s4 + $0x520] ss:$8 sps:$4 sm:$0xff]  }
 0x477   :  { %3793 = vmatprep.subr.bf16.mxu1 %v15001_v63  ;;  %v15013_v63 = vld [vmem:[%s21099_s4 + $0x534] ss:$8 sps:$4 sm:$0xff]  }
 0x47a   :  { %3794 = vmatpush1.bf16.msra.mxu1 %v14999_v1  ;;  %v15011_v1 = vld [vmem:[%s21099_s4 + $0x530] ss:$8 sps:$4 sm:$0xff]  }
 0x47b   :  { %4127 = vmatprep.subr.bf16.mxu1 %v15004_v14  ;;  %v15016_v14 = vld [vmem:[%s21099_s4 + $0x544] ss:$8 sps:$4 sm:$0xff]  }
 0x510   :  { %v3543_v35 = vpop.f32.mrb[40].mxu1 }
 0x511   :  { %v3545_v26 = vpop.f32.mrb[41].mxu1 }
 0x514   :  { %v3549_v41 = vpop.f32.mrb[42].mxu1 }
 0x515   :  { %v3566_v18 = vpack.c.bf16 %v3549_v41, %v3543_v35  ;;  %v3551_v56 = vpop.f32.mrb[43].mxu1  ;;  %v15031_v35 = vld [vmem:[%s21099_s4 + $0x594] ss:$8 sps:$4 sm:$0xff]   ;;  %v15034_v41 = vld [vmem:[%s21099_s4 + $0x5a4] ss:$8 sps:$4 sm:$0xff]  }
 0x516   :  { %v3567_v10 = vpack.c.bf16 %v3551_v56, %v3545_v26  ;;  %v15029_v26 = vld [vmem:[%s21099_s4 + $0x590] ss:$8 sps:$4 sm:$0xff]   ;;  %v15037_v56 = vld [vmem:[%s21099_s4 + $0x5b4] ss:$8 sps:$4 sm:$0xff]  }
 0x518   :  { %3795 = vmatprep.mubr.bf16.mxu1 %v3567_v10  ;;  %v3555_v38 = vpop.f32.mrb[44].mxu1  ;;  %v15035_v10 = vld [vmem:[%s21099_s4 + $0x5b0] ss:$8 sps:$4 sm:$0xff]  }
 0x519   :  { %3796 = vmatmul.mubr.bf16.vlgmr.msra.gmra.mrb[24].mxu1 %v3566_v18  ;;  %v3557_v40 = vpop.f32.mrb[45].mxu1  ;;  %v15032_v18 = vld [vmem:[%s21099_s4 + $0x5a0] ss:$8 sps:$4 sm:$0xff]  }
 0x51a   :  { %4128 = vmatpush1.bf16.msra.mxu1 %v15002_v31  ;;  %v17828_v31 = vpop.f32.mrb[36].mxu0 }
 0x51b   :  { %4129 = vmatprep.subr.bf16.mxu1 %v15007_v42  ;;  %v15040_v42 = vld [vmem:[%s21099_s4 + $0x5c4] ss:$8 sps:$4 sm:$0xff]  }
 0x51c   :  { %v3561_v48 = vpop.f32.mrb[46].mxu1 }
 0x51d   :  { %v3568_v52 = vpack.c.bf16 %v3561_v48, %v3555_v38  ;;  %v3563_v59 = vpop.f32.mrb[47].mxu1  ;;  %v17833_v38 = vpop.f32.mrb[37].mxu0 }
 0x51e   :  { %4130 = vmatpush1.bf16.msra.mxu1 %v15005_v43  ;;  %v3569_v62 = vpack.c.bf16 %v3563_v59, %v3557_v40  ;;  %v15038_v40 = vld [vmem:[%s21099_s4 + $0x5c0] ss:$8 sps:$4 sm:$0xff]   ;;  %v17838_v43 = vpop.f32.mrb[38].mxu0 }
 0x51f   :  { %4131 = vmatprep.subr.bf16.mxu1 %v15010_v45  ;;  %v15043_v45 = vld [vmem:[%s21099_s4 + $0x5d4] ss:$8 sps:$4 sm:$0xff]   ;;  %v4296_v48 = vpack.c.bf16 %v17838_v43, %v17828_v31  ;;  %v15110_v31 = vld [vmem:[%s21099_s4 + $0x740] ss:$8 sps:$4 sm:$0xff]  }
 0x520   :  { %3805 = vmatprep.mubr.bf16.mxu1 %v3569_v62  ;;  %v15046_v62 = vld [vmem:[%s21099_s4 + $0x5e4] ss:$8 sps:$4 sm:$0xff]   ;;  %v15115_v43 = vld [vmem:[%s21099_s4 + $0x754] ss:$8 sps:$4 sm:$0xff]  }
 0x521   :  { %3806 = vmatmul.mubr.bf16.gmra.mrb[28].mxu1 %v3568_v52  ;;  %v17845_v52 = vpop.f32.mrb[39].mxu0 }
 0x522   :  { %4132 = vmatpush1.bf16.msra.mxu1 %v15008_v61  ;;  %4159 = vmatprep.mubr.bf16.mxu1 %v3931_v0  ;;  %v15026_v0 = vld [vmem:[%s21099_s4 + $0x580] ss:$8 sps:$4 sm:$0xff]   ;;  %v4297_v59 = vpack.c.bf16 %v17845_v52, %v17833_v38  ;;  %v15041_v61 = vld [vmem:[%s21099_s4 + $0x5d0] ss:$8 sps:$4 sm:$0xff]   ;;  %v15112_v38 = vld [vmem:[%s21099_s4 + $0x744] ss:$8 sps:$4 sm:$0xff]  }
 0x523   :  { %4133 = vmatprep.subr.bf16.mxu1 %v15013_v63  ;;  %v17855_v63 = vpop.f32.mrb[40].mxu0  ;;  %v15118_v52 = vld [vmem:[%s21099_s4 + $0x764] ss:$8 sps:$4 sm:$0xff]  }
 0x526   :  { %4134 = vmatpush1.bf16.msra.mxu1 %v15011_v1  ;;  %v15044_v1 = vld [vmem:[%s21099_s4 + $0x5e0] ss:$8 sps:$4 sm:$0xff]  }
 0x527   :  { %4135 = vmatprep.subr.bf16.mxu1 %v15016_v14  ;;  %v17860_v14 = vpop.f32.mrb[41].mxu0 }
 0x52a   :  { %4136 = vmatpush1.bf16.msra.mxu1 %v15014_v16  ;;  %v15049_v16 = vld [vmem:[%s21099_s4 + $0x5f4] ss:$8 sps:$4 sm:$0xff]  }
 0x52b   :  { %4137 = vmatprep.subr.bf16.mxu1 %v15019_v17  ;;  %v17865_v17 = vpop.f32.mrb[42].mxu0 }
 0x52e   :  { %4138 = vmatpush1.bf16.msra.mxu1 %v15017_v21  ;;  %v4658_v21 = vpack.c.bf16 %v17865_v17, %v17855_v63  ;;  %v15152_v63 = vld [vmem:[%s21099_s4 + $0x820] ss:$8 sps:$4 sm:$0xff]   ;;  %v15157_v17 = vld [vmem:[%s21099_s4 + $0x834] ss:$8 sps:$4 sm:$0xff]  }
 0x52f   :  { %4139 = vmatprep.subr.bf16.mxu1 %v15022_v24  ;;  %v17869_v24 = vpop.f32.mrb[43].mxu0 }
 0x532   :  { %4140 = vmatpush1.bf16.msra.mxu1 %v15020_v20  ;;  %v4659_v20 = vpack.c.bf16 %v17869_v24, %v17860_v14  ;;  %v15121_v14 = vld [vmem:[%s21099_s4 + $0x774] ss:$8 sps:$4 sm:$0xff]   ;;  %v15119_v24 = vld [vmem:[%s21099_s4 + $0x770] ss:$8 sps:$4 sm:$0xff]  }
 0x533   :  { %4141 = vmatprep.subr.bf16.mxu1 %v15025_v22  ;;  %v15047_v22 = vld [vmem:[%s21099_s4 + $0x5f0] ss:$8 sps:$4 sm:$0xff]  }
 0x536   :  { %4142 = vmatpush1.bf16.msra.mxu1 %v15023_v47  ;;  %v15052_v47 = vld [vmem:[%s21099_s4 + $0x604] ss:$8 sps:$4 sm:$0xff]  }
 0x537   :  { %4143 = vmatprep.subr.bf16.mxu1 %v15028_v51  ;;  %v15050_v51 = vld [vmem:[%s21099_s4 + $0x600] ss:$8 sps:$4 sm:$0xff]  }
 0x53a   :  { %4144 = vmatpush1.bf16.msra.mxu1 %v15026_v0  ;;  %v15055_v0 = vld [vmem:[%s21099_s4 + $0x614] ss:$8 sps:$4 sm:$0xff]  }
 0x53b   :  { %4145 = vmatprep.subr.bf16.mxu1 %v15031_v35  ;;  %v15053_v35 = vld [vmem:[%s21099_s4 + $0x610] ss:$8 sps:$4 sm:$0xff]  }
 0x53e   :  { %4146 = vmatpush1.bf16.msra.mxu1 %v15029_v26  ;;  %v15058_v26 = vld [vmem:[%s21099_s4 + $0x624] ss:$8 sps:$4 sm:$0xff]  }
 0x53f   :  { %4147 = vmatprep.subr.bf16.mxu1 %v15034_v41  ;;  %v15074_v41 = vld [vmem:[%s21099_s4 + $0x680] ss:$8 sps:$4 sm:$0xff]  }
 0x542   :  { %4148 = vmatpush1.bf16.msra.mxu1 %v15032_v18  ;;  %v15079_v18 = vld [vmem:[%s21099_s4 + $0x694] ss:$8 sps:$4 sm:$0xff]  }
 0x543   :  { %4149 = vmatprep.subr.bf16.mxu1 %v15037_v56  ;;  %v15077_v56 = vld [vmem:[%s21099_s4 + $0x690] ss:$8 sps:$4 sm:$0xff]  }
 0x546   :  { %4150 = vmatpush1.bf16.msra.mxu1 %v15035_v10  ;;  %v15082_v10 = vld [vmem:[%s21099_s4 + $0x6a4] ss:$8 sps:$4 sm:$0xff]  }
 0x547   :  { %4151 = vmatprep.subr.bf16.mxu1 %v15040_v42  ;;  %v15080_v42 = vld [vmem:[%s21099_s4 + $0x6a0] ss:$8 sps:$4 sm:$0xff]  }
 0x54a   :  { %4152 = vmatpush1.bf16.msra.mxu1 %v15038_v40  ;;  %v15085_v40 = vld [vmem:[%s21099_s4 + $0x6b4] ss:$8 sps:$4 sm:$0xff]  }
 0x54b   :  { %4153 = vmatprep.subr.bf16.mxu1 %v15043_v45  ;;  %v15083_v45 = vld [vmem:[%s21099_s4 + $0x6b0] ss:$8 sps:$4 sm:$0xff]  }
 0x54e   :  { %4154 = vmatpush1.bf16.msra.mxu1 %v15041_v61  ;;  %v17960_v61 = vpop.f32.mrb[44].mxu0 }
 0x54f   :  { %4155 = vmatprep.subr.bf16.mxu1 %v15046_v62  ;;  %v15088_v62 = vld [vmem:[%s21099_s4 + $0x6c4] ss:$8 sps:$4 sm:$0xff]  }
 0x552   :  { %4156 = vmatpush1.bf16.msra.mxu1 %v15044_v1  ;;  %v17965_v1 = vpop.f32.mrb[45].mxu0 }
 0x553   :  { %4157 = vmatprep.subr.bf16.mxu1 %v15049_v16  ;;  %v15086_v16 = vld [vmem:[%s21099_s4 + $0x6c0] ss:$8 sps:$4 sm:$0xff]  }
 0x556   :  { %4158 = vmatpush1.bf16.msra.mxu1 %v15047_v22  ;;  %v17970_v22 = vpop.f32.mrb[46].mxu0 }
 0x557   :  { %4491 = vmatprep.subr.bf16.mxu1 %v15052_v47  ;;  %v15091_v47 = vld [vmem:[%s21099_s4 + $0x6d4] ss:$8 sps:$4 sm:$0xff]  }
 0x559   :  { %4160 = vmatmul.mubr.bf16.vlgmr.msra.gmra.mrb[24].mxu1 %v3930_v25  ;;  %v15059_v25 = vld [vmem:[%s21099_s4 + $0x630] ss:$8 sps:$4 sm:$0xff]  }
 0x55a   :  { %4492 = vmatpush1.bf16.msra.mxu1 %v15050_v51  ;;  %4169 = vmatprep.mubr.bf16.mxu1 %v3933_v13  ;;  %v15068_v13 = vld [vmem:[%s21099_s4 + $0x660] ss:$8 sps:$4 sm:$0xff]   ;;  %v4660_v51 = vpack.c.bf16 %v17970_v22, %v17960_v61  ;;  %v15163_v22 = vld [vmem:[%s21099_s4 + $0x854] ss:$8 sps:$4 sm:$0xff]  }
 0x55b   :  { %4493 = vmatprep.subr.bf16.mxu1 %v15055_v0  ;;  %v17977_v0 = vpop.f32.mrb[47].mxu0  ;;  %v15158_v61 = vld [vmem:[%s21099_s4 + $0x840] ss:$8 sps:$4 sm:$0xff]  }
 0x55e   :  { %4494 = vmatpush1.bf16.msra.mxu1 %v15053_v35  ;;  %v4661_v35 = vpack.c.bf16 %v17977_v0, %v17965_v1  ;;  %v15160_v1 = vld [vmem:[%s21099_s4 + $0x844] ss:$8 sps:$4 sm:$0xff]  }
 0x55f   :  { %4495 = vmatprep.subr.bf16.mxu1 %v15058_v26  ;;  %v15089_v26 = vld [vmem:[%s21099_s4 + $0x6d0] ss:$8 sps:$4 sm:$0xff]   ;;  %v15166_v0 = vld [vmem:[%s21099_s4 + $0x864] ss:$8 sps:$4 sm:$0xff]  }
 0x561   :  { %4170 = vmatmul.mubr.bf16.gmra.mrb[28].mxu1 %v3932_v5  ;;  %v15065_v5 = vld [vmem:[%s21099_s4 + $0x650] ss:$8 sps:$4 sm:$0xff]  }
 0x562   :  { %4496 = vmatpush1.bf16.msra.mxu1 %v15056_v23  ;;  %4523 = vmatprep.mubr.bf16.mxu1 %v4295_v33  ;;  %v15076_v33 = vld [vmem:[%s21099_s4 + $0x684] ss:$8 sps:$4 sm:$0xff]   ;;  %v17984_v23 = vpop.f32.mrb[48].mxu0 }
 0x563   :  { %4497 = vmatprep.subr.bf16.mxu1 %v15061_v49  ;;  %v15094_v49 = vld [vmem:[%s21099_s4 + $0x6e4] ss:$8 sps:$4 sm:$0xff]  }
 0x566   :  { %4498 = vmatpush1.bf16.msra.mxu1 %v15059_v25  ;;  %v17989_v25 = vpop.f32.mrb[49].mxu0 }
 0x567   :  { %4499 = vmatprep.subr.bf16.mxu1 %v15064_v3  ;;  %v15092_v3 = vld [vmem:[%s21099_s4 + $0x6e0] ss:$8 sps:$4 sm:$0xff]  }
 0x56a   :  { %4500 = vmatpush1.bf16.msra.mxu1 %v15062_v2  ;;  %v17994_v2 = vpop.f32.mrb[50].mxu0 }
 0x56b   :  { %4501 = vmatprep.subr.bf16.mxu1 %v15067_v4  ;;  %v15097_v4 = vld [vmem:[%s21099_s4 + $0x6f4] ss:$8 sps:$4 sm:$0xff]  }
 0x56e   :  { %4502 = vmatpush1.bf16.msra.mxu1 %v15065_v5  ;;  %v5022_v5 = vpack.c.bf16 %v17994_v2, %v17984_v23 }
 0x56f   :  { %4503 = vmatprep.subr.bf16.mxu1 %v15070_v12  ;;  %v18001_v12 = vpop.f32.mrb[51].mxu0 }
 0x572   :  { %4504 = vmatpush1.bf16.msra.mxu1 %v15068_v13  ;;  %v5023_v13 = vpack.c.bf16 %v18001_v12, %v17989_v25  ;;  %v15169_v25 = vld [vmem:[%s21099_s4 + $0x874] ss:$8 sps:$4 sm:$0xff]   ;;  %v15167_v12 = vld [vmem:[%s21099_s4 + $0x870] ss:$8 sps:$4 sm:$0xff]  }
 0x573   :  { %4505 = vmatprep.subr.bf16.mxu1 %v15073_v28  ;;  %v15095_v28 = vld [vmem:[%s21099_s4 + $0x6f0] ss:$8 sps:$4 sm:$0xff]  }
 0x576   :  { %4506 = vmatpush1.bf16.msra.mxu1 %v15071_v19  ;;  %v18008_v19 = vpop.f32.mrb[52].mxu0 }
 0x577   :  { %4507 = vmatprep.subr.bf16.mxu1 %v15076_v33  ;;  %v15100_v33 = vld [vmem:[%s21099_s4 + $0x704] ss:$8 sps:$4 sm:$0xff]  }
 0x57a   :  { %4508 = vmatpush1.bf16.msra.mxu1 %v15074_v41  ;;  %v18013_v41 = vpop.f32.mrb[53].mxu0 }
 0x57b   :  { %4509 = vmatprep.subr.bf16.mxu1 %v15079_v18  ;;  %v15098_v18 = vld [vmem:[%s21099_s4 + $0x700] ss:$8 sps:$4 sm:$0xff]  }
 0x57e   :  { %4510 = vmatpush1.bf16.msra.mxu1 %v15077_v56  ;;  %v18018_v56 = vpop.f32.mrb[54].mxu0 }
 0x57f   :  { %4511 = vmatprep.subr.bf16.mxu1 %v15082_v10  ;;  %v15103_v10 = vld [vmem:[%s21099_s4 + $0x714] ss:$8 sps:$4 sm:$0xff]  }
 0x582   :  { %4512 = vmatpush1.bf16.msra.mxu1 %v15080_v42  ;;  %v5024_v42 = vpack.c.bf16 %v18018_v56, %v18008_v19 }
 0x583   :  { %4513 = vmatprep.subr.bf16.mxu1 %v15085_v40  ;;  %v18025_v40 = vpop.f32.mrb[55].mxu0 }
 0x586   :  { %4514 = vmatpush1.bf16.msra.mxu1 %v15083_v45  ;;  %v5025_v45 = vpack.c.bf16 %v18025_v40, %v18013_v41 }
 0x587   :  { %4515 = vmatprep.subr.bf16.mxu1 %v15088_v62  ;;  %v15101_v62 = vld [vmem:[%s21099_s4 + $0x710] ss:$8 sps:$4 sm:$0xff]  }
 0x58a   :  { %4516 = vmatpush1.bf16.msra.mxu1 %v15086_v16  ;;  %v15106_v16 = vld [vmem:[%s21099_s4 + $0x724] ss:$8 sps:$4 sm:$0xff]  }
 0x58b   :  { %4517 = vmatprep.subr.bf16.mxu1 %v15091_v47  ;;  %v15122_v47 = vld [vmem:[%s21099_s4 + $0x780] ss:$8 sps:$4 sm:$0xff]  }
 0x58e   :  { %4518 = vmatpush1.bf16.msra.mxu1 %v15089_v26  ;;  %v15127_v26 = vld [vmem:[%s21099_s4 + $0x794] ss:$8 sps:$4 sm:$0xff]  }
 0x58f   :  { %4519 = vmatprep.subr.bf16.mxu1 %v15094_v49  ;;  %v15125_v49 = vld [vmem:[%s21099_s4 + $0x790] ss:$8 sps:$4 sm:$0xff]  }
 0x592   :  { %4520 = vmatpush1.bf16.msra.mxu1 %v15092_v3  ;;  %v15130_v3 = vld [vmem:[%s21099_s4 + $0x7a4] ss:$8 sps:$4 sm:$0xff]  }
 0x593   :  { %4521 = vmatprep.subr.bf16.mxu1 %v15097_v4  ;;  %v15128_v4 = vld [vmem:[%s21099_s4 + $0x7a0] ss:$8 sps:$4 sm:$0xff]  }
 0x596   :  { %4522 = vmatpush1.bf16.msra.mxu1 %v15095_v28  ;;  %v15133_v28 = vld [vmem:[%s21099_s4 + $0x7b4] ss:$8 sps:$4 sm:$0xff]  }
 0x597   :  { %4855 = vmatprep.subr.bf16.mxu1 %v15100_v33  ;;  %v15131_v33 = vld [vmem:[%s21099_s4 + $0x7b0] ss:$8 sps:$4 sm:$0xff]  }
 0x599   :  { %4524 = vmatmul.mubr.bf16.vlgmr.msra.gmra.mrb[24].mxu1 %v4294_v36  ;;  %v15107_v36 = vld [vmem:[%s21099_s4 + $0x730] ss:$8 sps:$4 sm:$0xff]  }
 0x59a   :  { %4856 = vmatpush1.bf16.msra.mxu1 %v15098_v18  ;;  %4533 = vmatprep.mubr.bf16.mxu1 %v4297_v59  ;;  %v15116_v59 = vld [vmem:[%s21099_s4 + $0x760] ss:$8 sps:$4 sm:$0xff]   ;;  %v15136_v18 = vld [vmem:[%s21099_s4 + $0x7c4] ss:$8 sps:$4 sm:$0xff]  }
 0x59b   :  { %4857 = vmatprep.subr.bf16.mxu1 %v15103_v10  ;;  %v15134_v10 = vld [vmem:[%s21099_s4 + $0x7c0] ss:$8 sps:$4 sm:$0xff]  }
 0x59e   :  { %4858 = vmatpush1.bf16.msra.mxu1 %v15101_v62  ;;  %v15139_v62 = vld [vmem:[%s21099_s4 + $0x7d4] ss:$8 sps:$4 sm:$0xff]  }
 0x59f   :  { %4859 = vmatprep.subr.bf16.mxu1 %v15106_v16  ;;  %v15137_v16 = vld [vmem:[%s21099_s4 + $0x7d0] ss:$8 sps:$4 sm:$0xff]  }
 0x5a1   :  { %4534 = vmatmul.mubr.bf16.gmra.mrb[28].mxu1 %v4296_v48  ;;  %v15113_v48 = vld [vmem:[%s21099_s4 + $0x750] ss:$8 sps:$4 sm:$0xff]  }
 0x5a2   :  { %4860 = vmatpush1.bf16.msra.mxu1 %v15104_v27  ;;  %4887 = vmatprep.mubr.bf16.mxu1 %v4659_v20  ;;  %v15124_v20 = vld [vmem:[%s21099_s4 + $0x784] ss:$8 sps:$4 sm:$0xff]  }
 0x5a3   :  { %4861 = vmatprep.subr.bf16.mxu1 %v15109_v29  ;;  %v15142_v27 = vld [vmem:[%s21099_s4 + $0x7e4] ss:$8 sps:$4 sm:$0xff]   ;;  %v15140_v29 = vld [vmem:[%s21099_s4 + $0x7e0] ss:$8 sps:$4 sm:$0xff]  }
 0x5a6   :  { %4862 = vmatpush1.bf16.msra.mxu1 %v15107_v36  ;;  %v15145_v36 = vld [vmem:[%s21099_s4 + $0x7f4] ss:$8 sps:$4 sm:$0xff]  }
 0x5a7   :  { %4863 = vmatprep.subr.bf16.mxu1 %v15112_v38  ;;  %v15143_v38 = vld [vmem:[%s21099_s4 + $0x7f0] ss:$8 sps:$4 sm:$0xff]  }
 0x5aa   :  { %4864 = vmatpush1.bf16.msra.mxu1 %v15110_v31  ;;  %v15148_v31 = vld [vmem:[%s21099_s4 + $0x804] ss:$8 sps:$4 sm:$0xff]  }
 0x5ab   :  { %4865 = vmatprep.subr.bf16.mxu1 %v15115_v43  ;;  %v15146_v43 = vld [vmem:[%s21099_s4 + $0x800] ss:$8 sps:$4 sm:$0xff]  }
 0x5ae   :  { %4866 = vmatpush1.bf16.msra.mxu1 %v15113_v48  ;;  %v15151_v48 = vld [vmem:[%s21099_s4 + $0x814] ss:$8 sps:$4 sm:$0xff]  }
 0x5af   :  { %4867 = vmatprep.subr.bf16.mxu1 %v15118_v52  ;;  %v15149_v52 = vld [vmem:[%s21099_s4 + $0x810] ss:$8 sps:$4 sm:$0xff]  }
 0x5b2   :  { %4868 = vmatpush1.bf16.msra.mxu1 %v15116_v59  ;;  %v15154_v59 = vld [vmem:[%s21099_s4 + $0x824] ss:$8 sps:$4 sm:$0xff]  }
 0x5b3   :  { %4869 = vmatprep.subr.bf16.mxu1 %v15121_v14  ;;  %v15170_v14 = vld [vmem:[%s21099_s4 + $0x880] ss:$8 sps:$4 sm:$0xff]  }
 0x5b6   :  { %4870 = vmatpush1.bf16.msra.mxu1 %v15119_v24  ;;  %v15175_v24 = vld [vmem:[%s21099_s4 + $0x894] ss:$8 sps:$4 sm:$0xff]  }
 0x5b7   :  { %4871 = vmatprep.subr.bf16.mxu1 %v15124_v20  ;;  %v15173_v20 = vld [vmem:[%s21099_s4 + $0x890] ss:$8 sps:$4 sm:$0xff]  }
 0x5ba   :  { %4872 = vmatpush1.bf16.msra.mxu1 %v15122_v47  ;;  %v15178_v47 = vld [vmem:[%s21099_s4 + $0x8a4] ss:$8 sps:$4 sm:$0xff]  }
 0x5bb   :  { %4873 = vmatprep.subr.bf16.mxu1 %v15127_v26  ;;  %v15176_v26 = vld [vmem:[%s21099_s4 + $0x8a0] ss:$8 sps:$4 sm:$0xff]  }
 0x5be   :  { %4874 = vmatpush1.bf16.msra.mxu1 %v15125_v49  ;;  %v15181_v49 = vld [vmem:[%s21099_s4 + $0x8b4] ss:$8 sps:$4 sm:$0xff]  }
 0x5bf   :  { %4875 = vmatprep.subr.bf16.mxu1 %v15130_v3  ;;  %v15179_v3 = vld [vmem:[%s21099_s4 + $0x8b0] ss:$8 sps:$4 sm:$0xff]  }
 0x5c2   :  { %4876 = vmatpush1.bf16.msra.mxu1 %v15128_v4  ;;  %v15184_v4 = vld [vmem:[%s21099_s4 + $0x8c4] ss:$8 sps:$4 sm:$0xff]  }
 0x5c3   :  { %4877 = vmatprep.subr.bf16.mxu1 %v15133_v28  ;;  %v15182_v28 = vld [vmem:[%s21099_s4 + $0x8c0] ss:$8 sps:$4 sm:$0xff]  }
 0x5c6   :  { %4878 = vmatpush1.bf16.msra.mxu1 %v15131_v33  ;;  %v15187_v33 = vld [vmem:[%s21099_s4 + $0x8d4] ss:$8 sps:$4 sm:$0xff]  }
 0x5c7   :  { %4879 = vmatprep.subr.bf16.mxu1 %v15136_v18  ;;  %v15185_v18 = vld [vmem:[%s21099_s4 + $0x8d0] ss:$8 sps:$4 sm:$0xff]  }
 0x5ca   :  { %4880 = vmatpush1.bf16.msra.mxu1 %v15134_v10  ;;  %v15190_v10 = vld [vmem:[%s21099_s4 + $0x8e4] ss:$8 sps:$4 sm:$0xff]  }
 0x5cb   :  { %4881 = vmatprep.subr.bf16.mxu1 %v15139_v62  ;;  %v15188_v62 = vld [vmem:[%s21099_s4 + $0x8e0] ss:$8 sps:$4 sm:$0xff]  }
 0x5ce   :  { %4882 = vmatpush1.bf16.msra.mxu1 %v15137_v16  ;;  %v15193_v16 = vld [vmem:[%s21099_s4 + $0x8f4] ss:$8 sps:$4 sm:$0xff]  }
 0x5cf   :  { %4883 = vmatprep.subr.bf16.mxu1 %v15142_v27  ;;  %v15191_v27 = vld [vmem:[%s21099_s4 + $0x8f0] ss:$8 sps:$4 sm:$0xff]  }
 0x5d2   :  { %4884 = vmatpush1.bf16.msra.mxu1 %v15140_v29 }
 0x5d3   :  { %4885 = vmatprep.subr.bf16.mxu1 %v15145_v36 }
 0x5d6   :  { %4886 = vmatpush1.bf16.msra.mxu1 %v15143_v38 }
 0x5d7   :  { %5219 = vmatprep.subr.bf16.mxu1 %v15148_v31 }
 0x5d9   :  { %4888 = vmatmul.mubr.bf16.vlgmr.msra.gmra.mrb[24].mxu1 %v4658_v21  ;;  %v15155_v21 = vld [vmem:[%s21099_s4 + $0x830] ss:$8 sps:$4 sm:$0xff]  }
 0x5da   :  { %5220 = vmatpush1.bf16.msra.mxu1 %v15146_v43  ;;  %4897 = vmatprep.mubr.bf16.mxu1 %v4661_v35  ;;  %v15164_v35 = vld [vmem:[%s21099_s4 + $0x860] ss:$8 sps:$4 sm:$0xff]  }
 0x5db   :  { %5221 = vmatprep.subr.bf16.mxu1 %v15151_v48 }
 0x5de   :  { %5222 = vmatpush1.bf16.msra.mxu1 %v15149_v52 }
 0x5df   :  { %5223 = vmatprep.subr.bf16.mxu1 %v15154_v59 }
 0x5e1   :  { %4898 = vmatmul.mubr.bf16.gmra.mrb[28].mxu1 %v4660_v51  ;;  %v15161_v51 = vld [vmem:[%s21099_s4 + $0x850] ss:$8 sps:$4 sm:$0xff]  }
 0x5e2   :  { %5224 = vmatpush1.bf16.msra.mxu1 %v15152_v63  ;;  %5251 = vmatprep.mubr.bf16.mxu1 %v5023_v13  ;;  %v15172_v13 = vld [vmem:[%s21099_s4 + $0x884] ss:$8 sps:$4 sm:$0xff]  }
 0x5e3   :  { %5225 = vmatprep.subr.bf16.mxu1 %v15157_v17 }
 0x5e6   :  { %5226 = vmatpush1.bf16.msra.mxu1 %v15155_v21 }
 0x5e7   :  { %5227 = vmatprep.subr.bf16.mxu1 %v15160_v1 }
 0x5ea   :  { %5228 = vmatpush1.bf16.msra.mxu1 %v15158_v61 }
 0x5eb   :  { %5229 = vmatprep.subr.bf16.mxu1 %v15163_v22 }
 0x5ee   :  { %5230 = vmatpush1.bf16.msra.mxu1 %v15161_v51 }
 0x5ef   :  { %5231 = vmatprep.subr.bf16.mxu1 %v15166_v0 }
 0x5f2   :  { %5232 = vmatpush1.bf16.msra.mxu1 %v15164_v35 }
 0x5f3   :  { %5233 = vmatprep.subr.bf16.mxu1 %v15169_v25 }
 0x5f6   :  { %5234 = vmatpush1.bf16.msra.mxu1 %v15167_v12 }
 0x5f7   :  { %5235 = vmatprep.subr.bf16.mxu1 %v15172_v13 }
 0x5fa   :  { %5236 = vmatpush1.bf16.msra.mxu1 %v15170_v14 }
 0x5fb   :  { %5237 = vmatprep.subr.bf16.mxu1 %v15175_v24 }
 0x5fe   :  { %5238 = vmatpush1.bf16.msra.mxu1 %v15173_v20 }
 0x5ff   :  { %5239 = vmatprep.subr.bf16.mxu1 %v15178_v47 }
 0x602   :  { %5240 = vmatpush1.bf16.msra.mxu1 %v15176_v26 }
 0x603   :  { %5241 = vmatprep.subr.bf16.mxu1 %v15181_v49 }
 0x606   :  { %5242 = vmatpush1.bf16.msra.mxu1 %v15179_v3 }
 0x607   :  { %5243 = vmatprep.subr.bf16.mxu1 %v15184_v4 }
 0x60a   :  { %5244 = vmatpush1.bf16.msra.mxu1 %v15182_v28 }
 0x60b   :  { %5245 = vmatprep.subr.bf16.mxu1 %v15187_v33 }
 0x60e   :  { %5246 = vmatpush1.bf16.msra.mxu1 %v15185_v18 }
 0x60f   :  { %5247 = vmatprep.subr.bf16.mxu1 %v15190_v10 }
 0x612   :  { %5248 = vmatpush1.bf16.msra.mxu1 %v15188_v62 }
 0x613   :  { %5249 = vmatprep.subr.bf16.mxu1 %v15193_v16 }
 0x616   :  { %5250 = vmatpush1.bf16.msra.mxu1 %v15191_v27 }
 0x619   :  { %5252 = vmatmul.mubr.bf16.vlgmr.msra.gmra.mrb[24].mxu1 %v5022_v5 }
 0x61a   :  { %5261 = vmatprep.mubr.bf16.mxu1 %v5025_v45 }
 0x621   :  { %5262 = vmatmul.mubr.bf16.gmra.mrb[28].mxu1 %v5024_v42 }
 0x622   :  { %6856 = vmatprep.mubr.f32.mxu1 %v16153_v37 }
 0x6ec   :  { %v5253_v29 = vpop.f32.mrb[24].mxu1 }
 0x6ed   :  { %v18247_v36 = vadd.f32 %v5253_v29, %v17594_v8  ;;  %v5255_v38 = vpop.f32.mrb[25].mxu1 }
 0x6ee   :  { %v18250_v31 = vadd.f32 %v5255_v38, %v17596_v9  ;;  %v5257_v23 = vpop.f32.mrb[26].mxu1 }
 0x6ef   :  { %v18253_v2 = vadd.f32 %v5257_v23, %v17599_v11  ;;  %v5259_v5 = vpop.f32.mrb[27].mxu1  ;;  %v5298_v19 = vmul.f32 %v18247_v36, %v18247_v36 }
 0x6f0   :  { %v18256_v41 = vadd.f32 %v5259_v5, %v17608_v15  ;;  %v5299_v9 = vmul.f32 %v18250_v31, %v18250_v31 }
 0x6f1   :  { %v5280_v56 = vadd.f32 %v18253_v2, %v18247_v36  ;;  %v5300_v8 = vmul.f32 %v18253_v2, %v18253_v2 }
 0x6f2   :  { %v5289_v11 = vadd.f32 %v18256_v41, %v18250_v31  ;;  %v5301_v42 = vmul.f32 %v18256_v41, %v18256_v41 }
 0x6f3   :  { %v5306_v15 = vadd.f32 %v5300_v8, %v5298_v19 }
 0x6f4   :  { %v5315_v40 = vadd.f32 %v5301_v42, %v5299_v9  ;;  %v5263_v45 = vpop.f32.mrb[28].mxu1 }
 0x6f5   :  { %v18271_v43 = vadd.f32 %v5263_v45, %v17620_v30  ;;  %v5265_v48 = vpop.f32.mrb[29].mxu1 }
 0x6f6   :  { %v18274_v52 = vadd.f32 %v5265_v48, %v17622_v32  ;;  %v5267_v59 = vpop.f32.mrb[30].mxu1 }
 0x6f7   :  { %v5281_v63 = vadd.f32 %v18271_v43, %v5280_v56  ;;  %v5302_v17 = vmul.f32 %v18271_v43, %v18271_v43  ;;  %v18280_v21 = vadd.f32 %v5267_v59, %v17624_v50  ;;  %v5269_v1 = vpop.f32.mrb[31].mxu1 }
 0x6f8   :  { %v5290_v61 = vadd.f32 %v18274_v52, %v5289_v11  ;;  %v5303_v30 = vmul.f32 %v18274_v52, %v18274_v52  ;;  %v18286_v22 = vadd.f32 %v5269_v1, %v17629_v46 }
 0x6f9   :  { %v5307_v32 = vadd.f32 %v5306_v15, %v5302_v17  ;;  %v5282_v51 = vadd.f32 %v18280_v21, %v5281_v63  ;;  %v5304_v0 = vmul.f32 %v18280_v21, %v18280_v21 }
 0x6fa   :  { %v5316_v35 = vadd.f32 %v5315_v40, %v5303_v30  ;;  %v5291_v25 = vadd.f32 %v18286_v22, %v5290_v61  ;;  %v5305_v50 = vmul.f32 %v18286_v22, %v18286_v22 }
 0x6fb   :  { %v5283_v12 = vrot.slane %v5282_v51, 4  ;;  %v5308_v13 = vadd.f32 %v5307_v32, %v5304_v0 }
 0x6fc   :  { %v5292_v14 = vrot.slane %v5291_v25, 4  ;;  %v5317_v24 = vadd.f32 %v5316_v35, %v5305_v50 }
 0x6fd   :  { %v5284_v20 = vadd.f32 %v5283_v12, %v5282_v51  ;;  %v5309_v47 = vrot.slane %v5308_v13, 4 }
 0x6fe   :  { %v5293_v46 = vadd.f32 %v5292_v14, %v5291_v25  ;;  %v5318_v26 = vrot.slane %v5317_v24, 4  ;;  %v5385_v14 = vld [vmem:[%s21108_s12] sm:$0x3] }
 0x6ff   :  { %v5285_v49 = vrot.slane %v5284_v20, 2  ;;  %v5310_v3 = vadd.f32 %v5309_v47, %v5308_v13 }
 0x700   :  { %v5294_v4 = vrot.slane %v5293_v46, 2  ;;  %v5319_v28 = vadd.f32 %v5318_v26, %v5317_v24 }
 0x701   :  { %v5286_v33 = vadd.f32 %v5285_v49, %v5284_v20  ;;  %v5311_v18 = vrot.slane %v5310_v3, 2 }
 0x702   :  { %v5295_v10 = vadd.f32 %v5294_v4, %v5293_v46  ;;  %v5320_v62 = vrot.slane %v5319_v28, 2 }
 0x703   :  { %v5287_v16 = vrot.slane %v5286_v33, 1  ;;  %v5312_v27 = vadd.f32 %v5311_v18, %v5310_v3 }
 0x704   :  { %v5296_v29 = vrot.slane %v5295_v10, 1  ;;  %v5321_v38 = vadd.f32 %v5320_v62, %v5319_v28  ;;  %v5390_v28 = vrot.slane %v5385_v14, %v16843_v6 }
 0x705   :  { %v5288_v23 = vadd.f32 %v5287_v16, %v5286_v33  ;;  %v5313_v5 = vrot.slane %v5312_v27, 1  ;;  %v5394_v33 = vrot.slane %v5385_v14, %v16845_v7  ;;  %v15194_v14 = vld [vmem:[%s21105_s5 + $0x100] ss:$8 sps:$4 sm:$0xff]  }
 0x706   :  { %v5297_v19 = vadd.f32 %v5296_v29, %v5295_v10  ;;  %v5322_v56 = vrot.slane %v5321_v38, 1 }
 0x707   :  { %v5314_v8 = vadd.f32 %v5313_v5, %v5312_v27  ;;  %v5324_v9 = vmul.f32 0.03125, %v5288_v23 }
 0x708   :  { %v5323_v11 = vadd.f32 %v5322_v56, %v5321_v38  ;;  %v5325_v42 = vmul.f32 0.03125, %v5297_v19 }
 0x709   :  { %v5326_v15 = vmul.f32 0.03125, %v5314_v8  ;;  %v5328_v40 = vmul.f32 %v5324_v9, %v5324_v9  ;;  %v5334_v45 = vsub.f32 %v18247_v36, %v5324_v9  ;;  %v5336_v48 = vsub.f32 %v18253_v2, %v5324_v9 }
 0x70a   :  { %v5338_v59 = vsub.f32 %v18271_v43, %v5324_v9  ;;  %v5340_v63 = vsub.f32 %v18280_v21, %v5324_v9  ;;  %v5327_v17 = vmul.f32 0.03125, %v5323_v11  ;;  %v5329_v1 = vmul.f32 %v5325_v42, %v5325_v42  ;;  %v2001_v21 = vld [vmem:[%s21106_s10] sm:$0x3] }
 0x70b   :  { %v5330_v61 = vsub.f32 %v5326_v15, %v5328_v40  ;;  %v5335_v30 = vsub.f32 %v18250_v31, %v5325_v42  ;;  %v5337_v32 = vsub.f32 %v18256_v41, %v5325_v42  ;;  %v5339_v51 = vsub.f32 %v18274_v52, %v5325_v42  ;;  %v5342_v41 = vld [vmem:[%s21107_s11] sm:$0x3] }
 0x70c   :  { %v5331_v0 = vsub.f32 %v5327_v17, %v5329_v1  ;;  %v5341_v35 = vsub.f32 %v18286_v22, %v5325_v42  ;;  %v2006_v22 = vrot.slane %v2001_v21, %v16843_v6  ;;  %v2010_v13 = vrot.slane %v2001_v21, %v16845_v7  ;;  %v15196_v21 = vld [vmem:[%s21105_s5 + $0x104] ss:$8 sps:$4 sm:$0xff]  }
 0x70d   :  { %v5332_v25 = vmax.f32 %v5330_v61, 0.0 }
 0x70e   :  { %v5333_v36 = vmax.f32 %v5331_v0, 0.0  ;;  %v2013_v47 = vadd.f32 %v2006_v22, %v17539_v54  ;;  %v2014_v46 = vadd.f32 %v2010_v13, %v17542_v39  ;;  %v2015_v26 = vadd.f32 %v2006_v22, %v17544_v44 }
 0x70f   :  { %v5343_v50 = vadd.f32 1e-05, %v5332_v25  ;;  %v2016_v49 = vadd.f32 %v2010_v13, %v17547_v55  ;;  %v2017_v18 = vadd.f32 %v2006_v22, %v17549_v53  ;;  %v2019_v10 = vadd.f32 %v2006_v22, %v17551_v57  ;;  %v16086_v22 = vld [vmem:[%s21103_s1 + $0x18] sm:$0xff] }
 0x710   :  { %v5344_v2 = vadd.f32 1e-05, %v5333_v36  ;;  %v2020_v54 = vadd.f32 %v2010_v13, %v17554_v58  ;;  %v2018_v39 = vadd.f32 %v2010_v13, %v17643_v34  ;;  %v16087_v13 = vld [vmem:[%s21103_s1 + $0x98] sm:$0xff] }
 0x711   :  { %16066 = vrsqrt.f32 %v5343_v50 }
 0x712   :  { %16068 = vrsqrt.f32 %v5344_v2  ;;  %v16080_v2 = vld [vmem:[%s21103_s1] sm:$0xff] }
 0x71b   :  { %v16067_v43 = vpop.eup %16066 }
 0x71c   :  { %v16069_v12 = vpop.eup %16068 }
 0x71d   :  { %v5349_v31 = vcombine.low %v16067_v43, %v16069_v12  ;;  %v16081_v43 = vld [vmem:[%s21103_s1 + $0x80] sm:$0xff]  ;;  %v16082_v12 = vld [vmem:[%s21103_s1 + $0x8] sm:$0xff] }
 0x71f   :  { %v5356_v52 = vrot.slane %v5349_v31, %v16827_v60  ;;  %v16083_v31 = vld [vmem:[%s21103_s1 + $0x88] sm:$0xff] }
 0x721   :  { %v5363_v24 = vrot.slane %v5356_v52, %v16827_v60  ;;  %v16085_v52 = vld [vmem:[%s21103_s1 + $0x90] sm:$0xff] }
 0x723   :  { %v5365_v20 = vmul.f32 %v5363_v24, %v5342_v41  ;;  %v16084_v41 = vld [vmem:[%s21103_s1 + $0x10] sm:$0xff]  ;;  %v16088_v24 = vld [vmem:[%s21103_s1 + $0x20] sm:$0xff] }
 0x725   :  { %v5370_v3 = vrot.slane %v5365_v20, %v16843_v6  ;;  %v5374_v4 = vrot.slane %v5365_v20, %v16845_v7  ;;  %v16089_v20 = vld [vmem:[%s21103_s1 + $0xa0] sm:$0xff] }
 0x727   :  { %v5377_v62 = vmul.f32 %v5370_v3, %v5334_v45  ;;  %v5378_v44 = vmul.f32 %v5374_v4, %v5335_v30  ;;  %v5379_v16 = vmul.f32 %v5370_v3, %v5336_v48  ;;  %v5380_v55 = vmul.f32 %v5374_v4, %v5337_v32 }
 0x728   :  { %v5381_v27 = vmul.f32 %v5370_v3, %v5338_v59  ;;  %v5382_v29 = vmul.f32 %v5374_v4, %v5339_v51  ;;  %v5383_v38 = vmul.f32 %v5370_v3, %v5340_v63  ;;  %v5384_v23 = vmul.f32 %v5374_v4, %v5341_v35  ;;  %v15202_v3 = vld [vmem:[%s21105_s5 + $0x124] ss:$8 sps:$4 sm:$0xff]   ;;  %v16092_v4 = vld [vmem:[%s21103_s1 + $0x30] sm:$0xff] }
 0x729   :  { %v5397_v5 = vadd.f32 %v5390_v28, %v5377_v62  ;;  %v5398_v19 = vadd.f32 %v5394_v33, %v5378_v44  ;;  %v5399_v56 = vadd.f32 %v5390_v28, %v5379_v16  ;;  %v5400_v8 = vadd.f32 %v5394_v33, %v5380_v55  ;;  %v15208_v62 = vld [vmem:[%s21105_s5 + $0x144] ss:$8 sps:$4 sm:$0xff]   ;;  %v15206_v16 = vld [vmem:[%s21105_s5 + $0x140] ss:$8 sps:$4 sm:$0xff]   ;;  %v15211_v55 = vld [vmem:[%s21105_s5 + $0x154] ss:$8 sps:$4 sm:$0xff]  }
 0x72a   :  { %v5401_v9 = vadd.f32 %v5390_v28, %v5381_v27  ;;  %v5402_v53 = vadd.f32 %v5394_v33, %v5382_v29  ;;  %v5403_v11 = vadd.f32 %v5390_v28, %v5383_v38  ;;  %v5404_v57 = vadd.f32 %v5394_v33, %v5384_v23  ;;  %v16093_v28 = vld [vmem:[%s21103_s1 + $0xb0] sm:$0xff]  ;;  %v15200_v33 = vld [vmem:[%s21105_s5 + $0x120] ss:$8 sps:$4 sm:$0xff]   ;;  %v15214_v38 = vld [vmem:[%s21105_s5 + $0x164] ss:$8 sps:$4 sm:$0xff]  }
 0x72b   :  { %v18327_v42 = vadd.f32 %v5397_v5, %v2013_v47  ;;  %v18329_v58 = vadd.f32 %v5398_v19, %v2014_v46  ;;  %v18331_v34 = vadd.f32 %v5399_v56, %v2015_v26  ;;  %v18333_v15 = vadd.f32 %v5400_v8, %v2016_v49  ;;  %v15199_v47 = vld [vmem:[%s21105_s5 + $0x114] ss:$8 sps:$4 sm:$0xff]   ;;  %v16090_v46 = vld [vmem:[%s21103_s1 + $0x28] sm:$0xff]  ;;  %v15197_v49 = vld [vmem:[%s21105_s5 + $0x110] ss:$8 sps:$4 sm:$0xff]  }
 0x72c   :  { %v18335_v40 = vadd.f32 %v5401_v9, %v2017_v18  ;;  %v18337_v45 = vadd.f32 %v5402_v53, %v2018_v39  ;;  %v18339_v48 = vadd.f32 %v5403_v11, %v2019_v10  ;;  %v18341_v59 = vadd.f32 %v5404_v57, %v2020_v54  ;;  %v16091_v26 = vld [vmem:[%s21103_s1 + $0xa8] sm:$0xff]  ;;  %v15205_v18 = vld [vmem:[%s21105_s5 + $0x134] ss:$8 sps:$4 sm:$0xff]   ;;  %v15203_v39 = vld [vmem:[%s21105_s5 + $0x130] ss:$8 sps:$4 sm:$0xff]  }
 0x72d   :  { %v5413_v63 = vmax.f32 %v18327_v42, 0.0  ;;  %v5414_v17 = vmax.f32 %v18329_v58, 0.0  ;;  %v5415_v1 = vmax.f32 %v18331_v34, 0.0  ;;  %v5416_v61 = vmax.f32 %v18333_v15, 0.0  ;;  %v16094_v10 = vld [vmem:[%s21103_s1 + $0x38] sm:$0xff]  ;;  %v16096_v44 = vld [vmem:[%s21103_s1 + $0xc0] sm:$0xff] }
 0x72e   :  { %v5418_v30 = vmax.f32 %v18337_v45, 0.0  ;;  %v5420_v32 = vmax.f32 %v18341_v59, 0.0  ;;  %v5417_v35 = vmax.f32 %v18335_v40, 0.0  ;;  %v5419_v25 = vmax.f32 %v18339_v48, 0.0  ;;  %v16095_v54 = vld [vmem:[%s21103_s1 + $0xb8] sm:$0xff]  ;;  %v16097_v27 = vld [vmem:[%s21103_s1 + $0xc8] sm:$0xff] }
 0x72f   :  { %v18353_v51 = vpack.c.bf16 %v5416_v61, %v5414_v17  ;;  %v18359_v0 = vpack.c.bf16 %v5415_v1, %v5413_v63  ;;  %v15209_v29 = vld [vmem:[%s21105_s5 + $0x150] ss:$8 sps:$4 sm:$0xff]   ;;  %v15212_v5 = vld [vmem:[%s21105_s5 + $0x160] ss:$8 sps:$4 sm:$0xff]   ;;  %v15217_v19 = vld [vmem:[%s21105_s5 + $0x174] ss:$8 sps:$4 sm:$0xff]  }
 0x730   :  { %v18367_v36 = vpack.c.bf16 %v5420_v32, %v5418_v30  ;;  %v18379_v50 = vpack.c.bf16 %v5419_v25, %v5417_v35  ;;  %v16098_v23 = vld [vmem:[%s21103_s1 + $0xd0] sm:$0xff]  ;;  %v16099_v56 = vld [vmem:[%s21103_s1 + $0xd8] sm:$0xff]  ;;  %v15220_v9 = vld [vmem:[%s21105_s5 + $0x184] ss:$8 sps:$4 sm:$0xff]  }
 0x731   :  { %14102 = vmatprep.subr.bf16.mxu0 %v18353_v51  ;;  %14134 = vmatprep.subr.bf16.mxu1 %v18353_v51  ;;  %v15215_v8 = vld [vmem:[%s21105_s5 + $0x170] ss:$8 sps:$4 sm:$0xff]   ;;  %v16100_v53 = vld [vmem:[%s21103_s1 + $0xe0] sm:$0xff]  ;;  %v15223_v57 = vld [vmem:[%s21105_s5 + $0x194] ss:$8 sps:$4 sm:$0xff]  }
 0x732   :  { %14104 = vmatpush1.bf16.msra.mxu0 %v18359_v0  ;;  %14136 = vmatpush1.bf16.msra.mxu1 %v18359_v0  ;;  %v15218_v11 = vld [vmem:[%s21105_s5 + $0x180] ss:$8 sps:$4 sm:$0xff]  }
 0x733   :  { %14106 = vmatprep.subr.bf16.mxu0 %v18367_v36  ;;  %14138 = vmatprep.subr.bf16.mxu1 %v18367_v36 }
 0x736   :  { %14108 = vmatpush1.bf16.msra.mxu0 %v18379_v50  ;;  %14140 = vmatpush1.bf16.msra.mxu1 %v18379_v50 }
 0x737   :  { %14110 = vmatprep.subr.bf16.mxu0 %v18353_v51  ;;  %14142 = vmatprep.subr.bf16.mxu1 %v18353_v51 }
 0x739   :  { %12869 = vmatmul.mubr.msk.f32.vlgmr.msra.gmra.mrb[56].mxu0 %vm2025_vm0, %v16080_v2  ;;  %13109 = vmatmul.mubr.msk.f32.vlgmr.msra.gmra.mrb[48].mxu1 %vm2025_vm0, %v16081_v43  ;;  %v16101_v2 = vld [vmem:[%s21103_s1 + $0xe8] sm:$0xff]  ;;  %v15221_v43 = vld [vmem:[%s21105_s5 + $0x190] ss:$8 sps:$4 sm:$0xff]  }
 0x73a   :  { %14112 = vmatpush1.bf16.msra.mxu0 %v18359_v0  ;;  %14144 = vmatpush1.bf16.msra.mxu1 %v18359_v0 }
 0x73b   :  { %14114 = vmatprep.subr.bf16.mxu0 %v18367_v36  ;;  %14146 = vmatprep.subr.bf16.mxu1 %v18367_v36 }
 0x73c   :  { %5491 = vmatprep.mubr.f32.mxu0 %v16153_v37  ;;  %6862 = vmatprep.mubr.f32.mxu1 %v16153_v37 }
 0x73d   :  { %12870 = vmatmul.mubr.msk.f32.gmra.mrb[58].mxu0 %vm2025_vm0, %v16082_v12  ;;  %13110 = vmatmul.mubr.msk.f32.gmra.mrb[50].mxu1 %vm2025_vm0, %v16083_v31  ;;  %v16103_v12 = vld [vmem:[%s21103_s1 + $0xf8] sm:$0xff]  ;;  %v16104_v31 = vld [vmem:[%s21103_s1 + $0x100] sm:$0xff] }
 0x73e   :  { %14116 = vmatpush1.bf16.msra.mxu0 %v18379_v50  ;;  %14148 = vmatpush1.bf16.msra.mxu1 %v18379_v50 }
 0x73f   :  { %14150 = vmatprep.subr.bf16.mxu1 %v18353_v51  ;;  %5497 = vmatprep.mubr.f32.mxu0 %v16153_v37 }
 0x740   :  { %6868 = vmatprep.mubr.f32.mxu1 %v16153_v37  ;;  %5832 = vmatprep.subr.bf16.mxu0 %v15196_v21  ;;  %v16102_v21 = vld [vmem:[%s21103_s1 + $0xf0] sm:$0xff] }
 0x741   :  { %12871 = vmatmul.mubr.msk.f32.gmra.mrb[60].mxu0 %vm2025_vm0, %v16084_v41  ;;  %13111 = vmatmul.mubr.msk.f32.gmra.mrb[52].mxu1 %vm2025_vm0, %v16085_v52  ;;  %v16105_v41 = vld [vmem:[%s21103_s1 + $0x108] sm:$0xff]  ;;  %v16106_v52 = vld [vmem:[%s21103_s1 + $0x110] sm:$0xff] }
 0x742   :  { %5503 = vmatprep.mubr.f32.mxu0 %v16153_v37  ;;  %6874 = vmatprep.mubr.f32.mxu1 %v16153_v37 }
 0x745   :  { %12872 = vmatmul.mubr.msk.f32.gmra.mrb[62].mxu0 %vm2025_vm0, %v16086_v22  ;;  %13112 = vmatmul.mubr.msk.f32.gmra.mrb[54].mxu1 %vm2025_vm0, %v16087_v13  ;;  %v16107_v22 = vld [vmem:[%s21103_s1 + $0x118] sm:$0xff]  ;;  %v15224_v13 = vld [vmem:[%s21105_s5 + $0x1a0] ss:$8 sps:$4 sm:$0xff]  }
 0x746   :  { %5610 = vmatprep.mubr.f32.mxu0 %v16153_v37  ;;  %7203 = vmatprep.mubr.f32.mxu1 %v16153_v37 }
 0x749   :  { %12873 = vmatmul.mubr.msk.f32.vlgmr.msra.gmra.mrb[64].mxu0 %vm2025_vm0, %v16088_v24  ;;  %13177 = vmatmul.mubr.msk.f32.vlgmr.msra.gmra.mrb[56].mxu1 %vm2025_vm0, %v16089_v20  ;;  %v15229_v24 = vld [vmem:[%s21105_s5 + $0x1b4] ss:$8 sps:$4 sm:$0xff]   ;;  %v15227_v20 = vld [vmem:[%s21105_s5 + $0x1b0] ss:$8 sps:$4 sm:$0xff]  }
 0x74a   :  { %14152 = vmatpush1.bf16.msra.mxu1 %v18359_v0  ;;  %5616 = vmatprep.mubr.f32.mxu0 %v16153_v37 }
 0x74b   :  { %14154 = vmatprep.subr.bf16.mxu1 %v18367_v36  ;;  %7209 = vmatprep.mubr.f32.mxu1 %v16153_v37 }
 0x74c   :  { %5833 = vmatpush1.bf16.msra.mxu0 %v15194_v14  ;;  %v15226_v14 = vld [vmem:[%s21105_s5 + $0x1a4] ss:$8 sps:$4 sm:$0xff]  }
 0x74d   :  { %12874 = vmatmul.mubr.msk.f32.gmra.mrb[66].mxu0 %vm2025_vm0, %v16090_v46  ;;  %13178 = vmatmul.mubr.msk.f32.gmra.mrb[58].mxu1 %vm2025_vm0, %v16091_v26  ;;  %v15232_v46 = vld [vmem:[%s21105_s5 + $0x1c4] ss:$8 sps:$4 sm:$0xff]   ;;  %v15235_v26 = vld [vmem:[%s21105_s5 + $0x1d4] ss:$8 sps:$4 sm:$0xff]  }
 0x74e   :  { %14156 = vmatpush1.bf16.msra.mxu1 %v18379_v50  ;;  %5622 = vmatprep.mubr.f32.mxu0 %v16153_v37 }
 0x74f   :  { %14158 = vmatprep.subr.bf16.mxu1 %v18353_v51  ;;  %7215 = vmatprep.mubr.f32.mxu1 %v16153_v37 }
 0x750   :  { %5834 = vmatprep.subr.bf16.mxu0 %v15199_v47  ;;  %v15230_v47 = vld [vmem:[%s21105_s5 + $0x1c0] ss:$8 sps:$4 sm:$0xff]  }
 0x751   :  { %12875 = vmatmul.mubr.msk.f32.gmra.mrb[68].mxu0 %vm2025_vm0, %v16092_v4  ;;  %13179 = vmatmul.mubr.msk.f32.gmra.mrb[60].mxu1 %vm2025_vm0, %v16093_v28  ;;  %v15238_v4 = vld [vmem:[%s21105_s5 + $0x1e4] ss:$8 sps:$4 sm:$0xff]   ;;  %v15241_v28 = vld [vmem:[%s21105_s5 + $0x1f4] ss:$8 sps:$4 sm:$0xff]  }
 0x752   :  { %5628 = vmatprep.mubr.f32.mxu0 %v16153_v37  ;;  %7221 = vmatprep.mubr.f32.mxu1 %v16153_v37 }
 0x753   :  { %5835 = vmatpush1.bf16.msra.mxu0 %v15197_v49  ;;  %v15233_v49 = vld [vmem:[%s21105_s5 + $0x1d0] ss:$8 sps:$4 sm:$0xff]  }
 0x754   :  { %5836 = vmatprep.subr.bf16.mxu0 %v15202_v3  ;;  %v15236_v3 = vld [vmem:[%s21105_s5 + $0x1e0] ss:$8 sps:$4 sm:$0xff]  }
 0x755   :  { %12876 = vmatmul.mubr.msk.f32.gmra.mrb[70].mxu0 %vm2025_vm0, %v16094_v10  ;;  %13180 = vmatmul.mubr.msk.f32.gmra.mrb[62].mxu1 %vm2025_vm0, %v16095_v54 }
 0x756   :  { %7550 = vmatprep.mubr.f32.mxu1 %v16153_v37 }
 0x757   :  { %5837 = vmatpush1.bf16.msra.mxu0 %v15200_v33  ;;  %v15239_v33 = vld [vmem:[%s21105_s5 + $0x1f0] ss:$8 sps:$4 sm:$0xff]  }
 0x758   :  { %5838 = vmatprep.subr.bf16.mxu0 %v15205_v18  ;;  %v15244_v18 = vld [vmem:[%s21105_s5 + $0x4] ss:$8 sps:$4 sm:$0xff]  }
 0x759   :  { %13245 = vmatmul.mubr.msk.f32.vlgmr.msra.gmra.mrb[64].mxu1 %vm2025_vm0, %v16096_v44 }
 0x75a   :  { %14160 = vmatpush1.bf16.msra.mxu1 %v18359_v0  ;;  %7556 = vmatprep.mubr.f32.mxu1 %v16153_v37 }
 0x75b   :  { %14162 = vmatprep.subr.bf16.mxu1 %v18367_v36  ;;  %5839 = vmatpush1.bf16.msra.mxu0 %v15203_v39 }
 0x75c   :  { %5840 = vmatprep.subr.bf16.mxu0 %v15208_v62 }
 0x75d   :  { %13246 = vmatmul.mubr.msk.f32.gmra.mrb[66].mxu1 %vm2025_vm0, %v16097_v27 }
 0x75e   :  { %14164 = vmatpush1.bf16.msra.mxu1 %v18379_v50  ;;  %7562 = vmatprep.mubr.f32.mxu1 %v16153_v37 }
 0x75f   :  { %14166 = vmatprep.subr.bf16.mxu1 %v18353_v51  ;;  %5841 = vmatpush1.bf16.msra.mxu0 %v15206_v16 }
 0x760   :  { %5842 = vmatprep.subr.bf16.mxu0 %v15211_v55 }
 0x761   :  { %13247 = vmatmul.mubr.msk.f32.gmra.mrb[68].mxu1 %vm2025_vm0, %v16098_v23 }
 0x762   :  { %7568 = vmatprep.mubr.f32.mxu1 %v16153_v37 }
 0x763   :  { %5843 = vmatpush1.bf16.msra.mxu0 %v15209_v29 }
 0x764   :  { %5844 = vmatprep.subr.bf16.mxu0 %v15214_v38 }
 0x765   :  { %13248 = vmatmul.mubr.msk.f32.gmra.mrb[70].mxu1 %vm2025_vm0, %v16099_v56 }
 0x766   :  { %7897 = vmatprep.mubr.f32.mxu1 %v16153_v37 }
 0x767   :  { %5845 = vmatpush1.bf16.msra.mxu0 %v15212_v5 }
 0x768   :  { %5846 = vmatprep.subr.bf16.mxu0 %v15217_v19 }
 0x769   :  { %13313 = vmatmul.mubr.msk.f32.vlgmr.msra.gmra.mrb[72].mxu1 %vm2025_vm0, %v16100_v53 }
 0x76a   :  { %14168 = vmatpush1.bf16.msra.mxu1 %v18359_v0  ;;  %7903 = vmatprep.mubr.f32.mxu1 %v16153_v37 }
 0x76b   :  { %14170 = vmatprep.subr.bf16.mxu1 %v18367_v36  ;;  %5847 = vmatpush1.bf16.msra.mxu0 %v15215_v8 }
 0x76c   :  { %5848 = vmatprep.subr.bf16.mxu0 %v15220_v9 }
 0x76d   :  { %13314 = vmatmul.mubr.msk.f32.gmra.mrb[74].mxu1 %vm2025_vm0, %v16101_v2  ;;  %v15247_v2 = vld [vmem:[%s21105_s5 + $0x14] ss:$8 sps:$4 sm:$0xff]  }
 0x76e   :  { %14172 = vmatpush1.bf16.msra.mxu1 %v18379_v50  ;;  %7909 = vmatprep.mubr.f32.mxu1 %v16153_v37 }
 0x76f   :  { %5849 = vmatpush1.bf16.msra.mxu0 %v15218_v11 }
 0x770   :  { %5850 = vmatprep.subr.bf16.mxu0 %v15223_v57  ;;  %v15242_v57 = vld [vmem:[%s21105_s5] ss:$8 sps:$4 sm:$0xff]  }
 0x771   :  { %13315 = vmatmul.mubr.msk.f32.gmra.mrb[76].mxu1 %vm2025_vm0, %v16102_v21 }
 0x772   :  { %7915 = vmatprep.mubr.f32.mxu1 %v16153_v37 }
 0x773   :  { %5851 = vmatpush1.bf16.msra.mxu0 %v15221_v43 }
 0x774   :  { %5852 = vmatprep.subr.bf16.mxu0 %v15226_v14  ;;  %v15248_v14 = vld [vmem:[%s21105_s5 + $0x20] ss:$8 sps:$4 sm:$0xff]  }
 0x775   :  { %13316 = vmatmul.mubr.msk.f32.gmra.mrb[78].mxu1 %vm2025_vm0, %v16103_v12  ;;  %v15245_v12 = vld [vmem:[%s21105_s5 + $0x10] ss:$8 sps:$4 sm:$0xff]  }
 0x776   :  { %8244 = vmatprep.mubr.f32.mxu1 %v16153_v37 }
 0x777   :  { %5853 = vmatpush1.bf16.msra.mxu0 %v15224_v13 }
 0x778   :  { %5854 = vmatprep.subr.bf16.mxu0 %v15229_v24  ;;  %v15253_v24 = vld [vmem:[%s21105_s5 + $0x34] ss:$8 sps:$4 sm:$0xff]  }
 0x779   :  { %13381 = vmatmul.mubr.msk.f32.vlgmr.msra.gmra.mrb[80].mxu1 %vm2025_vm0, %v16104_v31  ;;  %v15250_v31 = vld [vmem:[%s21105_s5 + $0x24] ss:$8 sps:$4 sm:$0xff]  }
 0x77a   :  { %8250 = vmatprep.mubr.f32.mxu1 %v16153_v37 }
 0x77b   :  { %5855 = vmatpush1.bf16.msra.mxu0 %v15227_v20  ;;  %v15251_v20 = vld [vmem:[%s21105_s5 + $0x30] ss:$8 sps:$4 sm:$0xff]  }
 0x77c   :  { %5856 = vmatprep.subr.bf16.mxu0 %v15232_v46  ;;  %v15254_v46 = vld [vmem:[%s21105_s5 + $0x40] ss:$8 sps:$4 sm:$0xff]  }
 0x77d   :  { %13382 = vmatmul.mubr.msk.f32.gmra.mrb[82].mxu1 %vm2025_vm0, %v16105_v41 }
 0x77e   :  { %8256 = vmatprep.mubr.f32.mxu1 %v16153_v37 }
 0x77f   :  { %5857 = vmatpush1.bf16.msra.mxu0 %v15230_v47  ;;  %v15256_v47 = vld [vmem:[%s21105_s5 + $0x44] ss:$8 sps:$4 sm:$0xff]  }
 0x780   :  { %5858 = vmatprep.subr.bf16.mxu0 %v15235_v26  ;;  %v15259_v26 = vld [vmem:[%s21105_s5 + $0x54] ss:$8 sps:$4 sm:$0xff]  }
 0x781   :  { %13383 = vmatmul.mubr.msk.f32.gmra.mrb[84].mxu1 %vm2025_vm0, %v16106_v52 }
 0x782   :  { %8262 = vmatprep.mubr.f32.mxu1 %v16153_v37 }
 0x783   :  { %5859 = vmatpush1.bf16.msra.mxu0 %v15233_v49  ;;  %v15257_v49 = vld [vmem:[%s21105_s5 + $0x50] ss:$8 sps:$4 sm:$0xff]  }
 0x784   :  { %5860 = vmatprep.subr.bf16.mxu0 %v15238_v4  ;;  %v15260_v4 = vld [vmem:[%s21105_s5 + $0x60] ss:$8 sps:$4 sm:$0xff]  }
 0x785   :  { %13384 = vmatmul.mubr.msk.f32.gmra.mrb[86].mxu1 %vm2025_vm0, %v16107_v22 }
 0x786   :  { %8724 = vmatprep.mubr.f32.mxu1 %v16153_v37 }
 0x787   :  { %5861 = vmatpush1.bf16.msra.mxu0 %v15236_v3  ;;  %v15262_v3 = vld [vmem:[%s21105_s5 + $0x64] ss:$8 sps:$4 sm:$0xff]  }
 0x788   :  { %5862 = vmatprep.subr.bf16.mxu0 %v15241_v28  ;;  %v15265_v28 = vld [vmem:[%s21105_s5 + $0x74] ss:$8 sps:$4 sm:$0xff]  }
 0x78b   :  { %5863 = vmatpush1.bf16.msra.mxu0 %v15239_v33  ;;  %v15263_v33 = vld [vmem:[%s21105_s5 + $0x70] ss:$8 sps:$4 sm:$0xff]  }
 0x78c   :  { %6045 = vmatprep.subr.bf16.mxu0 %v15244_v18  ;;  %v15268_v18 = vld [vmem:[%s21105_s5 + $0x84] ss:$8 sps:$4 sm:$0xff]  }
 0x80c   :  { %v18641_v10 = vpop.f32.mrb[56].mxu0 }
 0x80d   :  { %v5489_v54 = vpop.f32.mrb[57].mxu0 }
 0x810   :  { %v18643_v39 = vpop.f32.mrb[58].mxu0 }
 0x811   :  { %v5510_v62 = vpack.c.bf16 %v18643_v39, %v18641_v10  ;;  %v5495_v44 = vpop.f32.mrb[59].mxu0  ;;  %v15290_v10 = vld [vmem:[%s21105_s5 + $0x200] ss:$8 sps:$4 sm:$0xff]   ;;  %v15295_v39 = vld [vmem:[%s21105_s5 + $0x214] ss:$8 sps:$4 sm:$0xff]  }
 0x812   :  { %v5511_v16 = vpack.c.bf16 %v5495_v44, %v5489_v54  ;;  %v15266_v54 = vld [vmem:[%s21105_s5 + $0x80] ss:$8 sps:$4 sm:$0xff]   ;;  %v15271_v44 = vld [vmem:[%s21105_s5 + $0x94] ss:$8 sps:$4 sm:$0xff]  }
 0x814   :  { %v18647_v55 = vpop.f32.mrb[60].mxu0 }
 0x815   :  { %v18649_v27 = vpop.f32.mrb[61].mxu0 }
 0x818   :  { %v18651_v29 = vpop.f32.mrb[62].mxu0 }
 0x819   :  { %v5512_v38 = vpack.c.bf16 %v18651_v29, %v18647_v55  ;;  %v18655_v23 = vpop.f32.mrb[63].mxu0  ;;  %v15293_v55 = vld [vmem:[%s21105_s5 + $0x210] ss:$8 sps:$4 sm:$0xff]   ;;  %v16109_v29 = vld [vmem:[%s21103_s1 + $0x48] sm:$0xff] }
 0x81a   :  { %v5513_v5 = vpack.c.bf16 %v18655_v23, %v18649_v27  ;;  %v15298_v27 = vld [vmem:[%s21105_s5 + $0x224] ss:$8 sps:$4 sm:$0xff]   ;;  %v15301_v23 = vld [vmem:[%s21105_s5 + $0x234] ss:$8 sps:$4 sm:$0xff]  }
 0x81c   :  { %v5612_v19 = vpop.f32.mrb[64].mxu0 }
 0x81d   :  { %v5614_v56 = vpop.f32.mrb[65].mxu0 }
 0x820   :  { %v5618_v8 = vpop.f32.mrb[66].mxu0 }
 0x821   :  { %v5635_v9 = vpack.c.bf16 %v5618_v8, %v5612_v19  ;;  %v5620_v53 = vpop.f32.mrb[67].mxu0  ;;  %v15274_v19 = vld [vmem:[%s21105_s5 + $0xa4] ss:$8 sps:$4 sm:$0xff]   ;;  %v15277_v8 = vld [vmem:[%s21105_s5 + $0xb4] ss:$8 sps:$4 sm:$0xff]  }
 0x822   :  { %v5636_v11 = vpack.c.bf16 %v5620_v53, %v5614_v56  ;;  %v15272_v56 = vld [vmem:[%s21105_s5 + $0xa0] ss:$8 sps:$4 sm:$0xff]   ;;  %v15280_v53 = vld [vmem:[%s21105_s5 + $0xc4] ss:$8 sps:$4 sm:$0xff]  }
 0x824   :  { %5864 = vmatprep.mubr.bf16.mxu0 %v5636_v11  ;;  %v5624_v43 = vpop.f32.mrb[68].mxu0  ;;  %v15278_v11 = vld [vmem:[%s21105_s5 + $0xc0] ss:$8 sps:$4 sm:$0xff]  }
 0x825   :  { %5865 = vmatmul.mubr.bf16.vlgmr.msra.gmra.mrb[72].mxu0 %v5635_v9  ;;  %v5626_v21 = vpop.f32.mrb[69].mxu0  ;;  %v15275_v9 = vld [vmem:[%s21105_s5 + $0xb0] ss:$8 sps:$4 sm:$0xff]  }
 0x826   :  { %6046 = vmatpush1.bf16.msra.mxu0 %v15242_v57  ;;  %v15283_v57 = vld [vmem:[%s21105_s5 + $0xd4] ss:$8 sps:$4 sm:$0xff]  }
 0x827   :  { %6047 = vmatprep.subr.bf16.mxu0 %v15247_v2  ;;  %v15281_v2 = vld [vmem:[%s21105_s5 + $0xd0] ss:$8 sps:$4 sm:$0xff]  }
 0x828   :  { %v5630_v41 = vpop.f32.mrb[70].mxu0 }
 0x829   :  { %v5637_v52 = vpack.c.bf16 %v5630_v41, %v5624_v43  ;;  %v5632_v22 = vpop.f32.mrb[71].mxu0  ;;  %v15286_v43 = vld [vmem:[%s21105_s5 + $0xe4] ss:$8 sps:$4 sm:$0xff]  }
 0x82a   :  { %v5638_v13 = vpack.c.bf16 %v5632_v22, %v5626_v21  ;;  %6048 = vmatpush1.bf16.msra.mxu0 %v15245_v12  ;;  %v15284_v21 = vld [vmem:[%s21105_s5 + $0xe0] ss:$8 sps:$4 sm:$0xff]   ;;  %v15289_v12 = vld [vmem:[%s21105_s5 + $0xf4] ss:$8 sps:$4 sm:$0xff]   ;;  %v15292_v41 = vld [vmem:[%s21105_s5 + $0x204] ss:$8 sps:$4 sm:$0xff]  }
 0x82b   :  { %6049 = vmatprep.subr.bf16.mxu0 %v15250_v31  ;;  %v15287_v31 = vld [vmem:[%s21105_s5 + $0xf0] ss:$8 sps:$4 sm:$0xff]   ;;  %v15304_v22 = vld [vmem:[%s21105_s5 + $0x244] ss:$8 sps:$4 sm:$0xff]  }
 0x82c   :  { %5874 = vmatprep.mubr.bf16.mxu0 %v5638_v13  ;;  %v16111_v13 = vld [vmem:[%s21103_s1 + $0x58] sm:$0xff] }
 0x82d   :  { %5875 = vmatmul.mubr.bf16.gmra.mrb[76].mxu0 %v5637_v52  ;;  %v15299_v52 = vld [vmem:[%s21105_s5 + $0x230] ss:$8 sps:$4 sm:$0xff]  }
 0x82e   :  { %6050 = vmatpush1.bf16.msra.mxu0 %v15248_v14  ;;  %6077 = vmatprep.mubr.bf16.mxu0 %v5511_v16  ;;  %v15269_v16 = vld [vmem:[%s21105_s5 + $0x90] ss:$8 sps:$4 sm:$0xff]   ;;  %v15302_v14 = vld [vmem:[%s21105_s5 + $0x240] ss:$8 sps:$4 sm:$0xff]  }
 0x82f   :  { %6051 = vmatprep.subr.bf16.mxu0 %v15253_v24  ;;  %v15307_v24 = vld [vmem:[%s21105_s5 + $0x254] ss:$8 sps:$4 sm:$0xff]  }
 0x832   :  { %6052 = vmatpush1.bf16.msra.mxu0 %v15251_v20  ;;  %v15305_v20 = vld [vmem:[%s21105_s5 + $0x250] ss:$8 sps:$4 sm:$0xff]  }
 0x833   :  { %6053 = vmatprep.subr.bf16.mxu0 %v15256_v47  ;;  %v15310_v47 = vld [vmem:[%s21105_s5 + $0x264] ss:$8 sps:$4 sm:$0xff]  }
 0x836   :  { %6054 = vmatpush1.bf16.msra.mxu0 %v15254_v46  ;;  %v15308_v46 = vld [vmem:[%s21105_s5 + $0x260] ss:$8 sps:$4 sm:$0xff]  }
 0x837   :  { %6055 = vmatprep.subr.bf16.mxu0 %v15259_v26  ;;  %v15313_v26 = vld [vmem:[%s21105_s5 + $0x274] ss:$8 sps:$4 sm:$0xff]  }
 0x83a   :  { %6056 = vmatpush1.bf16.msra.mxu0 %v15257_v49  ;;  %v15311_v49 = vld [vmem:[%s21105_s5 + $0x270] ss:$8 sps:$4 sm:$0xff]  }
 0x83b   :  { %6057 = vmatprep.subr.bf16.mxu0 %v15262_v3  ;;  %v15316_v3 = vld [vmem:[%s21105_s5 + $0x284] ss:$8 sps:$4 sm:$0xff]  }
 0x83e   :  { %6058 = vmatpush1.bf16.msra.mxu0 %v15260_v4  ;;  %v15314_v4 = vld [vmem:[%s21105_s5 + $0x280] ss:$8 sps:$4 sm:$0xff]  }
 0x83f   :  { %6059 = vmatprep.subr.bf16.mxu0 %v15265_v28  ;;  %v15319_v28 = vld [vmem:[%s21105_s5 + $0x294] ss:$8 sps:$4 sm:$0xff]  }
 0x842   :  { %6060 = vmatpush1.bf16.msra.mxu0 %v15263_v33  ;;  %v15317_v33 = vld [vmem:[%s21105_s5 + $0x290] ss:$8 sps:$4 sm:$0xff]  }
 0x843   :  { %6061 = vmatprep.subr.bf16.mxu0 %v15268_v18  ;;  %v15322_v18 = vld [vmem:[%s21105_s5 + $0x2a4] ss:$8 sps:$4 sm:$0xff]  }
 0x846   :  { %6062 = vmatpush1.bf16.msra.mxu0 %v15266_v54  ;;  %v15320_v54 = vld [vmem:[%s21105_s5 + $0x2a0] ss:$8 sps:$4 sm:$0xff]  }
 0x847   :  { %6063 = vmatprep.subr.bf16.mxu0 %v15271_v44  ;;  %v15325_v44 = vld [vmem:[%s21105_s5 + $0x2b4] ss:$8 sps:$4 sm:$0xff]  }
 0x84a   :  { %6064 = vmatpush1.bf16.msra.mxu0 %v15269_v16  ;;  %v15323_v16 = vld [vmem:[%s21105_s5 + $0x2b0] ss:$8 sps:$4 sm:$0xff]  }
 0x84b   :  { %6065 = vmatprep.subr.bf16.mxu0 %v15274_v19  ;;  %v15328_v19 = vld [vmem:[%s21105_s5 + $0x2c4] ss:$8 sps:$4 sm:$0xff]  }
 0x84e   :  { %6066 = vmatpush1.bf16.msra.mxu0 %v15272_v56  ;;  %v15326_v56 = vld [vmem:[%s21105_s5 + $0x2c0] ss:$8 sps:$4 sm:$0xff]  }
 0x84f   :  { %6067 = vmatprep.subr.bf16.mxu0 %v15277_v8  ;;  %v15331_v8 = vld [vmem:[%s21105_s5 + $0x2d4] ss:$8 sps:$4 sm:$0xff]  }
 0x852   :  { %6068 = vmatpush1.bf16.msra.mxu0 %v15275_v9  ;;  %v15329_v9 = vld [vmem:[%s21105_s5 + $0x2d0] ss:$8 sps:$4 sm:$0xff]  }
 0x853   :  { %6069 = vmatprep.subr.bf16.mxu0 %v15280_v53  ;;  %v15334_v53 = vld [vmem:[%s21105_s5 + $0x2e4] ss:$8 sps:$4 sm:$0xff]  }
 0x856   :  { %6070 = vmatpush1.bf16.msra.mxu0 %v15278_v11  ;;  %v15332_v11 = vld [vmem:[%s21105_s5 + $0x2e0] ss:$8 sps:$4 sm:$0xff]  }
 0x857   :  { %6071 = vmatprep.subr.bf16.mxu0 %v15283_v57  ;;  %v15337_v57 = vld [vmem:[%s21105_s5 + $0x2f4] ss:$8 sps:$4 sm:$0xff]  }
 0x85a   :  { %6072 = vmatpush1.bf16.msra.mxu0 %v15281_v2  ;;  %v15335_v2 = vld [vmem:[%s21105_s5 + $0x2f0] ss:$8 sps:$4 sm:$0xff]  }
 0x85b   :  { %6073 = vmatprep.subr.bf16.mxu0 %v15286_v43 }
 0x85e   :  { %6074 = vmatpush1.bf16.msra.mxu0 %v15284_v21 }
 0x85f   :  { %6075 = vmatprep.subr.bf16.mxu0 %v15289_v12 }
 0x862   :  { %6076 = vmatpush1.bf16.msra.mxu0 %v15287_v31 }
 0x863   :  { %14118 = vmatprep.subr.bf16.mxu0 %v18353_v51 }
 0x865   :  { %6078 = vmatmul.mubr.bf16.vlgmr.msra.gmra.mrb[72].mxu0 %v5510_v62  ;;  %v16108_v62 = vld [vmem:[%s21103_s1 + $0x40] sm:$0xff] }
 0x866   :  { %6087 = vmatprep.mubr.bf16.mxu0 %v5513_v5  ;;  %14120 = vmatpush1.bf16.msra.mxu0 %v18359_v0  ;;  %v16110_v5 = vld [vmem:[%s21103_s1 + $0x50] sm:$0xff] }
 0x867   :  { %14122 = vmatprep.subr.bf16.mxu0 %v18367_v36 }
 0x86a   :  { %14124 = vmatpush1.bf16.msra.mxu0 %v18379_v50 }
 0x86b   :  { %6384 = vmatprep.subr.bf16.mxu0 %v15292_v41 }
 0x86d   :  { %6088 = vmatmul.mubr.bf16.gmra.mrb[76].mxu0 %v5512_v38  ;;  %v15296_v38 = vld [vmem:[%s21105_s5 + $0x220] ss:$8 sps:$4 sm:$0xff]  }
 0x86e   :  { %6162 = vmatprep.mubr.f32.mxu0 %v16153_v37 }
 0x875   :  { %12973 = vmatmul.mubr.msk.f32.vlgmr.msra.gmra.mrb[80].mxu0 %vm2025_vm0, %v16108_v62 }
 0x876   :  { %6385 = vmatpush1.bf16.msra.mxu0 %v15290_v10  ;;  %6168 = vmatprep.mubr.f32.mxu0 %v16153_v37 }
 0x877   :  { %6386 = vmatprep.subr.bf16.mxu0 %v15295_v39 }
 0x879   :  { %12974 = vmatmul.mubr.msk.f32.gmra.mrb[82].mxu0 %vm2025_vm0, %v16109_v29 }
 0x87a   :  { %6387 = vmatpush1.bf16.msra.mxu0 %v15293_v55  ;;  %6174 = vmatprep.mubr.f32.mxu0 %v16153_v37  ;;  %v15340_v55 = vld [vmem:[%s21105_s5 + $0x304] ss:$8 sps:$4 sm:$0xff]  }
 0x87b   :  { %6388 = vmatprep.subr.bf16.mxu0 %v15298_v27 }
 0x87d   :  { %12975 = vmatmul.mubr.msk.f32.gmra.mrb[84].mxu0 %vm2025_vm0, %v16110_v5  ;;  %v15346_v5 = vld [vmem:[%s21105_s5 + $0x324] ss:$8 sps:$4 sm:$0xff]  }
 0x87e   :  { %6389 = vmatpush1.bf16.msra.mxu0 %v15296_v38  ;;  %6180 = vmatprep.mubr.f32.mxu0 %v16153_v37 }
 0x87f   :  { %6390 = vmatprep.subr.bf16.mxu0 %v15301_v23  ;;  %v16112_v23 = vld [vmem:[%s21103_s1 + $0x60] sm:$0xff] }
 0x881   :  { %12976 = vmatmul.mubr.msk.f32.gmra.mrb[86].mxu0 %vm2025_vm0, %v16111_v13  ;;  %v15349_v13 = vld [vmem:[%s21105_s5 + $0x334] ss:$8 sps:$4 sm:$0xff]  }
 0x882   :  { %6391 = vmatpush1.bf16.msra.mxu0 %v15299_v52  ;;  %v16113_v52 = vld [vmem:[%s21103_s1 + $0x68] sm:$0xff] }
 0x883   :  { %6392 = vmatprep.subr.bf16.mxu0 %v15304_v22  ;;  %v15344_v22 = vld [vmem:[%s21105_s5 + $0x320] ss:$8 sps:$4 sm:$0xff]  }
 0x886   :  { %6393 = vmatpush1.bf16.msra.mxu0 %v15302_v14  ;;  %v16114_v14 = vld [vmem:[%s21103_s1 + $0x70] sm:$0xff] }
 0x887   :  { %6394 = vmatprep.subr.bf16.mxu0 %v15307_v24  ;;  %v15347_v24 = vld [vmem:[%s21105_s5 + $0x330] ss:$8 sps:$4 sm:$0xff]  }
 0x88a   :  { %6395 = vmatpush1.bf16.msra.mxu0 %v15305_v20  ;;  %v15352_v20 = vld [vmem:[%s21105_s5 + $0x344] ss:$8 sps:$4 sm:$0xff]  }
 0x88b   :  { %6396 = vmatprep.subr.bf16.mxu0 %v15310_v47  ;;  %v16115_v47 = vld [vmem:[%s21103_s1 + $0x78] sm:$0xff] }
 0x88e   :  { %6397 = vmatpush1.bf16.msra.mxu0 %v15308_v46  ;;  %v15350_v46 = vld [vmem:[%s21105_s5 + $0x340] ss:$8 sps:$4 sm:$0xff]  }
 0x88f   :  { %6398 = vmatprep.subr.bf16.mxu0 %v15313_v26  ;;  %v15355_v26 = vld [vmem:[%s21105_s5 + $0x354] ss:$8 sps:$4 sm:$0xff]  }
 0x892   :  { %6399 = vmatpush1.bf16.msra.mxu0 %v15311_v49  ;;  %v15353_v49 = vld [vmem:[%s21105_s5 + $0x350] ss:$8 sps:$4 sm:$0xff]  }
 0x893   :  { %6400 = vmatprep.subr.bf16.mxu0 %v15316_v3  ;;  %v15358_v3 = vld [vmem:[%s21105_s5 + $0x364] ss:$8 sps:$4 sm:$0xff]  }
 0x896   :  { %6401 = vmatpush1.bf16.msra.mxu0 %v15314_v4  ;;  %v15356_v4 = vld [vmem:[%s21105_s5 + $0x360] ss:$8 sps:$4 sm:$0xff]  }
 0x897   :  { %6402 = vmatprep.subr.bf16.mxu0 %v15319_v28  ;;  %v15361_v28 = vld [vmem:[%s21105_s5 + $0x374] ss:$8 sps:$4 sm:$0xff]  }
 0x89a   :  { %6403 = vmatpush1.bf16.msra.mxu0 %v15317_v33  ;;  %v15359_v33 = vld [vmem:[%s21105_s5 + $0x370] ss:$8 sps:$4 sm:$0xff]  }
 0x89b   :  { %6404 = vmatprep.subr.bf16.mxu0 %v15322_v18  ;;  %v15364_v18 = vld [vmem:[%s21105_s5 + $0x384] ss:$8 sps:$4 sm:$0xff]  }
 0x89e   :  { %6405 = vmatpush1.bf16.msra.mxu0 %v15320_v54  ;;  %v15362_v54 = vld [vmem:[%s21105_s5 + $0x380] ss:$8 sps:$4 sm:$0xff]  }
 0x89f   :  { %6406 = vmatprep.subr.bf16.mxu0 %v15325_v44  ;;  %v15367_v44 = vld [vmem:[%s21105_s5 + $0x394] ss:$8 sps:$4 sm:$0xff]  }
 0x8a2   :  { %6407 = vmatpush1.bf16.msra.mxu0 %v15323_v16  ;;  %v15365_v16 = vld [vmem:[%s21105_s5 + $0x390] ss:$8 sps:$4 sm:$0xff]  }
 0x8a3   :  { %6408 = vmatprep.subr.bf16.mxu0 %v15328_v19  ;;  %v15370_v19 = vld [vmem:[%s21105_s5 + $0x3a4] ss:$8 sps:$4 sm:$0xff]  }
 0x8a6   :  { %6409 = vmatpush1.bf16.msra.mxu0 %v15326_v56  ;;  %v15368_v56 = vld [vmem:[%s21105_s5 + $0x3a0] ss:$8 sps:$4 sm:$0xff]  }
 0x8a7   :  { %6410 = vmatprep.subr.bf16.mxu0 %v15331_v8  ;;  %v15373_v8 = vld [vmem:[%s21105_s5 + $0x3b4] ss:$8 sps:$4 sm:$0xff]  }
 0x8aa   :  { %6411 = vmatpush1.bf16.msra.mxu0 %v15329_v9  ;;  %v15371_v9 = vld [vmem:[%s21105_s5 + $0x3b0] ss:$8 sps:$4 sm:$0xff]  }
 0x8ab   :  { %6412 = vmatprep.subr.bf16.mxu0 %v15334_v53  ;;  %v15376_v53 = vld [vmem:[%s21105_s5 + $0x3c4] ss:$8 sps:$4 sm:$0xff]  }
 0x8ae   :  { %6413 = vmatpush1.bf16.msra.mxu0 %v15332_v11  ;;  %v15374_v11 = vld [vmem:[%s21105_s5 + $0x3c0] ss:$8 sps:$4 sm:$0xff]  }
 0x8af   :  { %6414 = vmatprep.subr.bf16.mxu0 %v15337_v57  ;;  %v15379_v57 = vld [vmem:[%s21105_s5 + $0x3d4] ss:$8 sps:$4 sm:$0xff]  }
 0x8b2   :  { %6415 = vmatpush1.bf16.msra.mxu0 %v15335_v2  ;;  %v15377_v2 = vld [vmem:[%s21105_s5 + $0x3d0] ss:$8 sps:$4 sm:$0xff]  }
 0x8b3   :  { %14126 = vmatprep.subr.bf16.mxu0 %v18353_v51 }
 0x948   :  { %v6164_v43 = vpop.f32.mrb[80].mxu0 }
 0x949   :  { %v6166_v21 = vpop.f32.mrb[81].mxu0 }
 0x94c   :  { %v6170_v12 = vpop.f32.mrb[82].mxu0 }
 0x94d   :  { %v6187_v31 = vpack.c.bf16 %v6170_v12, %v6164_v43  ;;  %v6172_v41 = vpop.f32.mrb[83].mxu0  ;;  %v15382_v43 = vld [vmem:[%s21105_s5 + $0x3e4] ss:$8 sps:$4 sm:$0xff]   ;;  %v15385_v12 = vld [vmem:[%s21105_s5 + $0x3f4] ss:$8 sps:$4 sm:$0xff]  }
 0x94e   :  { %v6188_v10 = vpack.c.bf16 %v6172_v41, %v6166_v21  ;;  %v15380_v21 = vld [vmem:[%s21105_s5 + $0x3e0] ss:$8 sps:$4 sm:$0xff]   ;;  %v15388_v41 = vld [vmem:[%s21105_s5 + $0x404] ss:$8 sps:$4 sm:$0xff]  }
 0x950   :  { %v6176_v39 = vpop.f32.mrb[84].mxu0  ;;  %6416 = vmatprep.mubr.bf16.mxu0 %v6188_v10  ;;  %v19004_v10 = vpop.f32.mrb[48].mxu1 }
 0x951   :  { %v6178_v62 = vpop.f32.mrb[85].mxu0  ;;  %6417 = vmatmul.mubr.bf16.vlgmr.msra.gmra.mrb[72].mxu0 %v6187_v31  ;;  %v15383_v31 = vld [vmem:[%s21105_s5 + $0x3f0] ss:$8 sps:$4 sm:$0xff]  }
 0x952   :  { %14128 = vmatpush1.bf16.msra.mxu0 %v18359_v0  ;;  %v15338_v0 = vld [vmem:[%s21105_s5 + $0x300] ss:$8 sps:$4 sm:$0xff]  }
 0x953   :  { %14130 = vmatprep.subr.bf16.mxu0 %v18367_v36  ;;  %v15343_v36 = vld [vmem:[%s21105_s5 + $0x314] ss:$8 sps:$4 sm:$0xff]  }
 0x954   :  { %v6182_v27 = vpop.f32.mrb[86].mxu0 }
 0x955   :  { %v6189_v51 = vpack.c.bf16 %v6182_v27, %v6176_v39  ;;  %v6184_v29 = vpop.f32.mrb[87].mxu0  ;;  %v6860_v39 = vpop.f32.mrb[49].mxu1 }
 0x956   :  { %v6190_v38 = vpack.c.bf16 %v6184_v29, %v6178_v62  ;;  %14132 = vmatpush1.bf16.msra.mxu0 %v18379_v50  ;;  %v15341_v50 = vld [vmem:[%s21105_s5 + $0x310] ss:$8 sps:$4 sm:$0xff]   ;;  %v19006_v62 = vpop.f32.mrb[50].mxu1 }
 0x957   :  { %6731 = vmatprep.subr.bf16.mxu0 %v15340_v55  ;;  %v6881_v55 = vpack.c.bf16 %v19006_v62, %v19004_v10  ;;  %v6866_v27 = vpop.f32.mrb[51].mxu1  ;;  %v15440_v10 = vld [vmem:[%s21105_s5 + $0x520] ss:$8 sps:$4 sm:$0xff]   ;;  %v15445_v62 = vld [vmem:[%s21105_s5 + $0x534] ss:$8 sps:$4 sm:$0xff]  }
 0x958   :  { %6426 = vmatprep.mubr.bf16.mxu0 %v6190_v38  ;;  %v19010_v29 = vpop.f32.mrb[52].mxu1 }
 0x959   :  { %6427 = vmatmul.mubr.bf16.gmra.mrb[76].mxu0 %v6189_v51  ;;  %v6882_v51 = vpack.c.bf16 %v6866_v27, %v6860_v39  ;;  %v19012_v38 = vpop.f32.mrb[53].mxu1  ;;  %v15407_v39 = vld [vmem:[%s21105_s5 + $0x470] ss:$8 sps:$4 sm:$0xff]   ;;  %v15412_v27 = vld [vmem:[%s21105_s5 + $0x484] ss:$8 sps:$4 sm:$0xff]  }
 0x95a   :  { %6509 = vmatprep.mubr.f32.mxu0 %v16153_v37 }
 0x961   :  { %13041 = vmatmul.mubr.msk.f32.vlgmr.msra.gmra.mrb[88].mxu0 %vm2025_vm0, %v16112_v23 }
 0x962   :  { %6515 = vmatprep.mubr.f32.mxu0 %v16153_v37  ;;  %6732 = vmatpush1.bf16.msra.mxu0 %v15338_v0  ;;  %v19014_v0 = vpop.f32.mrb[54].mxu1 }
 0x963   :  { %6733 = vmatprep.subr.bf16.mxu0 %v15343_v36  ;;  %v6883_v36 = vpack.c.bf16 %v19014_v0, %v19010_v29  ;;  %v19018_v23 = vpop.f32.mrb[55].mxu1  ;;  %v15446_v29 = vld [vmem:[%s21105_s5 + $0x540] ss:$8 sps:$4 sm:$0xff]   ;;  %v15451_v0 = vld [vmem:[%s21105_s5 + $0x554] ss:$8 sps:$4 sm:$0xff]  }
 0x965   :  { %13042 = vmatmul.mubr.msk.f32.gmra.mrb[90].mxu0 %vm2025_vm0, %v16113_v52 }
 0x966   :  { %6521 = vmatprep.mubr.f32.mxu0 %v16153_v37  ;;  %6734 = vmatpush1.bf16.msra.mxu0 %v15341_v50  ;;  %v6884_v50 = vpack.c.bf16 %v19018_v23, %v19012_v38  ;;  %v15448_v38 = vld [vmem:[%s21105_s5 + $0x544] ss:$8 sps:$4 sm:$0xff]  }
 0x967   :  { %6735 = vmatprep.subr.bf16.mxu0 %v15346_v5  ;;  %v19022_v5 = vpop.f32.mrb[56].mxu1  ;;  %v15454_v23 = vld [vmem:[%s21105_s5 + $0x564] ss:$8 sps:$4 sm:$0xff]  }
 0x968   :  { %v19024_v52 = vpop.f32.mrb[57].mxu1 }
 0x969   :  { %13043 = vmatmul.mubr.msk.f32.gmra.mrb[92].mxu0 %vm2025_vm0, %v16114_v14 }
 0x96a   :  { %6527 = vmatprep.mubr.f32.mxu0 %v16153_v37  ;;  %6736 = vmatpush1.bf16.msra.mxu0 %v15344_v22  ;;  %v19026_v22 = vpop.f32.mrb[58].mxu1 }
 0x96b   :  { %6737 = vmatprep.subr.bf16.mxu0 %v15349_v13  ;;  %v7228_v14 = vpack.c.bf16 %v19026_v22, %v19022_v5  ;;  %v15488_v5 = vld [vmem:[%s21105_s5 + $0x620] ss:$8 sps:$4 sm:$0xff]   ;;  %v15493_v22 = vld [vmem:[%s21105_s5 + $0x634] ss:$8 sps:$4 sm:$0xff]  }
 0x96d   :  { %13044 = vmatmul.mubr.msk.f32.gmra.mrb[94].mxu0 %vm2025_vm0, %v16115_v47 }
 0x96e   :  { %6738 = vmatpush1.bf16.msra.mxu0 %v15347_v24  ;;  %v19030_v24 = vpop.f32.mrb[59].mxu1 }
 0x96f   :  { %6739 = vmatprep.subr.bf16.mxu0 %v15352_v20  ;;  %v7229_v47 = vpack.c.bf16 %v19030_v24, %v19024_v52  ;;  %v15457_v52 = vld [vmem:[%s21105_s5 + $0x574] ss:$8 sps:$4 sm:$0xff]   ;;  %v15455_v24 = vld [vmem:[%s21105_s5 + $0x570] ss:$8 sps:$4 sm:$0xff]  }
 0x972   :  { %6740 = vmatpush1.bf16.msra.mxu0 %v15350_v46 }
 0x973   :  { %6741 = vmatprep.subr.bf16.mxu0 %v15355_v26 }
 0x976   :  { %6742 = vmatpush1.bf16.msra.mxu0 %v15353_v49 }
 0x977   :  { %6743 = vmatprep.subr.bf16.mxu0 %v15358_v3 }
 0x97a   :  { %6744 = vmatpush1.bf16.msra.mxu0 %v15356_v4  ;;  %v15386_v4 = vld [vmem:[%s21105_s5 + $0x400] ss:$8 sps:$4 sm:$0xff]  }
 0x97b   :  { %6745 = vmatprep.subr.bf16.mxu0 %v15361_v28  ;;  %v15391_v28 = vld [vmem:[%s21105_s5 + $0x414] ss:$8 sps:$4 sm:$0xff]  }
 0x97e   :  { %6746 = vmatpush1.bf16.msra.mxu0 %v15359_v33 }
 0x97f   :  { %6747 = vmatprep.subr.bf16.mxu0 %v15364_v18 }
 0x982   :  { %6748 = vmatpush1.bf16.msra.mxu0 %v15362_v54  ;;  %v15389_v54 = vld [vmem:[%s21105_s5 + $0x410] ss:$8 sps:$4 sm:$0xff]  }
 0x983   :  { %6749 = vmatprep.subr.bf16.mxu0 %v15367_v44  ;;  %v15394_v44 = vld [vmem:[%s21105_s5 + $0x424] ss:$8 sps:$4 sm:$0xff]  }
 0x986   :  { %6750 = vmatpush1.bf16.msra.mxu0 %v15365_v16 }
 0x987   :  { %6751 = vmatprep.subr.bf16.mxu0 %v15370_v19 }
 0x98a   :  { %6752 = vmatpush1.bf16.msra.mxu0 %v15368_v56 }
 0x98b   :  { %6753 = vmatprep.subr.bf16.mxu0 %v15373_v8  ;;  %v15392_v8 = vld [vmem:[%s21105_s5 + $0x420] ss:$8 sps:$4 sm:$0xff]  }
 0x98e   :  { %6754 = vmatpush1.bf16.msra.mxu0 %v15371_v9 }
 0x98f   :  { %6755 = vmatprep.subr.bf16.mxu0 %v15376_v53  ;;  %v15397_v53 = vld [vmem:[%s21105_s5 + $0x434] ss:$8 sps:$4 sm:$0xff]  }
 0x992   :  { %6756 = vmatpush1.bf16.msra.mxu0 %v15374_v11  ;;  %v15395_v11 = vld [vmem:[%s21105_s5 + $0x430] ss:$8 sps:$4 sm:$0xff]  }
 0x993   :  { %6757 = vmatprep.subr.bf16.mxu0 %v15379_v57  ;;  %v15400_v57 = vld [vmem:[%s21105_s5 + $0x444] ss:$8 sps:$4 sm:$0xff]  }
 0x996   :  { %6758 = vmatpush1.bf16.msra.mxu0 %v15377_v2  ;;  %v15398_v2 = vld [vmem:[%s21105_s5 + $0x440] ss:$8 sps:$4 sm:$0xff]  }
 0x997   :  { %6759 = vmatprep.subr.bf16.mxu0 %v15382_v43  ;;  %v15403_v43 = vld [vmem:[%s21105_s5 + $0x454] ss:$8 sps:$4 sm:$0xff]  }
 0x99a   :  { %6760 = vmatpush1.bf16.msra.mxu0 %v15380_v21  ;;  %v15401_v21 = vld [vmem:[%s21105_s5 + $0x450] ss:$8 sps:$4 sm:$0xff]  }
 0x99b   :  { %6761 = vmatprep.subr.bf16.mxu0 %v15385_v12  ;;  %v15406_v12 = vld [vmem:[%s21105_s5 + $0x464] ss:$8 sps:$4 sm:$0xff]  }
 0x99e   :  { %6762 = vmatpush1.bf16.msra.mxu0 %v15383_v31  ;;  %v15404_v31 = vld [vmem:[%s21105_s5 + $0x460] ss:$8 sps:$4 sm:$0xff]  }
 0x99f   :  { %7078 = vmatprep.subr.bf16.mxu0 %v15388_v41  ;;  %v15409_v41 = vld [vmem:[%s21105_s5 + $0x474] ss:$8 sps:$4 sm:$0xff]  }
 0xa34   :  { %v6511_v13 = vpop.f32.mrb[88].mxu0 }
 0xa35   :  { %v6513_v20 = vpop.f32.mrb[89].mxu0 }
 0xa38   :  { %v6517_v46 = vpop.f32.mrb[90].mxu0 }
 0xa39   :  { %v6534_v26 = vpack.c.bf16 %v6517_v46, %v6511_v13  ;;  %v6519_v49 = vpop.f32.mrb[91].mxu0  ;;  %v15415_v13 = vld [vmem:[%s21105_s5 + $0x494] ss:$8 sps:$4 sm:$0xff]   ;;  %v15418_v46 = vld [vmem:[%s21105_s5 + $0x4a4] ss:$8 sps:$4 sm:$0xff]  }
 0xa3a   :  { %v6535_v3 = vpack.c.bf16 %v6519_v49, %v6513_v20  ;;  %v15413_v20 = vld [vmem:[%s21105_s5 + $0x490] ss:$8 sps:$4 sm:$0xff]   ;;  %v15421_v49 = vld [vmem:[%s21105_s5 + $0x4b4] ss:$8 sps:$4 sm:$0xff]  }
 0xa3c   :  { %6763 = vmatprep.mubr.bf16.mxu0 %v6535_v3  ;;  %v6523_v33 = vpop.f32.mrb[92].mxu0  ;;  %v15419_v3 = vld [vmem:[%s21105_s5 + $0x4b0] ss:$8 sps:$4 sm:$0xff]  }
 0xa3d   :  { %6764 = vmatmul.mubr.bf16.vlgmr.msra.gmra.mrb[72].mxu0 %v6534_v26  ;;  %v6525_v18 = vpop.f32.mrb[93].mxu0  ;;  %v15416_v26 = vld [vmem:[%s21105_s5 + $0x4a0] ss:$8 sps:$4 sm:$0xff]  }
 0xa3e   :  { %7079 = vmatpush1.bf16.msra.mxu0 %v15386_v4  ;;  %v19103_v4 = vpop.f32.mrb[60].mxu1 }
 0xa3f   :  { %7080 = vmatprep.subr.bf16.mxu0 %v15391_v28  ;;  %v15424_v28 = vld [vmem:[%s21105_s5 + $0x4c4] ss:$8 sps:$4 sm:$0xff]  }
 0xa40   :  { %v6529_v16 = vpop.f32.mrb[94].mxu0 }
 0xa41   :  { %v6536_v19 = vpack.c.bf16 %v6529_v16, %v6523_v33  ;;  %v6531_v56 = vpop.f32.mrb[95].mxu0  ;;  %v19108_v33 = vpop.f32.mrb[61].mxu1 }
 0xa42   :  { %7081 = vmatpush1.bf16.msra.mxu0 %v15389_v54  ;;  %v6537_v9 = vpack.c.bf16 %v6531_v56, %v6525_v18  ;;  %v15422_v18 = vld [vmem:[%s21105_s5 + $0x4c0] ss:$8 sps:$4 sm:$0xff]   ;;  %v19113_v54 = vpop.f32.mrb[62].mxu1 }
 0xa43   :  { %7082 = vmatprep.subr.bf16.mxu0 %v15394_v44  ;;  %v15427_v44 = vld [vmem:[%s21105_s5 + $0x4d4] ss:$8 sps:$4 sm:$0xff]   ;;  %v7230_v16 = vpack.c.bf16 %v19113_v54, %v19103_v4  ;;  %v15494_v4 = vld [vmem:[%s21105_s5 + $0x640] ss:$8 sps:$4 sm:$0xff]  }
 0xa44   :  { %6773 = vmatprep.mubr.bf16.mxu0 %v6537_v9  ;;  %v15430_v9 = vld [vmem:[%s21105_s5 + $0x4e4] ss:$8 sps:$4 sm:$0xff]   ;;  %v15499_v54 = vld [vmem:[%s21105_s5 + $0x654] ss:$8 sps:$4 sm:$0xff]  }
 0xa45   :  { %6774 = vmatmul.mubr.bf16.gmra.mrb[76].mxu0 %v6536_v19  ;;  %v19120_v19 = vpop.f32.mrb[63].mxu1 }
 0xa46   :  { %7083 = vmatpush1.bf16.msra.mxu0 %v15392_v8  ;;  %7110 = vmatprep.mubr.bf16.mxu0 %v6882_v51  ;;  %v15410_v51 = vld [vmem:[%s21105_s5 + $0x480] ss:$8 sps:$4 sm:$0xff]   ;;  %v7231_v56 = vpack.c.bf16 %v19120_v19, %v19108_v33  ;;  %v15425_v8 = vld [vmem:[%s21105_s5 + $0x4d0] ss:$8 sps:$4 sm:$0xff]   ;;  %v15496_v33 = vld [vmem:[%s21105_s5 + $0x644] ss:$8 sps:$4 sm:$0xff]  }
 0xa47   :  { %7084 = vmatprep.subr.bf16.mxu0 %v15397_v53  ;;  %v19130_v53 = vpop.f32.mrb[64].mxu1  ;;  %v15502_v19 = vld [vmem:[%s21105_s5 + $0x664] ss:$8 sps:$4 sm:$0xff]  }
 0xa4a   :  { %7085 = vmatpush1.bf16.msra.mxu0 %v15395_v11  ;;  %v15428_v11 = vld [vmem:[%s21105_s5 + $0x4e0] ss:$8 sps:$4 sm:$0xff]  }
 0xa4b   :  { %7086 = vmatprep.subr.bf16.mxu0 %v15400_v57  ;;  %v19135_v57 = vpop.f32.mrb[65].mxu1 }
 0xa4e   :  { %7087 = vmatpush1.bf16.msra.mxu0 %v15398_v2  ;;  %v15433_v2 = vld [vmem:[%s21105_s5 + $0x4f4] ss:$8 sps:$4 sm:$0xff]  }
 0xa4f   :  { %7088 = vmatprep.subr.bf16.mxu0 %v15403_v43  ;;  %v19140_v43 = vpop.f32.mrb[66].mxu1 }
 0xa52   :  { %7089 = vmatpush1.bf16.msra.mxu0 %v15401_v21  ;;  %v7575_v21 = vpack.c.bf16 %v19140_v43, %v19130_v53  ;;  %v15536_v53 = vld [vmem:[%s21105_s5 + $0x720] ss:$8 sps:$4 sm:$0xff]   ;;  %v15541_v43 = vld [vmem:[%s21105_s5 + $0x734] ss:$8 sps:$4 sm:$0xff]  }
 0xa53   :  { %7090 = vmatprep.subr.bf16.mxu0 %v15406_v12  ;;  %v19144_v12 = vpop.f32.mrb[67].mxu1 }
 0xa56   :  { %7091 = vmatpush1.bf16.msra.mxu0 %v15404_v31  ;;  %v7576_v31 = vpack.c.bf16 %v19144_v12, %v19135_v57  ;;  %v15505_v57 = vld [vmem:[%s21105_s5 + $0x674] ss:$8 sps:$4 sm:$0xff]   ;;  %v15503_v12 = vld [vmem:[%s21105_s5 + $0x670] ss:$8 sps:$4 sm:$0xff]  }
 0xa57   :  { %7092 = vmatprep.subr.bf16.mxu0 %v15409_v41  ;;  %v15431_v41 = vld [vmem:[%s21105_s5 + $0x4f0] ss:$8 sps:$4 sm:$0xff]  }
 0xa5a   :  { %7093 = vmatpush1.bf16.msra.mxu0 %v15407_v39  ;;  %v15436_v39 = vld [vmem:[%s21105_s5 + $0x504] ss:$8 sps:$4 sm:$0xff]  }
 0xa5b   :  { %7094 = vmatprep.subr.bf16.mxu0 %v15412_v27  ;;  %v15434_v27 = vld [vmem:[%s21105_s5 + $0x500] ss:$8 sps:$4 sm:$0xff]  }
 0xa5e   :  { %7095 = vmatpush1.bf16.msra.mxu0 %v15410_v51  ;;  %v15439_v51 = vld [vmem:[%s21105_s5 + $0x514] ss:$8 sps:$4 sm:$0xff]  }
 0xa5f   :  { %7096 = vmatprep.subr.bf16.mxu0 %v15415_v13  ;;  %v15437_v13 = vld [vmem:[%s21105_s5 + $0x510] ss:$8 sps:$4 sm:$0xff]  }
 0xa62   :  { %7097 = vmatpush1.bf16.msra.mxu0 %v15413_v20  ;;  %v15442_v20 = vld [vmem:[%s21105_s5 + $0x524] ss:$8 sps:$4 sm:$0xff]  }
 0xa63   :  { %7098 = vmatprep.subr.bf16.mxu0 %v15418_v46  ;;  %v15458_v46 = vld [vmem:[%s21105_s5 + $0x580] ss:$8 sps:$4 sm:$0xff]  }
 0xa66   :  { %7099 = vmatpush1.bf16.msra.mxu0 %v15416_v26  ;;  %v15463_v26 = vld [vmem:[%s21105_s5 + $0x594] ss:$8 sps:$4 sm:$0xff]  }
 0xa67   :  { %7100 = vmatprep.subr.bf16.mxu0 %v15421_v49  ;;  %v15461_v49 = vld [vmem:[%s21105_s5 + $0x590] ss:$8 sps:$4 sm:$0xff]  }
 0xa6a   :  { %7101 = vmatpush1.bf16.msra.mxu0 %v15419_v3  ;;  %v15466_v3 = vld [vmem:[%s21105_s5 + $0x5a4] ss:$8 sps:$4 sm:$0xff]  }
 0xa6b   :  { %7102 = vmatprep.subr.bf16.mxu0 %v15424_v28  ;;  %v15464_v28 = vld [vmem:[%s21105_s5 + $0x5a0] ss:$8 sps:$4 sm:$0xff]  }
 0xa6e   :  { %7103 = vmatpush1.bf16.msra.mxu0 %v15422_v18  ;;  %v15469_v18 = vld [vmem:[%s21105_s5 + $0x5b4] ss:$8 sps:$4 sm:$0xff]  }
 0xa6f   :  { %7104 = vmatprep.subr.bf16.mxu0 %v15427_v44  ;;  %v15467_v44 = vld [vmem:[%s21105_s5 + $0x5b0] ss:$8 sps:$4 sm:$0xff]  }
 0xa72   :  { %7105 = vmatpush1.bf16.msra.mxu0 %v15425_v8  ;;  %v19235_v8 = vpop.f32.mrb[68].mxu1 }
 0xa73   :  { %7106 = vmatprep.subr.bf16.mxu0 %v15430_v9  ;;  %v15472_v9 = vld [vmem:[%s21105_s5 + $0x5c4] ss:$8 sps:$4 sm:$0xff]  }
 0xa76   :  { %7107 = vmatpush1.bf16.msra.mxu0 %v15428_v11  ;;  %v19240_v11 = vpop.f32.mrb[69].mxu1 }
 0xa77   :  { %7108 = vmatprep.subr.bf16.mxu0 %v15433_v2  ;;  %v15470_v2 = vld [vmem:[%s21105_s5 + $0x5c0] ss:$8 sps:$4 sm:$0xff]  }
 0xa7a   :  { %7109 = vmatpush1.bf16.msra.mxu0 %v15431_v41  ;;  %v19245_v41 = vpop.f32.mrb[70].mxu1 }
 0xa7b   :  { %7425 = vmatprep.subr.bf16.mxu0 %v15436_v39  ;;  %v15475_v39 = vld [vmem:[%s21105_s5 + $0x5d4] ss:$8 sps:$4 sm:$0xff]  }
 0xa7d   :  { %7111 = vmatmul.mubr.bf16.vlgmr.msra.gmra.mrb[72].mxu0 %v6881_v55  ;;  %v15443_v55 = vld [vmem:[%s21105_s5 + $0x530] ss:$8 sps:$4 sm:$0xff]  }
 0xa7e   :  { %7426 = vmatpush1.bf16.msra.mxu0 %v15434_v27  ;;  %7120 = vmatprep.mubr.bf16.mxu0 %v6884_v50  ;;  %v15452_v50 = vld [vmem:[%s21105_s5 + $0x560] ss:$8 sps:$4 sm:$0xff]   ;;  %v7577_v27 = vpack.c.bf16 %v19245_v41, %v19235_v8  ;;  %v15547_v41 = vld [vmem:[%s21105_s5 + $0x754] ss:$8 sps:$4 sm:$0xff]  }
 0xa7f   :  { %7427 = vmatprep.subr.bf16.mxu0 %v15439_v51  ;;  %v19252_v51 = vpop.f32.mrb[71].mxu1  ;;  %v15542_v8 = vld [vmem:[%s21105_s5 + $0x740] ss:$8 sps:$4 sm:$0xff]  }
 0xa82   :  { %7428 = vmatpush1.bf16.msra.mxu0 %v15437_v13  ;;  %v7578_v13 = vpack.c.bf16 %v19252_v51, %v19240_v11  ;;  %v15544_v11 = vld [vmem:[%s21105_s5 + $0x744] ss:$8 sps:$4 sm:$0xff]  }
 0xa83   :  { %7429 = vmatprep.subr.bf16.mxu0 %v15442_v20  ;;  %v15473_v20 = vld [vmem:[%s21105_s5 + $0x5d0] ss:$8 sps:$4 sm:$0xff]   ;;  %v15550_v51 = vld [vmem:[%s21105_s5 + $0x764] ss:$8 sps:$4 sm:$0xff]  }
 0xa85   :  { %7121 = vmatmul.mubr.bf16.gmra.mrb[76].mxu0 %v6883_v36  ;;  %v15449_v36 = vld [vmem:[%s21105_s5 + $0x550] ss:$8 sps:$4 sm:$0xff]  }
 0xa86   :  { %7430 = vmatpush1.bf16.msra.mxu0 %v15440_v10  ;;  %7457 = vmatprep.mubr.bf16.mxu0 %v7229_v47  ;;  %v15460_v47 = vld [vmem:[%s21105_s5 + $0x584] ss:$8 sps:$4 sm:$0xff]  }
 0xa87   :  { %7431 = vmatprep.subr.bf16.mxu0 %v15445_v62  ;;  %v15478_v10 = vld [vmem:[%s21105_s5 + $0x5e4] ss:$8 sps:$4 sm:$0xff]   ;;  %v19262_v62 = vpop.f32.mrb[72].mxu1 }
 0xa8a   :  { %7432 = vmatpush1.bf16.msra.mxu0 %v15443_v55  ;;  %v15476_v55 = vld [vmem:[%s21105_s5 + $0x5e0] ss:$8 sps:$4 sm:$0xff]  }
 0xa8b   :  { %7433 = vmatprep.subr.bf16.mxu0 %v15448_v38  ;;  %v19267_v38 = vpop.f32.mrb[73].mxu1 }
 0xa8e   :  { %7434 = vmatpush1.bf16.msra.mxu0 %v15446_v29  ;;  %v15481_v29 = vld [vmem:[%s21105_s5 + $0x5f4] ss:$8 sps:$4 sm:$0xff]  }
 0xa8f   :  { %7435 = vmatprep.subr.bf16.mxu0 %v15451_v0  ;;  %v19272_v0 = vpop.f32.mrb[74].mxu1 }
 0xa92   :  { %7436 = vmatpush1.bf16.msra.mxu0 %v15449_v36  ;;  %v7922_v36 = vpack.c.bf16 %v19272_v0, %v19262_v62  ;;  %v15584_v62 = vld [vmem:[%s21105_s5 + $0x820] ss:$8 sps:$4 sm:$0xff]   ;;  %v15589_v0 = vld [vmem:[%s21105_s5 + $0x834] ss:$8 sps:$4 sm:$0xff]  }
 0xa93   :  { %7437 = vmatprep.subr.bf16.mxu0 %v15454_v23  ;;  %v19276_v23 = vpop.f32.mrb[75].mxu1 }
 0xa96   :  { %7438 = vmatpush1.bf16.msra.mxu0 %v15452_v50  ;;  %v7923_v50 = vpack.c.bf16 %v19276_v23, %v19267_v38  ;;  %v15553_v38 = vld [vmem:[%s21105_s5 + $0x774] ss:$8 sps:$4 sm:$0xff]   ;;  %v15551_v23 = vld [vmem:[%s21105_s5 + $0x770] ss:$8 sps:$4 sm:$0xff]  }
 0xa97   :  { %7439 = vmatprep.subr.bf16.mxu0 %v15457_v52  ;;  %v15479_v52 = vld [vmem:[%s21105_s5 + $0x5f0] ss:$8 sps:$4 sm:$0xff]  }
 0xa9a   :  { %7440 = vmatpush1.bf16.msra.mxu0 %v15455_v24  ;;  %v15484_v24 = vld [vmem:[%s21105_s5 + $0x604] ss:$8 sps:$4 sm:$0xff]  }
 0xa9b   :  { %7441 = vmatprep.subr.bf16.mxu0 %v15460_v47  ;;  %v15482_v47 = vld [vmem:[%s21105_s5 + $0x600] ss:$8 sps:$4 sm:$0xff]  }
 0xa9e   :  { %7442 = vmatpush1.bf16.msra.mxu0 %v15458_v46  ;;  %v15487_v46 = vld [vmem:[%s21105_s5 + $0x614] ss:$8 sps:$4 sm:$0xff]  }
 0xa9f   :  { %7443 = vmatprep.subr.bf16.mxu0 %v15463_v26  ;;  %v15485_v26 = vld [vmem:[%s21105_s5 + $0x610] ss:$8 sps:$4 sm:$0xff]  }
 0xaa2   :  { %7444 = vmatpush1.bf16.msra.mxu0 %v15461_v49  ;;  %v15490_v49 = vld [vmem:[%s21105_s5 + $0x624] ss:$8 sps:$4 sm:$0xff]  }
 0xaa3   :  { %7445 = vmatprep.subr.bf16.mxu0 %v15466_v3  ;;  %v15506_v3 = vld [vmem:[%s21105_s5 + $0x680] ss:$8 sps:$4 sm:$0xff]  }
 0xaa6   :  { %7446 = vmatpush1.bf16.msra.mxu0 %v15464_v28  ;;  %v15511_v28 = vld [vmem:[%s21105_s5 + $0x694] ss:$8 sps:$4 sm:$0xff]  }
 0xaa7   :  { %7447 = vmatprep.subr.bf16.mxu0 %v15469_v18  ;;  %v15509_v18 = vld [vmem:[%s21105_s5 + $0x690] ss:$8 sps:$4 sm:$0xff]  }
 0xaaa   :  { %7448 = vmatpush1.bf16.msra.mxu0 %v15467_v44  ;;  %v15514_v44 = vld [vmem:[%s21105_s5 + $0x6a4] ss:$8 sps:$4 sm:$0xff]  }
 0xaab   :  { %7449 = vmatprep.subr.bf16.mxu0 %v15472_v9  ;;  %v15512_v9 = vld [vmem:[%s21105_s5 + $0x6a0] ss:$8 sps:$4 sm:$0xff]  }
 0xaae   :  { %7450 = vmatpush1.bf16.msra.mxu0 %v15470_v2  ;;  %v15517_v2 = vld [vmem:[%s21105_s5 + $0x6b4] ss:$8 sps:$4 sm:$0xff]  }
 0xaaf   :  { %7451 = vmatprep.subr.bf16.mxu0 %v15475_v39  ;;  %v15515_v39 = vld [vmem:[%s21105_s5 + $0x6b0] ss:$8 sps:$4 sm:$0xff]  }
 0xab2   :  { %7452 = vmatpush1.bf16.msra.mxu0 %v15473_v20  ;;  %v19367_v20 = vpop.f32.mrb[76].mxu1 }
 0xab3   :  { %7453 = vmatprep.subr.bf16.mxu0 %v15478_v10  ;;  %v15520_v10 = vld [vmem:[%s21105_s5 + $0x6c4] ss:$8 sps:$4 sm:$0xff]  }
 0xab6   :  { %7454 = vmatpush1.bf16.msra.mxu0 %v15476_v55  ;;  %v19372_v55 = vpop.f32.mrb[77].mxu1 }
 0xab7   :  { %7455 = vmatprep.subr.bf16.mxu0 %v15481_v29  ;;  %v19374_v29 = vpop.f32.mrb[78].mxu1 }
 0xaba   :  { %7456 = vmatpush1.bf16.msra.mxu0 %v15479_v52  ;;  %v7924_v52 = vpack.c.bf16 %v19374_v29, %v19367_v20  ;;  %v15590_v20 = vld [vmem:[%s21105_s5 + $0x840] ss:$8 sps:$4 sm:$0xff]   ;;  %v15595_v29 = vld [vmem:[%s21105_s5 + $0x854] ss:$8 sps:$4 sm:$0xff]  }
 0xabb   :  { %7772 = vmatprep.subr.bf16.mxu0 %v15484_v24  ;;  %v15518_v24 = vld [vmem:[%s21105_s5 + $0x6c0] ss:$8 sps:$4 sm:$0xff]  }
 0xabd   :  { %7458 = vmatmul.mubr.bf16.vlgmr.msra.gmra.mrb[72].mxu0 %v7228_v14  ;;  %v15491_v14 = vld [vmem:[%s21105_s5 + $0x630] ss:$8 sps:$4 sm:$0xff]  }
 0xabe   :  { %7773 = vmatpush1.bf16.msra.mxu0 %v15482_v47  ;;  %7467 = vmatprep.mubr.bf16.mxu0 %v7231_v56  ;;  %v15500_v56 = vld [vmem:[%s21105_s5 + $0x660] ss:$8 sps:$4 sm:$0xff]   ;;  %v19381_v47 = vpop.f32.mrb[79].mxu1 }
 0xabf   :  { %7774 = vmatprep.subr.bf16.mxu0 %v15487_v46  ;;  %v15523_v46 = vld [vmem:[%s21105_s5 + $0x6d4] ss:$8 sps:$4 sm:$0xff]  }
 0xac2   :  { %7775 = vmatpush1.bf16.msra.mxu0 %v15485_v26  ;;  %v7925_v26 = vpack.c.bf16 %v19381_v47, %v19372_v55  ;;  %v15592_v55 = vld [vmem:[%s21105_s5 + $0x844] ss:$8 sps:$4 sm:$0xff]  }
 0xac3   :  { %7776 = vmatprep.subr.bf16.mxu0 %v15490_v49  ;;  %v15521_v49 = vld [vmem:[%s21105_s5 + $0x6d0] ss:$8 sps:$4 sm:$0xff]   ;;  %v15598_v47 = vld [vmem:[%s21105_s5 + $0x864] ss:$8 sps:$4 sm:$0xff]  }
 0xac5   :  { %7468 = vmatmul.mubr.bf16.gmra.mrb[76].mxu0 %v7230_v16  ;;  %v15497_v16 = vld [vmem:[%s21105_s5 + $0x650] ss:$8 sps:$4 sm:$0xff]  }
 0xac6   :  { %7777 = vmatpush1.bf16.msra.mxu0 %v15488_v5  ;;  %7804 = vmatprep.mubr.bf16.mxu0 %v7576_v31  ;;  %v15508_v31 = vld [vmem:[%s21105_s5 + $0x684] ss:$8 sps:$4 sm:$0xff]   ;;  %v19391_v5 = vpop.f32.mrb[80].mxu1 }
 0xac7   :  { %7778 = vmatprep.subr.bf16.mxu0 %v15493_v22  ;;  %v15526_v22 = vld [vmem:[%s21105_s5 + $0x6e4] ss:$8 sps:$4 sm:$0xff]  }
 0xaca   :  { %7779 = vmatpush1.bf16.msra.mxu0 %v15491_v14  ;;  %v19396_v14 = vpop.f32.mrb[81].mxu1 }
 0xacb   :  { %7780 = vmatprep.subr.bf16.mxu0 %v15496_v33  ;;  %v15524_v33 = vld [vmem:[%s21105_s5 + $0x6e0] ss:$8 sps:$4 sm:$0xff]  }
 0xace   :  { %7781 = vmatpush1.bf16.msra.mxu0 %v15494_v4  ;;  %v19401_v4 = vpop.f32.mrb[82].mxu1 }
 0xacf   :  { %7782 = vmatprep.subr.bf16.mxu0 %v15499_v54  ;;  %v15529_v54 = vld [vmem:[%s21105_s5 + $0x6f4] ss:$8 sps:$4 sm:$0xff]  }
 0xad2   :  { %7783 = vmatpush1.bf16.msra.mxu0 %v15497_v16  ;;  %v8269_v16 = vpack.c.bf16 %v19401_v4, %v19391_v5 }
 0xad3   :  { %7784 = vmatprep.subr.bf16.mxu0 %v15502_v19  ;;  %v19408_v19 = vpop.f32.mrb[83].mxu1 }
 0xad6   :  { %7785 = vmatpush1.bf16.msra.mxu0 %v15500_v56  ;;  %v8270_v56 = vpack.c.bf16 %v19408_v19, %v19396_v14  ;;  %v15601_v14 = vld [vmem:[%s21105_s5 + $0x874] ss:$8 sps:$4 sm:$0xff]   ;;  %v15599_v19 = vld [vmem:[%s21105_s5 + $0x870] ss:$8 sps:$4 sm:$0xff]  }
 0xad7   :  { %7786 = vmatprep.subr.bf16.mxu0 %v15505_v57  ;;  %v15527_v57 = vld [vmem:[%s21105_s5 + $0x6f0] ss:$8 sps:$4 sm:$0xff]  }
 0xada   :  { %7787 = vmatpush1.bf16.msra.mxu0 %v15503_v12  ;;  %v19415_v12 = vpop.f32.mrb[84].mxu1 }
 0xadb   :  { %7788 = vmatprep.subr.bf16.mxu0 %v15508_v31  ;;  %v15532_v31 = vld [vmem:[%s21105_s5 + $0x704] ss:$8 sps:$4 sm:$0xff]  }
 0xade   :  { %7789 = vmatpush1.bf16.msra.mxu0 %v15506_v3  ;;  %v19420_v3 = vpop.f32.mrb[85].mxu1 }
 0xadf   :  { %7790 = vmatprep.subr.bf16.mxu0 %v15511_v28  ;;  %v15530_v28 = vld [vmem:[%s21105_s5 + $0x700] ss:$8 sps:$4 sm:$0xff]  }
 0xae2   :  { %7791 = vmatpush1.bf16.msra.mxu0 %v15509_v18  ;;  %v19425_v18 = vpop.f32.mrb[86].mxu1 }
 0xae3   :  { %7792 = vmatprep.subr.bf16.mxu0 %v15514_v44  ;;  %v15535_v44 = vld [vmem:[%s21105_s5 + $0x714] ss:$8 sps:$4 sm:$0xff]  }
 0xae6   :  { %7793 = vmatpush1.bf16.msra.mxu0 %v15512_v9  ;;  %v8271_v9 = vpack.c.bf16 %v19425_v18, %v19415_v12 }
 0xae7   :  { %7794 = vmatprep.subr.bf16.mxu0 %v15517_v2  ;;  %v19432_v2 = vpop.f32.mrb[87].mxu1 }
 0xaea   :  { %7795 = vmatpush1.bf16.msra.mxu0 %v15515_v39  ;;  %v8272_v39 = vpack.c.bf16 %v19432_v2, %v19420_v3 }
 0xaeb   :  { %7796 = vmatprep.subr.bf16.mxu0 %v15520_v10  ;;  %v15533_v10 = vld [vmem:[%s21105_s5 + $0x710] ss:$8 sps:$4 sm:$0xff]  }
 0xaee   :  { %7797 = vmatpush1.bf16.msra.mxu0 %v15518_v24  ;;  %v15538_v24 = vld [vmem:[%s21105_s5 + $0x724] ss:$8 sps:$4 sm:$0xff]  }
 0xaef   :  { %7798 = vmatprep.subr.bf16.mxu0 %v15523_v46  ;;  %v15554_v46 = vld [vmem:[%s21105_s5 + $0x780] ss:$8 sps:$4 sm:$0xff]  }
 0xaf2   :  { %7799 = vmatpush1.bf16.msra.mxu0 %v15521_v49  ;;  %v15559_v49 = vld [vmem:[%s21105_s5 + $0x794] ss:$8 sps:$4 sm:$0xff]  }
 0xaf3   :  { %7800 = vmatprep.subr.bf16.mxu0 %v15526_v22  ;;  %v15557_v22 = vld [vmem:[%s21105_s5 + $0x790] ss:$8 sps:$4 sm:$0xff]  }
 0xaf6   :  { %7801 = vmatpush1.bf16.msra.mxu0 %v15524_v33  ;;  %v15562_v33 = vld [vmem:[%s21105_s5 + $0x7a4] ss:$8 sps:$4 sm:$0xff]  }
 0xaf7   :  { %7802 = vmatprep.subr.bf16.mxu0 %v15529_v54  ;;  %v15560_v54 = vld [vmem:[%s21105_s5 + $0x7a0] ss:$8 sps:$4 sm:$0xff]  }
 0xafa   :  { %7803 = vmatpush1.bf16.msra.mxu0 %v15527_v57  ;;  %v15565_v57 = vld [vmem:[%s21105_s5 + $0x7b4] ss:$8 sps:$4 sm:$0xff]  }
 0xafb   :  { %8119 = vmatprep.subr.bf16.mxu0 %v15532_v31  ;;  %v15563_v31 = vld [vmem:[%s21105_s5 + $0x7b0] ss:$8 sps:$4 sm:$0xff]  }
 0xafd   :  { %7805 = vmatmul.mubr.bf16.vlgmr.msra.gmra.mrb[72].mxu0 %v7575_v21  ;;  %v15539_v21 = vld [vmem:[%s21105_s5 + $0x730] ss:$8 sps:$4 sm:$0xff]  }
 0xafe   :  { %8120 = vmatpush1.bf16.msra.mxu0 %v15530_v28  ;;  %7814 = vmatprep.mubr.bf16.mxu0 %v7578_v13  ;;  %v15548_v13 = vld [vmem:[%s21105_s5 + $0x760] ss:$8 sps:$4 sm:$0xff]   ;;  %v15568_v28 = vld [vmem:[%s21105_s5 + $0x7c4] ss:$8 sps:$4 sm:$0xff]  }
 0xaff   :  { %8121 = vmatprep.subr.bf16.mxu0 %v15535_v44  ;;  %v15566_v44 = vld [vmem:[%s21105_s5 + $0x7c0] ss:$8 sps:$4 sm:$0xff]  }
 0xb02   :  { %8122 = vmatpush1.bf16.msra.mxu0 %v15533_v10  ;;  %v15571_v10 = vld [vmem:[%s21105_s5 + $0x7d4] ss:$8 sps:$4 sm:$0xff]  }
 0xb03   :  { %8123 = vmatprep.subr.bf16.mxu0 %v15538_v24  ;;  %v15569_v24 = vld [vmem:[%s21105_s5 + $0x7d0] ss:$8 sps:$4 sm:$0xff]  }
 0xb05   :  { %7815 = vmatmul.mubr.bf16.gmra.mrb[76].mxu0 %v7577_v27  ;;  %v15545_v27 = vld [vmem:[%s21105_s5 + $0x750] ss:$8 sps:$4 sm:$0xff]  }
 0xb06   :  { %8124 = vmatpush1.bf16.msra.mxu0 %v15536_v53  ;;  %8151 = vmatprep.mubr.bf16.mxu0 %v7923_v50  ;;  %v15556_v50 = vld [vmem:[%s21105_s5 + $0x784] ss:$8 sps:$4 sm:$0xff]  }
 0xb07   :  { %8125 = vmatprep.subr.bf16.mxu0 %v15541_v43  ;;  %v15574_v53 = vld [vmem:[%s21105_s5 + $0x7e4] ss:$8 sps:$4 sm:$0xff]   ;;  %v15572_v43 = vld [vmem:[%s21105_s5 + $0x7e0] ss:$8 sps:$4 sm:$0xff]  }
 0xb0a   :  { %8126 = vmatpush1.bf16.msra.mxu0 %v15539_v21  ;;  %v15577_v21 = vld [vmem:[%s21105_s5 + $0x7f4] ss:$8 sps:$4 sm:$0xff]  }
 0xb0b   :  { %8127 = vmatprep.subr.bf16.mxu0 %v15544_v11  ;;  %v15575_v11 = vld [vmem:[%s21105_s5 + $0x7f0] ss:$8 sps:$4 sm:$0xff]  }
 0xb0e   :  { %8128 = vmatpush1.bf16.msra.mxu0 %v15542_v8  ;;  %v15580_v8 = vld [vmem:[%s21105_s5 + $0x804] ss:$8 sps:$4 sm:$0xff]  }
 0xb0f   :  { %8129 = vmatprep.subr.bf16.mxu0 %v15547_v41  ;;  %v15578_v41 = vld [vmem:[%s21105_s5 + $0x800] ss:$8 sps:$4 sm:$0xff]  }
 0xb12   :  { %8130 = vmatpush1.bf16.msra.mxu0 %v15545_v27  ;;  %v15583_v27 = vld [vmem:[%s21105_s5 + $0x814] ss:$8 sps:$4 sm:$0xff]  }
 0xb13   :  { %8131 = vmatprep.subr.bf16.mxu0 %v15550_v51  ;;  %v15581_v51 = vld [vmem:[%s21105_s5 + $0x810] ss:$8 sps:$4 sm:$0xff]  }
 0xb16   :  { %8132 = vmatpush1.bf16.msra.mxu0 %v15548_v13  ;;  %v15586_v13 = vld [vmem:[%s21105_s5 + $0x824] ss:$8 sps:$4 sm:$0xff]  }
 0xb17   :  { %8133 = vmatprep.subr.bf16.mxu0 %v15553_v38  ;;  %v15602_v38 = vld [vmem:[%s21105_s5 + $0x880] ss:$8 sps:$4 sm:$0xff]  }
 0xb1a   :  { %8134 = vmatpush1.bf16.msra.mxu0 %v15551_v23  ;;  %v15607_v23 = vld [vmem:[%s21105_s5 + $0x894] ss:$8 sps:$4 sm:$0xff]  }
 0xb1b   :  { %8135 = vmatprep.subr.bf16.mxu0 %v15556_v50  ;;  %v15605_v50 = vld [vmem:[%s21105_s5 + $0x890] ss:$8 sps:$4 sm:$0xff]  }
 0xb1e   :  { %8136 = vmatpush1.bf16.msra.mxu0 %v15554_v46  ;;  %v15610_v46 = vld [vmem:[%s21105_s5 + $0x8a4] ss:$8 sps:$4 sm:$0xff]  }
 0xb1f   :  { %8137 = vmatprep.subr.bf16.mxu0 %v15559_v49  ;;  %v15608_v49 = vld [vmem:[%s21105_s5 + $0x8a0] ss:$8 sps:$4 sm:$0xff]  }
 0xb22   :  { %8138 = vmatpush1.bf16.msra.mxu0 %v15557_v22  ;;  %v15613_v22 = vld [vmem:[%s21105_s5 + $0x8b4] ss:$8 sps:$4 sm:$0xff]  }
 0xb23   :  { %8139 = vmatprep.subr.bf16.mxu0 %v15562_v33  ;;  %v15611_v33 = vld [vmem:[%s21105_s5 + $0x8b0] ss:$8 sps:$4 sm:$0xff]  }
 0xb26   :  { %8140 = vmatpush1.bf16.msra.mxu0 %v15560_v54  ;;  %v15616_v54 = vld [vmem:[%s21105_s5 + $0x8c4] ss:$8 sps:$4 sm:$0xff]  }
 0xb27   :  { %8141 = vmatprep.subr.bf16.mxu0 %v15565_v57  ;;  %v15614_v57 = vld [vmem:[%s21105_s5 + $0x8c0] ss:$8 sps:$4 sm:$0xff]  }
 0xb2a   :  { %8142 = vmatpush1.bf16.msra.mxu0 %v15563_v31  ;;  %v15619_v31 = vld [vmem:[%s21105_s5 + $0x8d4] ss:$8 sps:$4 sm:$0xff]  }
 0xb2b   :  { %8143 = vmatprep.subr.bf16.mxu0 %v15568_v28  ;;  %v15617_v28 = vld [vmem:[%s21105_s5 + $0x8d0] ss:$8 sps:$4 sm:$0xff]  }
 0xb2e   :  { %8144 = vmatpush1.bf16.msra.mxu0 %v15566_v44  ;;  %v15622_v44 = vld [vmem:[%s21105_s5 + $0x8e4] ss:$8 sps:$4 sm:$0xff]  }
 0xb2f   :  { %8145 = vmatprep.subr.bf16.mxu0 %v15571_v10  ;;  %v15620_v10 = vld [vmem:[%s21105_s5 + $0x8e0] ss:$8 sps:$4 sm:$0xff]  }
 0xb32   :  { %8146 = vmatpush1.bf16.msra.mxu0 %v15569_v24  ;;  %v15625_v24 = vld [vmem:[%s21105_s5 + $0x8f4] ss:$8 sps:$4 sm:$0xff]  }
 0xb33   :  { %8147 = vmatprep.subr.bf16.mxu0 %v15574_v53  ;;  %v15623_v53 = vld [vmem:[%s21105_s5 + $0x8f0] ss:$8 sps:$4 sm:$0xff]  }
 0xb36   :  { %8148 = vmatpush1.bf16.msra.mxu0 %v15572_v43 }
 0xb37   :  { %8149 = vmatprep.subr.bf16.mxu0 %v15577_v21 }
 0xb3a   :  { %8150 = vmatpush1.bf16.msra.mxu0 %v15575_v11 }
 0xb3b   :  { %8466 = vmatprep.subr.bf16.mxu0 %v15580_v8 }
 0xb3d   :  { %8152 = vmatmul.mubr.bf16.vlgmr.msra.gmra.mrb[72].mxu0 %v7922_v36  ;;  %v15587_v36 = vld [vmem:[%s21105_s5 + $0x830] ss:$8 sps:$4 sm:$0xff]  }
 0xb3e   :  { %8467 = vmatpush1.bf16.msra.mxu0 %v15578_v41  ;;  %8161 = vmatprep.mubr.bf16.mxu0 %v7925_v26  ;;  %v15596_v26 = vld [vmem:[%s21105_s5 + $0x860] ss:$8 sps:$4 sm:$0xff]  }
 0xb3f   :  { %8468 = vmatprep.subr.bf16.mxu0 %v15583_v27 }
 0xb42   :  { %8469 = vmatpush1.bf16.msra.mxu0 %v15581_v51 }
 0xb43   :  { %8470 = vmatprep.subr.bf16.mxu0 %v15586_v13 }
 0xb45   :  { %8162 = vmatmul.mubr.bf16.gmra.mrb[76].mxu0 %v7924_v52  ;;  %v15593_v52 = vld [vmem:[%s21105_s5 + $0x850] ss:$8 sps:$4 sm:$0xff]  }
 0xb46   :  { %8471 = vmatpush1.bf16.msra.mxu0 %v15584_v62  ;;  %8498 = vmatprep.mubr.bf16.mxu0 %v8270_v56  ;;  %v15604_v56 = vld [vmem:[%s21105_s5 + $0x884] ss:$8 sps:$4 sm:$0xff]  }
 0xb47   :  { %8472 = vmatprep.subr.bf16.mxu0 %v15589_v0 }
 0xb4a   :  { %8473 = vmatpush1.bf16.msra.mxu0 %v15587_v36 }
 0xb4b   :  { %8474 = vmatprep.subr.bf16.mxu0 %v15592_v55 }
 0xb4e   :  { %8475 = vmatpush1.bf16.msra.mxu0 %v15590_v20 }
 0xb4f   :  { %8476 = vmatprep.subr.bf16.mxu0 %v15595_v29 }
 0xb52   :  { %8477 = vmatpush1.bf16.msra.mxu0 %v15593_v52 }
 0xb53   :  { %8478 = vmatprep.subr.bf16.mxu0 %v15598_v47 }
 0xb56   :  { %8479 = vmatpush1.bf16.msra.mxu0 %v15596_v26 }
 0xb57   :  { %8480 = vmatprep.subr.bf16.mxu0 %v15601_v14 }
 0xb5a   :  { %8481 = vmatpush1.bf16.msra.mxu0 %v15599_v19 }
 0xb5b   :  { %8482 = vmatprep.subr.bf16.mxu0 %v15604_v56 }
 0xb5e   :  { %8483 = vmatpush1.bf16.msra.mxu0 %v15602_v38 }
 0xb5f   :  { %8484 = vmatprep.subr.bf16.mxu0 %v15607_v23 }
 0xb62   :  { %8485 = vmatpush1.bf16.msra.mxu0 %v15605_v50 }
 0xb63   :  { %8486 = vmatprep.subr.bf16.mxu0 %v15610_v46 }
 0xb66   :  { %8487 = vmatpush1.bf16.msra.mxu0 %v15608_v49 }
 0xb67   :  { %8488 = vmatprep.subr.bf16.mxu0 %v15613_v22 }
 0xb6a   :  { %8489 = vmatpush1.bf16.msra.mxu0 %v15611_v33 }
 0xb6b   :  { %8490 = vmatprep.subr.bf16.mxu0 %v15616_v54 }
 0xb6e   :  { %8491 = vmatpush1.bf16.msra.mxu0 %v15614_v57 }
 0xb6f   :  { %8492 = vmatprep.subr.bf16.mxu0 %v15619_v31 }
 0xb72   :  { %8493 = vmatpush1.bf16.msra.mxu0 %v15617_v28 }
 0xb73   :  { %8494 = vmatprep.subr.bf16.mxu0 %v15622_v44 }
 0xb76   :  { %8495 = vmatpush1.bf16.msra.mxu0 %v15620_v10 }
 0xb77   :  { %8496 = vmatprep.subr.bf16.mxu0 %v15625_v24 }
 0xb7a   :  { %8497 = vmatpush1.bf16.msra.mxu0 %v15623_v53 }
 0xb7d   :  { %8499 = vmatmul.mubr.bf16.vlgmr.msra.gmra.mrb[72].mxu0 %v8269_v16 }
 0xb7e   :  { %8508 = vmatprep.mubr.bf16.mxu0 %v8272_v39 }
 0xb85   :  { %8509 = vmatmul.mubr.bf16.gmra.mrb[76].mxu0 %v8271_v9 }
 0xb86   :  { %10095 = vmatprep.mubr.f32.mxu0 %v16153_v37 }
 0xc50   :  { %v19653_v43 = vpop.f32.mrb[72].mxu0 }
 0xc51   :  { %v19655_v21 = vpop.f32.mrb[73].mxu0  ;;  %v8545_v5 = vmul.f32 %v19653_v43, %v19653_v43 }
 0xc52   :  { %v19657_v11 = vpop.f32.mrb[74].mxu0  ;;  %v8546_v12 = vmul.f32 %v19655_v21, %v19655_v21 }
 0xc53   :  { %v8527_v4 = vadd.f32 %v19657_v11, %v19653_v43  ;;  %v8547_v16 = vmul.f32 %v19657_v11, %v19657_v11  ;;  %v19665_v3 = vpop.f32.mrb[75].mxu0 }
 0xc54   :  { %v8536_v18 = vadd.f32 %v19665_v3, %v19655_v21  ;;  %v8548_v9 = vmul.f32 %v19665_v3, %v19665_v3 }
 0xc55   :  { %v8553_v2 = vadd.f32 %v8547_v16, %v8545_v5 }
 0xc56   :  { %v8562_v39 = vadd.f32 %v8548_v9, %v8546_v12 }
 0xc58   :  { %v19673_v8 = vpop.f32.mrb[76].mxu0 }
 0xc59   :  { %v8528_v41 = vadd.f32 %v8527_v4, %v19673_v8  ;;  %v8549_v27 = vmul.f32 %v19673_v8, %v19673_v8  ;;  %v19678_v51 = vpop.f32.mrb[77].mxu0 }
 0xc5a   :  { %v8537_v13 = vadd.f32 %v8536_v18, %v19678_v51  ;;  %v8550_v62 = vmul.f32 %v19678_v51, %v19678_v51  ;;  %v19683_v0 = vpop.f32.mrb[78].mxu0 }
 0xc5b   :  { %v8554_v36 = vadd.f32 %v8553_v2, %v8549_v27  ;;  %v8529_v55 = vadd.f32 %v8528_v41, %v19683_v0  ;;  %v8551_v20 = vmul.f32 %v19683_v0, %v19683_v0  ;;  %v19688_v29 = vpop.f32.mrb[79].mxu0 }
 0xc5c   :  { %v8563_v52 = vadd.f32 %v8562_v39, %v8550_v62  ;;  %v8538_v47 = vadd.f32 %v8537_v13, %v19688_v29  ;;  %v8552_v26 = vmul.f32 %v19688_v29, %v19688_v29 }
 0xc5d   :  { %v8530_v14 = vrot.slane %v8529_v55, 4  ;;  %v8555_v19 = vadd.f32 %v8554_v36, %v8551_v20 }
 0xc5e   :  { %v8539_v56 = vrot.slane %v8538_v47, 4  ;;  %v8564_v38 = vadd.f32 %v8563_v52, %v8552_v26 }
 0xc5f   :  { %v8531_v23 = vadd.f32 %v8530_v14, %v8529_v55  ;;  %v8556_v50 = vrot.slane %v8555_v19, 4 }
 0xc60   :  { %v8540_v46 = vadd.f32 %v8539_v56, %v8538_v47  ;;  %v8565_v49 = vrot.slane %v8564_v38, 4 }
 0xc61   :  { %v8532_v22 = vrot.slane %v8531_v23, 2  ;;  %v8557_v33 = vadd.f32 %v8556_v50, %v8555_v19 }
 0xc62   :  { %v8541_v54 = vrot.slane %v8540_v46, 2  ;;  %v8566_v57 = vadd.f32 %v8565_v49, %v8564_v38 }
 0xc63   :  { %v8533_v31 = vadd.f32 %v8532_v22, %v8531_v23  ;;  %v8558_v28 = vrot.slane %v8557_v33, 2 }
 0xc64   :  { %v8542_v44 = vadd.f32 %v8541_v54, %v8540_v46  ;;  %v8567_v10 = vrot.slane %v8566_v57, 2 }
 0xc65   :  { %v8534_v24 = vrot.slane %v8533_v31, 1  ;;  %v8559_v53 = vadd.f32 %v8558_v28, %v8557_v33 }
 0xc66   :  { %v8543_v5 = vrot.slane %v8542_v44, 1  ;;  %v8568_v4 = vadd.f32 %v8567_v10, %v8566_v57 }
 0xc67   :  { %v8535_v16 = vadd.f32 %v8534_v24, %v8533_v31  ;;  %v8560_v12 = vrot.slane %v8559_v53, 1 }
 0xc68   :  { %v8544_v18 = vadd.f32 %v8543_v5, %v8542_v44  ;;  %v8569_v9 = vrot.slane %v8568_v4, 1 }
 0xc69   :  { %v8561_v2 = vadd.f32 %v8560_v12, %v8559_v53  ;;  %v8571_v39 = vmul.f32 0.03125, %v8535_v16 }
 0xc6a   :  { %v8570_v41 = vadd.f32 %v8569_v9, %v8568_v4  ;;  %v8572_v27 = vmul.f32 0.03125, %v8544_v18 }
 0xc6b   :  { %v8573_v13 = vmul.f32 0.03125, %v8561_v2  ;;  %v8575_v62 = vmul.f32 %v8571_v39, %v8571_v39  ;;  %v8581_v36 = vsub.f32 %v19653_v43, %v8571_v39  ;;  %v8583_v55 = vsub.f32 %v19657_v11, %v8571_v39 }
 0xc6c   :  { %v8585_v20 = vsub.f32 %v19673_v8, %v8571_v39  ;;  %v8587_v52 = vsub.f32 %v19683_v0, %v8571_v39  ;;  %v8574_v47 = vmul.f32 0.03125, %v8570_v41  ;;  %v8576_v26 = vmul.f32 %v8572_v27, %v8572_v27 }
 0xc6d   :  { %v8577_v14 = vsub.f32 %v8573_v13, %v8575_v62  ;;  %v8582_v19 = vsub.f32 %v19655_v21, %v8572_v27  ;;  %v8584_v56 = vsub.f32 %v19665_v3, %v8572_v27  ;;  %v8586_v38 = vsub.f32 %v19678_v51, %v8572_v27  ;;  %v8589_v21 = vld [vmem:[%s21110_s13] sm:$0x3] }
 0xc6e   :  { %v8578_v23 = vsub.f32 %v8574_v47, %v8576_v26  ;;  %v8588_v50 = vsub.f32 %v19688_v29, %v8572_v27  ;;  %v8632_v51 = vld [vmem:[%s21111_s14] sm:$0x3] }
 0xc6f   :  { %v8579_v46 = vmax.f32 %v8577_v14, 0.0  ;;  %v8637_v31 = vrot.slane %v8632_v51, %v16843_v6  ;;  %v8641_v28 = vrot.slane %v8632_v51, %v16845_v7  ;;  %v15626_v51 = vld [vmem:[%s21109_s6 + $0x100] ss:$8 sps:$4 sm:$0xff]  }
 0xc70   :  { %v8580_v43 = vmax.f32 %v8578_v23, 0.0 }
 0xc71   :  { %v8590_v49 = vadd.f32 1e-05, %v8579_v46  ;;  %v16116_v46 = vld [vmem:[%s21103_s1] sm:$0xff] }
 0xc72   :  { %v8591_v11 = vadd.f32 1e-05, %v8580_v43  ;;  %v16117_v43 = vld [vmem:[%s21103_s1 + $0x80] sm:$0xff] }
 0xc73   :  { %16070 = vrsqrt.f32 %v8590_v49  ;;  %v15628_v49 = vld [vmem:[%s21109_s6 + $0x104] ss:$8 sps:$4 sm:$0xff]  }
 0xc74   :  { %16072 = vrsqrt.f32 %v8591_v11  ;;  %v16118_v11 = vld [vmem:[%s21103_s1 + $0x8] sm:$0xff] }
 0xc7d   :  { %v16071_v8 = vpop.eup %16070 }
 0xc7e   :  { %v16073_v0 = vpop.eup %16072 }
 0xc7f   :  { %v8596_v22 = vcombine.low %v16071_v8, %v16073_v0  ;;  %v16119_v8 = vld [vmem:[%s21103_s1 + $0x88] sm:$0xff]  ;;  %v16120_v0 = vld [vmem:[%s21103_s1 + $0x10] sm:$0xff] }
 0xc81   :  { %v8603_v3 = vrot.slane %v8596_v22, %v16827_v60  ;;  %v16121_v22 = vld [vmem:[%s21103_s1 + $0x90] sm:$0xff] }
 0xc83   :  { %v8610_v29 = vrot.slane %v8603_v3, %v16827_v60  ;;  %v16123_v3 = vld [vmem:[%s21103_s1 + $0x98] sm:$0xff] }
 0xc85   :  { %v8612_v33 = vmul.f32 %v8610_v29, %v8589_v21  ;;  %v16122_v21 = vld [vmem:[%s21103_s1 + $0x18] sm:$0xff]  ;;  %v16124_v29 = vld [vmem:[%s21103_s1 + $0x20] sm:$0xff] }
 0xc87   :  { %v8617_v54 = vrot.slane %v8612_v33, %v16843_v6  ;;  %v8621_v57 = vrot.slane %v8612_v33, %v16845_v7  ;;  %v16125_v33 = vld [vmem:[%s21103_s1 + $0xa0] sm:$0xff] }
 0xc89   :  { %v8624_v44 = vmul.f32 %v8617_v54, %v8581_v36  ;;  %v8625_v10 = vmul.f32 %v8621_v57, %v8582_v19  ;;  %v8626_v24 = vmul.f32 %v8617_v54, %v8583_v55  ;;  %v8627_v53 = vmul.f32 %v8621_v57, %v8584_v56 }
 0xc8a   :  { %v8628_v5 = vmul.f32 %v8617_v54, %v8585_v20  ;;  %v8629_v4 = vmul.f32 %v8621_v57, %v8586_v38  ;;  %v8630_v16 = vmul.f32 %v8617_v54, %v8587_v52  ;;  %v8631_v12 = vmul.f32 %v8621_v57, %v8588_v50  ;;  %v15631_v54 = vld [vmem:[%s21109_s6 + $0x114] ss:$8 sps:$4 sm:$0xff]   ;;  %v16126_v57 = vld [vmem:[%s21103_s1 + $0x28] sm:$0xff] }
 0xc8b   :  { %v8644_v18 = vadd.f32 %v8637_v31, %v8624_v44  ;;  %v8645_v9 = vadd.f32 %v8641_v28, %v8625_v10  ;;  %v8646_v2 = vadd.f32 %v8637_v31, %v8626_v24  ;;  %v8647_v39 = vadd.f32 %v8641_v28, %v8627_v53  ;;  %v15634_v44 = vld [vmem:[%s21109_s6 + $0x124] ss:$8 sps:$4 sm:$0xff]   ;;  %v16128_v10 = vld [vmem:[%s21103_s1 + $0x30] sm:$0xff]  ;;  %v15632_v53 = vld [vmem:[%s21109_s6 + $0x120] ss:$8 sps:$4 sm:$0xff]  }
 0xc8c   :  { %v8648_v41 = vadd.f32 %v8637_v31, %v8628_v5  ;;  %v8649_v27 = vadd.f32 %v8641_v28, %v8629_v4  ;;  %v8650_v13 = vadd.f32 %v8637_v31, %v8630_v16  ;;  %v8651_v62 = vadd.f32 %v8641_v28, %v8631_v12  ;;  %v16127_v31 = vld [vmem:[%s21103_s1 + $0xa8] sm:$0xff]  ;;  %v15629_v28 = vld [vmem:[%s21109_s6 + $0x110] ss:$8 sps:$4 sm:$0xff]   ;;  %v15637_v5 = vld [vmem:[%s21109_s6 + $0x134] ss:$8 sps:$4 sm:$0xff]  }
 0xc8d   :  { %v8652_v47 = vmax.f32 %v8644_v18, 0.0  ;;  %v8653_v26 = vmax.f32 %v8645_v9, 0.0  ;;  %v8654_v14 = vmax.f32 %v8646_v2, 0.0  ;;  %v8655_v23 = vmax.f32 %v8647_v39, 0.0  ;;  %v16129_v24 = vld [vmem:[%s21103_s1 + $0xb0] sm:$0xff]  ;;  %v16130_v4 = vld [vmem:[%s21103_s1 + $0x38] sm:$0xff] }
 0xc8e   :  { %v8656_v36 = vmax.f32 %v8648_v41, 0.0  ;;  %v8657_v19 = vmax.f32 %v8649_v27, 0.0  ;;  %v8658_v55 = vmax.f32 %v8650_v13, 0.0  ;;  %v8659_v56 = vmax.f32 %v8651_v62, 0.0  ;;  %v16131_v16 = vld [vmem:[%s21103_s1 + $0xb8] sm:$0xff]  ;;  %v16132_v9 = vld [vmem:[%s21103_s1 + $0xc0] sm:$0xff] }
 0xc8f   :  { %v19713_v20 = vpack.c.bf16 %v8655_v23, %v8653_v26  ;;  %v19715_v52 = vpack.c.bf16 %v8654_v14, %v8652_v47  ;;  %v15635_v12 = vld [vmem:[%s21109_s6 + $0x130] ss:$8 sps:$4 sm:$0xff]   ;;  %v15640_v18 = vld [vmem:[%s21109_s6 + $0x144] ss:$8 sps:$4 sm:$0xff]   ;;  %v15638_v2 = vld [vmem:[%s21109_s6 + $0x140] ss:$8 sps:$4 sm:$0xff]  }
 0xc90   :  { %v19717_v38 = vpack.c.bf16 %v8659_v56, %v8657_v19  ;;  %v19719_v50 = vpack.c.bf16 %v8658_v55, %v8656_v36  ;;  %v15643_v39 = vld [vmem:[%s21109_s6 + $0x154] ss:$8 sps:$4 sm:$0xff]   ;;  %v16133_v41 = vld [vmem:[%s21103_s1 + $0xc8] sm:$0xff]  ;;  %v15641_v27 = vld [vmem:[%s21109_s6 + $0x150] ss:$8 sps:$4 sm:$0xff]  }
 0xc91   :  { %14174 = vmatprep.subr.bf16.mxu1 %v19713_v20  ;;  %14206 = vmatprep.subr.bf16.mxu0 %v19713_v20  ;;  %v15646_v13 = vld [vmem:[%s21109_s6 + $0x164] ss:$8 sps:$4 sm:$0xff]   ;;  %v16134_v62 = vld [vmem:[%s21103_s1 + $0xd0] sm:$0xff]  ;;  %v15644_v47 = vld [vmem:[%s21109_s6 + $0x160] ss:$8 sps:$4 sm:$0xff]  }
 0xc92   :  { %14176 = vmatpush1.bf16.msra.mxu1 %v19715_v52  ;;  %14208 = vmatpush1.bf16.msra.mxu0 %v19715_v52  ;;  %v15649_v26 = vld [vmem:[%s21109_s6 + $0x174] ss:$8 sps:$4 sm:$0xff]   ;;  %v15647_v23 = vld [vmem:[%s21109_s6 + $0x170] ss:$8 sps:$4 sm:$0xff]   ;;  %v15652_v36 = vld [vmem:[%s21109_s6 + $0x184] ss:$8 sps:$4 sm:$0xff]  }
 0xc93   :  { %14178 = vmatprep.subr.bf16.mxu1 %v19717_v38  ;;  %14210 = vmatprep.subr.bf16.mxu0 %v19717_v38  ;;  %v16135_v14 = vld [vmem:[%s21103_s1 + $0xd8] sm:$0xff]  ;;  %v16136_v19 = vld [vmem:[%s21103_s1 + $0xe0] sm:$0xff] }
 0xc94   :  { %v15650_v55 = vld [vmem:[%s21109_s6 + $0x180] ss:$8 sps:$4 sm:$0xff]   ;;  %v15655_v56 = vld [vmem:[%s21109_s6 + $0x194] ss:$8 sps:$4 sm:$0xff]  }
 0xc96   :  { %14180 = vmatpush1.bf16.msra.mxu1 %v19719_v50  ;;  %14212 = vmatpush1.bf16.msra.mxu0 %v19719_v50 }
 0xc97   :  { %14182 = vmatprep.subr.bf16.mxu1 %v19713_v20  ;;  %14214 = vmatprep.subr.bf16.mxu0 %v19713_v20 }
 0xc99   :  { %13449 = vmatmul.mubr.msk.f32.vlgmr.msra.gmra.mrb[88].mxu1 %vm2025_vm0, %v16116_v46  ;;  %13689 = vmatmul.mubr.msk.f32.vlgmr.msra.gmra.mrb[96].mxu0 %vm2025_vm0, %v16117_v43  ;;  %v16137_v46 = vld [vmem:[%s21103_s1 + $0xe8] sm:$0xff]  ;;  %v15653_v43 = vld [vmem:[%s21109_s6 + $0x190] ss:$8 sps:$4 sm:$0xff]  }
 0xc9a   :  { %14184 = vmatpush1.bf16.msra.mxu1 %v19715_v52  ;;  %14216 = vmatpush1.bf16.msra.mxu0 %v19715_v52 }
 0xc9b   :  { %14186 = vmatprep.subr.bf16.mxu1 %v19717_v38  ;;  %14218 = vmatprep.subr.bf16.mxu0 %v19717_v38 }
 0xc9c   :  { %8730 = vmatprep.mubr.f32.mxu1 %v16153_v37  ;;  %10101 = vmatprep.mubr.f32.mxu0 %v16153_v37 }
 0xc9d   :  { %13450 = vmatmul.mubr.msk.f32.gmra.mrb[90].mxu1 %vm2025_vm0, %v16118_v11  ;;  %13690 = vmatmul.mubr.msk.f32.gmra.mrb[98].mxu0 %vm2025_vm0, %v16119_v8  ;;  %v16138_v11 = vld [vmem:[%s21103_s1 + $0xf0] sm:$0xff]  ;;  %v15656_v8 = vld [vmem:[%s21109_s6 + $0x1a0] ss:$8 sps:$4 sm:$0xff]  }
 0xc9e   :  { %14188 = vmatpush1.bf16.msra.mxu1 %v19719_v50  ;;  %14220 = vmatpush1.bf16.msra.mxu0 %v19719_v50 }
 0xc9f   :  { %14222 = vmatprep.subr.bf16.mxu0 %v19713_v20  ;;  %8736 = vmatprep.mubr.f32.mxu1 %v16153_v37 }
 0xca0   :  { %10107 = vmatprep.mubr.f32.mxu0 %v16153_v37  ;;  %9071 = vmatprep.subr.bf16.mxu1 %v15628_v49  ;;  %v15658_v49 = vld [vmem:[%s21109_s6 + $0x1a4] ss:$8 sps:$4 sm:$0xff]  }
 0xca1   :  { %13451 = vmatmul.mubr.msk.f32.gmra.mrb[92].mxu1 %vm2025_vm0, %v16120_v0  ;;  %13691 = vmatmul.mubr.msk.f32.gmra.mrb[100].mxu0 %vm2025_vm0, %v16121_v22  ;;  %v15661_v0 = vld [vmem:[%s21109_s6 + $0x1b4] ss:$8 sps:$4 sm:$0xff]  }
 0xca2   :  { %8742 = vmatprep.mubr.f32.mxu1 %v16153_v37  ;;  %10113 = vmatprep.mubr.f32.mxu0 %v16153_v37  ;;  %v16139_v22 = vld [vmem:[%s21103_s1 + $0xf8] sm:$0xff] }
 0xca5   :  { %13452 = vmatmul.mubr.msk.f32.gmra.mrb[94].mxu1 %vm2025_vm0, %v16122_v21  ;;  %13692 = vmatmul.mubr.msk.f32.gmra.mrb[102].mxu0 %vm2025_vm0, %v16123_v3  ;;  %v15659_v21 = vld [vmem:[%s21109_s6 + $0x1b0] ss:$8 sps:$4 sm:$0xff]   ;;  %v16140_v3 = vld [vmem:[%s21103_s1 + $0x100] sm:$0xff] }
 0xca6   :  { %8849 = vmatprep.mubr.f32.mxu1 %v16153_v37  ;;  %10442 = vmatprep.mubr.f32.mxu0 %v16153_v37 }
 0xca9   :  { %13453 = vmatmul.mubr.msk.f32.vlgmr.msra.gmra.mrb[96].mxu1 %vm2025_vm0, %v16124_v29  ;;  %13757 = vmatmul.mubr.msk.f32.vlgmr.msra.gmra.mrb[104].mxu0 %vm2025_vm0, %v16125_v33  ;;  %v16142_v29 = vld [vmem:[%s21103_s1 + $0x110] sm:$0xff]  ;;  %v16143_v33 = vld [vmem:[%s21103_s1 + $0x118] sm:$0xff] }
 0xcaa   :  { %14224 = vmatpush1.bf16.msra.mxu0 %v19715_v52  ;;  %8855 = vmatprep.mubr.f32.mxu1 %v16153_v37 }
 0xcab   :  { %14226 = vmatprep.subr.bf16.mxu0 %v19717_v38  ;;  %10448 = vmatprep.mubr.f32.mxu0 %v16153_v37 }
 0xcac   :  { %9072 = vmatpush1.bf16.msra.mxu1 %v15626_v51  ;;  %v16141_v51 = vld [vmem:[%s21103_s1 + $0x108] sm:$0xff] }
 0xcad   :  { %13454 = vmatmul.mubr.msk.f32.gmra.mrb[98].mxu1 %vm2025_vm0, %v16126_v57  ;;  %13758 = vmatmul.mubr.msk.f32.gmra.mrb[106].mxu0 %vm2025_vm0, %v16127_v31  ;;  %v15664_v57 = vld [vmem:[%s21109_s6 + $0x1c4] ss:$8 sps:$4 sm:$0xff]   ;;  %v15667_v31 = vld [vmem:[%s21109_s6 + $0x1d4] ss:$8 sps:$4 sm:$0xff]  }
 0xcae   :  { %14228 = vmatpush1.bf16.msra.mxu0 %v19719_v50  ;;  %8861 = vmatprep.mubr.f32.mxu1 %v16153_v37 }
 0xcaf   :  { %14230 = vmatprep.subr.bf16.mxu0 %v19713_v20  ;;  %10454 = vmatprep.mubr.f32.mxu0 %v16153_v37 }
 0xcb0   :  { %9073 = vmatprep.subr.bf16.mxu1 %v15631_v54  ;;  %v15662_v54 = vld [vmem:[%s21109_s6 + $0x1c0] ss:$8 sps:$4 sm:$0xff]  }
 0xcb1   :  { %13455 = vmatmul.mubr.msk.f32.gmra.mrb[100].mxu1 %vm2025_vm0, %v16128_v10  ;;  %13759 = vmatmul.mubr.msk.f32.gmra.mrb[108].mxu0 %vm2025_vm0, %v16129_v24  ;;  %v15670_v10 = vld [vmem:[%s21109_s6 + $0x1e4] ss:$8 sps:$4 sm:$0xff]   ;;  %v15673_v24 = vld [vmem:[%s21109_s6 + $0x1f4] ss:$8 sps:$4 sm:$0xff]  }
 0xcb2   :  { %8867 = vmatprep.mubr.f32.mxu1 %v16153_v37  ;;  %10460 = vmatprep.mubr.f32.mxu0 %v16153_v37 }
 0xcb3   :  { %9074 = vmatpush1.bf16.msra.mxu1 %v15629_v28  ;;  %v15665_v28 = vld [vmem:[%s21109_s6 + $0x1d0] ss:$8 sps:$4 sm:$0xff]  }
 0xcb4   :  { %9075 = vmatprep.subr.bf16.mxu1 %v15634_v44  ;;  %v15668_v44 = vld [vmem:[%s21109_s6 + $0x1e0] ss:$8 sps:$4 sm:$0xff]  }
 0xcb5   :  { %13456 = vmatmul.mubr.msk.f32.gmra.mrb[102].mxu1 %vm2025_vm0, %v16130_v4  ;;  %13760 = vmatmul.mubr.msk.f32.gmra.mrb[110].mxu0 %vm2025_vm0, %v16131_v16 }
 0xcb6   :  { %10789 = vmatprep.mubr.f32.mxu0 %v16153_v37 }
 0xcb7   :  { %9076 = vmatpush1.bf16.msra.mxu1 %v15632_v53  ;;  %v15671_v53 = vld [vmem:[%s21109_s6 + $0x1f0] ss:$8 sps:$4 sm:$0xff]  }
 0xcb8   :  { %9077 = vmatprep.subr.bf16.mxu1 %v15637_v5  ;;  %v15676_v5 = vld [vmem:[%s21109_s6 + $0x4] ss:$8 sps:$4 sm:$0xff]  }
 0xcb9   :  { %13825 = vmatmul.mubr.msk.f32.vlgmr.msra.gmra.mrb[112].mxu0 %vm2025_vm0, %v16132_v9 }
 0xcba   :  { %14232 = vmatpush1.bf16.msra.mxu0 %v19715_v52  ;;  %10795 = vmatprep.mubr.f32.mxu0 %v16153_v37 }
 0xcbb   :  { %14234 = vmatprep.subr.bf16.mxu0 %v19717_v38  ;;  %9078 = vmatpush1.bf16.msra.mxu1 %v15635_v12 }
 0xcbc   :  { %9079 = vmatprep.subr.bf16.mxu1 %v15640_v18 }
 0xcbd   :  { %13826 = vmatmul.mubr.msk.f32.gmra.mrb[114].mxu0 %vm2025_vm0, %v16133_v41 }
 0xcbe   :  { %14236 = vmatpush1.bf16.msra.mxu0 %v19719_v50  ;;  %10801 = vmatprep.mubr.f32.mxu0 %v16153_v37 }
 0xcbf   :  { %14238 = vmatprep.subr.bf16.mxu0 %v19713_v20  ;;  %9080 = vmatpush1.bf16.msra.mxu1 %v15638_v2 }
 0xcc0   :  { %9081 = vmatprep.subr.bf16.mxu1 %v15643_v39 }
 0xcc1   :  { %13827 = vmatmul.mubr.msk.f32.gmra.mrb[116].mxu0 %vm2025_vm0, %v16134_v62 }
 0xcc2   :  { %10807 = vmatprep.mubr.f32.mxu0 %v16153_v37 }
 0xcc3   :  { %9082 = vmatpush1.bf16.msra.mxu1 %v15641_v27 }
 0xcc4   :  { %9083 = vmatprep.subr.bf16.mxu1 %v15646_v13 }
 0xcc5   :  { %13828 = vmatmul.mubr.msk.f32.gmra.mrb[118].mxu0 %vm2025_vm0, %v16135_v14 }
 0xcc6   :  { %11136 = vmatprep.mubr.f32.mxu0 %v16153_v37 }
 0xcc7   :  { %9084 = vmatpush1.bf16.msra.mxu1 %v15644_v47 }
 0xcc8   :  { %9085 = vmatprep.subr.bf16.mxu1 %v15649_v26 }
 0xcc9   :  { %13893 = vmatmul.mubr.msk.f32.vlgmr.msra.gmra.mrb[120].mxu0 %vm2025_vm0, %v16136_v19 }
 0xcca   :  { %14240 = vmatpush1.bf16.msra.mxu0 %v19715_v52  ;;  %11142 = vmatprep.mubr.f32.mxu0 %v16153_v37 }
 0xccb   :  { %14242 = vmatprep.subr.bf16.mxu0 %v19717_v38  ;;  %9086 = vmatpush1.bf16.msra.mxu1 %v15647_v23 }
 0xccc   :  { %9087 = vmatprep.subr.bf16.mxu1 %v15652_v36 }
 0xccd   :  { %13894 = vmatmul.mubr.msk.f32.gmra.mrb[122].mxu0 %vm2025_vm0, %v16137_v46  ;;  %v15679_v46 = vld [vmem:[%s21109_s6 + $0x14] ss:$8 sps:$4 sm:$0xff]  }
 0xcce   :  { %14244 = vmatpush1.bf16.msra.mxu0 %v19719_v50  ;;  %11148 = vmatprep.mubr.f32.mxu0 %v16153_v37 }
 0xccf   :  { %9088 = vmatpush1.bf16.msra.mxu1 %v15650_v55 }
 0xcd0   :  { %9089 = vmatprep.subr.bf16.mxu1 %v15655_v56  ;;  %v15674_v56 = vld [vmem:[%s21109_s6] ss:$8 sps:$4 sm:$0xff]  }
 0xcd1   :  { %13895 = vmatmul.mubr.msk.f32.gmra.mrb[124].mxu0 %vm2025_vm0, %v16138_v11  ;;  %v15677_v11 = vld [vmem:[%s21109_s6 + $0x10] ss:$8 sps:$4 sm:$0xff]  }
 0xcd2   :  { %11154 = vmatprep.mubr.f32.mxu0 %v16153_v37 }
 0xcd3   :  { %9090 = vmatpush1.bf16.msra.mxu1 %v15653_v43 }
 0xcd4   :  { %9091 = vmatprep.subr.bf16.mxu1 %v15658_v49 }
 0xcd5   :  { %13896 = vmatmul.mubr.msk.f32.gmra.mrb[126].mxu0 %vm2025_vm0, %v16139_v22 }
 0xcd6   :  { %11483 = vmatprep.mubr.f32.mxu0 %v16153_v37 }
 0xcd7   :  { %9092 = vmatpush1.bf16.msra.mxu1 %v15656_v8  ;;  %v15682_v8 = vld [vmem:[%s21109_s6 + $0x24] ss:$8 sps:$4 sm:$0xff]  }
 0xcd8   :  { %9093 = vmatprep.subr.bf16.mxu1 %v15661_v0 }
 0xcd9   :  { %13961 = vmatmul.mubr.msk.f32.vlgmr.msra.gmra.mrb[128].mxu0 %vm2025_vm0, %v16140_v3 }
 0xcda   :  { %11489 = vmatprep.mubr.f32.mxu0 %v16153_v37 }
 0xcdb   :  { %9094 = vmatpush1.bf16.msra.mxu1 %v15659_v21 }
 0xcdc   :  { %9095 = vmatprep.subr.bf16.mxu1 %v15664_v57  ;;  %v15686_v57 = vld [vmem:[%s21109_s6 + $0x40] ss:$8 sps:$4 sm:$0xff]  }
 0xcdd   :  { %13962 = vmatmul.mubr.msk.f32.gmra.mrb[130].mxu0 %vm2025_vm0, %v16141_v51  ;;  %v15680_v51 = vld [vmem:[%s21109_s6 + $0x20] ss:$8 sps:$4 sm:$0xff]  }
 0xcde   :  { %11495 = vmatprep.mubr.f32.mxu0 %v16153_v37 }
 0xcdf   :  { %9096 = vmatpush1.bf16.msra.mxu1 %v15662_v54  ;;  %v15688_v54 = vld [vmem:[%s21109_s6 + $0x44] ss:$8 sps:$4 sm:$0xff]  }
 0xce0   :  { %9097 = vmatprep.subr.bf16.mxu1 %v15667_v31  ;;  %v15691_v31 = vld [vmem:[%s21109_s6 + $0x54] ss:$8 sps:$4 sm:$0xff]  }
 0xce1   :  { %13963 = vmatmul.mubr.msk.f32.gmra.mrb[132].mxu0 %vm2025_vm0, %v16142_v29  ;;  %v15685_v29 = vld [vmem:[%s21109_s6 + $0x34] ss:$8 sps:$4 sm:$0xff]  }
 0xce2   :  { %11501 = vmatprep.mubr.f32.mxu0 %v16153_v37 }
 0xce3   :  { %9098 = vmatpush1.bf16.msra.mxu1 %v15665_v28  ;;  %v15689_v28 = vld [vmem:[%s21109_s6 + $0x50] ss:$8 sps:$4 sm:$0xff]  }
 0xce4   :  { %9099 = vmatprep.subr.bf16.mxu1 %v15670_v10  ;;  %v15692_v10 = vld [vmem:[%s21109_s6 + $0x60] ss:$8 sps:$4 sm:$0xff]  }
 0xce5   :  { %13964 = vmatmul.mubr.msk.f32.gmra.mrb[134].mxu0 %vm2025_vm0, %v16143_v33  ;;  %v15683_v33 = vld [vmem:[%s21109_s6 + $0x30] ss:$8 sps:$4 sm:$0xff]  }
 0xce7   :  { %9100 = vmatpush1.bf16.msra.mxu1 %v15668_v44  ;;  %v15694_v44 = vld [vmem:[%s21109_s6 + $0x64] ss:$8 sps:$4 sm:$0xff]  }
 0xce8   :  { %9101 = vmatprep.subr.bf16.mxu1 %v15673_v24  ;;  %v15697_v24 = vld [vmem:[%s21109_s6 + $0x74] ss:$8 sps:$4 sm:$0xff]  }
 0xceb   :  { %9102 = vmatpush1.bf16.msra.mxu1 %v15671_v53  ;;  %v15695_v53 = vld [vmem:[%s21109_s6 + $0x70] ss:$8 sps:$4 sm:$0xff]  }
 0xcec   :  { %9284 = vmatprep.subr.bf16.mxu1 %v15676_v5  ;;  %v15700_v5 = vld [vmem:[%s21109_s6 + $0x84] ss:$8 sps:$4 sm:$0xff]  }
 0xd6c   :  { %v19986_v4 = vpop.f32.mrb[88].mxu1 }
 0xd6d   :  { %v8728_v16 = vpop.f32.mrb[89].mxu1 }
 0xd70   :  { %v19988_v12 = vpop.f32.mrb[90].mxu1 }
 0xd71   :  { %v8749_v18 = vpack.c.bf16 %v19988_v12, %v19986_v4  ;;  %v8734_v9 = vpop.f32.mrb[91].mxu1  ;;  %v15722_v4 = vld [vmem:[%s21109_s6 + $0x200] ss:$8 sps:$4 sm:$0xff]   ;;  %v15727_v12 = vld [vmem:[%s21109_s6 + $0x214] ss:$8 sps:$4 sm:$0xff]  }
 0xd72   :  { %v8750_v2 = vpack.c.bf16 %v8734_v9, %v8728_v16  ;;  %v15698_v16 = vld [vmem:[%s21109_s6 + $0x80] ss:$8 sps:$4 sm:$0xff]   ;;  %v15703_v9 = vld [vmem:[%s21109_s6 + $0x94] ss:$8 sps:$4 sm:$0xff]  }
 0xd74   :  { %v19992_v39 = vpop.f32.mrb[92].mxu1 }
 0xd75   :  { %v19994_v41 = vpop.f32.mrb[93].mxu1 }
 0xd78   :  { %v19996_v27 = vpop.f32.mrb[94].mxu1 }
 0xd79   :  { %v8751_v13 = vpack.c.bf16 %v19996_v27, %v19992_v39  ;;  %v20000_v62 = vpop.f32.mrb[95].mxu1  ;;  %v15725_v39 = vld [vmem:[%s21109_s6 + $0x210] ss:$8 sps:$4 sm:$0xff]   ;;  %v16145_v27 = vld [vmem:[%s21103_s1 + $0x48] sm:$0xff] }
 0xd7a   :  { %v8752_v47 = vpack.c.bf16 %v20000_v62, %v19994_v41  ;;  %v15730_v41 = vld [vmem:[%s21109_s6 + $0x224] ss:$8 sps:$4 sm:$0xff]   ;;  %v15733_v62 = vld [vmem:[%s21109_s6 + $0x234] ss:$8 sps:$4 sm:$0xff]  }
 0xd7c   :  { %v8851_v26 = vpop.f32.mrb[96].mxu1 }
 0xd7d   :  { %v8853_v14 = vpop.f32.mrb[97].mxu1 }
 0xd80   :  { %v8857_v23 = vpop.f32.mrb[98].mxu1 }
 0xd81   :  { %v8874_v36 = vpack.c.bf16 %v8857_v23, %v8851_v26  ;;  %v8859_v19 = vpop.f32.mrb[99].mxu1  ;;  %v15706_v26 = vld [vmem:[%s21109_s6 + $0xa4] ss:$8 sps:$4 sm:$0xff]   ;;  %v15709_v23 = vld [vmem:[%s21109_s6 + $0xb4] ss:$8 sps:$4 sm:$0xff]  }
 0xd82   :  { %v8875_v55 = vpack.c.bf16 %v8859_v19, %v8853_v14  ;;  %v15704_v14 = vld [vmem:[%s21109_s6 + $0xa0] ss:$8 sps:$4 sm:$0xff]   ;;  %v15712_v19 = vld [vmem:[%s21109_s6 + $0xc4] ss:$8 sps:$4 sm:$0xff]  }
 0xd84   :  { %9103 = vmatprep.mubr.bf16.mxu1 %v8875_v55  ;;  %v8863_v43 = vpop.f32.mrb[100].mxu1  ;;  %v15710_v55 = vld [vmem:[%s21109_s6 + $0xc0] ss:$8 sps:$4 sm:$0xff]  }
 0xd85   :  { %9104 = vmatmul.mubr.bf16.vlgmr.msra.gmra.mrb[104].mxu1 %v8874_v36  ;;  %v8865_v49 = vpop.f32.mrb[101].mxu1  ;;  %v15707_v36 = vld [vmem:[%s21109_s6 + $0xb0] ss:$8 sps:$4 sm:$0xff]  }
 0xd86   :  { %9285 = vmatpush1.bf16.msra.mxu1 %v15674_v56  ;;  %v15715_v56 = vld [vmem:[%s21109_s6 + $0xd4] ss:$8 sps:$4 sm:$0xff]  }
 0xd87   :  { %9286 = vmatprep.subr.bf16.mxu1 %v15679_v46  ;;  %v15713_v46 = vld [vmem:[%s21109_s6 + $0xd0] ss:$8 sps:$4 sm:$0xff]  }
 0xd88   :  { %v8869_v0 = vpop.f32.mrb[102].mxu1 }
 0xd89   :  { %v8876_v22 = vpack.c.bf16 %v8869_v0, %v8863_v43  ;;  %v8871_v21 = vpop.f32.mrb[103].mxu1  ;;  %v15718_v43 = vld [vmem:[%s21109_s6 + $0xe4] ss:$8 sps:$4 sm:$0xff]  }
 0xd8a   :  { %v8877_v3 = vpack.c.bf16 %v8871_v21, %v8865_v49  ;;  %9287 = vmatpush1.bf16.msra.mxu1 %v15677_v11  ;;  %v15716_v49 = vld [vmem:[%s21109_s6 + $0xe0] ss:$8 sps:$4 sm:$0xff]   ;;  %v15721_v11 = vld [vmem:[%s21109_s6 + $0xf4] ss:$8 sps:$4 sm:$0xff]   ;;  %v15724_v0 = vld [vmem:[%s21109_s6 + $0x204] ss:$8 sps:$4 sm:$0xff]  }
 0xd8b   :  { %9288 = vmatprep.subr.bf16.mxu1 %v15682_v8  ;;  %v15719_v8 = vld [vmem:[%s21109_s6 + $0xf0] ss:$8 sps:$4 sm:$0xff]   ;;  %v15736_v21 = vld [vmem:[%s21109_s6 + $0x244] ss:$8 sps:$4 sm:$0xff]  }
 0xd8c   :  { %9113 = vmatprep.mubr.bf16.mxu1 %v8877_v3  ;;  %v16147_v3 = vld [vmem:[%s21103_s1 + $0x58] sm:$0xff] }
 0xd8d   :  { %9114 = vmatmul.mubr.bf16.gmra.mrb[108].mxu1 %v8876_v22  ;;  %v15731_v22 = vld [vmem:[%s21109_s6 + $0x230] ss:$8 sps:$4 sm:$0xff]  }
 0xd8e   :  { %9289 = vmatpush1.bf16.msra.mxu1 %v15680_v51  ;;  %9316 = vmatprep.mubr.bf16.mxu1 %v8750_v2  ;;  %v15701_v2 = vld [vmem:[%s21109_s6 + $0x90] ss:$8 sps:$4 sm:$0xff]   ;;  %v15734_v51 = vld [vmem:[%s21109_s6 + $0x240] ss:$8 sps:$4 sm:$0xff]  }
 0xd8f   :  { %9290 = vmatprep.subr.bf16.mxu1 %v15685_v29  ;;  %v15739_v29 = vld [vmem:[%s21109_s6 + $0x254] ss:$8 sps:$4 sm:$0xff]  }
 0xd92   :  { %9291 = vmatpush1.bf16.msra.mxu1 %v15683_v33  ;;  %v15737_v33 = vld [vmem:[%s21109_s6 + $0x250] ss:$8 sps:$4 sm:$0xff]  }
 0xd93   :  { %9292 = vmatprep.subr.bf16.mxu1 %v15688_v54  ;;  %v15742_v54 = vld [vmem:[%s21109_s6 + $0x264] ss:$8 sps:$4 sm:$0xff]  }
 0xd96   :  { %9293 = vmatpush1.bf16.msra.mxu1 %v15686_v57  ;;  %v15740_v57 = vld [vmem:[%s21109_s6 + $0x260] ss:$8 sps:$4 sm:$0xff]  }
 0xd97   :  { %9294 = vmatprep.subr.bf16.mxu1 %v15691_v31  ;;  %v15745_v31 = vld [vmem:[%s21109_s6 + $0x274] ss:$8 sps:$4 sm:$0xff]  }
 0xd9a   :  { %9295 = vmatpush1.bf16.msra.mxu1 %v15689_v28  ;;  %v15743_v28 = vld [vmem:[%s21109_s6 + $0x270] ss:$8 sps:$4 sm:$0xff]  }
 0xd9b   :  { %9296 = vmatprep.subr.bf16.mxu1 %v15694_v44  ;;  %v15748_v44 = vld [vmem:[%s21109_s6 + $0x284] ss:$8 sps:$4 sm:$0xff]  }
 0xd9e   :  { %9297 = vmatpush1.bf16.msra.mxu1 %v15692_v10  ;;  %v15746_v10 = vld [vmem:[%s21109_s6 + $0x280] ss:$8 sps:$4 sm:$0xff]  }
 0xd9f   :  { %9298 = vmatprep.subr.bf16.mxu1 %v15697_v24  ;;  %v15751_v24 = vld [vmem:[%s21109_s6 + $0x294] ss:$8 sps:$4 sm:$0xff]  }
 0xda2   :  { %9299 = vmatpush1.bf16.msra.mxu1 %v15695_v53  ;;  %v15749_v53 = vld [vmem:[%s21109_s6 + $0x290] ss:$8 sps:$4 sm:$0xff]  }
 0xda3   :  { %9300 = vmatprep.subr.bf16.mxu1 %v15700_v5  ;;  %v15754_v5 = vld [vmem:[%s21109_s6 + $0x2a4] ss:$8 sps:$4 sm:$0xff]  }
 0xda6   :  { %9301 = vmatpush1.bf16.msra.mxu1 %v15698_v16  ;;  %v15752_v16 = vld [vmem:[%s21109_s6 + $0x2a0] ss:$8 sps:$4 sm:$0xff]  }
 0xda7   :  { %9302 = vmatprep.subr.bf16.mxu1 %v15703_v9  ;;  %v15757_v9 = vld [vmem:[%s21109_s6 + $0x2b4] ss:$8 sps:$4 sm:$0xff]  }
 0xdaa   :  { %9303 = vmatpush1.bf16.msra.mxu1 %v15701_v2  ;;  %v15755_v2 = vld [vmem:[%s21109_s6 + $0x2b0] ss:$8 sps:$4 sm:$0xff]  }
 0xdab   :  { %9304 = vmatprep.subr.bf16.mxu1 %v15706_v26  ;;  %v15760_v26 = vld [vmem:[%s21109_s6 + $0x2c4] ss:$8 sps:$4 sm:$0xff]  }
 0xdae   :  { %9305 = vmatpush1.bf16.msra.mxu1 %v15704_v14  ;;  %v15758_v14 = vld [vmem:[%s21109_s6 + $0x2c0] ss:$8 sps:$4 sm:$0xff]  }
 0xdaf   :  { %9306 = vmatprep.subr.bf16.mxu1 %v15709_v23  ;;  %v15763_v23 = vld [vmem:[%s21109_s6 + $0x2d4] ss:$8 sps:$4 sm:$0xff]  }
 0xdb2   :  { %9307 = vmatpush1.bf16.msra.mxu1 %v15707_v36  ;;  %v15761_v36 = vld [vmem:[%s21109_s6 + $0x2d0] ss:$8 sps:$4 sm:$0xff]  }
 0xdb3   :  { %9308 = vmatprep.subr.bf16.mxu1 %v15712_v19  ;;  %v15766_v19 = vld [vmem:[%s21109_s6 + $0x2e4] ss:$8 sps:$4 sm:$0xff]  }
 0xdb6   :  { %9309 = vmatpush1.bf16.msra.mxu1 %v15710_v55  ;;  %v15764_v55 = vld [vmem:[%s21109_s6 + $0x2e0] ss:$8 sps:$4 sm:$0xff]  }
 0xdb7   :  { %9310 = vmatprep.subr.bf16.mxu1 %v15715_v56  ;;  %v15769_v56 = vld [vmem:[%s21109_s6 + $0x2f4] ss:$8 sps:$4 sm:$0xff]  }
 0xdba   :  { %9311 = vmatpush1.bf16.msra.mxu1 %v15713_v46  ;;  %v15767_v46 = vld [vmem:[%s21109_s6 + $0x2f0] ss:$8 sps:$4 sm:$0xff]  }
 0xdbb   :  { %9312 = vmatprep.subr.bf16.mxu1 %v15718_v43 }
 0xdbe   :  { %9313 = vmatpush1.bf16.msra.mxu1 %v15716_v49 }
 0xdbf   :  { %9314 = vmatprep.subr.bf16.mxu1 %v15721_v11 }
 0xdc2   :  { %9315 = vmatpush1.bf16.msra.mxu1 %v15719_v8 }
 0xdc3   :  { %14190 = vmatprep.subr.bf16.mxu1 %v19713_v20 }
 0xdc5   :  { %9317 = vmatmul.mubr.bf16.vlgmr.msra.gmra.mrb[104].mxu1 %v8749_v18  ;;  %v16144_v18 = vld [vmem:[%s21103_s1 + $0x40] sm:$0xff] }
 0xdc6   :  { %9326 = vmatprep.mubr.bf16.mxu1 %v8752_v47  ;;  %14192 = vmatpush1.bf16.msra.mxu1 %v19715_v52  ;;  %v16146_v47 = vld [vmem:[%s21103_s1 + $0x50] sm:$0xff] }
 0xdc7   :  { %14194 = vmatprep.subr.bf16.mxu1 %v19717_v38 }
 0xdca   :  { %14196 = vmatpush1.bf16.msra.mxu1 %v19719_v50 }
 0xdcb   :  { %9623 = vmatprep.subr.bf16.mxu1 %v15724_v0 }
 0xdcd   :  { %9327 = vmatmul.mubr.bf16.gmra.mrb[108].mxu1 %v8751_v13  ;;  %v15728_v13 = vld [vmem:[%s21109_s6 + $0x220] ss:$8 sps:$4 sm:$0xff]  }
 0xdce   :  { %9401 = vmatprep.mubr.f32.mxu1 %v16153_v37 }
 0xdd5   :  { %13553 = vmatmul.mubr.msk.f32.vlgmr.msra.gmra.mrb[112].mxu1 %vm2025_vm0, %v16144_v18 }
 0xdd6   :  { %9624 = vmatpush1.bf16.msra.mxu1 %v15722_v4  ;;  %9407 = vmatprep.mubr.f32.mxu1 %v16153_v37 }
 0xdd7   :  { %9625 = vmatprep.subr.bf16.mxu1 %v15727_v12 }
 0xdd9   :  { %13554 = vmatmul.mubr.msk.f32.gmra.mrb[114].mxu1 %vm2025_vm0, %v16145_v27 }
 0xdda   :  { %9626 = vmatpush1.bf16.msra.mxu1 %v15725_v39  ;;  %9413 = vmatprep.mubr.f32.mxu1 %v16153_v37  ;;  %v15772_v39 = vld [vmem:[%s21109_s6 + $0x304] ss:$8 sps:$4 sm:$0xff]  }
 0xddb   :  { %9627 = vmatprep.subr.bf16.mxu1 %v15730_v41 }
 0xddd   :  { %13555 = vmatmul.mubr.msk.f32.gmra.mrb[116].mxu1 %vm2025_vm0, %v16146_v47  ;;  %v15778_v47 = vld [vmem:[%s21109_s6 + $0x324] ss:$8 sps:$4 sm:$0xff]  }
 0xdde   :  { %9628 = vmatpush1.bf16.msra.mxu1 %v15728_v13  ;;  %9419 = vmatprep.mubr.f32.mxu1 %v16153_v37 }
 0xddf   :  { %9629 = vmatprep.subr.bf16.mxu1 %v15733_v62  ;;  %v16148_v62 = vld [vmem:[%s21103_s1 + $0x60] sm:$0xff] }
 0xde1   :  { %13556 = vmatmul.mubr.msk.f32.gmra.mrb[118].mxu1 %vm2025_vm0, %v16147_v3  ;;  %v15781_v3 = vld [vmem:[%s21109_s6 + $0x334] ss:$8 sps:$4 sm:$0xff]  }
 0xde2   :  { %9630 = vmatpush1.bf16.msra.mxu1 %v15731_v22  ;;  %v16149_v22 = vld [vmem:[%s21103_s1 + $0x68] sm:$0xff] }
 0xde3   :  { %9631 = vmatprep.subr.bf16.mxu1 %v15736_v21  ;;  %v15776_v21 = vld [vmem:[%s21109_s6 + $0x320] ss:$8 sps:$4 sm:$0xff]  }
 0xde6   :  { %9632 = vmatpush1.bf16.msra.mxu1 %v15734_v51  ;;  %v16150_v51 = vld [vmem:[%s21103_s1 + $0x70] sm:$0xff] }
 0xde7   :  { %9633 = vmatprep.subr.bf16.mxu1 %v15739_v29  ;;  %v15779_v29 = vld [vmem:[%s21109_s6 + $0x330] ss:$8 sps:$4 sm:$0xff]  }
 0xdea   :  { %9634 = vmatpush1.bf16.msra.mxu1 %v15737_v33  ;;  %v15784_v33 = vld [vmem:[%s21109_s6 + $0x344] ss:$8 sps:$4 sm:$0xff]  }
 0xdeb   :  { %9635 = vmatprep.subr.bf16.mxu1 %v15742_v54  ;;  %v16151_v54 = vld [vmem:[%s21103_s1 + $0x78] sm:$0xff] }
 0xdee   :  { %9636 = vmatpush1.bf16.msra.mxu1 %v15740_v57  ;;  %v15787_v57 = vld [vmem:[%s21109_s6 + $0x354] ss:$8 sps:$4 sm:$0xff]  }
 0xdef   :  { %9637 = vmatprep.subr.bf16.mxu1 %v15745_v31  ;;  %v15785_v31 = vld [vmem:[%s21109_s6 + $0x350] ss:$8 sps:$4 sm:$0xff]  }
 0xdf2   :  { %9638 = vmatpush1.bf16.msra.mxu1 %v15743_v28  ;;  %v15790_v28 = vld [vmem:[%s21109_s6 + $0x364] ss:$8 sps:$4 sm:$0xff]  }
 0xdf3   :  { %9639 = vmatprep.subr.bf16.mxu1 %v15748_v44  ;;  %v15788_v44 = vld [vmem:[%s21109_s6 + $0x360] ss:$8 sps:$4 sm:$0xff]  }
 0xdf6   :  { %9640 = vmatpush1.bf16.msra.mxu1 %v15746_v10  ;;  %v15793_v10 = vld [vmem:[%s21109_s6 + $0x374] ss:$8 sps:$4 sm:$0xff]  }
 0xdf7   :  { %9641 = vmatprep.subr.bf16.mxu1 %v15751_v24  ;;  %v15791_v24 = vld [vmem:[%s21109_s6 + $0x370] ss:$8 sps:$4 sm:$0xff]  }
 0xdfa   :  { %9642 = vmatpush1.bf16.msra.mxu1 %v15749_v53  ;;  %v15796_v53 = vld [vmem:[%s21109_s6 + $0x384] ss:$8 sps:$4 sm:$0xff]  }
 0xdfb   :  { %9643 = vmatprep.subr.bf16.mxu1 %v15754_v5  ;;  %v15794_v5 = vld [vmem:[%s21109_s6 + $0x380] ss:$8 sps:$4 sm:$0xff]  }
 0xdfe   :  { %9644 = vmatpush1.bf16.msra.mxu1 %v15752_v16  ;;  %v15799_v16 = vld [vmem:[%s21109_s6 + $0x394] ss:$8 sps:$4 sm:$0xff]  }
 0xdff   :  { %9645 = vmatprep.subr.bf16.mxu1 %v15757_v9  ;;  %v15797_v9 = vld [vmem:[%s21109_s6 + $0x390] ss:$8 sps:$4 sm:$0xff]  }
 0xe02   :  { %9646 = vmatpush1.bf16.msra.mxu1 %v15755_v2  ;;  %v15802_v2 = vld [vmem:[%s21109_s6 + $0x3a4] ss:$8 sps:$4 sm:$0xff]  }
 0xe03   :  { %9647 = vmatprep.subr.bf16.mxu1 %v15760_v26  ;;  %v15800_v26 = vld [vmem:[%s21109_s6 + $0x3a0] ss:$8 sps:$4 sm:$0xff]  }
 0xe06   :  { %9648 = vmatpush1.bf16.msra.mxu1 %v15758_v14  ;;  %v15805_v14 = vld [vmem:[%s21109_s6 + $0x3b4] ss:$8 sps:$4 sm:$0xff]  }
 0xe07   :  { %9649 = vmatprep.subr.bf16.mxu1 %v15763_v23  ;;  %v15803_v23 = vld [vmem:[%s21109_s6 + $0x3b0] ss:$8 sps:$4 sm:$0xff]  }
 0xe0a   :  { %9650 = vmatpush1.bf16.msra.mxu1 %v15761_v36  ;;  %v15808_v36 = vld [vmem:[%s21109_s6 + $0x3c4] ss:$8 sps:$4 sm:$0xff]  }
 0xe0b   :  { %9651 = vmatprep.subr.bf16.mxu1 %v15766_v19  ;;  %v15806_v19 = vld [vmem:[%s21109_s6 + $0x3c0] ss:$8 sps:$4 sm:$0xff]  }
 0xe0e   :  { %9652 = vmatpush1.bf16.msra.mxu1 %v15764_v55  ;;  %v15811_v55 = vld [vmem:[%s21109_s6 + $0x3d4] ss:$8 sps:$4 sm:$0xff]  }
 0xe0f   :  { %9653 = vmatprep.subr.bf16.mxu1 %v15769_v56  ;;  %v15809_v56 = vld [vmem:[%s21109_s6 + $0x3d0] ss:$8 sps:$4 sm:$0xff]  }
 0xe12   :  { %9654 = vmatpush1.bf16.msra.mxu1 %v15767_v46  ;;  %v15814_v46 = vld [vmem:[%s21109_s6 + $0x3e4] ss:$8 sps:$4 sm:$0xff]  }
 0xe13   :  { %14198 = vmatprep.subr.bf16.mxu1 %v19713_v20 }
 0xea8   :  { %v9403_v43 = vpop.f32.mrb[112].mxu1 }
 0xea9   :  { %v9405_v49 = vpop.f32.mrb[113].mxu1 }
 0xeac   :  { %v9409_v11 = vpop.f32.mrb[114].mxu1 }
 0xead   :  { %v9426_v8 = vpack.c.bf16 %v9409_v11, %v9403_v43  ;;  %v9411_v0 = vpop.f32.mrb[115].mxu1  ;;  %v15812_v43 = vld [vmem:[%s21109_s6 + $0x3e0] ss:$8 sps:$4 sm:$0xff]   ;;  %v15815_v11 = vld [vmem:[%s21109_s6 + $0x3f0] ss:$8 sps:$4 sm:$0xff]  }
 0xeae   :  { %v9427_v4 = vpack.c.bf16 %v9411_v0, %v9405_v49  ;;  %v15817_v49 = vld [vmem:[%s21109_s6 + $0x3f4] ss:$8 sps:$4 sm:$0xff]   ;;  %v20349_v0 = vpop.f32.mrb[96].mxu0 }
 0xeb0   :  { %9655 = vmatprep.mubr.bf16.mxu1 %v9427_v4  ;;  %v9415_v12 = vpop.f32.mrb[116].mxu1  ;;  %v10099_v4 = vpop.f32.mrb[97].mxu0 }
 0xeb1   :  { %9656 = vmatmul.mubr.bf16.vlgmr.msra.gmra.mrb[104].mxu1 %v9426_v8  ;;  %v9417_v18 = vpop.f32.mrb[117].mxu1  ;;  %v15820_v8 = vld [vmem:[%s21109_s6 + $0x404] ss:$8 sps:$4 sm:$0xff]  }
 0xeb2   :  { %14200 = vmatpush1.bf16.msra.mxu1 %v19715_v52  ;;  %v15770_v52 = vld [vmem:[%s21109_s6 + $0x300] ss:$8 sps:$4 sm:$0xff]  }
 0xeb3   :  { %14202 = vmatprep.subr.bf16.mxu1 %v19717_v38  ;;  %v15775_v38 = vld [vmem:[%s21109_s6 + $0x314] ss:$8 sps:$4 sm:$0xff]  }
 0xeb4   :  { %v9421_v41 = vpop.f32.mrb[118].mxu1 }
 0xeb5   :  { %v9428_v20 = vpack.c.bf16 %v9421_v41, %v9415_v12  ;;  %v9423_v27 = vpop.f32.mrb[119].mxu1  ;;  %v20351_v12 = vpop.f32.mrb[98].mxu0 }
 0xeb6   :  { %v9429_v13 = vpack.c.bf16 %v9423_v27, %v9417_v18  ;;  %14204 = vmatpush1.bf16.msra.mxu1 %v19719_v50  ;;  %v15773_v50 = vld [vmem:[%s21109_s6 + $0x310] ss:$8 sps:$4 sm:$0xff]   ;;  %v10105_v18 = vpop.f32.mrb[99].mxu0 }
 0xeb7   :  { %9970 = vmatprep.subr.bf16.mxu1 %v15772_v39  ;;  %v10120_v39 = vpack.c.bf16 %v20351_v12, %v20349_v0  ;;  %v10121_v41 = vpack.c.bf16 %v10105_v18, %v10099_v4  ;;  %v15844_v4 = vld [vmem:[%s21109_s6 + $0x484] ss:$8 sps:$4 sm:$0xff]   ;;  %v15842_v18 = vld [vmem:[%s21109_s6 + $0x480] ss:$8 sps:$4 sm:$0xff]   ;;  %v15877_v12 = vld [vmem:[%s21109_s6 + $0x534] ss:$8 sps:$4 sm:$0xff]  }
 0xeb8   :  { %9665 = vmatprep.mubr.bf16.mxu1 %v9429_v13  ;;  %v15872_v0 = vld [vmem:[%s21109_s6 + $0x520] ss:$8 sps:$4 sm:$0xff]  }
 0xeb9   :  { %9666 = vmatmul.mubr.bf16.gmra.mrb[108].mxu1 %v9428_v20  ;;  %v20355_v20 = vpop.f32.mrb[100].mxu0 }
 0xeba   :  { %9748 = vmatprep.mubr.f32.mxu1 %v16153_v37  ;;  %v20357_v27 = vpop.f32.mrb[101].mxu0 }
 0xebb   :  { %v20359_v13 = vpop.f32.mrb[102].mxu0 }
 0xec1   :  { %13621 = vmatmul.mubr.msk.f32.vlgmr.msra.gmra.mrb[120].mxu1 %vm2025_vm0, %v16148_v62  ;;  %v10122_v62 = vpack.c.bf16 %v20359_v13, %v20355_v20  ;;  %v15878_v20 = vld [vmem:[%s21109_s6 + $0x540] ss:$8 sps:$4 sm:$0xff]   ;;  %v15883_v13 = vld [vmem:[%s21109_s6 + $0x554] ss:$8 sps:$4 sm:$0xff]  }
 0xec2   :  { %9754 = vmatprep.mubr.f32.mxu1 %v16153_v37  ;;  %9971 = vmatpush1.bf16.msra.mxu1 %v15770_v52  ;;  %v20361_v52 = vpop.f32.mrb[103].mxu0 }
 0xec3   :  { %9972 = vmatprep.subr.bf16.mxu1 %v15775_v38  ;;  %v10123_v38 = vpack.c.bf16 %v20361_v52, %v20357_v27  ;;  %v15880_v27 = vld [vmem:[%s21109_s6 + $0x544] ss:$8 sps:$4 sm:$0xff]   ;;  %v15881_v52 = vld [vmem:[%s21109_s6 + $0x550] ss:$8 sps:$4 sm:$0xff]  }
 0xec5   :  { %13622 = vmatmul.mubr.msk.f32.gmra.mrb[122].mxu1 %vm2025_vm0, %v16149_v22 }
 0xec6   :  { %9760 = vmatprep.mubr.f32.mxu1 %v16153_v37  ;;  %9973 = vmatpush1.bf16.msra.mxu1 %v15773_v50  ;;  %v20367_v50 = vpop.f32.mrb[104].mxu0 }
 0xec7   :  { %9974 = vmatprep.subr.bf16.mxu1 %v15778_v47  ;;  %v20369_v47 = vpop.f32.mrb[105].mxu0 }
 0xec9   :  { %13623 = vmatmul.mubr.msk.f32.gmra.mrb[124].mxu1 %vm2025_vm0, %v16150_v51 }
 0xeca   :  { %9766 = vmatprep.mubr.f32.mxu1 %v16153_v37  ;;  %9975 = vmatpush1.bf16.msra.mxu1 %v15776_v21  ;;  %v15782_v37 = vld [vmem:[%s21109_s6 + $0x340] ss:$8 sps:$4 sm:$0xff]   ;;  %v20371_v21 = vpop.f32.mrb[106].mxu0 }
 0xecb   :  { %9976 = vmatprep.subr.bf16.mxu1 %v15781_v3  ;;  %v20373_v51 = vpop.f32.mrb[107].mxu0 }
 0xecd   :  { %13624 = vmatmul.mubr.msk.f32.gmra.mrb[126].mxu1 %vm2025_vm0, %v16151_v54 }
 0xece   :  { %9977 = vmatpush1.bf16.msra.mxu1 %v15779_v29  ;;  %v10467_v29 = vpack.c.bf16 %v20371_v21, %v20367_v50  ;;  %v15920_v50 = vld [vmem:[%s21109_s6 + $0x620] ss:$8 sps:$4 sm:$0xff]   ;;  %v15925_v21 = vld [vmem:[%s21109_s6 + $0x634] ss:$8 sps:$4 sm:$0xff]  }
 0xecf   :  { %9978 = vmatprep.subr.bf16.mxu1 %v15784_v33  ;;  %v10468_v33 = vpack.c.bf16 %v20373_v51, %v20369_v47  ;;  %v15889_v47 = vld [vmem:[%s21109_s6 + $0x574] ss:$8 sps:$4 sm:$0xff]   ;;  %v15887_v51 = vld [vmem:[%s21109_s6 + $0x570] ss:$8 sps:$4 sm:$0xff]  }
 0xed2   :  { %9979 = vmatpush1.bf16.msra.mxu1 %v15782_v37 }
 0xed3   :  { %9980 = vmatprep.subr.bf16.mxu1 %v15787_v57 }
 0xed6   :  { %9981 = vmatpush1.bf16.msra.mxu1 %v15785_v31 }
 0xed7   :  { %9982 = vmatprep.subr.bf16.mxu1 %v15790_v28  ;;  %v15818_v28 = vld [vmem:[%s21109_s6 + $0x400] ss:$8 sps:$4 sm:$0xff]  }
 0xeda   :  { %9983 = vmatpush1.bf16.msra.mxu1 %v15788_v44  ;;  %v15823_v44 = vld [vmem:[%s21109_s6 + $0x414] ss:$8 sps:$4 sm:$0xff]  }
 0xedb   :  { %9984 = vmatprep.subr.bf16.mxu1 %v15793_v10 }
 0xede   :  { %9985 = vmatpush1.bf16.msra.mxu1 %v15791_v24 }
 0xedf   :  { %9986 = vmatprep.subr.bf16.mxu1 %v15796_v53  ;;  %v15821_v53 = vld [vmem:[%s21109_s6 + $0x410] ss:$8 sps:$4 sm:$0xff]  }
 0xee2   :  { %9987 = vmatpush1.bf16.msra.mxu1 %v15794_v5  ;;  %v15826_v5 = vld [vmem:[%s21109_s6 + $0x424] ss:$8 sps:$4 sm:$0xff]  }
 0xee3   :  { %9988 = vmatprep.subr.bf16.mxu1 %v15799_v16 }
 0xee6   :  { %9989 = vmatpush1.bf16.msra.mxu1 %v15797_v9 }
 0xee7   :  { %9990 = vmatprep.subr.bf16.mxu1 %v15802_v2 }
 0xeea   :  { %9991 = vmatpush1.bf16.msra.mxu1 %v15800_v26  ;;  %v15824_v26 = vld [vmem:[%s21109_s6 + $0x420] ss:$8 sps:$4 sm:$0xff]  }
 0xeeb   :  { %9992 = vmatprep.subr.bf16.mxu1 %v15805_v14 }
 0xeee   :  { %9993 = vmatpush1.bf16.msra.mxu1 %v15803_v23  ;;  %v15829_v23 = vld [vmem:[%s21109_s6 + $0x434] ss:$8 sps:$4 sm:$0xff]  }
 0xeef   :  { %9994 = vmatprep.subr.bf16.mxu1 %v15808_v36  ;;  %v15827_v36 = vld [vmem:[%s21109_s6 + $0x430] ss:$8 sps:$4 sm:$0xff]  }
 0xef2   :  { %9995 = vmatpush1.bf16.msra.mxu1 %v15806_v19  ;;  %v15832_v19 = vld [vmem:[%s21109_s6 + $0x444] ss:$8 sps:$4 sm:$0xff]  }
 0xef3   :  { %9996 = vmatprep.subr.bf16.mxu1 %v15811_v55  ;;  %v15830_v55 = vld [vmem:[%s21109_s6 + $0x440] ss:$8 sps:$4 sm:$0xff]  }
 0xef6   :  { %9997 = vmatpush1.bf16.msra.mxu1 %v15809_v56  ;;  %v15835_v56 = vld [vmem:[%s21109_s6 + $0x454] ss:$8 sps:$4 sm:$0xff]  }
 0xef7   :  { %9998 = vmatprep.subr.bf16.mxu1 %v15814_v46  ;;  %v15833_v46 = vld [vmem:[%s21109_s6 + $0x450] ss:$8 sps:$4 sm:$0xff]  }
 0xefa   :  { %9999 = vmatpush1.bf16.msra.mxu1 %v15812_v43  ;;  %v15838_v43 = vld [vmem:[%s21109_s6 + $0x464] ss:$8 sps:$4 sm:$0xff]  }
 0xefb   :  { %10000 = vmatprep.subr.bf16.mxu1 %v15817_v49  ;;  %v15836_v49 = vld [vmem:[%s21109_s6 + $0x460] ss:$8 sps:$4 sm:$0xff]  }
 0xefe   :  { %10001 = vmatpush1.bf16.msra.mxu1 %v15815_v11  ;;  %v15841_v11 = vld [vmem:[%s21109_s6 + $0x474] ss:$8 sps:$4 sm:$0xff]  }
 0xeff   :  { %10317 = vmatprep.subr.bf16.mxu1 %v15820_v8  ;;  %v15839_v8 = vld [vmem:[%s21109_s6 + $0x470] ss:$8 sps:$4 sm:$0xff]  }
 0xf94   :  { %v9750_v22 = vpop.f32.mrb[120].mxu1 }
 0xf95   :  { %v9752_v3 = vpop.f32.mrb[121].mxu1 }
 0xf98   :  { %v9756_v54 = vpop.f32.mrb[122].mxu1 }
 0xf99   :  { %v9773_v37 = vpack.c.bf16 %v9756_v54, %v9750_v22  ;;  %v9758_v57 = vpop.f32.mrb[123].mxu1  ;;  %v15845_v22 = vld [vmem:[%s21109_s6 + $0x490] ss:$8 sps:$4 sm:$0xff]   ;;  %v15848_v54 = vld [vmem:[%s21109_s6 + $0x4a0] ss:$8 sps:$4 sm:$0xff]  }
 0xf9a   :  { %v9774_v31 = vpack.c.bf16 %v9758_v57, %v9752_v3  ;;  %v15850_v3 = vld [vmem:[%s21109_s6 + $0x4a4] ss:$8 sps:$4 sm:$0xff]   ;;  %v15851_v57 = vld [vmem:[%s21109_s6 + $0x4b0] ss:$8 sps:$4 sm:$0xff]  }
 0xf9c   :  { %10002 = vmatprep.mubr.bf16.mxu1 %v9774_v31  ;;  %v9762_v10 = vpop.f32.mrb[124].mxu1  ;;  %v15856_v31 = vld [vmem:[%s21109_s6 + $0x4c4] ss:$8 sps:$4 sm:$0xff]  }
 0xf9d   :  { %10003 = vmatmul.mubr.bf16.vlgmr.msra.gmra.mrb[104].mxu1 %v9773_v37  ;;  %v9764_v24 = vpop.f32.mrb[125].mxu1  ;;  %v15853_v37 = vld [vmem:[%s21109_s6 + $0x4b4] ss:$8 sps:$4 sm:$0xff]  }
 0xf9e   :  { %10318 = vmatpush1.bf16.msra.mxu1 %v15818_v28  ;;  %v20451_v28 = vpop.f32.mrb[108].mxu0 }
 0xf9f   :  { %10319 = vmatprep.subr.bf16.mxu1 %v15823_v44  ;;  %v15854_v44 = vld [vmem:[%s21109_s6 + $0x4c0] ss:$8 sps:$4 sm:$0xff]  }
 0xfa0   :  { %v9768_v16 = vpop.f32.mrb[126].mxu1 }
 0xfa1   :  { %v9775_v9 = vpack.c.bf16 %v9768_v16, %v9762_v10  ;;  %v9770_v2 = vpop.f32.mrb[127].mxu1  ;;  %v20456_v10 = vpop.f32.mrb[109].mxu0 }
 0xfa2   :  { %10320 = vmatpush1.bf16.msra.mxu1 %v15821_v53  ;;  %v9776_v14 = vpack.c.bf16 %v9770_v2, %v9764_v24  ;;  %v15859_v24 = vld [vmem:[%s21109_s6 + $0x4d4] ss:$8 sps:$4 sm:$0xff]   ;;  %v20461_v53 = vpop.f32.mrb[110].mxu0 }
 0xfa3   :  { %10321 = vmatprep.subr.bf16.mxu1 %v15826_v5  ;;  %v20463_v5 = vpop.f32.mrb[111].mxu0  ;;  %v10469_v2 = vpack.c.bf16 %v20461_v53, %v20451_v28  ;;  %v15926_v28 = vld [vmem:[%s21109_s6 + $0x640] ss:$8 sps:$4 sm:$0xff]   ;;  %v15931_v53 = vld [vmem:[%s21109_s6 + $0x654] ss:$8 sps:$4 sm:$0xff]  }
 0xfa4   :  { %10012 = vmatprep.mubr.bf16.mxu1 %v9776_v14  ;;  %v10470_v16 = vpack.c.bf16 %v20463_v5, %v20456_v10  ;;  %v15860_v14 = vld [vmem:[%s21109_s6 + $0x4e0] ss:$8 sps:$4 sm:$0xff]   ;;  %v15928_v10 = vld [vmem:[%s21109_s6 + $0x644] ss:$8 sps:$4 sm:$0xff]   ;;  %v15929_v5 = vld [vmem:[%s21109_s6 + $0x650] ss:$8 sps:$4 sm:$0xff]  }
 0xfa5   :  { %10013 = vmatmul.mubr.bf16.gmra.mrb[108].mxu1 %v9775_v9  ;;  %v15857_v9 = vld [vmem:[%s21109_s6 + $0x4d0] ss:$8 sps:$4 sm:$0xff]  }
 0xfa6   :  { %10322 = vmatpush1.bf16.msra.mxu1 %v15824_v26  ;;  %10349 = vmatprep.mubr.bf16.mxu1 %v10121_v41  ;;  %v15847_v41 = vld [vmem:[%s21109_s6 + $0x494] ss:$8 sps:$4 sm:$0xff]   ;;  %v15862_v26 = vld [vmem:[%s21109_s6 + $0x4e4] ss:$8 sps:$4 sm:$0xff]  }
 0xfa7   :  { %10323 = vmatprep.subr.bf16.mxu1 %v15829_v23  ;;  %v20478_v23 = vpop.f32.mrb[112].mxu0 }
 0xfaa   :  { %10324 = vmatpush1.bf16.msra.mxu1 %v15827_v36  ;;  %v15865_v36 = vld [vmem:[%s21109_s6 + $0x4f4] ss:$8 sps:$4 sm:$0xff]  }
 0xfab   :  { %10325 = vmatprep.subr.bf16.mxu1 %v15832_v19  ;;  %v20483_v19 = vpop.f32.mrb[113].mxu0 }
 0xfae   :  { %10326 = vmatpush1.bf16.msra.mxu1 %v15830_v55  ;;  %v20485_v55 = vpop.f32.mrb[114].mxu0 }
 0xfaf   :  { %10327 = vmatprep.subr.bf16.mxu1 %v15835_v56  ;;  %v20487_v56 = vpop.f32.mrb[115].mxu0 }
 0xfb2   :  { %10328 = vmatpush1.bf16.msra.mxu1 %v15833_v46  ;;  %v15863_v46 = vld [vmem:[%s21109_s6 + $0x4f0] ss:$8 sps:$4 sm:$0xff]  }
 0xfb3   :  { %10329 = vmatprep.subr.bf16.mxu1 %v15838_v43  ;;  %v10814_v43 = vpack.c.bf16 %v20485_v55, %v20478_v23  ;;  %v15970_v23 = vld [vmem:[%s21109_s6 + $0x724] ss:$8 sps:$4 sm:$0xff]   ;;  %v15968_v55 = vld [vmem:[%s21109_s6 + $0x720] ss:$8 sps:$4 sm:$0xff]  }
 0xfb6   :  { %10330 = vmatpush1.bf16.msra.mxu1 %v15836_v49  ;;  %v10815_v49 = vpack.c.bf16 %v20487_v56, %v20483_v19  ;;  %v15937_v19 = vld [vmem:[%s21109_s6 + $0x674] ss:$8 sps:$4 sm:$0xff]   ;;  %v15935_v56 = vld [vmem:[%s21109_s6 + $0x670] ss:$8 sps:$4 sm:$0xff]  }
 0xfb7   :  { %10331 = vmatprep.subr.bf16.mxu1 %v15841_v11  ;;  %v15868_v11 = vld [vmem:[%s21109_s6 + $0x504] ss:$8 sps:$4 sm:$0xff]  }
 0xfba   :  { %10332 = vmatpush1.bf16.msra.mxu1 %v15839_v8  ;;  %v15866_v8 = vld [vmem:[%s21109_s6 + $0x500] ss:$8 sps:$4 sm:$0xff]  }
 0xfbb   :  { %10333 = vmatprep.subr.bf16.mxu1 %v15844_v4  ;;  %v15871_v4 = vld [vmem:[%s21109_s6 + $0x514] ss:$8 sps:$4 sm:$0xff]  }
 0xfbe   :  { %10334 = vmatpush1.bf16.msra.mxu1 %v15842_v18  ;;  %v15869_v18 = vld [vmem:[%s21109_s6 + $0x510] ss:$8 sps:$4 sm:$0xff]  }
 0xfbf   :  { %10335 = vmatprep.subr.bf16.mxu1 %v15847_v41  ;;  %v15874_v41 = vld [vmem:[%s21109_s6 + $0x524] ss:$8 sps:$4 sm:$0xff]  }
 0xfc2   :  { %10336 = vmatpush1.bf16.msra.mxu1 %v15845_v22  ;;  %v15890_v22 = vld [vmem:[%s21109_s6 + $0x580] ss:$8 sps:$4 sm:$0xff]  }
 0xfc3   :  { %10337 = vmatprep.subr.bf16.mxu1 %v15850_v3  ;;  %v15895_v3 = vld [vmem:[%s21109_s6 + $0x594] ss:$8 sps:$4 sm:$0xff]  }
 0xfc6   :  { %10338 = vmatpush1.bf16.msra.mxu1 %v15848_v54  ;;  %v15893_v54 = vld [vmem:[%s21109_s6 + $0x590] ss:$8 sps:$4 sm:$0xff]  }
 0xfc7   :  { %10339 = vmatprep.subr.bf16.mxu1 %v15853_v37  ;;  %v15898_v37 = vld [vmem:[%s21109_s6 + $0x5a4] ss:$8 sps:$4 sm:$0xff]  }
 0xfca   :  { %10340 = vmatpush1.bf16.msra.mxu1 %v15851_v57  ;;  %v15896_v57 = vld [vmem:[%s21109_s6 + $0x5a0] ss:$8 sps:$4 sm:$0xff]  }
 0xfcb   :  { %10341 = vmatprep.subr.bf16.mxu1 %v15856_v31  ;;  %v15901_v31 = vld [vmem:[%s21109_s6 + $0x5b4] ss:$8 sps:$4 sm:$0xff]  }
 0xfce   :  { %10342 = vmatpush1.bf16.msra.mxu1 %v15854_v44  ;;  %v15899_v44 = vld [vmem:[%s21109_s6 + $0x5b0] ss:$8 sps:$4 sm:$0xff]  }
 0xfcf   :  { %10343 = vmatprep.subr.bf16.mxu1 %v15859_v24  ;;  %v15904_v24 = vld [vmem:[%s21109_s6 + $0x5c4] ss:$8 sps:$4 sm:$0xff]  }
 0xfd2   :  { %10344 = vmatpush1.bf16.msra.mxu1 %v15857_v9  ;;  %v20583_v9 = vpop.f32.mrb[116].mxu0 }
 0xfd3   :  { %10345 = vmatprep.subr.bf16.mxu1 %v15862_v26  ;;  %v15902_v26 = vld [vmem:[%s21109_s6 + $0x5c0] ss:$8 sps:$4 sm:$0xff]  }
 0xfd6   :  { %10346 = vmatpush1.bf16.msra.mxu1 %v15860_v14  ;;  %v20588_v14 = vpop.f32.mrb[117].mxu0 }
 0xfd7   :  { %10347 = vmatprep.subr.bf16.mxu1 %v15865_v36  ;;  %v15907_v36 = vld [vmem:[%s21109_s6 + $0x5d4] ss:$8 sps:$4 sm:$0xff]  }
 0xfda   :  { %10348 = vmatpush1.bf16.msra.mxu1 %v15863_v46  ;;  %v20593_v46 = vpop.f32.mrb[118].mxu0 }
 0xfdb   :  { %10664 = vmatprep.subr.bf16.mxu1 %v15868_v11  ;;  %v20595_v11 = vpop.f32.mrb[119].mxu0 }
 0xfdd   :  { %10350 = vmatmul.mubr.bf16.vlgmr.msra.gmra.mrb[104].mxu1 %v10120_v39  ;;  %v15875_v39 = vld [vmem:[%s21109_s6 + $0x530] ss:$8 sps:$4 sm:$0xff]  }
 0xfde   :  { %10665 = vmatpush1.bf16.msra.mxu1 %v15866_v8  ;;  %10359 = vmatprep.mubr.bf16.mxu1 %v10123_v38  ;;  %v15886_v38 = vld [vmem:[%s21109_s6 + $0x564] ss:$8 sps:$4 sm:$0xff]   ;;  %v10817_v8 = vpack.c.bf16 %v20595_v11, %v20588_v14  ;;  %v15971_v14 = vld [vmem:[%s21109_s6 + $0x730] ss:$8 sps:$4 sm:$0xff]  }
 0xfdf   :  { %10666 = vmatprep.subr.bf16.mxu1 %v15871_v4  ;;  %v15905_v4 = vld [vmem:[%s21109_s6 + $0x5d0] ss:$8 sps:$4 sm:$0xff]   ;;  %v15976_v11 = vld [vmem:[%s21109_s6 + $0x744] ss:$8 sps:$4 sm:$0xff]  }
 0xfe2   :  { %10667 = vmatpush1.bf16.msra.mxu1 %v15869_v18  ;;  %v10816_v18 = vpack.c.bf16 %v20593_v46, %v20583_v9  ;;  %v15974_v9 = vld [vmem:[%s21109_s6 + $0x740] ss:$8 sps:$4 sm:$0xff]   ;;  %v15979_v46 = vld [vmem:[%s21109_s6 + $0x754] ss:$8 sps:$4 sm:$0xff]  }
 0xfe3   :  { %10668 = vmatprep.subr.bf16.mxu1 %v15874_v41  ;;  %v15910_v41 = vld [vmem:[%s21109_s6 + $0x5e4] ss:$8 sps:$4 sm:$0xff]  }
 0xfe5   :  { %10360 = vmatmul.mubr.bf16.gmra.mrb[108].mxu1 %v10122_v62  ;;  %v15884_v62 = vld [vmem:[%s21109_s6 + $0x560] ss:$8 sps:$4 sm:$0xff]  }
 0xfe6   :  { %10669 = vmatpush1.bf16.msra.mxu1 %v15872_v0  ;;  %10696 = vmatprep.mubr.bf16.mxu1 %v10468_v33  ;;  %v15892_v33 = vld [vmem:[%s21109_s6 + $0x584] ss:$8 sps:$4 sm:$0xff]   ;;  %v15908_v0 = vld [vmem:[%s21109_s6 + $0x5e0] ss:$8 sps:$4 sm:$0xff]  }
 0xfe7   :  { %10670 = vmatprep.subr.bf16.mxu1 %v15877_v12  ;;  %v20610_v12 = vpop.f32.mrb[120].mxu0 }
 0xfea   :  { %10671 = vmatpush1.bf16.msra.mxu1 %v15875_v39  ;;  %v15913_v39 = vld [vmem:[%s21109_s6 + $0x5f4] ss:$8 sps:$4 sm:$0xff]  }
 0xfeb   :  { %10672 = vmatprep.subr.bf16.mxu1 %v15880_v27  ;;  %v20615_v27 = vpop.f32.mrb[121].mxu0 }
 0xfee   :  { %10673 = vmatpush1.bf16.msra.mxu1 %v15878_v20  ;;  %v20617_v20 = vpop.f32.mrb[122].mxu0 }
 0xfef   :  { %10674 = vmatprep.subr.bf16.mxu1 %v15883_v13  ;;  %v20619_v13 = vpop.f32.mrb[123].mxu0 }
 0xff2   :  { %10675 = vmatpush1.bf16.msra.mxu1 %v15881_v52  ;;  %v15911_v52 = vld [vmem:[%s21109_s6 + $0x5f0] ss:$8 sps:$4 sm:$0xff]  }
 0xff3   :  { %10676 = vmatprep.subr.bf16.mxu1 %v15886_v38  ;;  %v11161_v38 = vpack.c.bf16 %v20617_v20, %v20610_v12  ;;  %v16016_v12 = vld [vmem:[%s21109_s6 + $0x820] ss:$8 sps:$4 sm:$0xff]   ;;  %v16021_v20 = vld [vmem:[%s21109_s6 + $0x834] ss:$8 sps:$4 sm:$0xff]  }
 0xff6   :  { %10677 = vmatpush1.bf16.msra.mxu1 %v15884_v62  ;;  %v11162_v62 = vpack.c.bf16 %v20619_v13, %v20615_v27  ;;  %v15980_v27 = vld [vmem:[%s21109_s6 + $0x760] ss:$8 sps:$4 sm:$0xff]   ;;  %v15985_v13 = vld [vmem:[%s21109_s6 + $0x774] ss:$8 sps:$4 sm:$0xff]  }
 0xff7   :  { %10678 = vmatprep.subr.bf16.mxu1 %v15889_v47  ;;  %v15916_v47 = vld [vmem:[%s21109_s6 + $0x604] ss:$8 sps:$4 sm:$0xff]  }
 0xffa   :  { %10679 = vmatpush1.bf16.msra.mxu1 %v15887_v51  ;;  %v15914_v51 = vld [vmem:[%s21109_s6 + $0x600] ss:$8 sps:$4 sm:$0xff]  }
 0xffb   :  { %10680 = vmatprep.subr.bf16.mxu1 %v15892_v33  ;;  %v15919_v33 = vld [vmem:[%s21109_s6 + $0x614] ss:$8 sps:$4 sm:$0xff]  }
 0xffe   :  { %10681 = vmatpush1.bf16.msra.mxu1 %v15890_v22  ;;  %v15917_v22 = vld [vmem:[%s21109_s6 + $0x610] ss:$8 sps:$4 sm:$0xff]  }
 0xfff   :  { %10682 = vmatprep.subr.bf16.mxu1 %v15895_v3  ;;  %v15922_v3 = vld [vmem:[%s21109_s6 + $0x624] ss:$8 sps:$4 sm:$0xff]  }
0x1002   :  { %10683 = vmatpush1.bf16.msra.mxu1 %v15893_v54  ;;  %v15938_v54 = vld [vmem:[%s21109_s6 + $0x680] ss:$8 sps:$4 sm:$0xff]  }
0x1003   :  { %10684 = vmatprep.subr.bf16.mxu1 %v15898_v37  ;;  %v15943_v37 = vld [vmem:[%s21109_s6 + $0x694] ss:$8 sps:$4 sm:$0xff]  }
0x1006   :  { %10685 = vmatpush1.bf16.msra.mxu1 %v15896_v57  ;;  %v15941_v57 = vld [vmem:[%s21109_s6 + $0x690] ss:$8 sps:$4 sm:$0xff]  }
0x1007   :  { %10686 = vmatprep.subr.bf16.mxu1 %v15901_v31  ;;  %v15946_v31 = vld [vmem:[%s21109_s6 + $0x6a4] ss:$8 sps:$4 sm:$0xff]  }
0x100a   :  { %10687 = vmatpush1.bf16.msra.mxu1 %v15899_v44  ;;  %v15944_v44 = vld [vmem:[%s21109_s6 + $0x6a0] ss:$8 sps:$4 sm:$0xff]  }
0x100b   :  { %10688 = vmatprep.subr.bf16.mxu1 %v15904_v24  ;;  %v15949_v24 = vld [vmem:[%s21109_s6 + $0x6b4] ss:$8 sps:$4 sm:$0xff]  }
0x100e   :  { %10689 = vmatpush1.bf16.msra.mxu1 %v15902_v26  ;;  %v15947_v26 = vld [vmem:[%s21109_s6 + $0x6b0] ss:$8 sps:$4 sm:$0xff]  }
0x100f   :  { %10690 = vmatprep.subr.bf16.mxu1 %v15907_v36  ;;  %v15952_v36 = vld [vmem:[%s21109_s6 + $0x6c4] ss:$8 sps:$4 sm:$0xff]  }
0x1012   :  { %10691 = vmatpush1.bf16.msra.mxu1 %v15905_v4  ;;  %v20715_v4 = vpop.f32.mrb[124].mxu0 }
0x1013   :  { %10692 = vmatprep.subr.bf16.mxu1 %v15910_v41  ;;  %v20717_v41 = vpop.f32.mrb[125].mxu0 }
0x1016   :  { %10693 = vmatpush1.bf16.msra.mxu1 %v15908_v0  ;;  %v15950_v0 = vld [vmem:[%s21109_s6 + $0x6c0] ss:$8 sps:$4 sm:$0xff]  }
0x1017   :  { %10694 = vmatprep.subr.bf16.mxu1 %v15913_v39  ;;  %v20722_v39 = vpop.f32.mrb[126].mxu0 }
0x101a   :  { %10695 = vmatpush1.bf16.msra.mxu1 %v15911_v52  ;;  %v15955_v52 = vld [vmem:[%s21109_s6 + $0x6d4] ss:$8 sps:$4 sm:$0xff]  }
0x101b   :  { %11011 = vmatprep.subr.bf16.mxu1 %v15916_v47  ;;  %v20727_v47 = vpop.f32.mrb[127].mxu0 }
0x101d   :  { %10697 = vmatmul.mubr.bf16.vlgmr.msra.gmra.mrb[104].mxu1 %v10467_v29  ;;  %v15923_v29 = vld [vmem:[%s21109_s6 + $0x630] ss:$8 sps:$4 sm:$0xff]  }
0x101e   :  { %11012 = vmatpush1.bf16.msra.mxu1 %v15914_v51  ;;  %10706 = vmatprep.mubr.bf16.mxu1 %v10470_v16  ;;  %v15934_v16 = vld [vmem:[%s21109_s6 + $0x664] ss:$8 sps:$4 sm:$0xff]   ;;  %v11164_v51 = vpack.c.bf16 %v20727_v47, %v20717_v41  ;;  %v16025_v47 = vld [vmem:[%s21109_s6 + $0x850] ss:$8 sps:$4 sm:$0xff]  }
0x101f   :  { %11013 = vmatprep.subr.bf16.mxu1 %v15919_v33  ;;  %v11163_v33 = vpack.c.bf16 %v20722_v39, %v20715_v4  ;;  %v16024_v41 = vld [vmem:[%s21109_s6 + $0x844] ss:$8 sps:$4 sm:$0xff]   ;;  %v16022_v4 = vld [vmem:[%s21109_s6 + $0x840] ss:$8 sps:$4 sm:$0xff]   ;;  %v16027_v39 = vld [vmem:[%s21109_s6 + $0x854] ss:$8 sps:$4 sm:$0xff]  }
0x1022   :  { %11014 = vmatpush1.bf16.msra.mxu1 %v15917_v22  ;;  %v15953_v22 = vld [vmem:[%s21109_s6 + $0x6d0] ss:$8 sps:$4 sm:$0xff]  }
0x1023   :  { %11015 = vmatprep.subr.bf16.mxu1 %v15922_v3  ;;  %v15958_v3 = vld [vmem:[%s21109_s6 + $0x6e4] ss:$8 sps:$4 sm:$0xff]  }
0x1025   :  { %10707 = vmatmul.mubr.bf16.gmra.mrb[108].mxu1 %v10469_v2  ;;  %v15932_v2 = vld [vmem:[%s21109_s6 + $0x660] ss:$8 sps:$4 sm:$0xff]  }
0x1026   :  { %11016 = vmatpush1.bf16.msra.mxu1 %v15920_v50  ;;  %11043 = vmatprep.mubr.bf16.mxu1 %v10815_v49  ;;  %v15940_v49 = vld [vmem:[%s21109_s6 + $0x684] ss:$8 sps:$4 sm:$0xff]   ;;  %v20739_v50 = vpop.f32.mrb[128].mxu0 }
0x1027   :  { %11017 = vmatprep.subr.bf16.mxu1 %v15925_v21  ;;  %v15956_v21 = vld [vmem:[%s21109_s6 + $0x6e0] ss:$8 sps:$4 sm:$0xff]  }
0x102a   :  { %11018 = vmatpush1.bf16.msra.mxu1 %v15923_v29  ;;  %v20744_v29 = vpop.f32.mrb[129].mxu0 }
0x102b   :  { %11019 = vmatprep.subr.bf16.mxu1 %v15928_v10  ;;  %v15961_v10 = vld [vmem:[%s21109_s6 + $0x6f4] ss:$8 sps:$4 sm:$0xff]  }
0x102e   :  { %11020 = vmatpush1.bf16.msra.mxu1 %v15926_v28  ;;  %v20749_v28 = vpop.f32.mrb[130].mxu0 }
0x102f   :  { %11021 = vmatprep.subr.bf16.mxu1 %v15931_v53  ;;  %v20751_v53 = vpop.f32.mrb[131].mxu0 }
0x1032   :  { %11022 = vmatpush1.bf16.msra.mxu1 %v15929_v5  ;;  %v11508_v5 = vpack.c.bf16 %v20749_v28, %v20739_v50 }
0x1033   :  { %11023 = vmatprep.subr.bf16.mxu1 %v15934_v16  ;;  %v11509_v16 = vpack.c.bf16 %v20751_v53, %v20744_v29  ;;  %v16033_v29 = vld [vmem:[%s21109_s6 + $0x874] ss:$8 sps:$4 sm:$0xff]   ;;  %v16031_v53 = vld [vmem:[%s21109_s6 + $0x870] ss:$8 sps:$4 sm:$0xff]  }
0x1036   :  { %11024 = vmatpush1.bf16.msra.mxu1 %v15932_v2  ;;  %v15959_v2 = vld [vmem:[%s21109_s6 + $0x6f0] ss:$8 sps:$4 sm:$0xff]  }
0x1037   :  { %11025 = vmatprep.subr.bf16.mxu1 %v15937_v19  ;;  %v15964_v19 = vld [vmem:[%s21109_s6 + $0x704] ss:$8 sps:$4 sm:$0xff]  }
0x103a   :  { %11026 = vmatpush1.bf16.msra.mxu1 %v15935_v56  ;;  %v20763_v56 = vpop.f32.mrb[132].mxu0 }
0x103b   :  { %11027 = vmatprep.subr.bf16.mxu1 %v15940_v49  ;;  %v15962_v49 = vld [vmem:[%s21109_s6 + $0x700] ss:$8 sps:$4 sm:$0xff]  }
0x103e   :  { %11028 = vmatpush1.bf16.msra.mxu1 %v15938_v54  ;;  %v20768_v54 = vpop.f32.mrb[133].mxu0 }
0x103f   :  { %11029 = vmatprep.subr.bf16.mxu1 %v15943_v37  ;;  %v15967_v37 = vld [vmem:[%s21109_s6 + $0x714] ss:$8 sps:$4 sm:$0xff]  }
0x1042   :  { %11030 = vmatpush1.bf16.msra.mxu1 %v15941_v57  ;;  %v20773_v57 = vpop.f32.mrb[134].mxu0 }
0x1043   :  { %11031 = vmatprep.subr.bf16.mxu1 %v15946_v31  ;;  %v20775_v31 = vpop.f32.mrb[135].mxu0 }
0x1046   :  { %11032 = vmatpush1.bf16.msra.mxu1 %v15944_v44  ;;  %v11510_v44 = vpack.c.bf16 %v20773_v57, %v20763_v56 }
0x1047   :  { %11033 = vmatprep.subr.bf16.mxu1 %v15949_v24  ;;  %v11511_v24 = vpack.c.bf16 %v20775_v31, %v20768_v54 }
0x104a   :  { %11034 = vmatpush1.bf16.msra.mxu1 %v15947_v26  ;;  %v15965_v26 = vld [vmem:[%s21109_s6 + $0x710] ss:$8 sps:$4 sm:$0xff]  }
0x104b   :  { %11035 = vmatprep.subr.bf16.mxu1 %v15952_v36  ;;  %v15988_v36 = vld [vmem:[%s21109_s6 + $0x784] ss:$8 sps:$4 sm:$0xff]  }
0x104e   :  { %11036 = vmatpush1.bf16.msra.mxu1 %v15950_v0  ;;  %v15986_v0 = vld [vmem:[%s21109_s6 + $0x780] ss:$8 sps:$4 sm:$0xff]  }
0x104f   :  { %11037 = vmatprep.subr.bf16.mxu1 %v15955_v52  ;;  %v15991_v52 = vld [vmem:[%s21109_s6 + $0x794] ss:$8 sps:$4 sm:$0xff]  }
0x1052   :  { %11038 = vmatpush1.bf16.msra.mxu1 %v15953_v22  ;;  %v15989_v22 = vld [vmem:[%s21109_s6 + $0x790] ss:$8 sps:$4 sm:$0xff]  }
0x1053   :  { %11039 = vmatprep.subr.bf16.mxu1 %v15958_v3  ;;  %v15994_v3 = vld [vmem:[%s21109_s6 + $0x7a4] ss:$8 sps:$4 sm:$0xff]  }
0x1056   :  { %11040 = vmatpush1.bf16.msra.mxu1 %v15956_v21  ;;  %v15992_v21 = vld [vmem:[%s21109_s6 + $0x7a0] ss:$8 sps:$4 sm:$0xff]  }
0x1057   :  { %11041 = vmatprep.subr.bf16.mxu1 %v15961_v10  ;;  %v15997_v10 = vld [vmem:[%s21109_s6 + $0x7b4] ss:$8 sps:$4 sm:$0xff]  }
0x105a   :  { %11042 = vmatpush1.bf16.msra.mxu1 %v15959_v2  ;;  %v15995_v2 = vld [vmem:[%s21109_s6 + $0x7b0] ss:$8 sps:$4 sm:$0xff]  }
0x105b   :  { %11358 = vmatprep.subr.bf16.mxu1 %v15964_v19  ;;  %v16000_v19 = vld [vmem:[%s21109_s6 + $0x7c4] ss:$8 sps:$4 sm:$0xff]  }
0x105d   :  { %11044 = vmatmul.mubr.bf16.vlgmr.msra.gmra.mrb[104].mxu1 %v10814_v43  ;;  %v15973_v43 = vld [vmem:[%s21109_s6 + $0x734] ss:$8 sps:$4 sm:$0xff]  }
0x105e   :  { %11359 = vmatpush1.bf16.msra.mxu1 %v15962_v49  ;;  %11053 = vmatprep.mubr.bf16.mxu1 %v10817_v8  ;;  %v15977_v8 = vld [vmem:[%s21109_s6 + $0x750] ss:$8 sps:$4 sm:$0xff]   ;;  %v15998_v49 = vld [vmem:[%s21109_s6 + $0x7c0] ss:$8 sps:$4 sm:$0xff]  }
0x105f   :  { %11360 = vmatprep.subr.bf16.mxu1 %v15967_v37  ;;  %v16003_v37 = vld [vmem:[%s21109_s6 + $0x7d4] ss:$8 sps:$4 sm:$0xff]  }
0x1062   :  { %11361 = vmatpush1.bf16.msra.mxu1 %v15965_v26  ;;  %v16001_v26 = vld [vmem:[%s21109_s6 + $0x7d0] ss:$8 sps:$4 sm:$0xff]  }
0x1063   :  { %11362 = vmatprep.subr.bf16.mxu1 %v15970_v23  ;;  %v16006_v23 = vld [vmem:[%s21109_s6 + $0x7e4] ss:$8 sps:$4 sm:$0xff]  }
0x1065   :  { %11054 = vmatmul.mubr.bf16.gmra.mrb[108].mxu1 %v10816_v18  ;;  %v15982_v18 = vld [vmem:[%s21109_s6 + $0x764] ss:$8 sps:$4 sm:$0xff]  }
0x1066   :  { %11363 = vmatpush1.bf16.msra.mxu1 %v15968_v55  ;;  %11390 = vmatprep.mubr.bf16.mxu1 %v11162_v62  ;;  %v15983_v62 = vld [vmem:[%s21109_s6 + $0x770] ss:$8 sps:$4 sm:$0xff]   ;;  %v16004_v55 = vld [vmem:[%s21109_s6 + $0x7e0] ss:$8 sps:$4 sm:$0xff]  }
0x1067   :  { %11364 = vmatprep.subr.bf16.mxu1 %v15973_v43  ;;  %v16009_v43 = vld [vmem:[%s21109_s6 + $0x7f4] ss:$8 sps:$4 sm:$0xff]  }
0x106a   :  { %11365 = vmatpush1.bf16.msra.mxu1 %v15971_v14  ;;  %v16007_v14 = vld [vmem:[%s21109_s6 + $0x7f0] ss:$8 sps:$4 sm:$0xff]  }
0x106b   :  { %11366 = vmatprep.subr.bf16.mxu1 %v15976_v11  ;;  %v16012_v11 = vld [vmem:[%s21109_s6 + $0x804] ss:$8 sps:$4 sm:$0xff]  }
0x106e   :  { %11367 = vmatpush1.bf16.msra.mxu1 %v15974_v9  ;;  %v16010_v9 = vld [vmem:[%s21109_s6 + $0x800] ss:$8 sps:$4 sm:$0xff]  }
0x106f   :  { %11368 = vmatprep.subr.bf16.mxu1 %v15979_v46  ;;  %v16015_v46 = vld [vmem:[%s21109_s6 + $0x814] ss:$8 sps:$4 sm:$0xff]  }
0x1072   :  { %11369 = vmatpush1.bf16.msra.mxu1 %v15977_v8  ;;  %v16013_v8 = vld [vmem:[%s21109_s6 + $0x810] ss:$8 sps:$4 sm:$0xff]  }
0x1073   :  { %11370 = vmatprep.subr.bf16.mxu1 %v15982_v18  ;;  %v16018_v18 = vld [vmem:[%s21109_s6 + $0x824] ss:$8 sps:$4 sm:$0xff]  }
0x1076   :  { %11371 = vmatpush1.bf16.msra.mxu1 %v15980_v27  ;;  %v16034_v27 = vld [vmem:[%s21109_s6 + $0x880] ss:$8 sps:$4 sm:$0xff]  }
0x1077   :  { %11372 = vmatprep.subr.bf16.mxu1 %v15985_v13  ;;  %v16039_v13 = vld [vmem:[%s21109_s6 + $0x894] ss:$8 sps:$4 sm:$0xff]  }
0x107a   :  { %11373 = vmatpush1.bf16.msra.mxu1 %v15983_v62  ;;  %v16037_v62 = vld [vmem:[%s21109_s6 + $0x890] ss:$8 sps:$4 sm:$0xff]  }
0x107b   :  { %11374 = vmatprep.subr.bf16.mxu1 %v15988_v36  ;;  %v16042_v36 = vld [vmem:[%s21109_s6 + $0x8a4] ss:$8 sps:$4 sm:$0xff]  }
0x107e   :  { %11375 = vmatpush1.bf16.msra.mxu1 %v15986_v0  ;;  %v16040_v0 = vld [vmem:[%s21109_s6 + $0x8a0] ss:$8 sps:$4 sm:$0xff]  }
0x107f   :  { %11376 = vmatprep.subr.bf16.mxu1 %v15991_v52  ;;  %v16045_v52 = vld [vmem:[%s21109_s6 + $0x8b4] ss:$8 sps:$4 sm:$0xff]  }
0x1082   :  { %11377 = vmatpush1.bf16.msra.mxu1 %v15989_v22  ;;  %v16043_v22 = vld [vmem:[%s21109_s6 + $0x8b0] ss:$8 sps:$4 sm:$0xff]  }
0x1083   :  { %11378 = vmatprep.subr.bf16.mxu1 %v15994_v3  ;;  %v16048_v3 = vld [vmem:[%s21109_s6 + $0x8c4] ss:$8 sps:$4 sm:$0xff]  }
0x1086   :  { %11379 = vmatpush1.bf16.msra.mxu1 %v15992_v21  ;;  %v16046_v21 = vld [vmem:[%s21109_s6 + $0x8c0] ss:$8 sps:$4 sm:$0xff]  }
0x1087   :  { %11380 = vmatprep.subr.bf16.mxu1 %v15997_v10  ;;  %v16051_v10 = vld [vmem:[%s21109_s6 + $0x8d4] ss:$8 sps:$4 sm:$0xff]  }
0x108a   :  { %11381 = vmatpush1.bf16.msra.mxu1 %v15995_v2  ;;  %v16049_v2 = vld [vmem:[%s21109_s6 + $0x8d0] ss:$8 sps:$4 sm:$0xff]  }
0x108b   :  { %11382 = vmatprep.subr.bf16.mxu1 %v16000_v19  ;;  %v16054_v19 = vld [vmem:[%s21109_s6 + $0x8e4] ss:$8 sps:$4 sm:$0xff]  }
0x108e   :  { %11383 = vmatpush1.bf16.msra.mxu1 %v15998_v49  ;;  %v16052_v49 = vld [vmem:[%s21109_s6 + $0x8e0] ss:$8 sps:$4 sm:$0xff]  }
0x108f   :  { %11384 = vmatprep.subr.bf16.mxu1 %v16003_v37  ;;  %v16057_v37 = vld [vmem:[%s21109_s6 + $0x8f4] ss:$8 sps:$4 sm:$0xff]  }
0x1092   :  { %11385 = vmatpush1.bf16.msra.mxu1 %v16001_v26  ;;  %v16055_v26 = vld [vmem:[%s21109_s6 + $0x8f0] ss:$8 sps:$4 sm:$0xff]  }
0x1093   :  { %11386 = vmatprep.subr.bf16.mxu1 %v16006_v23 }
0x1096   :  { %11387 = vmatpush1.bf16.msra.mxu1 %v16004_v55 }
0x1097   :  { %11388 = vmatprep.subr.bf16.mxu1 %v16009_v43 }
0x109a   :  { %11389 = vmatpush1.bf16.msra.mxu1 %v16007_v14 }
0x109b   :  { %11705 = vmatprep.subr.bf16.mxu1 %v16012_v11 }
0x109d   :  { %11391 = vmatmul.mubr.bf16.vlgmr.msra.gmra.mrb[104].mxu1 %v11161_v38  ;;  %v16019_v38 = vld [vmem:[%s21109_s6 + $0x830] ss:$8 sps:$4 sm:$0xff]  }
0x109e   :  { %11706 = vmatpush1.bf16.msra.mxu1 %v16010_v9  ;;  %11400 = vmatprep.mubr.bf16.mxu1 %v11164_v51  ;;  %v16030_v51 = vld [vmem:[%s21109_s6 + $0x864] ss:$8 sps:$4 sm:$0xff]  }
0x109f   :  { %11707 = vmatprep.subr.bf16.mxu1 %v16015_v46 }
0x10a2   :  { %11708 = vmatpush1.bf16.msra.mxu1 %v16013_v8 }
0x10a3   :  { %11709 = vmatprep.subr.bf16.mxu1 %v16018_v18 }
0x10a5   :  { %11401 = vmatmul.mubr.bf16.gmra.mrb[108].mxu1 %v11163_v33  ;;  %v16028_v33 = vld [vmem:[%s21109_s6 + $0x860] ss:$8 sps:$4 sm:$0xff]  }
0x10a6   :  { %11710 = vmatpush1.bf16.msra.mxu1 %v16016_v12  ;;  %11737 = vmatprep.mubr.bf16.mxu1 %v11509_v16  ;;  %v16036_v16 = vld [vmem:[%s21109_s6 + $0x884] ss:$8 sps:$4 sm:$0xff]  }
0x10a7   :  { %11711 = vmatprep.subr.bf16.mxu1 %v16021_v20 }
0x10aa   :  { %11712 = vmatpush1.bf16.msra.mxu1 %v16019_v38 }
0x10ab   :  { %11713 = vmatprep.subr.bf16.mxu1 %v16024_v41 }
0x10ae   :  { %11714 = vmatpush1.bf16.msra.mxu1 %v16022_v4 }
0x10af   :  { %11715 = vmatprep.subr.bf16.mxu1 %v16027_v39 }
0x10b2   :  { %11716 = vmatpush1.bf16.msra.mxu1 %v16025_v47 }
0x10b3   :  { %11717 = vmatprep.subr.bf16.mxu1 %v16030_v51 }
0x10b6   :  { %11718 = vmatpush1.bf16.msra.mxu1 %v16028_v33 }
0x10b7   :  { %11719 = vmatprep.subr.bf16.mxu1 %v16033_v29 }
0x10ba   :  { %11720 = vmatpush1.bf16.msra.mxu1 %v16031_v53 }
0x10bb   :  { %11721 = vmatprep.subr.bf16.mxu1 %v16036_v16 }
0x10be   :  { %11722 = vmatpush1.bf16.msra.mxu1 %v16034_v27 }
0x10bf   :  { %11723 = vmatprep.subr.bf16.mxu1 %v16039_v13 }
0x10c2   :  { %11724 = vmatpush1.bf16.msra.mxu1 %v16037_v62 }
0x10c3   :  { %11725 = vmatprep.subr.bf16.mxu1 %v16042_v36 }
0x10c6   :  { %11726 = vmatpush1.bf16.msra.mxu1 %v16040_v0 }
0x10c7   :  { %11727 = vmatprep.subr.bf16.mxu1 %v16045_v52 }
0x10ca   :  { %11728 = vmatpush1.bf16.msra.mxu1 %v16043_v22 }
0x10cb   :  { %11729 = vmatprep.subr.bf16.mxu1 %v16048_v3 }
0x10ce   :  { %11730 = vmatpush1.bf16.msra.mxu1 %v16046_v21 }
0x10cf   :  { %11731 = vmatprep.subr.bf16.mxu1 %v16051_v10 }
0x10d2   :  { %11732 = vmatpush1.bf16.msra.mxu1 %v16049_v2 }
0x10d3   :  { %11733 = vmatprep.subr.bf16.mxu1 %v16054_v19 }
0x10d6   :  { %11734 = vmatpush1.bf16.msra.mxu1 %v16052_v49 }
0x10d7   :  { %11735 = vmatprep.subr.bf16.mxu1 %v16057_v37 }
0x10da   :  { %11736 = vmatpush1.bf16.msra.mxu1 %v16055_v26 }
0x10dd   :  { %11738 = vmatmul.mubr.bf16.vlgmr.msra.gmra.mrb[104].mxu1 %v11508_v5 }
0x10de   :  { %11747 = vmatprep.mubr.bf16.mxu1 %v11511_v24 }
0x10e5   :  { %11748 = vmatmul.mubr.bf16.gmra.mrb[108].mxu1 %v11510_v44 }
0x11b0   :  { %v20997_v23 = vpop.f32.mrb[104].mxu1 }
0x11b1   :  { %v20999_v55 = vpop.f32.mrb[105].mxu1  ;;  %v11784_v14 = vmul.f32 %v20997_v23, %v20997_v23 }
0x11b2   :  { %v21001_v43 = vpop.f32.mrb[106].mxu1  ;;  %v11785_v56 = vmul.f32 %v20999_v55, %v20999_v55 }
0x11b3   :  { %v11766_v50 = vadd.f32 %v21001_v43, %v20997_v23  ;;  %v11786_v28 = vmul.f32 %v21001_v43, %v21001_v43  ;;  %v21009_v5 = vpop.f32.mrb[107].mxu1 }
0x11b4   :  { %v11775_v54 = vadd.f32 %v21009_v5, %v20999_v55  ;;  %v11787_v57 = vmul.f32 %v21009_v5, %v21009_v5 }
0x11b5   :  { %v11792_v31 = vadd.f32 %v11786_v28, %v11784_v14 }
0x11b6   :  { %v11801_v44 = vadd.f32 %v11787_v57, %v11785_v56 }
0x11b8   :  { %v21017_v24 = vpop.f32.mrb[108].mxu1 }
0x11b9   :  { %v11767_v11 = vadd.f32 %v11766_v50, %v21017_v24  ;;  %v11788_v9 = vmul.f32 %v21017_v24, %v21017_v24  ;;  %v21022_v46 = vpop.f32.mrb[109].mxu1 }
0x11ba   :  { %v11776_v8 = vadd.f32 %v11775_v54, %v21022_v46  ;;  %v11789_v18 = vmul.f32 %v21022_v46, %v21022_v46  ;;  %v21027_v12 = vpop.f32.mrb[110].mxu1 }
0x11bb   :  { %v11793_v20 = vadd.f32 %v11792_v31, %v11788_v9  ;;  %v11768_v38 = vadd.f32 %v11767_v11, %v21027_v12  ;;  %v11790_v41 = vmul.f32 %v21027_v12, %v21027_v12  ;;  %v21032_v4 = vpop.f32.mrb[111].mxu1 }
0x11bc   :  { %v11802_v39 = vadd.f32 %v11801_v44, %v11789_v18  ;;  %v11777_v47 = vadd.f32 %v11776_v8, %v21032_v4  ;;  %v11791_v51 = vmul.f32 %v21032_v4, %v21032_v4 }
0x11bd   :  { %v11769_v33 = vrot.slane %v11768_v38, 4  ;;  %v11794_v29 = vadd.f32 %v11793_v20, %v11790_v41 }
0x11be   :  { %v11778_v53 = vrot.slane %v11777_v47, 4  ;;  %v11803_v16 = vadd.f32 %v11802_v39, %v11791_v51 }
0x11bf   :  { %v11770_v27 = vadd.f32 %v11769_v33, %v11768_v38  ;;  %v11795_v13 = vrot.slane %v11794_v29, 4 }
0x11c0   :  { %v11779_v62 = vadd.f32 %v11778_v53, %v11777_v47  ;;  %v11804_v36 = vrot.slane %v11803_v16, 4 }
0x11c1   :  { %v11771_v0 = vrot.slane %v11770_v27, 2  ;;  %v11796_v52 = vadd.f32 %v11795_v13, %v11794_v29 }
0x11c2   :  { %v11780_v22 = vrot.slane %v11779_v62, 2  ;;  %v11805_v3 = vadd.f32 %v11804_v36, %v11803_v16 }
0x11c3   :  { %v11772_v21 = vadd.f32 %v11771_v0, %v11770_v27  ;;  %v11797_v10 = vrot.slane %v11796_v52, 2 }
0x11c4   :  { %v11781_v2 = vadd.f32 %v11780_v22, %v11779_v62  ;;  %v11806_v19 = vrot.slane %v11805_v3, 2 }
0x11c5   :  { %v11773_v49 = vrot.slane %v11772_v21, 1  ;;  %v11798_v37 = vadd.f32 %v11797_v10, %v11796_v52 }
0x11c6   :  { %v11782_v26 = vrot.slane %v11781_v2, 1  ;;  %v11807_v14 = vadd.f32 %v11806_v19, %v11805_v3 }
0x11c7   :  { %v11774_v50 = vadd.f32 %v11773_v49, %v11772_v21  ;;  %v11799_v28 = vrot.slane %v11798_v37, 1 }
0x11c8   :  { %v11783_v56 = vadd.f32 %v11782_v26, %v11781_v2  ;;  %v11808_v54 = vrot.slane %v11807_v14, 1 }
0x11c9   :  { %v11800_v57 = vadd.f32 %v11799_v28, %v11798_v37  ;;  %v11810_v31 = vmul.f32 0.03125, %v11774_v50 }
0x11ca   :  { %v11809_v44 = vadd.f32 %v11808_v54, %v11807_v14  ;;  %v11811_v11 = vmul.f32 0.03125, %v11783_v56 }
0x11cb   :  { %v11812_v9 = vmul.f32 0.03125, %v11800_v57  ;;  %v11814_v8 = vmul.f32 %v11810_v31, %v11810_v31  ;;  %v11820_v18 = vsub.f32 %v20997_v23, %v11810_v31  ;;  %v11822_v20 = vsub.f32 %v21001_v43, %v11810_v31 }
0x11cc   :  { %v11824_v38 = vsub.f32 %v21017_v24, %v11810_v31  ;;  %v11826_v41 = vsub.f32 %v21027_v12, %v11810_v31  ;;  %v11813_v39 = vmul.f32 0.03125, %v11809_v44  ;;  %v11815_v47 = vmul.f32 %v11811_v11, %v11811_v11 }
0x11cd   :  { %v11816_v51 = vsub.f32 %v11812_v9, %v11814_v8  ;;  %v11821_v33 = vsub.f32 %v20999_v55, %v11811_v11  ;;  %v11823_v29 = vsub.f32 %v21009_v5, %v11811_v11  ;;  %v11825_v53 = vsub.f32 %v21022_v46, %v11811_v11  ;;  %v11828_v55 = vld [vmem:[%s21112_s15] sm:$0x3] }
0x11ce   :  { %v11817_v16 = vsub.f32 %v11813_v39, %v11815_v47  ;;  %v11827_v27 = vsub.f32 %v21032_v4, %v11811_v11  ;;  %v11871_v46 = vld [vmem:[%s21113_s16] sm:$0x3] }
0x11cf   :  { %v11818_v13 = vmax.f32 %v11816_v51, 0.0  ;;  %v11876_v3 = vrot.slane %v11871_v46, %v16843_v6  ;;  %v11880_v21 = vrot.slane %v11871_v46, %v16845_v7 }
0x11d0   :  { %v11819_v23 = vmax.f32 %v11817_v16, 0.0 }
0x11d1   :  { %v11829_v62 = vadd.f32 1e-05, %v11818_v13 }
0x11d2   :  { %v11830_v43 = vadd.f32 1e-05, %v11819_v23 }
0x11d3   :  { %16074 = vrsqrt.f32 %v11829_v62 }
0x11d4   :  { %16076 = vrsqrt.f32 %v11830_v43 }
0x11dd   :  { %v16075_v24 = vpop.eup %16074 }
0x11de   :  { %v16077_v12 = vpop.eup %16076 }
0x11df   :  { %v11835_v36 = vcombine.low %v16075_v24, %v16077_v12 }
0x11e1   :  { %v11842_v0 = vrot.slane %v11835_v36, %v16827_v60 }
0x11e3   :  { %v11849_v5 = vrot.slane %v11842_v0, %v16827_v60 }
0x11e5   :  { %v11851_v4 = vmul.f32 %v11849_v5, %v11828_v55 }
0x11e7   :  { %v11856_v52 = vrot.slane %v11851_v4, %v16843_v6  ;;  %v11860_v22 = vrot.slane %v11851_v4, %v16845_v7 }
0x11e9   :  { %v11863_v10 = vmul.f32 %v11856_v52, %v11820_v18  ;;  %v11864_v2 = vmul.f32 %v11860_v22, %v11821_v33  ;;  %v11865_v19 = vmul.f32 %v11856_v52, %v11822_v20  ;;  %v11866_v49 = vmul.f32 %v11860_v22, %v11823_v29 }
0x11ea   :  { %v11867_v37 = vmul.f32 %v11856_v52, %v11824_v38  ;;  %v11868_v26 = vmul.f32 %v11860_v22, %v11825_v53  ;;  %v11869_v60 = vmul.f32 %v11856_v52, %v11826_v41  ;;  %v11870_v14 = vmul.f32 %v11860_v22, %v11827_v27 }
0x11eb   :  { %v11883_v50 = vadd.f32 %v11876_v3, %v11863_v10  ;;  %v11884_v28 = vadd.f32 %v11880_v21, %v11864_v2  ;;  %v11885_v56 = vadd.f32 %v11876_v3, %v11865_v19  ;;  %v11886_v54 = vadd.f32 %v11880_v21, %v11866_v49 }
0x11ec   :  { %v11887_v57 = vadd.f32 %v11876_v3, %v11867_v37  ;;  %v11888_v31 = vadd.f32 %v11880_v21, %v11868_v26  ;;  %v11889_v44 = vadd.f32 %v11876_v3, %v11869_v60  ;;  %v11890_v11 = vadd.f32 %v11880_v21, %v11870_v14 }
0x11ed   :  { %v11891_v6 = vadd.f32 %v11883_v50, %v5413_v63  ;;  %v11892_v7 = vadd.f32 %v11884_v28, %v5414_v17  ;;  %v11893_v9 = vadd.f32 %v11885_v56, %v5415_v1  ;;  %v11894_v8 = vadd.f32 %v11886_v54, %v5416_v61 }
0x11ee   :  { %v11895_v18 = vadd.f32 %v11887_v57, %v5417_v35  ;;  %v11896_v20 = vadd.f32 %v11888_v31, %v5418_v30  ;;  %v11897_v38 = vadd.f32 %v11889_v44, %v5419_v25  ;;  %v11898_v42 = vadd.f32 %v11890_v11, %v5420_v32 }
0x11ef   :  { %v11899_v58 = vmax.f32 %v11891_v6, 0.0  ;;  %v11900_v63 = vmax.f32 %v11892_v7, 0.0  ;;  %v11901_v17 = vmax.f32 %v11893_v9, 0.0  ;;  %v11902_v34 = vmax.f32 %v11894_v8, 0.0 }
0x11f0   :  { %v11903_v1 = vmax.f32 %v11895_v18, 0.0  ;;  %v11904_v41 = vmax.f32 %v11896_v20, 0.0  ;;  %v11905_v15 = vmax.f32 %v11897_v38, 0.0  ;;  %v11906_v61 = vmax.f32 %v11898_v42, 0.0 }
0x11f1   :  { %11907 = vst [vmem:[%s21114_s17] sm:$0xff] %v11899_v58  ;;  %11908 = vst [vmem:[%s21114_s17 + $0x8] sm:$0xff] %v11900_v63 }
0x11f2   :  { %11909 = vst [vmem:[%s21114_s17 + $0x10] sm:$0xff] %v11901_v17  ;;  %11910 = vst [vmem:[%s21114_s17 + $0x18] sm:$0xff] %v11902_v34 }
0x11f3   :  { %11911 = vst [vmem:[%s21114_s17 + $0x20] sm:$0xff] %v11903_v1  ;;  %11912 = vst [vmem:[%s21114_s17 + $0x28] sm:$0xff] %v11904_v41 }
0x11f4   :  { %11913 = vst [vmem:[%s21114_s17 + $0x30] sm:$0xff] %v11905_v15  ;;  %11914 = vst [vmem:[%s21114_s17 + $0x38] sm:$0xff] %v11906_v61 }

</bundles_post_ra>
